<compile_context>
chip_gen: v7x
topology: tpu7x:2x2x1
jax: 0.10.0
libtpu: 0.0.40
codegen_flags: <defaults>
</compile_context>

<pallas_src>
import functools

import jax
import jax.numpy as jnp
from jax.experimental import pallas as pl
from jax.experimental.pallas import tpu as pltpu


_VMEM_SPEC = pl.BlockSpec(memory_space=pltpu.MemorySpace.VMEM)
_LANE = 128
_SUBLANE = 8


def _round_up(n, m):
    return ((n + m - 1) // m) * m


# ----------------------------- fused Pallas kernel -------------------------- #

def _fused_lstm_kernel(
    seq_len_ref,                                   # (Bp, 1)   int32
    x_ref,                                         # (T*Bp, Ep) f32  time-major, flattened
    w_ih_0f_ref, w_hh_0f_ref, b_0f_ref,            # layer 0 forward
    w_ih_0b_ref, w_hh_0b_ref, b_0b_ref,            # layer 0 backward
    w_ih_1f_ref, w_hh_1f_ref, b_1f_ref,            # layer 1 forward
    w_ih_1b_ref, w_hh_1b_ref, b_1b_ref,            # layer 1 backward
    w_fc_ref, b_fc_ref,                            # classifier (2H, Cp), (1, Cp)
    out_ref,                                       # (Bp, Cp)  f32
    seq0_scr,                                      # (T*Bp, 2H) f32  layer-0 output seq
    xproj_scr,                                     # (T*Bp, 4H) f32  hoisted input proj
    *, T, Bp, H):

    seq_vec = seq_len_ref[...]                     # (Bp, 1) int32, loaded once
    # Hoisted per-timestep validity masks (shared by every layer/direction).
    valid_t = [seq_vec > t for t in range(T)]      # list of (Bp, 1) bool

    def project(x2d, w_ih_ref, b_ref):
        # One big MXU GEMM (no serial dependency on h), bias folded in here.
        xproj_scr[...] = (
            jnp.dot(x2d, w_ih_ref[...], preferred_element_type=jnp.float32)
            + b_ref[...])

    def recurrence(w_hh_ref, *, reverse, store_col=None):
        w_hh = w_hh_ref[...]                       # (H, 4H), loop-invariant
        h = jnp.zeros((Bp, H), jnp.float32)
        c = jnp.zeros((Bp, H), jnp.float32)
        order = range(T - 1, -1, -1) if reverse else range(T)
        for t in order:                            # fully unrolled, static t
            gates = (xproj_scr[pl.ds(t * Bp, Bp), :]
                     + jnp.dot(h, w_hh, preferred_element_type=jnp.float32))
            # PyTorch gate order: i, f, g, o
            i_g = jax.nn.sigmoid(gates[:, 0 * H:1 * H])
            f_g = jax.nn.sigmoid(gates[:, 1 * H:2 * H])
            g_g = jnp.tanh(gates[:, 2 * H:3 * H])
            o_g = jax.nn.sigmoid(gates[:, 3 * H:4 * H])
            c_new = f_g * c + i_g * g_g
            h_new = o_g * jnp.tanh(c_new)
            v = valid_t[t]                         # (Bp, 1) bool
            h = jnp.where(v, h_new, h)
            c = jnp.where(v, c_new, c)
            if store_col is not None:
                seq0_scr[pl.ds(t * Bp, Bp), pl.ds(store_col, H)] = h
        return h                                   # final (masked) hidden == hn

    x2d = x_ref[...]                               # (T*Bp, Ep)

    # ---- layer 0 (writes its output sequence into seq0_scr) ----
    project(x2d, w_ih_0f_ref, b_0f_ref)
    recurrence(w_hh_0f_ref, reverse=False, store_col=0)
    project(x2d, w_ih_0b_ref, b_0b_ref)
    recurrence(w_hh_0b_ref, reverse=True, store_col=H)

    # ---- layer 1 (only final hidden states are consumed) ----
    seq0 = seq0_scr[...]                           # (T*Bp, 2H)
    project(seq0, w_ih_1f_ref, b_1f_ref)
    hn_f = recurrence(w_hh_1f_ref, reverse=False)
    project(seq0, w_ih_1b_ref, b_1b_ref)
    hn_b = recurrence(w_hh_1b_ref, reverse=True)

    # hidden = cat(hn[-2], hn[-1]); pack/unsort permutation is identity.
    hidden = jnp.concatenate([hn_f, hn_b], axis=-1)            # (Bp, 2H)
    out_ref[...] = (jnp.dot(hidden, w_fc_ref[...],
                            preferred_element_type=jnp.float32)
                    + b_fc_ref[...])


# ------------------------------- JAX wrapper -------------------------------- #

@functools.partial(jax.jit, static_argnames=("class_num",))
def lstm_model_forward(tokens, seq_len, kparams, *, class_num):
    """Full forward pass: embedding lookup (JAX glue) + one fused Pallas kernel."""
    B, T = tokens.shape
    emb_tbl = kparams["embedding"]                 # (vocab, Ep), zero-padded cols
    Ep = emb_tbl.shape[1]
    H = kparams["lstm"][0][0][1].shape[0]          # w_hh_t is (H, 4H)
    w_fc_t, b_fc = kparams["fc"]
    Cp = w_fc_t.shape[1]
    Bp = _round_up(max(B, _SUBLANE), _SUBLANE)

    # Embedding gather stays in plain JAX glue.
    emb = jnp.take(emb_tbl, tokens, axis=0)                    # (B, T, Ep)
    x = jnp.transpose(emb, (1, 0, 2)).astype(jnp.float32)      # (T, B, Ep) time-major
    x = jnp.pad(x, ((0, 0), (0, Bp - B), (0, 0)))              # (T, Bp, Ep)
    x2d = x.reshape(T * Bp, Ep)

    # Padded batch rows get seq_len = 0 -> never valid -> hn stays zero.
    seq_len_p = jnp.pad(seq_len.astype(jnp.int32), (0, Bp - B)).reshape(Bp, 1)

    flat_w = []
    for layer in kparams["lstm"]:
        for (w_ih_t, w_hh_t, b) in layer:
            flat_w += [w_ih_t, w_hh_t, b]

    kernel = functools.partial(_fused_lstm_kernel, T=T, Bp=Bp, H=H)
    n_inputs = 2 + len(flat_w) + 2
    out_p = pl.pallas_call(
        kernel,
        out_shape=jax.ShapeDtypeStruct((Bp, Cp), jnp.float32),
        in_specs=[_VMEM_SPEC] * n_inputs,
        out_specs=_VMEM_SPEC,
        scratch_shapes=[pltpu.VMEM((T * Bp, 2 * H), jnp.float32),   # layer-0 out seq
                        pltpu.VMEM((T * Bp, 4 * H), jnp.float32)],  # hoisted x-proj
    )(seq_len_p, x2d, *flat_w, w_fc_t, b_fc)

    return out_p[:B, :class_num]


# ------------------------- params: init + kernel prep ----------------------- #

def init_params(key, vocab_size, embed_dim, hidden_size, num_layers, class_num):
    """PyTorch-layout parameters (same convention as nn.LSTM / nn.Linear)."""
    k = 1.0 / jnp.sqrt(jnp.float32(hidden_size))
    keys = iter(jax.random.split(key, 64))

    def unif(shape):
        return jax.random.uniform(next(keys), shape, jnp.float32, -k, k)

    embedding = jax.random.normal(next(keys), (vocab_size, embed_dim), jnp.float32)

    lstm_layers = []
    for layer in range(num_layers):
        in_size = embed_dim if layer == 0 else 2 * hidden_size
        directions = []
        for _ in range(2):                                   # forward, backward
            w_ih = unif((4 * hidden_size, in_size))
            w_hh = unif((4 * hidden_size, hidden_size))
            b_ih = unif((4 * hidden_size,))
            b_hh = unif((4 * hidden_size,))
            directions.append((w_ih, w_hh, b_ih, b_hh))
        lstm_layers.append(directions)

    w_fc = unif((class_num, 2 * hidden_size))
    b_fc = unif((class_num,))
    return {"embedding": embedding, "lstm": lstm_layers, "fc": (w_fc, b_fc)}


def prepare_params(params):
    """One-time transpose / lane-pad into kernel-ready layout (done outside jit)."""
    emb = params["embedding"].astype(jnp.float32)
    E = emb.shape[1]
    Ep = _round_up(E, _LANE)
    emb_p = jnp.pad(emb, ((0, 0), (0, Ep - E)))              # zero-pad feature cols

    lstm_k = []
    for layer in params["lstm"]:
        dirs = []
        for (w_ih, w_hh, b_ih, b_hh) in layer:
            in_size = w_ih.shape[1]
            in_p = _round_up(in_size, _LANE)
            w_ih_t = jnp.pad(jnp.transpose(w_ih).astype(jnp.float32),
                             ((0, in_p - in_size), (0, 0)))  # (In_p, 4H)
            w_hh_t = jnp.transpose(w_hh).astype(jnp.float32)  # (H, 4H)
            b = (b_ih + b_hh).astype(jnp.float32)[None, :]    # (1, 4H)
            dirs.append((w_ih_t, w_hh_t, b))
        lstm_k.append(dirs)

    w_fc, b_fc = params["fc"]
    C = w_fc.shape[0]
    Cp = _round_up(C, _LANE)
    w_fc_t = jnp.pad(jnp.transpose(w_fc).astype(jnp.float32),
                     ((0, 0), (0, Cp - C)))                  # (2H, Cp), zero-padded cols
    b_fc_p = jnp.pad(b_fc.astype(jnp.float32), (0, Cp - C))[None, :]   # (1, Cp)

    return {"embedding": emb_p, "lstm": lstm_k, "fc": (w_fc_t, b_fc_p)}


# ----------------------------------- main ------------------------------------ #

if __name__ == "__main__":
    VOCAB, EMBED, HIDDEN, LAYERS, CLASSES = 10000, 100, 128, 2, 2
    B, T = 2, 8

    root = jax.random.PRNGKey(0)
    k_par, k_tok = jax.random.split(root)

    params = init_params(k_par, VOCAB, EMBED, HIDDEN, LAYERS, CLASSES)
    kparams = prepare_params(params)

    tokens = jax.random.randint(k_tok, (B, T), 0, VOCAB, dtype=jnp.int32)
    seq_len = jnp.array([T, 5], dtype=jnp.int32)   # variable lengths (batch_first)

    logits = lstm_model_forward(tokens, seq_len, kparams, class_num=CLASSES)
    logits = jax.block_until_ready(logits)
    assert logits.shape == (B, CLASSES) and logits.dtype == jnp.float32
    print("KERNEL_OK")
</pallas_src>

<mosaic_0001>
module attributes {stable_mosaic.version = 11 : i64} {
  func.func @_fused_lstm_kernel(%arg0: memref<8x1xi32, #tpu.memory_space<vmem>>, %arg1: memref<64x128xf32, #tpu.memory_space<vmem>>, %arg2: memref<128x512xf32, #tpu.memory_space<vmem>>, %arg3: memref<128x512xf32, #tpu.memory_space<vmem>>, %arg4: memref<1x512xf32, #tpu.memory_space<vmem>>, %arg5: memref<128x512xf32, #tpu.memory_space<vmem>>, %arg6: memref<128x512xf32, #tpu.memory_space<vmem>>, %arg7: memref<1x512xf32, #tpu.memory_space<vmem>>, %arg8: memref<256x512xf32, #tpu.memory_space<vmem>>, %arg9: memref<128x512xf32, #tpu.memory_space<vmem>>, %arg10: memref<1x512xf32, #tpu.memory_space<vmem>>, %arg11: memref<256x512xf32, #tpu.memory_space<vmem>>, %arg12: memref<128x512xf32, #tpu.memory_space<vmem>>, %arg13: memref<1x512xf32, #tpu.memory_space<vmem>>, %arg14: memref<256x128xf32, #tpu.memory_space<vmem>>, %arg15: memref<1x128xf32, #tpu.memory_space<vmem>>, %arg16: memref<8x128xf32, #tpu.memory_space<vmem>>, %arg17: memref<64x256xf32, #tpu.memory_space<vmem>>, %arg18: memref<64x512xf32, #tpu.memory_space<vmem>>) attributes {dimension_semantics = [], scalar_prefetch = 0 : i64, scratch_operands = 2 : i64, tpu.core_type = #tpu.core_type<tc>} {
    %c0 = arith.constant 0 : index
    %c0_0 = arith.constant 0 : index
    %0 = vector.load %arg0[%c0, %c0_0] : memref<8x1xi32, #tpu.memory_space<vmem>>, vector<8x1xi32>
    %c0_i32 = arith.constant 0 : i32
    %1 = vector.broadcast %c0_i32 : i32 to vector<8x1xi32>
    %2 = arith.cmpi sgt, %0, %1 : vector<8x1xi32>
    %c1_i32 = arith.constant 1 : i32
    %3 = vector.broadcast %c1_i32 : i32 to vector<8x1xi32>
    %4 = arith.cmpi sgt, %0, %3 : vector<8x1xi32>
    %c2_i32 = arith.constant 2 : i32
    %5 = vector.broadcast %c2_i32 : i32 to vector<8x1xi32>
    %6 = arith.cmpi sgt, %0, %5 : vector<8x1xi32>
    %c3_i32 = arith.constant 3 : i32
    %7 = vector.broadcast %c3_i32 : i32 to vector<8x1xi32>
    %8 = arith.cmpi sgt, %0, %7 : vector<8x1xi32>
    %c4_i32 = arith.constant 4 : i32
    %9 = vector.broadcast %c4_i32 : i32 to vector<8x1xi32>
    %10 = arith.cmpi sgt, %0, %9 : vector<8x1xi32>
    %c5_i32 = arith.constant 5 : i32
    %11 = vector.broadcast %c5_i32 : i32 to vector<8x1xi32>
    %12 = arith.cmpi sgt, %0, %11 : vector<8x1xi32>
    %c6_i32 = arith.constant 6 : i32
    %13 = vector.broadcast %c6_i32 : i32 to vector<8x1xi32>
    %14 = arith.cmpi sgt, %0, %13 : vector<8x1xi32>
    %c7_i32 = arith.constant 7 : i32
    %15 = vector.broadcast %c7_i32 : i32 to vector<8x1xi32>
    %16 = arith.cmpi sgt, %0, %15 : vector<8x1xi32>
    %c0_1 = arith.constant 0 : index
    %c0_2 = arith.constant 0 : index
    %17 = vector.load %arg1[%c0_1, %c0_2] : memref<64x128xf32, #tpu.memory_space<vmem>>, vector<64x128xf32>
    %c0_3 = arith.constant 0 : index
    %c0_4 = arith.constant 0 : index
    %18 = vector.load %arg2[%c0_3, %c0_4] : memref<128x512xf32, #tpu.memory_space<vmem>>, vector<128x512xf32>
    %cst = arith.constant dense<0.000000e+00> : vector<64x512xf32>
    %19 = tpu.matmul %17, %18, %cst {dimension_numbers = #tpu.dot_dimension_numbers<[1], [0], [0], [1], [0, 0, 1, 1], [], []>} : vector<64x128xf32>, vector<128x512xf32>, vector<64x512xf32> -> vector<64x512xf32>
    %c0_5 = arith.constant 0 : index
    %c0_6 = arith.constant 0 : index
    %20 = vector.load %arg4[%c0_5, %c0_6] : memref<1x512xf32, #tpu.memory_space<vmem>>, vector<1x512xf32>
    %21 = vector.broadcast %20 : vector<1x512xf32> to vector<64x512xf32>
    %22 = arith.addf %19, %21 : vector<64x512xf32>
    %c0_7 = arith.constant 0 : index
    %c0_8 = arith.constant 0 : index
    %23 = vector.load %arg18[%c0_7, %c0_8] : memref<64x512xf32, #tpu.memory_space<vmem>>, vector<64x512xf32>
    tpu.vector_store %arg18[%c0_7, %c0_8], %22 {strides = array<i32>} : memref<64x512xf32, #tpu.memory_space<vmem>>, vector<64x512xf32>,
    %c0_9 = arith.constant 0 : index
    %c0_10 = arith.constant 0 : index
    %24 = vector.load %arg3[%c0_9, %c0_10] : memref<128x512xf32, #tpu.memory_space<vmem>>, vector<128x512xf32>
    %cst_11 = arith.constant 0.000000e+00 : f32
    %25 = vector.broadcast %cst_11 : f32 to vector<8x128xf32>
    %cst_12 = arith.constant 0.000000e+00 : f32
    %26 = vector.broadcast %cst_12 : f32 to vector<8x128xf32>
    %c0_13 = arith.constant 0 : index
    %c0_14 = arith.constant 0 : index
    %27 = vector.load %arg18[%c0_13, %c0_14] : memref<64x512xf32, #tpu.memory_space<vmem>>, vector<8x512xf32>
    %cst_15 = arith.constant dense<0.000000e+00> : vector<8x512xf32>
    %28 = tpu.matmul %25, %24, %cst_15 {dimension_numbers = #tpu.dot_dimension_numbers<[1], [0], [0], [1], [0, 0, 1, 1], [], []>} : vector<8x128xf32>, vector<128x512xf32>, vector<8x512xf32> -> vector<8x512xf32>
    %29 = arith.addf %27, %28 : vector<8x512xf32>
    %30 = vector.extract_strided_slice %29 {offsets = [0, 0], sizes = [8, 128], strides = [1, 1]} : vector<8x512xf32> to vector<8x128xf32>
    %31 = arith.negf %30 : vector<8x128xf32>
    %32 = math.exp %31 : vector<8x128xf32>
    %cst_16 = arith.constant 1.000000e+00 : f32
    %33 = vector.broadcast %cst_16 : f32 to vector<8x128xf32>
    %34 = arith.addf %33, %32 : vector<8x128xf32>
    %35 = arith.divf %33, %34 : vector<8x128xf32>
    %36 = vector.extract_strided_slice %29 {offsets = [0, 128], sizes = [8, 128], strides = [1, 1]} : vector<8x512xf32> to vector<8x128xf32>
    %37 = arith.negf %36 : vector<8x128xf32>
    %38 = math.exp %37 : vector<8x128xf32>
    %cst_17 = arith.constant 1.000000e+00 : f32
    %39 = vector.broadcast %cst_17 : f32 to vector<8x128xf32>
    %40 = arith.addf %39, %38 : vector<8x128xf32>
    %41 = arith.divf %39, %40 : vector<8x128xf32>
    %42 = vector.extract_strided_slice %29 {offsets = [0, 256], sizes = [8, 128], strides = [1, 1]} : vector<8x512xf32> to vector<8x128xf32>
    %43 = math.tanh %42 : vector<8x128xf32>
    %44 = vector.extract_strided_slice %29 {offsets = [0, 384], sizes = [8, 128], strides = [1, 1]} : vector<8x512xf32> to vector<8x128xf32>
    %45 = arith.negf %44 : vector<8x128xf32>
    %46 = math.exp %45 : vector<8x128xf32>
    %cst_18 = arith.constant 1.000000e+00 : f32
    %47 = vector.broadcast %cst_18 : f32 to vector<8x128xf32>
    %48 = arith.addf %47, %46 : vector<8x128xf32>
    %49 = arith.divf %47, %48 : vector<8x128xf32>
    %50 = arith.mulf %41, %26 : vector<8x128xf32>
    %51 = arith.mulf %35, %43 : vector<8x128xf32>
    %52 = arith.addf %50, %51 : vector<8x128xf32>
    %53 = math.tanh %52 : vector<8x128xf32>
    %54 = arith.mulf %49, %53 : vector<8x128xf32>
    %55 = vector.shape_cast %2 : vector<8x1xi1> to vector<8x1xi1>
    %56 = vector.broadcast %55 : vector<8x1xi1> to vector<8x128xi1>
    %57 = arith.select %56, %54, %25 : vector<8x128xi1>, vector<8x128xf32>
    %58 = vector.shape_cast %2 : vector<8x1xi1> to vector<8x1xi1>
    %59 = vector.broadcast %58 : vector<8x1xi1> to vector<8x128xi1>
    %60 = arith.select %59, %52, %26 : vector<8x128xi1>, vector<8x128xf32>
    %c0_19 = arith.constant 0 : index
    %c0_20 = arith.constant 0 : index
    %61 = vector.load %arg17[%c0_19, %c0_20] : memref<64x256xf32, #tpu.memory_space<vmem>>, vector<8x128xf32>
    tpu.vector_store %arg17[%c0_19, %c0_20], %57 {strides = array<i32>} : memref<64x256xf32, #tpu.memory_space<vmem>>, vector<8x128xf32>,
    %c8 = arith.constant 8 : index
    %c0_21 = arith.constant 0 : index
    %62 = vector.load %arg18[%c8, %c0_21] : memref<64x512xf32, #tpu.memory_space<vmem>>, vector<8x512xf32>
    %cst_22 = arith.constant dense<0.000000e+00> : vector<8x512xf32>
    %63 = tpu.matmul %57, %24, %cst_22 {dimension_numbers = #tpu.dot_dimension_numbers<[1], [0], [0], [1], [0, 0, 1, 1], [], []>} : vector<8x128xf32>, vector<128x512xf32>, vector<8x512xf32> -> vector<8x512xf32>
    %64 = arith.addf %62, %63 : vector<8x512xf32>
    %65 = vector.extract_strided_slice %64 {offsets = [0, 0], sizes = [8, 128], strides = [1, 1]} : vector<8x512xf32> to vector<8x128xf32>
    %66 = arith.negf %65 : vector<8x128xf32>
    %67 = math.exp %66 : vector<8x128xf32>
    %cst_23 = arith.constant 1.000000e+00 : f32
    %68 = vector.broadcast %cst_23 : f32 to vector<8x128xf32>
    %69 = arith.addf %68, %67 : vector<8x128xf32>
    %70 = arith.divf %68, %69 : vector<8x128xf32>
    %71 = vector.extract_strided_slice %64 {offsets = [0, 128], sizes = [8, 128], strides = [1, 1]} : vector<8x512xf32> to vector<8x128xf32>
    %72 = arith.negf %71 : vector<8x128xf32>
    %73 = math.exp %72 : vector<8x128xf32>
    %cst_24 = arith.constant 1.000000e+00 : f32
    %74 = vector.broadcast %cst_24 : f32 to vector<8x128xf32>
    %75 = arith.addf %74, %73 : vector<8x128xf32>
    %76 = arith.divf %74, %75 : vector<8x128xf32>
    %77 = vector.extract_strided_slice %64 {offsets = [0, 256], sizes = [8, 128], strides = [1, 1]} : vector<8x512xf32> to vector<8x128xf32>
    %78 = math.tanh %77 : vector<8x128xf32>
    %79 = vector.extract_strided_slice %64 {offsets = [0, 384], sizes = [8, 128], strides = [1, 1]} : vector<8x512xf32> to vector<8x128xf32>
    %80 = arith.negf %79 : vector<8x128xf32>
    %81 = math.exp %80 : vector<8x128xf32>
    %cst_25 = arith.constant 1.000000e+00 : f32
    %82 = vector.broadcast %cst_25 : f32 to vector<8x128xf32>
    %83 = arith.addf %82, %81 : vector<8x128xf32>
    %84 = arith.divf %82, %83 : vector<8x128xf32>
    %85 = arith.mulf %76, %60 : vector<8x128xf32>
    %86 = arith.mulf %70, %78 : vector<8x128xf32>
    %87 = arith.addf %85, %86 : vector<8x128xf32>
    %88 = math.tanh %87 : vector<8x128xf32>
    %89 = arith.mulf %84, %88 : vector<8x128xf32>
    %90 = vector.shape_cast %4 : vector<8x1xi1> to vector<8x1xi1>
    %91 = vector.broadcast %90 : vector<8x1xi1> to vector<8x128xi1>
    %92 = arith.select %91, %89, %57 : vector<8x128xi1>, vector<8x128xf32>
    %93 = vector.shape_cast %4 : vector<8x1xi1> to vector<8x1xi1>
    %94 = vector.broadcast %93 : vector<8x1xi1> to vector<8x128xi1>
    %95 = arith.select %94, %87, %60 : vector<8x128xi1>, vector<8x128xf32>
    %c8_26 = arith.constant 8 : index
    %c0_27 = arith.constant 0 : index
    %96 = vector.load %arg17[%c8_26, %c0_27] : memref<64x256xf32, #tpu.memory_space<vmem>>, vector<8x128xf32>
    tpu.vector_store %arg17[%c8_26, %c0_27], %92 {strides = array<i32>} : memref<64x256xf32, #tpu.memory_space<vmem>>, vector<8x128xf32>,
    %c16 = arith.constant 16 : index
    %c0_28 = arith.constant 0 : index
    %97 = vector.load %arg18[%c16, %c0_28] : memref<64x512xf32, #tpu.memory_space<vmem>>, vector<8x512xf32>
    %cst_29 = arith.constant dense<0.000000e+00> : vector<8x512xf32>
    %98 = tpu.matmul %92, %24, %cst_29 {dimension_numbers = #tpu.dot_dimension_numbers<[1], [0], [0], [1], [0, 0, 1, 1], [], []>} : vector<8x128xf32>, vector<128x512xf32>, vector<8x512xf32> -> vector<8x512xf32>
    %99 = arith.addf %97, %98 : vector<8x512xf32>
    %100 = vector.extract_strided_slice %99 {offsets = [0, 0], sizes = [8, 128], strides = [1, 1]} : vector<8x512xf32> to vector<8x128xf32>
    %101 = arith.negf %100 : vector<8x128xf32>
    %102 = math.exp %101 : vector<8x128xf32>
    %cst_30 = arith.constant 1.000000e+00 : f32
    %103 = vector.broadcast %cst_30 : f32 to vector<8x128xf32>
    %104 = arith.addf %103, %102 : vector<8x128xf32>
    %105 = arith.divf %103, %104 : vector<8x128xf32>
    %106 = vector.extract_strided_slice %99 {offsets = [0, 128], sizes = [8, 128], strides = [1, 1]} : vector<8x512xf32> to vector<8x128xf32>
    %107 = arith.negf %106 : vector<8x128xf32>
    %108 = math.exp %107 : vector<8x128xf32>
    %cst_31 = arith.constant 1.000000e+00 : f32
    %109 = vector.broadcast %cst_31 : f32 to vector<8x128xf32>
    %110 = arith.addf %109, %108 : vector<8x128xf32>
    %111 = arith.divf %109, %110 : vector<8x128xf32>
    %112 = vector.extract_strided_slice %99 {offsets = [0, 256], sizes = [8, 128], strides = [1, 1]} : vector<8x512xf32> to vector<8x128xf32>
    %113 = math.tanh %112 : vector<8x128xf32>
    %114 = vector.extract_strided_slice %99 {offsets = [0, 384], sizes = [8, 128], strides = [1, 1]} : vector<8x512xf32> to vector<8x128xf32>
    %115 = arith.negf %114 : vector<8x128xf32>
    %116 = math.exp %115 : vector<8x128xf32>
    %cst_32 = arith.constant 1.000000e+00 : f32
    %117 = vector.broadcast %cst_32 : f32 to vector<8x128xf32>
    %118 = arith.addf %117, %116 : vector<8x128xf32>
    %119 = arith.divf %117, %118 : vector<8x128xf32>
    %120 = arith.mulf %111, %95 : vector<8x128xf32>
    %121 = arith.mulf %105, %113 : vector<8x128xf32>
    %122 = arith.addf %120, %121 : vector<8x128xf32>
    %123 = math.tanh %122 : vector<8x128xf32>
    %124 = arith.mulf %119, %123 : vector<8x128xf32>
    %125 = vector.shape_cast %6 : vector<8x1xi1> to vector<8x1xi1>
    %126 = vector.broadcast %125 : vector<8x1xi1> to vector<8x128xi1>
    %127 = arith.select %126, %124, %92 : vector<8x128xi1>, vector<8x128xf32>
    %128 = vector.shape_cast %6 : vector<8x1xi1> to vector<8x1xi1>
    %129 = vector.broadcast %128 : vector<8x1xi1> to vector<8x128xi1>
    %130 = arith.select %129, %122, %95 : vector<8x128xi1>, vector<8x128xf32>
    %c16_33 = arith.constant 16 : index
    %c0_34 = arith.constant 0 : index
    %131 = vector.load %arg17[%c16_33, %c0_34] : memref<64x256xf32, #tpu.memory_space<vmem>>, vector<8x128xf32>
    tpu.vector_store %arg17[%c16_33, %c0_34], %127 {strides = array<i32>} : memref<64x256xf32, #tpu.memory_space<vmem>>, vector<8x128xf32>,
    %c24 = arith.constant 24 : index
    %c0_35 = arith.constant 0 : index
    %132 = vector.load %arg18[%c24, %c0_35] : memref<64x512xf32, #tpu.memory_space<vmem>>, vector<8x512xf32>
    %cst_36 = arith.constant dense<0.000000e+00> : vector<8x512xf32>
    %133 = tpu.matmul %127, %24, %cst_36 {dimension_numbers = #tpu.dot_dimension_numbers<[1], [0], [0], [1], [0, 0, 1, 1], [], []>} : vector<8x128xf32>, vector<128x512xf32>, vector<8x512xf32> -> vector<8x512xf32>
    %134 = arith.addf %132, %133 : vector<8x512xf32>
    %135 = vector.extract_strided_slice %134 {offsets = [0, 0], sizes = [8, 128], strides = [1, 1]} : vector<8x512xf32> to vector<8x128xf32>
    %136 = arith.negf %135 : vector<8x128xf32>
    %137 = math.exp %136 : vector<8x128xf32>
    %cst_37 = arith.constant 1.000000e+00 : f32
    %138 = vector.broadcast %cst_37 : f32 to vector<8x128xf32>
    %139 = arith.addf %138, %137 : vector<8x128xf32>
    %140 = arith.divf %138, %139 : vector<8x128xf32>
    %141 = vector.extract_strided_slice %134 {offsets = [0, 128], sizes = [8, 128], strides = [1, 1]} : vector<8x512xf32> to vector<8x128xf32>
    %142 = arith.negf %141 : vector<8x128xf32>
    %143 = math.exp %142 : vector<8x128xf32>
    %cst_38 = arith.constant 1.000000e+00 : f32
    %144 = vector.broadcast %cst_38 : f32 to vector<8x128xf32>
    %145 = arith.addf %144, %143 : vector<8x128xf32>
    %146 = arith.divf %144, %145 : vector<8x128xf32>
    %147 = vector.extract_strided_slice %134 {offsets = [0, 256], sizes = [8, 128], strides = [1, 1]} : vector<8x512xf32> to vector<8x128xf32>
    %148 = math.tanh %147 : vector<8x128xf32>
    %149 = vector.extract_strided_slice %134 {offsets = [0, 384], sizes = [8, 128], strides = [1, 1]} : vector<8x512xf32> to vector<8x128xf32>
    %150 = arith.negf %149 : vector<8x128xf32>
    %151 = math.exp %150 : vector<8x128xf32>
    %cst_39 = arith.constant 1.000000e+00 : f32
    %152 = vector.broadcast %cst_39 : f32 to vector<8x128xf32>
    %153 = arith.addf %152, %151 : vector<8x128xf32>
    %154 = arith.divf %152, %153 : vector<8x128xf32>
    %155 = arith.mulf %146, %130 : vector<8x128xf32>
    %156 = arith.mulf %140, %148 : vector<8x128xf32>
    %157 = arith.addf %155, %156 : vector<8x128xf32>
    %158 = math.tanh %157 : vector<8x128xf32>
    %159 = arith.mulf %154, %158 : vector<8x128xf32>
    %160 = vector.shape_cast %8 : vector<8x1xi1> to vector<8x1xi1>
    %161 = vector.broadcast %160 : vector<8x1xi1> to vector<8x128xi1>
    %162 = arith.select %161, %159, %127 : vector<8x128xi1>, vector<8x128xf32>
    %163 = vector.shape_cast %8 : vector<8x1xi1> to vector<8x1xi1>
    %164 = vector.broadcast %163 : vector<8x1xi1> to vector<8x128xi1>
    %165 = arith.select %164, %157, %130 : vector<8x128xi1>, vector<8x128xf32>
    %c24_40 = arith.constant 24 : index
    %c0_41 = arith.constant 0 : index
    %166 = vector.load %arg17[%c24_40, %c0_41] : memref<64x256xf32, #tpu.memory_space<vmem>>, vector<8x128xf32>
    tpu.vector_store %arg17[%c24_40, %c0_41], %162 {strides = array<i32>} : memref<64x256xf32, #tpu.memory_space<vmem>>, vector<8x128xf32>,
    %c32 = arith.constant 32 : index
    %c0_42 = arith.constant 0 : index
    %167 = vector.load %arg18[%c32, %c0_42] : memref<64x512xf32, #tpu.memory_space<vmem>>, vector<8x512xf32>
    %cst_43 = arith.constant dense<0.000000e+00> : vector<8x512xf32>
    %168 = tpu.matmul %162, %24, %cst_43 {dimension_numbers = #tpu.dot_dimension_numbers<[1], [0], [0], [1], [0, 0, 1, 1], [], []>} : vector<8x128xf32>, vector<128x512xf32>, vector<8x512xf32> -> vector<8x512xf32>
    %169 = arith.addf %167, %168 : vector<8x512xf32>
    %170 = vector.extract_strided_slice %169 {offsets = [0, 0], sizes = [8, 128], strides = [1, 1]} : vector<8x512xf32> to vector<8x128xf32>
    %171 = arith.negf %170 : vector<8x128xf32>
    %172 = math.exp %171 : vector<8x128xf32>
    %cst_44 = arith.constant 1.000000e+00 : f32
    %173 = vector.broadcast %cst_44 : f32 to vector<8x128xf32>
    %174 = arith.addf %173, %172 : vector<8x128xf32>
    %175 = arith.divf %173, %174 : vector<8x128xf32>
    %176 = vector.extract_strided_slice %169 {offsets = [0, 128], sizes = [8, 128], strides = [1, 1]} : vector<8x512xf32> to vector<8x128xf32>
    %177 = arith.negf %176 : vector<8x128xf32>
    %178 = math.exp %177 : vector<8x128xf32>
    %cst_45 = arith.constant 1.000000e+00 : f32
    %179 = vector.broadcast %cst_45 : f32 to vector<8x128xf32>
    %180 = arith.addf %179, %178 : vector<8x128xf32>
    %181 = arith.divf %179, %180 : vector<8x128xf32>
    %182 = vector.extract_strided_slice %169 {offsets = [0, 256], sizes = [8, 128], strides = [1, 1]} : vector<8x512xf32> to vector<8x128xf32>
    %183 = math.tanh %182 : vector<8x128xf32>
    %184 = vector.extract_strided_slice %169 {offsets = [0, 384], sizes = [8, 128], strides = [1, 1]} : vector<8x512xf32> to vector<8x128xf32>
    %185 = arith.negf %184 : vector<8x128xf32>
    %186 = math.exp %185 : vector<8x128xf32>
    %cst_46 = arith.constant 1.000000e+00 : f32
    %187 = vector.broadcast %cst_46 : f32 to vector<8x128xf32>
    %188 = arith.addf %187, %186 : vector<8x128xf32>
    %189 = arith.divf %187, %188 : vector<8x128xf32>
    %190 = arith.mulf %181, %165 : vector<8x128xf32>
    %191 = arith.mulf %175, %183 : vector<8x128xf32>
    %192 = arith.addf %190, %191 : vector<8x128xf32>
    %193 = math.tanh %192 : vector<8x128xf32>
    %194 = arith.mulf %189, %193 : vector<8x128xf32>
    %195 = vector.shape_cast %10 : vector<8x1xi1> to vector<8x1xi1>
    %196 = vector.broadcast %195 : vector<8x1xi1> to vector<8x128xi1>
    %197 = arith.select %196, %194, %162 : vector<8x128xi1>, vector<8x128xf32>
    %198 = vector.shape_cast %10 : vector<8x1xi1> to vector<8x1xi1>
    %199 = vector.broadcast %198 : vector<8x1xi1> to vector<8x128xi1>
    %200 = arith.select %199, %192, %165 : vector<8x128xi1>, vector<8x128xf32>
    %c32_47 = arith.constant 32 : index
    %c0_48 = arith.constant 0 : index
    %201 = vector.load %arg17[%c32_47, %c0_48] : memref<64x256xf32, #tpu.memory_space<vmem>>, vector<8x128xf32>
    tpu.vector_store %arg17[%c32_47, %c0_48], %197 {strides = array<i32>} : memref<64x256xf32, #tpu.memory_space<vmem>>, vector<8x128xf32>,
    %c40 = arith.constant 40 : index
    %c0_49 = arith.constant 0 : index
    %202 = vector.load %arg18[%c40, %c0_49] : memref<64x512xf32, #tpu.memory_space<vmem>>, vector<8x512xf32>
    %cst_50 = arith.constant dense<0.000000e+00> : vector<8x512xf32>
    %203 = tpu.matmul %197, %24, %cst_50 {dimension_numbers = #tpu.dot_dimension_numbers<[1], [0], [0], [1], [0, 0, 1, 1], [], []>} : vector<8x128xf32>, vector<128x512xf32>, vector<8x512xf32> -> vector<8x512xf32>
    %204 = arith.addf %202, %203 : vector<8x512xf32>
    %205 = vector.extract_strided_slice %204 {offsets = [0, 0], sizes = [8, 128], strides = [1, 1]} : vector<8x512xf32> to vector<8x128xf32>
    %206 = arith.negf %205 : vector<8x128xf32>
    %207 = math.exp %206 : vector<8x128xf32>
    %cst_51 = arith.constant 1.000000e+00 : f32
    %208 = vector.broadcast %cst_51 : f32 to vector<8x128xf32>
    %209 = arith.addf %208, %207 : vector<8x128xf32>
    %210 = arith.divf %208, %209 : vector<8x128xf32>
    %211 = vector.extract_strided_slice %204 {offsets = [0, 128], sizes = [8, 128], strides = [1, 1]} : vector<8x512xf32> to vector<8x128xf32>
    %212 = arith.negf %211 : vector<8x128xf32>
    %213 = math.exp %212 : vector<8x128xf32>
    %cst_52 = arith.constant 1.000000e+00 : f32
    %214 = vector.broadcast %cst_52 : f32 to vector<8x128xf32>
    %215 = arith.addf %214, %213 : vector<8x128xf32>
    %216 = arith.divf %214, %215 : vector<8x128xf32>
    %217 = vector.extract_strided_slice %204 {offsets = [0, 256], sizes = [8, 128], strides = [1, 1]} : vector<8x512xf32> to vector<8x128xf32>
    %218 = math.tanh %217 : vector<8x128xf32>
    %219 = vector.extract_strided_slice %204 {offsets = [0, 384], sizes = [8, 128], strides = [1, 1]} : vector<8x512xf32> to vector<8x128xf32>
    %220 = arith.negf %219 : vector<8x128xf32>
    %221 = math.exp %220 : vector<8x128xf32>
    %cst_53 = arith.constant 1.000000e+00 : f32
    %222 = vector.broadcast %cst_53 : f32 to vector<8x128xf32>
    %223 = arith.addf %222, %221 : vector<8x128xf32>
    %224 = arith.divf %222, %223 : vector<8x128xf32>
    %225 = arith.mulf %216, %200 : vector<8x128xf32>
    %226 = arith.mulf %210, %218 : vector<8x128xf32>
    %227 = arith.addf %225, %226 : vector<8x128xf32>
    %228 = math.tanh %227 : vector<8x128xf32>
    %229 = arith.mulf %224, %228 : vector<8x128xf32>
    %230 = vector.shape_cast %12 : vector<8x1xi1> to vector<8x1xi1>
    %231 = vector.broadcast %230 : vector<8x1xi1> to vector<8x128xi1>
    %232 = arith.select %231, %229, %197 : vector<8x128xi1>, vector<8x128xf32>
    %233 = vector.shape_cast %12 : vector<8x1xi1> to vector<8x1xi1>
    %234 = vector.broadcast %233 : vector<8x1xi1> to vector<8x128xi1>
    %235 = arith.select %234, %227, %200 : vector<8x128xi1>, vector<8x128xf32>
    %c40_54 = arith.constant 40 : index
    %c0_55 = arith.constant 0 : index
    %236 = vector.load %arg17[%c40_54, %c0_55] : memref<64x256xf32, #tpu.memory_space<vmem>>, vector<8x128xf32>
    tpu.vector_store %arg17[%c40_54, %c0_55], %232 {strides = array<i32>} : memref<64x256xf32, #tpu.memory_space<vmem>>, vector<8x128xf32>,
    %c48 = arith.constant 48 : index
    %c0_56 = arith.constant 0 : index
    %237 = vector.load %arg18[%c48, %c0_56] : memref<64x512xf32, #tpu.memory_space<vmem>>, vector<8x512xf32>
    %cst_57 = arith.constant dense<0.000000e+00> : vector<8x512xf32>
    %238 = tpu.matmul %232, %24, %cst_57 {dimension_numbers = #tpu.dot_dimension_numbers<[1], [0], [0], [1], [0, 0, 1, 1], [], []>} : vector<8x128xf32>, vector<128x512xf32>, vector<8x512xf32> -> vector<8x512xf32>
    %239 = arith.addf %237, %238 : vector<8x512xf32>
    %240 = vector.extract_strided_slice %239 {offsets = [0, 0], sizes = [8, 128], strides = [1, 1]} : vector<8x512xf32> to vector<8x128xf32>
    %241 = arith.negf %240 : vector<8x128xf32>
    %242 = math.exp %241 : vector<8x128xf32>
    %cst_58 = arith.constant 1.000000e+00 : f32
    %243 = vector.broadcast %cst_58 : f32 to vector<8x128xf32>
    %244 = arith.addf %243, %242 : vector<8x128xf32>
    %245 = arith.divf %243, %244 : vector<8x128xf32>
    %246 = vector.extract_strided_slice %239 {offsets = [0, 128], sizes = [8, 128], strides = [1, 1]} : vector<8x512xf32> to vector<8x128xf32>
    %247 = arith.negf %246 : vector<8x128xf32>
    %248 = math.exp %247 : vector<8x128xf32>
    %cst_59 = arith.constant 1.000000e+00 : f32
    %249 = vector.broadcast %cst_59 : f32 to vector<8x128xf32>
    %250 = arith.addf %249, %248 : vector<8x128xf32>
    %251 = arith.divf %249, %250 : vector<8x128xf32>
    %252 = vector.extract_strided_slice %239 {offsets = [0, 256], sizes = [8, 128], strides = [1, 1]} : vector<8x512xf32> to vector<8x128xf32>
    %253 = math.tanh %252 : vector<8x128xf32>
    %254 = vector.extract_strided_slice %239 {offsets = [0, 384], sizes = [8, 128], strides = [1, 1]} : vector<8x512xf32> to vector<8x128xf32>
    %255 = arith.negf %254 : vector<8x128xf32>
    %256 = math.exp %255 : vector<8x128xf32>
    %cst_60 = arith.constant 1.000000e+00 : f32
    %257 = vector.broadcast %cst_60 : f32 to vector<8x128xf32>
    %258 = arith.addf %257, %256 : vector<8x128xf32>
    %259 = arith.divf %257, %258 : vector<8x128xf32>
    %260 = arith.mulf %251, %235 : vector<8x128xf32>
    %261 = arith.mulf %245, %253 : vector<8x128xf32>
    %262 = arith.addf %260, %261 : vector<8x128xf32>
    %263 = math.tanh %262 : vector<8x128xf32>
    %264 = arith.mulf %259, %263 : vector<8x128xf32>
    %265 = vector.shape_cast %14 : vector<8x1xi1> to vector<8x1xi1>
    %266 = vector.broadcast %265 : vector<8x1xi1> to vector<8x128xi1>
    %267 = arith.select %266, %264, %232 : vector<8x128xi1>, vector<8x128xf32>
    %268 = vector.shape_cast %14 : vector<8x1xi1> to vector<8x1xi1>
    %269 = vector.broadcast %268 : vector<8x1xi1> to vector<8x128xi1>
    %270 = arith.select %269, %262, %235 : vector<8x128xi1>, vector<8x128xf32>
    %c48_61 = arith.constant 48 : index
    %c0_62 = arith.constant 0 : index
    %271 = vector.load %arg17[%c48_61, %c0_62] : memref<64x256xf32, #tpu.memory_space<vmem>>, vector<8x128xf32>
    tpu.vector_store %arg17[%c48_61, %c0_62], %267 {strides = array<i32>} : memref<64x256xf32, #tpu.memory_space<vmem>>, vector<8x128xf32>,
    %c56 = arith.constant 56 : index
    %c0_63 = arith.constant 0 : index
    %272 = vector.load %arg18[%c56, %c0_63] : memref<64x512xf32, #tpu.memory_space<vmem>>, vector<8x512xf32>
    %cst_64 = arith.constant dense<0.000000e+00> : vector<8x512xf32>
    %273 = tpu.matmul %267, %24, %cst_64 {dimension_numbers = #tpu.dot_dimension_numbers<[1], [0], [0], [1], [0, 0, 1, 1], [], []>} : vector<8x128xf32>, vector<128x512xf32>, vector<8x512xf32> -> vector<8x512xf32>
    %274 = arith.addf %272, %273 : vector<8x512xf32>
    %275 = vector.extract_strided_slice %274 {offsets = [0, 0], sizes = [8, 128], strides = [1, 1]} : vector<8x512xf32> to vector<8x128xf32>
    %276 = arith.negf %275 : vector<8x128xf32>
    %277 = math.exp %276 : vector<8x128xf32>
    %cst_65 = arith.constant 1.000000e+00 : f32
    %278 = vector.broadcast %cst_65 : f32 to vector<8x128xf32>
    %279 = arith.addf %278, %277 : vector<8x128xf32>
    %280 = arith.divf %278, %279 : vector<8x128xf32>
    %281 = vector.extract_strided_slice %274 {offsets = [0, 128], sizes = [8, 128], strides = [1, 1]} : vector<8x512xf32> to vector<8x128xf32>
    %282 = arith.negf %281 : vector<8x128xf32>
    %283 = math.exp %282 : vector<8x128xf32>
    %cst_66 = arith.constant 1.000000e+00 : f32
    %284 = vector.broadcast %cst_66 : f32 to vector<8x128xf32>
    %285 = arith.addf %284, %283 : vector<8x128xf32>
    %286 = arith.divf %284, %285 : vector<8x128xf32>
    %287 = vector.extract_strided_slice %274 {offsets = [0, 256], sizes = [8, 128], strides = [1, 1]} : vector<8x512xf32> to vector<8x128xf32>
    %288 = math.tanh %287 : vector<8x128xf32>
    %289 = vector.extract_strided_slice %274 {offsets = [0, 384], sizes = [8, 128], strides = [1, 1]} : vector<8x512xf32> to vector<8x128xf32>
    %290 = arith.negf %289 : vector<8x128xf32>
    %291 = math.exp %290 : vector<8x128xf32>
    %cst_67 = arith.constant 1.000000e+00 : f32
    %292 = vector.broadcast %cst_67 : f32 to vector<8x128xf32>
    %293 = arith.addf %292, %291 : vector<8x128xf32>
    %294 = arith.divf %292, %293 : vector<8x128xf32>
    %295 = arith.mulf %286, %270 : vector<8x128xf32>
    %296 = arith.mulf %280, %288 : vector<8x128xf32>
    %297 = arith.addf %295, %296 : vector<8x128xf32>
    %298 = math.tanh %297 : vector<8x128xf32>
    %299 = arith.mulf %294, %298 : vector<8x128xf32>
    %300 = vector.shape_cast %16 : vector<8x1xi1> to vector<8x1xi1>
    %301 = vector.broadcast %300 : vector<8x1xi1> to vector<8x128xi1>
    %302 = arith.select %301, %299, %267 : vector<8x128xi1>, vector<8x128xf32>
    %c56_68 = arith.constant 56 : index
    %c0_69 = arith.constant 0 : index
    %303 = vector.load %arg17[%c56_68, %c0_69] : memref<64x256xf32, #tpu.memory_space<vmem>>, vector<8x128xf32>
    tpu.vector_store %arg17[%c56_68, %c0_69], %302 {strides = array<i32>} : memref<64x256xf32, #tpu.memory_space<vmem>>, vector<8x128xf32>,
    %c0_70 = arith.constant 0 : index
    %c0_71 = arith.constant 0 : index
    %304 = vector.load %arg5[%c0_70, %c0_71] : memref<128x512xf32, #tpu.memory_space<vmem>>, vector<128x512xf32>
    %cst_72 = arith.constant dense<0.000000e+00> : vector<64x512xf32>
    %305 = tpu.matmul %17, %304, %cst_72 {dimension_numbers = #tpu.dot_dimension_numbers<[1], [0], [0], [1], [0, 0, 1, 1], [], []>} : vector<64x128xf32>, vector<128x512xf32>, vector<64x512xf32> -> vector<64x512xf32>
    %c0_73 = arith.constant 0 : index
    %c0_74 = arith.constant 0 : index
    %306 = vector.load %arg7[%c0_73, %c0_74] : memref<1x512xf32, #tpu.memory_space<vmem>>, vector<1x512xf32>
    %307 = vector.broadcast %306 : vector<1x512xf32> to vector<64x512xf32>
    %308 = arith.addf %305, %307 : vector<64x512xf32>
    %c0_75 = arith.constant 0 : index
    %c0_76 = arith.constant 0 : index
    %309 = vector.load %arg18[%c0_75, %c0_76] : memref<64x512xf32, #tpu.memory_space<vmem>>, vector<64x512xf32>
    tpu.vector_store %arg18[%c0_75, %c0_76], %308 {strides = array<i32>} : memref<64x512xf32, #tpu.memory_space<vmem>>, vector<64x512xf32>,
    %c0_77 = arith.constant 0 : index
    %c0_78 = arith.constant 0 : index
    %310 = vector.load %arg6[%c0_77, %c0_78] : memref<128x512xf32, #tpu.memory_space<vmem>>, vector<128x512xf32>
    %cst_79 = arith.constant 0.000000e+00 : f32
    %311 = vector.broadcast %cst_79 : f32 to vector<8x128xf32>
    %cst_80 = arith.constant 0.000000e+00 : f32
    %312 = vector.broadcast %cst_80 : f32 to vector<8x128xf32>
    %c56_81 = arith.constant 56 : index
    %c0_82 = arith.constant 0 : index
    %313 = vector.load %arg18[%c56_81, %c0_82] : memref<64x512xf32, #tpu.memory_space<vmem>>, vector<8x512xf32>
    %cst_83 = arith.constant dense<0.000000e+00> : vector<8x512xf32>
    %314 = tpu.matmul %311, %310, %cst_83 {dimension_numbers = #tpu.dot_dimension_numbers<[1], [0], [0], [1], [0, 0, 1, 1], [], []>} : vector<8x128xf32>, vector<128x512xf32>, vector<8x512xf32> -> vector<8x512xf32>
    %315 = arith.addf %313, %314 : vector<8x512xf32>
    %316 = vector.extract_strided_slice %315 {offsets = [0, 0], sizes = [8, 128], strides = [1, 1]} : vector<8x512xf32> to vector<8x128xf32>
    %317 = arith.negf %316 : vector<8x128xf32>
    %318 = math.exp %317 : vector<8x128xf32>
    %cst_84 = arith.constant 1.000000e+00 : f32
    %319 = vector.broadcast %cst_84 : f32 to vector<8x128xf32>
    %320 = arith.addf %319, %318 : vector<8x128xf32>
    %321 = arith.divf %319, %320 : vector<8x128xf32>
    %322 = vector.extract_strided_slice %315 {offsets = [0, 128], sizes = [8, 128], strides = [1, 1]} : vector<8x512xf32> to vector<8x128xf32>
    %323 = arith.negf %322 : vector<8x128xf32>
    %324 = math.exp %323 : vector<8x128xf32>
    %cst_85 = arith.constant 1.000000e+00 : f32
    %325 = vector.broadcast %cst_85 : f32 to vector<8x128xf32>
    %326 = arith.addf %325, %324 : vector<8x128xf32>
    %327 = arith.divf %325, %326 : vector<8x128xf32>
    %328 = vector.extract_strided_slice %315 {offsets = [0, 256], sizes = [8, 128], strides = [1, 1]} : vector<8x512xf32> to vector<8x128xf32>
    %329 = math.tanh %328 : vector<8x128xf32>
    %330 = vector.extract_strided_slice %315 {offsets = [0, 384], sizes = [8, 128], strides = [1, 1]} : vector<8x512xf32> to vector<8x128xf32>
    %331 = arith.negf %330 : vector<8x128xf32>
    %332 = math.exp %331 : vector<8x128xf32>
    %cst_86 = arith.constant 1.000000e+00 : f32
    %333 = vector.broadcast %cst_86 : f32 to vector<8x128xf32>
    %334 = arith.addf %333, %332 : vector<8x128xf32>
    %335 = arith.divf %333, %334 : vector<8x128xf32>
    %336 = arith.mulf %327, %312 : vector<8x128xf32>
    %337 = arith.mulf %321, %329 : vector<8x128xf32>
    %338 = arith.addf %336, %337 : vector<8x128xf32>
    %339 = math.tanh %338 : vector<8x128xf32>
    %340 = arith.mulf %335, %339 : vector<8x128xf32>
    %341 = vector.shape_cast %16 : vector<8x1xi1> to vector<8x1xi1>
    %342 = vector.broadcast %341 : vector<8x1xi1> to vector<8x128xi1>
    %343 = arith.select %342, %340, %311 : vector<8x128xi1>, vector<8x128xf32>
    %344 = vector.shape_cast %16 : vector<8x1xi1> to vector<8x1xi1>
    %345 = vector.broadcast %344 : vector<8x1xi1> to vector<8x128xi1>
    %346 = arith.select %345, %338, %312 : vector<8x128xi1>, vector<8x128xf32>
    %c56_87 = arith.constant 56 : index
    %c128 = arith.constant 128 : index
    %347 = vector.load %arg17[%c56_87, %c128] : memref<64x256xf32, #tpu.memory_space<vmem>>, vector<8x128xf32>
    tpu.vector_store %arg17[%c56_87, %c128], %343 {strides = array<i32>} : memref<64x256xf32, #tpu.memory_space<vmem>>, vector<8x128xf32>,
    %c48_88 = arith.constant 48 : index
    %c0_89 = arith.constant 0 : index
    %348 = vector.load %arg18[%c48_88, %c0_89] : memref<64x512xf32, #tpu.memory_space<vmem>>, vector<8x512xf32>
    %cst_90 = arith.constant dense<0.000000e+00> : vector<8x512xf32>
    %349 = tpu.matmul %343, %310, %cst_90 {dimension_numbers = #tpu.dot_dimension_numbers<[1], [0], [0], [1], [0, 0, 1, 1], [], []>} : vector<8x128xf32>, vector<128x512xf32>, vector<8x512xf32> -> vector<8x512xf32>
    %350 = arith.addf %348, %349 : vector<8x512xf32>
    %351 = vector.extract_strided_slice %350 {offsets = [0, 0], sizes = [8, 128], strides = [1, 1]} : vector<8x512xf32> to vector<8x128xf32>
    %352 = arith.negf %351 : vector<8x128xf32>
    %353 = math.exp %352 : vector<8x128xf32>
    %cst_91 = arith.constant 1.000000e+00 : f32
    %354 = vector.broadcast %cst_91 : f32 to vector<8x128xf32>
    %355 = arith.addf %354, %353 : vector<8x128xf32>
    %356 = arith.divf %354, %355 : vector<8x128xf32>
    %357 = vector.extract_strided_slice %350 {offsets = [0, 128], sizes = [8, 128], strides = [1, 1]} : vector<8x512xf32> to vector<8x128xf32>
    %358 = arith.negf %357 : vector<8x128xf32>
    %359 = math.exp %358 : vector<8x128xf32>
    %cst_92 = arith.constant 1.000000e+00 : f32
    %360 = vector.broadcast %cst_92 : f32 to vector<8x128xf32>
    %361 = arith.addf %360, %359 : vector<8x128xf32>
    %362 = arith.divf %360, %361 : vector<8x128xf32>
    %363 = vector.extract_strided_slice %350 {offsets = [0, 256], sizes = [8, 128], strides = [1, 1]} : vector<8x512xf32> to vector<8x128xf32>
    %364 = math.tanh %363 : vector<8x128xf32>
    %365 = vector.extract_strided_slice %350 {offsets = [0, 384], sizes = [8, 128], strides = [1, 1]} : vector<8x512xf32> to vector<8x128xf32>
    %366 = arith.negf %365 : vector<8x128xf32>
    %367 = math.exp %366 : vector<8x128xf32>
    %cst_93 = arith.constant 1.000000e+00 : f32
    %368 = vector.broadcast %cst_93 : f32 to vector<8x128xf32>
    %369 = arith.addf %368, %367 : vector<8x128xf32>
    %370 = arith.divf %368, %369 : vector<8x128xf32>
    %371 = arith.mulf %362, %346 : vector<8x128xf32>
    %372 = arith.mulf %356, %364 : vector<8x128xf32>
    %373 = arith.addf %371, %372 : vector<8x128xf32>
    %374 = math.tanh %373 : vector<8x128xf32>
    %375 = arith.mulf %370, %374 : vector<8x128xf32>
    %376 = vector.shape_cast %14 : vector<8x1xi1> to vector<8x1xi1>
    %377 = vector.broadcast %376 : vector<8x1xi1> to vector<8x128xi1>
    %378 = arith.select %377, %375, %343 : vector<8x128xi1>, vector<8x128xf32>
    %379 = vector.shape_cast %14 : vector<8x1xi1> to vector<8x1xi1>
    %380 = vector.broadcast %379 : vector<8x1xi1> to vector<8x128xi1>
    %381 = arith.select %380, %373, %346 : vector<8x128xi1>, vector<8x128xf32>
    %c48_94 = arith.constant 48 : index
    %c128_95 = arith.constant 128 : index
    %382 = vector.load %arg17[%c48_94, %c128_95] : memref<64x256xf32, #tpu.memory_space<vmem>>, vector<8x128xf32>
    tpu.vector_store %arg17[%c48_94, %c128_95], %378 {strides = array<i32>} : memref<64x256xf32, #tpu.memory_space<vmem>>, vector<8x128xf32>,
    %c40_96 = arith.constant 40 : index
    %c0_97 = arith.constant 0 : index
    %383 = vector.load %arg18[%c40_96, %c0_97] : memref<64x512xf32, #tpu.memory_space<vmem>>, vector<8x512xf32>
    %cst_98 = arith.constant dense<0.000000e+00> : vector<8x512xf32>
    %384 = tpu.matmul %378, %310, %cst_98 {dimension_numbers = #tpu.dot_dimension_numbers<[1], [0], [0], [1], [0, 0, 1, 1], [], []>} : vector<8x128xf32>, vector<128x512xf32>, vector<8x512xf32> -> vector<8x512xf32>
    %385 = arith.addf %383, %384 : vector<8x512xf32>
    %386 = vector.extract_strided_slice %385 {offsets = [0, 0], sizes = [8, 128], strides = [1, 1]} : vector<8x512xf32> to vector<8x128xf32>
    %387 = arith.negf %386 : vector<8x128xf32>
    %388 = math.exp %387 : vector<8x128xf32>
    %cst_99 = arith.constant 1.000000e+00 : f32
    %389 = vector.broadcast %cst_99 : f32 to vector<8x128xf32>
    %390 = arith.addf %389, %388 : vector<8x128xf32>
    %391 = arith.divf %389, %390 : vector<8x128xf32>
    %392 = vector.extract_strided_slice %385 {offsets = [0, 128], sizes = [8, 128], strides = [1, 1]} : vector<8x512xf32> to vector<8x128xf32>
    %393 = arith.negf %392 : vector<8x128xf32>
    %394 = math.exp %393 : vector<8x128xf32>
    %cst_100 = arith.constant 1.000000e+00 : f32
    %395 = vector.broadcast %cst_100 : f32 to vector<8x128xf32>
    %396 = arith.addf %395, %394 : vector<8x128xf32>
    %397 = arith.divf %395, %396 : vector<8x128xf32>
    %398 = vector.extract_strided_slice %385 {offsets = [0, 256], sizes = [8, 128], strides = [1, 1]} : vector<8x512xf32> to vector<8x128xf32>
    %399 = math.tanh %398 : vector<8x128xf32>
    %400 = vector.extract_strided_slice %385 {offsets = [0, 384], sizes = [8, 128], strides = [1, 1]} : vector<8x512xf32> to vector<8x128xf32>
    %401 = arith.negf %400 : vector<8x128xf32>
    %402 = math.exp %401 : vector<8x128xf32>
    %cst_101 = arith.constant 1.000000e+00 : f32
    %403 = vector.broadcast %cst_101 : f32 to vector<8x128xf32>
    %404 = arith.addf %403, %402 : vector<8x128xf32>
    %405 = arith.divf %403, %404 : vector<8x128xf32>
    %406 = arith.mulf %397, %381 : vector<8x128xf32>
    %407 = arith.mulf %391, %399 : vector<8x128xf32>
    %408 = arith.addf %406, %407 : vector<8x128xf32>
    %409 = math.tanh %408 : vector<8x128xf32>
    %410 = arith.mulf %405, %409 : vector<8x128xf32>
    %411 = vector.shape_cast %12 : vector<8x1xi1> to vector<8x1xi1>
    %412 = vector.broadcast %411 : vector<8x1xi1> to vector<8x128xi1>
    %413 = arith.select %412, %410, %378 : vector<8x128xi1>, vector<8x128xf32>
    %414 = vector.shape_cast %12 : vector<8x1xi1> to vector<8x1xi1>
    %415 = vector.broadcast %414 : vector<8x1xi1> to vector<8x128xi1>
    %416 = arith.select %415, %408, %381 : vector<8x128xi1>, vector<8x128xf32>
    %c40_102 = arith.constant 40 : index
    %c128_103 = arith.constant 128 : index
    %417 = vector.load %arg17[%c40_102, %c128_103] : memref<64x256xf32, #tpu.memory_space<vmem>>, vector<8x128xf32>
    tpu.vector_store %arg17[%c40_102, %c128_103], %413 {strides = array<i32>} : memref<64x256xf32, #tpu.memory_space<vmem>>, vector<8x128xf32>,
    %c32_104 = arith.constant 32 : index
    %c0_105 = arith.constant 0 : index
    %418 = vector.load %arg18[%c32_104, %c0_105] : memref<64x512xf32, #tpu.memory_space<vmem>>, vector<8x512xf32>
    %cst_106 = arith.constant dense<0.000000e+00> : vector<8x512xf32>
    %419 = tpu.matmul %413, %310, %cst_106 {dimension_numbers = #tpu.dot_dimension_numbers<[1], [0], [0], [1], [0, 0, 1, 1], [], []>} : vector<8x128xf32>, vector<128x512xf32>, vector<8x512xf32> -> vector<8x512xf32>
    %420 = arith.addf %418, %419 : vector<8x512xf32>
    %421 = vector.extract_strided_slice %420 {offsets = [0, 0], sizes = [8, 128], strides = [1, 1]} : vector<8x512xf32> to vector<8x128xf32>
    %422 = arith.negf %421 : vector<8x128xf32>
    %423 = math.exp %422 : vector<8x128xf32>
    %cst_107 = arith.constant 1.000000e+00 : f32
    %424 = vector.broadcast %cst_107 : f32 to vector<8x128xf32>
    %425 = arith.addf %424, %423 : vector<8x128xf32>
    %426 = arith.divf %424, %425 : vector<8x128xf32>
    %427 = vector.extract_strided_slice %420 {offsets = [0, 128], sizes = [8, 128], strides = [1, 1]} : vector<8x512xf32> to vector<8x128xf32>
    %428 = arith.negf %427 : vector<8x128xf32>
    %429 = math.exp %428 : vector<8x128xf32>
    %cst_108 = arith.constant 1.000000e+00 : f32
    %430 = vector.broadcast %cst_108 : f32 to vector<8x128xf32>
    %431 = arith.addf %430, %429 : vector<8x128xf32>
    %432 = arith.divf %430, %431 : vector<8x128xf32>
    %433 = vector.extract_strided_slice %420 {offsets = [0, 256], sizes = [8, 128], strides = [1, 1]} : vector<8x512xf32> to vector<8x128xf32>
    %434 = math.tanh %433 : vector<8x128xf32>
    %435 = vector.extract_strided_slice %420 {offsets = [0, 384], sizes = [8, 128], strides = [1, 1]} : vector<8x512xf32> to vector<8x128xf32>
    %436 = arith.negf %435 : vector<8x128xf32>
    %437 = math.exp %436 : vector<8x128xf32>
    %cst_109 = arith.constant 1.000000e+00 : f32
    %438 = vector.broadcast %cst_109 : f32 to vector<8x128xf32>
    %439 = arith.addf %438, %437 : vector<8x128xf32>
    %440 = arith.divf %438, %439 : vector<8x128xf32>
    %441 = arith.mulf %432, %416 : vector<8x128xf32>
    %442 = arith.mulf %426, %434 : vector<8x128xf32>
    %443 = arith.addf %441, %442 : vector<8x128xf32>
    %444 = math.tanh %443 : vector<8x128xf32>
    %445 = arith.mulf %440, %444 : vector<8x128xf32>
    %446 = vector.shape_cast %10 : vector<8x1xi1> to vector<8x1xi1>
    %447 = vector.broadcast %446 : vector<8x1xi1> to vector<8x128xi1>
    %448 = arith.select %447, %445, %413 : vector<8x128xi1>, vector<8x128xf32>
    %449 = vector.shape_cast %10 : vector<8x1xi1> to vector<8x1xi1>
    %450 = vector.broadcast %449 : vector<8x1xi1> to vector<8x128xi1>
    %451 = arith.select %450, %443, %416 : vector<8x128xi1>, vector<8x128xf32>
    %c32_110 = arith.constant 32 : index
    %c128_111 = arith.constant 128 : index
    %452 = vector.load %arg17[%c32_110, %c128_111] : memref<64x256xf32, #tpu.memory_space<vmem>>, vector<8x128xf32>
    tpu.vector_store %arg17[%c32_110, %c128_111], %448 {strides = array<i32>} : memref<64x256xf32, #tpu.memory_space<vmem>>, vector<8x128xf32>,
    %c24_112 = arith.constant 24 : index
    %c0_113 = arith.constant 0 : index
    %453 = vector.load %arg18[%c24_112, %c0_113] : memref<64x512xf32, #tpu.memory_space<vmem>>, vector<8x512xf32>
    %cst_114 = arith.constant dense<0.000000e+00> : vector<8x512xf32>
    %454 = tpu.matmul %448, %310, %cst_114 {dimension_numbers = #tpu.dot_dimension_numbers<[1], [0], [0], [1], [0, 0, 1, 1], [], []>} : vector<8x128xf32>, vector<128x512xf32>, vector<8x512xf32> -> vector<8x512xf32>
    %455 = arith.addf %453, %454 : vector<8x512xf32>
    %456 = vector.extract_strided_slice %455 {offsets = [0, 0], sizes = [8, 128], strides = [1, 1]} : vector<8x512xf32> to vector<8x128xf32>
    %457 = arith.negf %456 : vector<8x128xf32>
    %458 = math.exp %457 : vector<8x128xf32>
    %cst_115 = arith.constant 1.000000e+00 : f32
    %459 = vector.broadcast %cst_115 : f32 to vector<8x128xf32>
    %460 = arith.addf %459, %458 : vector<8x128xf32>
    %461 = arith.divf %459, %460 : vector<8x128xf32>
    %462 = vector.extract_strided_slice %455 {offsets = [0, 128], sizes = [8, 128], strides = [1, 1]} : vector<8x512xf32> to vector<8x128xf32>
    %463 = arith.negf %462 : vector<8x128xf32>
    %464 = math.exp %463 : vector<8x128xf32>
    %cst_116 = arith.constant 1.000000e+00 : f32
    %465 = vector.broadcast %cst_116 : f32 to vector<8x128xf32>
    %466 = arith.addf %465, %464 : vector<8x128xf32>
    %467 = arith.divf %465, %466 : vector<8x128xf32>
    %468 = vector.extract_strided_slice %455 {offsets = [0, 256], sizes = [8, 128], strides = [1, 1]} : vector<8x512xf32> to vector<8x128xf32>
    %469 = math.tanh %468 : vector<8x128xf32>
    %470 = vector.extract_strided_slice %455 {offsets = [0, 384], sizes = [8, 128], strides = [1, 1]} : vector<8x512xf32> to vector<8x128xf32>
    %471 = arith.negf %470 : vector<8x128xf32>
    %472 = math.exp %471 : vector<8x128xf32>
    %cst_117 = arith.constant 1.000000e+00 : f32
    %473 = vector.broadcast %cst_117 : f32 to vector<8x128xf32>
    %474 = arith.addf %473, %472 : vector<8x128xf32>
    %475 = arith.divf %473, %474 : vector<8x128xf32>
    %476 = arith.mulf %467, %451 : vector<8x128xf32>
    %477 = arith.mulf %461, %469 : vector<8x128xf32>
    %478 = arith.addf %476, %477 : vector<8x128xf32>
    %479 = math.tanh %478 : vector<8x128xf32>
    %480 = arith.mulf %475, %479 : vector<8x128xf32>
    %481 = vector.shape_cast %8 : vector<8x1xi1> to vector<8x1xi1>
    %482 = vector.broadcast %481 : vector<8x1xi1> to vector<8x128xi1>
    %483 = arith.select %482, %480, %448 : vector<8x128xi1>, vector<8x128xf32>
    %484 = vector.shape_cast %8 : vector<8x1xi1> to vector<8x1xi1>
    %485 = vector.broadcast %484 : vector<8x1xi1> to vector<8x128xi1>
    %486 = arith.select %485, %478, %451 : vector<8x128xi1>, vector<8x128xf32>
    %c24_118 = arith.constant 24 : index
    %c128_119 = arith.constant 128 : index
    %487 = vector.load %arg17[%c24_118, %c128_119] : memref<64x256xf32, #tpu.memory_space<vmem>>, vector<8x128xf32>
    tpu.vector_store %arg17[%c24_118, %c128_119], %483 {strides = array<i32>} : memref<64x256xf32, #tpu.memory_space<vmem>>, vector<8x128xf32>,
    %c16_120 = arith.constant 16 : index
    %c0_121 = arith.constant 0 : index
    %488 = vector.load %arg18[%c16_120, %c0_121] : memref<64x512xf32, #tpu.memory_space<vmem>>, vector<8x512xf32>
    %cst_122 = arith.constant dense<0.000000e+00> : vector<8x512xf32>
    %489 = tpu.matmul %483, %310, %cst_122 {dimension_numbers = #tpu.dot_dimension_numbers<[1], [0], [0], [1], [0, 0, 1, 1], [], []>} : vector<8x128xf32>, vector<128x512xf32>, vector<8x512xf32> -> vector<8x512xf32>
    %490 = arith.addf %488, %489 : vector<8x512xf32>
    %491 = vector.extract_strided_slice %490 {offsets = [0, 0], sizes = [8, 128], strides = [1, 1]} : vector<8x512xf32> to vector<8x128xf32>
    %492 = arith.negf %491 : vector<8x128xf32>
    %493 = math.exp %492 : vector<8x128xf32>
    %cst_123 = arith.constant 1.000000e+00 : f32
    %494 = vector.broadcast %cst_123 : f32 to vector<8x128xf32>
    %495 = arith.addf %494, %493 : vector<8x128xf32>
    %496 = arith.divf %494, %495 : vector<8x128xf32>
    %497 = vector.extract_strided_slice %490 {offsets = [0, 128], sizes = [8, 128], strides = [1, 1]} : vector<8x512xf32> to vector<8x128xf32>
    %498 = arith.negf %497 : vector<8x128xf32>
    %499 = math.exp %498 : vector<8x128xf32>
    %cst_124 = arith.constant 1.000000e+00 : f32
    %500 = vector.broadcast %cst_124 : f32 to vector<8x128xf32>
    %501 = arith.addf %500, %499 : vector<8x128xf32>
    %502 = arith.divf %500, %501 : vector<8x128xf32>
    %503 = vector.extract_strided_slice %490 {offsets = [0, 256], sizes = [8, 128], strides = [1, 1]} : vector<8x512xf32> to vector<8x128xf32>
    %504 = math.tanh %503 : vector<8x128xf32>
    %505 = vector.extract_strided_slice %490 {offsets = [0, 384], sizes = [8, 128], strides = [1, 1]} : vector<8x512xf32> to vector<8x128xf32>
    %506 = arith.negf %505 : vector<8x128xf32>
    %507 = math.exp %506 : vector<8x128xf32>
    %cst_125 = arith.constant 1.000000e+00 : f32
    %508 = vector.broadcast %cst_125 : f32 to vector<8x128xf32>
    %509 = arith.addf %508, %507 : vector<8x128xf32>
    %510 = arith.divf %508, %509 : vector<8x128xf32>
    %511 = arith.mulf %502, %486 : vector<8x128xf32>
    %512 = arith.mulf %496, %504 : vector<8x128xf32>
    %513 = arith.addf %511, %512 : vector<8x128xf32>
    %514 = math.tanh %513 : vector<8x128xf32>
    %515 = arith.mulf %510, %514 : vector<8x128xf32>
    %516 = vector.shape_cast %6 : vector<8x1xi1> to vector<8x1xi1>
    %517 = vector.broadcast %516 : vector<8x1xi1> to vector<8x128xi1>
    %518 = arith.select %517, %515, %483 : vector<8x128xi1>, vector<8x128xf32>
    %519 = vector.shape_cast %6 : vector<8x1xi1> to vector<8x1xi1>
    %520 = vector.broadcast %519 : vector<8x1xi1> to vector<8x128xi1>
    %521 = arith.select %520, %513, %486 : vector<8x128xi1>, vector<8x128xf32>
    %c16_126 = arith.constant 16 : index
    %c128_127 = arith.constant 128 : index
    %522 = vector.load %arg17[%c16_126, %c128_127] : memref<64x256xf32, #tpu.memory_space<vmem>>, vector<8x128xf32>
    tpu.vector_store %arg17[%c16_126, %c128_127], %518 {strides = array<i32>} : memref<64x256xf32, #tpu.memory_space<vmem>>, vector<8x128xf32>,
    %c8_128 = arith.constant 8 : index
    %c0_129 = arith.constant 0 : index
    %523 = vector.load %arg18[%c8_128, %c0_129] : memref<64x512xf32, #tpu.memory_space<vmem>>, vector<8x512xf32>
    %cst_130 = arith.constant dense<0.000000e+00> : vector<8x512xf32>
    %524 = tpu.matmul %518, %310, %cst_130 {dimension_numbers = #tpu.dot_dimension_numbers<[1], [0], [0], [1], [0, 0, 1, 1], [], []>} : vector<8x128xf32>, vector<128x512xf32>, vector<8x512xf32> -> vector<8x512xf32>
    %525 = arith.addf %523, %524 : vector<8x512xf32>
    %526 = vector.extract_strided_slice %525 {offsets = [0, 0], sizes = [8, 128], strides = [1, 1]} : vector<8x512xf32> to vector<8x128xf32>
    %527 = arith.negf %526 : vector<8x128xf32>
    %528 = math.exp %527 : vector<8x128xf32>
    %cst_131 = arith.constant 1.000000e+00 : f32
    %529 = vector.broadcast %cst_131 : f32 to vector<8x128xf32>
    %530 = arith.addf %529, %528 : vector<8x128xf32>
    %531 = arith.divf %529, %530 : vector<8x128xf32>
    %532 = vector.extract_strided_slice %525 {offsets = [0, 128], sizes = [8, 128], strides = [1, 1]} : vector<8x512xf32> to vector<8x128xf32>
    %533 = arith.negf %532 : vector<8x128xf32>
    %534 = math.exp %533 : vector<8x128xf32>
    %cst_132 = arith.constant 1.000000e+00 : f32
    %535 = vector.broadcast %cst_132 : f32 to vector<8x128xf32>
    %536 = arith.addf %535, %534 : vector<8x128xf32>
    %537 = arith.divf %535, %536 : vector<8x128xf32>
    %538 = vector.extract_strided_slice %525 {offsets = [0, 256], sizes = [8, 128], strides = [1, 1]} : vector<8x512xf32> to vector<8x128xf32>
    %539 = math.tanh %538 : vector<8x128xf32>
    %540 = vector.extract_strided_slice %525 {offsets = [0, 384], sizes = [8, 128], strides = [1, 1]} : vector<8x512xf32> to vector<8x128xf32>
    %541 = arith.negf %540 : vector<8x128xf32>
    %542 = math.exp %541 : vector<8x128xf32>
    %cst_133 = arith.constant 1.000000e+00 : f32
    %543 = vector.broadcast %cst_133 : f32 to vector<8x128xf32>
    %544 = arith.addf %543, %542 : vector<8x128xf32>
    %545 = arith.divf %543, %544 : vector<8x128xf32>
    %546 = arith.mulf %537, %521 : vector<8x128xf32>
    %547 = arith.mulf %531, %539 : vector<8x128xf32>
    %548 = arith.addf %546, %547 : vector<8x128xf32>
    %549 = math.tanh %548 : vector<8x128xf32>
    %550 = arith.mulf %545, %549 : vector<8x128xf32>
    %551 = vector.shape_cast %4 : vector<8x1xi1> to vector<8x1xi1>
    %552 = vector.broadcast %551 : vector<8x1xi1> to vector<8x128xi1>
    %553 = arith.select %552, %550, %518 : vector<8x128xi1>, vector<8x128xf32>
    %554 = vector.shape_cast %4 : vector<8x1xi1> to vector<8x1xi1>
    %555 = vector.broadcast %554 : vector<8x1xi1> to vector<8x128xi1>
    %556 = arith.select %555, %548, %521 : vector<8x128xi1>, vector<8x128xf32>
    %c8_134 = arith.constant 8 : index
    %c128_135 = arith.constant 128 : index
    %557 = vector.load %arg17[%c8_134, %c128_135] : memref<64x256xf32, #tpu.memory_space<vmem>>, vector<8x128xf32>
    tpu.vector_store %arg17[%c8_134, %c128_135], %553 {strides = array<i32>} : memref<64x256xf32, #tpu.memory_space<vmem>>, vector<8x128xf32>,
    %c0_136 = arith.constant 0 : index
    %c0_137 = arith.constant 0 : index
    %558 = vector.load %arg18[%c0_136, %c0_137] : memref<64x512xf32, #tpu.memory_space<vmem>>, vector<8x512xf32>
    %cst_138 = arith.constant dense<0.000000e+00> : vector<8x512xf32>
    %559 = tpu.matmul %553, %310, %cst_138 {dimension_numbers = #tpu.dot_dimension_numbers<[1], [0], [0], [1], [0, 0, 1, 1], [], []>} : vector<8x128xf32>, vector<128x512xf32>, vector<8x512xf32> -> vector<8x512xf32>
    %560 = arith.addf %558, %559 : vector<8x512xf32>
    %561 = vector.extract_strided_slice %560 {offsets = [0, 0], sizes = [8, 128], strides = [1, 1]} : vector<8x512xf32> to vector<8x128xf32>
    %562 = arith.negf %561 : vector<8x128xf32>
    %563 = math.exp %562 : vector<8x128xf32>
    %cst_139 = arith.constant 1.000000e+00 : f32
    %564 = vector.broadcast %cst_139 : f32 to vector<8x128xf32>
    %565 = arith.addf %564, %563 : vector<8x128xf32>
    %566 = arith.divf %564, %565 : vector<8x128xf32>
    %567 = vector.extract_strided_slice %560 {offsets = [0, 128], sizes = [8, 128], strides = [1, 1]} : vector<8x512xf32> to vector<8x128xf32>
    %568 = arith.negf %567 : vector<8x128xf32>
    %569 = math.exp %568 : vector<8x128xf32>
    %cst_140 = arith.constant 1.000000e+00 : f32
    %570 = vector.broadcast %cst_140 : f32 to vector<8x128xf32>
    %571 = arith.addf %570, %569 : vector<8x128xf32>
    %572 = arith.divf %570, %571 : vector<8x128xf32>
    %573 = vector.extract_strided_slice %560 {offsets = [0, 256], sizes = [8, 128], strides = [1, 1]} : vector<8x512xf32> to vector<8x128xf32>
    %574 = math.tanh %573 : vector<8x128xf32>
    %575 = vector.extract_strided_slice %560 {offsets = [0, 384], sizes = [8, 128], strides = [1, 1]} : vector<8x512xf32> to vector<8x128xf32>
    %576 = arith.negf %575 : vector<8x128xf32>
    %577 = math.exp %576 : vector<8x128xf32>
    %cst_141 = arith.constant 1.000000e+00 : f32
    %578 = vector.broadcast %cst_141 : f32 to vector<8x128xf32>
    %579 = arith.addf %578, %577 : vector<8x128xf32>
    %580 = arith.divf %578, %579 : vector<8x128xf32>
    %581 = arith.mulf %572, %556 : vector<8x128xf32>
    %582 = arith.mulf %566, %574 : vector<8x128xf32>
    %583 = arith.addf %581, %582 : vector<8x128xf32>
    %584 = math.tanh %583 : vector<8x128xf32>
    %585 = arith.mulf %580, %584 : vector<8x128xf32>
    %586 = vector.shape_cast %2 : vector<8x1xi1> to vector<8x1xi1>
    %587 = vector.broadcast %586 : vector<8x1xi1> to vector<8x128xi1>
    %588 = arith.select %587, %585, %553 : vector<8x128xi1>, vector<8x128xf32>
    %c0_142 = arith.constant 0 : index
    %c128_143 = arith.constant 128 : index
    %589 = vector.load %arg17[%c0_142, %c128_143] : memref<64x256xf32, #tpu.memory_space<vmem>>, vector<8x128xf32>
    tpu.vector_store %arg17[%c0_142, %c128_143], %588 {strides = array<i32>} : memref<64x256xf32, #tpu.memory_space<vmem>>, vector<8x128xf32>,
    %c0_144 = arith.constant 0 : index
    %c0_145 = arith.constant 0 : index
    %590 = vector.load %arg17[%c0_144, %c0_145] : memref<64x256xf32, #tpu.memory_space<vmem>>, vector<64x256xf32>
    %c0_146 = arith.constant 0 : index
    %c0_147 = arith.constant 0 : index
    %591 = vector.load %arg8[%c0_146, %c0_147] : memref<256x512xf32, #tpu.memory_space<vmem>>, vector<256x512xf32>
    %cst_148 = arith.constant dense<0.000000e+00> : vector<64x512xf32>
    %592 = tpu.matmul %590, %591, %cst_148 {dimension_numbers = #tpu.dot_dimension_numbers<[1], [0], [0], [1], [0, 0, 1, 1], [], []>} : vector<64x256xf32>, vector<256x512xf32>, vector<64x512xf32> -> vector<64x512xf32>
    %c0_149 = arith.constant 0 : index
    %c0_150 = arith.constant 0 : index
    %593 = vector.load %arg10[%c0_149, %c0_150] : memref<1x512xf32, #tpu.memory_space<vmem>>, vector<1x512xf32>
    %594 = vector.broadcast %593 : vector<1x512xf32> to vector<64x512xf32>
    %595 = arith.addf %592, %594 : vector<64x512xf32>
    %c0_151 = arith.constant 0 : index
    %c0_152 = arith.constant 0 : index
    %596 = vector.load %arg18[%c0_151, %c0_152] : memref<64x512xf32, #tpu.memory_space<vmem>>, vector<64x512xf32>
    tpu.vector_store %arg18[%c0_151, %c0_152], %595 {strides = array<i32>} : memref<64x512xf32, #tpu.memory_space<vmem>>, vector<64x512xf32>,
    %c0_153 = arith.constant 0 : index
    %c0_154 = arith.constant 0 : index
    %597 = vector.load %arg9[%c0_153, %c0_154] : memref<128x512xf32, #tpu.memory_space<vmem>>, vector<128x512xf32>
    %cst_155 = arith.constant 0.000000e+00 : f32
    %598 = vector.broadcast %cst_155 : f32 to vector<8x128xf32>
    %cst_156 = arith.constant 0.000000e+00 : f32
    %599 = vector.broadcast %cst_156 : f32 to vector<8x128xf32>
    %c0_157 = arith.constant 0 : index
    %c0_158 = arith.constant 0 : index
    %600 = vector.load %arg18[%c0_157, %c0_158] : memref<64x512xf32, #tpu.memory_space<vmem>>, vector<8x512xf32>
    %cst_159 = arith.constant dense<0.000000e+00> : vector<8x512xf32>
    %601 = tpu.matmul %598, %597, %cst_159 {dimension_numbers = #tpu.dot_dimension_numbers<[1], [0], [0], [1], [0, 0, 1, 1], [], []>} : vector<8x128xf32>, vector<128x512xf32>, vector<8x512xf32> -> vector<8x512xf32>
    %602 = arith.addf %600, %601 : vector<8x512xf32>
    %603 = vector.extract_strided_slice %602 {offsets = [0, 0], sizes = [8, 128], strides = [1, 1]} : vector<8x512xf32> to vector<8x128xf32>
    %604 = arith.negf %603 : vector<8x128xf32>
    %605 = math.exp %604 : vector<8x128xf32>
    %cst_160 = arith.constant 1.000000e+00 : f32
    %606 = vector.broadcast %cst_160 : f32 to vector<8x128xf32>
    %607 = arith.addf %606, %605 : vector<8x128xf32>
    %608 = arith.divf %606, %607 : vector<8x128xf32>
    %609 = vector.extract_strided_slice %602 {offsets = [0, 128], sizes = [8, 128], strides = [1, 1]} : vector<8x512xf32> to vector<8x128xf32>
    %610 = arith.negf %609 : vector<8x128xf32>
    %611 = math.exp %610 : vector<8x128xf32>
    %cst_161 = arith.constant 1.000000e+00 : f32
    %612 = vector.broadcast %cst_161 : f32 to vector<8x128xf32>
    %613 = arith.addf %612, %611 : vector<8x128xf32>
    %614 = arith.divf %612, %613 : vector<8x128xf32>
    %615 = vector.extract_strided_slice %602 {offsets = [0, 256], sizes = [8, 128], strides = [1, 1]} : vector<8x512xf32> to vector<8x128xf32>
    %616 = math.tanh %615 : vector<8x128xf32>
    %617 = vector.extract_strided_slice %602 {offsets = [0, 384], sizes = [8, 128], strides = [1, 1]} : vector<8x512xf32> to vector<8x128xf32>
    %618 = arith.negf %617 : vector<8x128xf32>
    %619 = math.exp %618 : vector<8x128xf32>
    %cst_162 = arith.constant 1.000000e+00 : f32
    %620 = vector.broadcast %cst_162 : f32 to vector<8x128xf32>
    %621 = arith.addf %620, %619 : vector<8x128xf32>
    %622 = arith.divf %620, %621 : vector<8x128xf32>
    %623 = arith.mulf %614, %599 : vector<8x128xf32>
    %624 = arith.mulf %608, %616 : vector<8x128xf32>
    %625 = arith.addf %623, %624 : vector<8x128xf32>
    %626 = math.tanh %625 : vector<8x128xf32>
    %627 = arith.mulf %622, %626 : vector<8x128xf32>
    %628 = vector.shape_cast %2 : vector<8x1xi1> to vector<8x1xi1>
    %629 = vector.broadcast %628 : vector<8x1xi1> to vector<8x128xi1>
    %630 = arith.select %629, %627, %598 : vector<8x128xi1>, vector<8x128xf32>
    %631 = vector.shape_cast %2 : vector<8x1xi1> to vector<8x1xi1>
    %632 = vector.broadcast %631 : vector<8x1xi1> to vector<8x128xi1>
    %633 = arith.select %632, %625, %599 : vector<8x128xi1>, vector<8x128xf32>
    %c8_163 = arith.constant 8 : index
    %c0_164 = arith.constant 0 : index
    %634 = vector.load %arg18[%c8_163, %c0_164] : memref<64x512xf32, #tpu.memory_space<vmem>>, vector<8x512xf32>
    %cst_165 = arith.constant dense<0.000000e+00> : vector<8x512xf32>
    %635 = tpu.matmul %630, %597, %cst_165 {dimension_numbers = #tpu.dot_dimension_numbers<[1], [0], [0], [1], [0, 0, 1, 1], [], []>} : vector<8x128xf32>, vector<128x512xf32>, vector<8x512xf32> -> vector<8x512xf32>
    %636 = arith.addf %634, %635 : vector<8x512xf32>
    %637 = vector.extract_strided_slice %636 {offsets = [0, 0], sizes = [8, 128], strides = [1, 1]} : vector<8x512xf32> to vector<8x128xf32>
    %638 = arith.negf %637 : vector<8x128xf32>
    %639 = math.exp %638 : vector<8x128xf32>
    %cst_166 = arith.constant 1.000000e+00 : f32
    %640 = vector.broadcast %cst_166 : f32 to vector<8x128xf32>
    %641 = arith.addf %640, %639 : vector<8x128xf32>
    %642 = arith.divf %640, %641 : vector<8x128xf32>
    %643 = vector.extract_strided_slice %636 {offsets = [0, 128], sizes = [8, 128], strides = [1, 1]} : vector<8x512xf32> to vector<8x128xf32>
    %644 = arith.negf %643 : vector<8x128xf32>
    %645 = math.exp %644 : vector<8x128xf32>
    %cst_167 = arith.constant 1.000000e+00 : f32
    %646 = vector.broadcast %cst_167 : f32 to vector<8x128xf32>
    %647 = arith.addf %646, %645 : vector<8x128xf32>
    %648 = arith.divf %646, %647 : vector<8x128xf32>
    %649 = vector.extract_strided_slice %636 {offsets = [0, 256], sizes = [8, 128], strides = [1, 1]} : vector<8x512xf32> to vector<8x128xf32>
    %650 = math.tanh %649 : vector<8x128xf32>
    %651 = vector.extract_strided_slice %636 {offsets = [0, 384], sizes = [8, 128], strides = [1, 1]} : vector<8x512xf32> to vector<8x128xf32>
    %652 = arith.negf %651 : vector<8x128xf32>
    %653 = math.exp %652 : vector<8x128xf32>
    %cst_168 = arith.constant 1.000000e+00 : f32
    %654 = vector.broadcast %cst_168 : f32 to vector<8x128xf32>
    %655 = arith.addf %654, %653 : vector<8x128xf32>
    %656 = arith.divf %654, %655 : vector<8x128xf32>
    %657 = arith.mulf %648, %633 : vector<8x128xf32>
    %658 = arith.mulf %642, %650 : vector<8x128xf32>
    %659 = arith.addf %657, %658 : vector<8x128xf32>
    %660 = math.tanh %659 : vector<8x128xf32>
    %661 = arith.mulf %656, %660 : vector<8x128xf32>
    %662 = vector.shape_cast %4 : vector<8x1xi1> to vector<8x1xi1>
    %663 = vector.broadcast %662 : vector<8x1xi1> to vector<8x128xi1>
    %664 = arith.select %663, %661, %630 : vector<8x128xi1>, vector<8x128xf32>
    %665 = vector.shape_cast %4 : vector<8x1xi1> to vector<8x1xi1>
    %666 = vector.broadcast %665 : vector<8x1xi1> to vector<8x128xi1>
    %667 = arith.select %666, %659, %633 : vector<8x128xi1>, vector<8x128xf32>
    %c16_169 = arith.constant 16 : index
    %c0_170 = arith.constant 0 : index
    %668 = vector.load %arg18[%c16_169, %c0_170] : memref<64x512xf32, #tpu.memory_space<vmem>>, vector<8x512xf32>
    %cst_171 = arith.constant dense<0.000000e+00> : vector<8x512xf32>
    %669 = tpu.matmul %664, %597, %cst_171 {dimension_numbers = #tpu.dot_dimension_numbers<[1], [0], [0], [1], [0, 0, 1, 1], [], []>} : vector<8x128xf32>, vector<128x512xf32>, vector<8x512xf32> -> vector<8x512xf32>
    %670 = arith.addf %668, %669 : vector<8x512xf32>
    %671 = vector.extract_strided_slice %670 {offsets = [0, 0], sizes = [8, 128], strides = [1, 1]} : vector<8x512xf32> to vector<8x128xf32>
    %672 = arith.negf %671 : vector<8x128xf32>
    %673 = math.exp %672 : vector<8x128xf32>
    %cst_172 = arith.constant 1.000000e+00 : f32
    %674 = vector.broadcast %cst_172 : f32 to vector<8x128xf32>
    %675 = arith.addf %674, %673 : vector<8x128xf32>
    %676 = arith.divf %674, %675 : vector<8x128xf32>
    %677 = vector.extract_strided_slice %670 {offsets = [0, 128], sizes = [8, 128], strides = [1, 1]} : vector<8x512xf32> to vector<8x128xf32>
    %678 = arith.negf %677 : vector<8x128xf32>
    %679 = math.exp %678 : vector<8x128xf32>
    %cst_173 = arith.constant 1.000000e+00 : f32
    %680 = vector.broadcast %cst_173 : f32 to vector<8x128xf32>
    %681 = arith.addf %680, %679 : vector<8x128xf32>
    %682 = arith.divf %680, %681 : vector<8x128xf32>
    %683 = vector.extract_strided_slice %670 {offsets = [0, 256], sizes = [8, 128], strides = [1, 1]} : vector<8x512xf32> to vector<8x128xf32>
    %684 = math.tanh %683 : vector<8x128xf32>
    %685 = vector.extract_strided_slice %670 {offsets = [0, 384], sizes = [8, 128], strides = [1, 1]} : vector<8x512xf32> to vector<8x128xf32>
    %686 = arith.negf %685 : vector<8x128xf32>
    %687 = math.exp %686 : vector<8x128xf32>
    %cst_174 = arith.constant 1.000000e+00 : f32
    %688 = vector.broadcast %cst_174 : f32 to vector<8x128xf32>
    %689 = arith.addf %688, %687 : vector<8x128xf32>
    %690 = arith.divf %688, %689 : vector<8x128xf32>
    %691 = arith.mulf %682, %667 : vector<8x128xf32>
    %692 = arith.mulf %676, %684 : vector<8x128xf32>
    %693 = arith.addf %691, %692 : vector<8x128xf32>
    %694 = math.tanh %693 : vector<8x128xf32>
    %695 = arith.mulf %690, %694 : vector<8x128xf32>
    %696 = vector.shape_cast %6 : vector<8x1xi1> to vector<8x1xi1>
    %697 = vector.broadcast %696 : vector<8x1xi1> to vector<8x128xi1>
    %698 = arith.select %697, %695, %664 : vector<8x128xi1>, vector<8x128xf32>
    %699 = vector.shape_cast %6 : vector<8x1xi1> to vector<8x1xi1>
    %700 = vector.broadcast %699 : vector<8x1xi1> to vector<8x128xi1>
    %701 = arith.select %700, %693, %667 : vector<8x128xi1>, vector<8x128xf32>
    %c24_175 = arith.constant 24 : index
    %c0_176 = arith.constant 0 : index
    %702 = vector.load %arg18[%c24_175, %c0_176] : memref<64x512xf32, #tpu.memory_space<vmem>>, vector<8x512xf32>
    %cst_177 = arith.constant dense<0.000000e+00> : vector<8x512xf32>
    %703 = tpu.matmul %698, %597, %cst_177 {dimension_numbers = #tpu.dot_dimension_numbers<[1], [0], [0], [1], [0, 0, 1, 1], [], []>} : vector<8x128xf32>, vector<128x512xf32>, vector<8x512xf32> -> vector<8x512xf32>
    %704 = arith.addf %702, %703 : vector<8x512xf32>
    %705 = vector.extract_strided_slice %704 {offsets = [0, 0], sizes = [8, 128], strides = [1, 1]} : vector<8x512xf32> to vector<8x128xf32>
    %706 = arith.negf %705 : vector<8x128xf32>
    %707 = math.exp %706 : vector<8x128xf32>
    %cst_178 = arith.constant 1.000000e+00 : f32
    %708 = vector.broadcast %cst_178 : f32 to vector<8x128xf32>
    %709 = arith.addf %708, %707 : vector<8x128xf32>
    %710 = arith.divf %708, %709 : vector<8x128xf32>
    %711 = vector.extract_strided_slice %704 {offsets = [0, 128], sizes = [8, 128], strides = [1, 1]} : vector<8x512xf32> to vector<8x128xf32>
    %712 = arith.negf %711 : vector<8x128xf32>
    %713 = math.exp %712 : vector<8x128xf32>
    %cst_179 = arith.constant 1.000000e+00 : f32
    %714 = vector.broadcast %cst_179 : f32 to vector<8x128xf32>
    %715 = arith.addf %714, %713 : vector<8x128xf32>
    %716 = arith.divf %714, %715 : vector<8x128xf32>
    %717 = vector.extract_strided_slice %704 {offsets = [0, 256], sizes = [8, 128], strides = [1, 1]} : vector<8x512xf32> to vector<8x128xf32>
    %718 = math.tanh %717 : vector<8x128xf32>
    %719 = vector.extract_strided_slice %704 {offsets = [0, 384], sizes = [8, 128], strides = [1, 1]} : vector<8x512xf32> to vector<8x128xf32>
    %720 = arith.negf %719 : vector<8x128xf32>
    %721 = math.exp %720 : vector<8x128xf32>
    %cst_180 = arith.constant 1.000000e+00 : f32
    %722 = vector.broadcast %cst_180 : f32 to vector<8x128xf32>
    %723 = arith.addf %722, %721 : vector<8x128xf32>
    %724 = arith.divf %722, %723 : vector<8x128xf32>
    %725 = arith.mulf %716, %701 : vector<8x128xf32>
    %726 = arith.mulf %710, %718 : vector<8x128xf32>
    %727 = arith.addf %725, %726 : vector<8x128xf32>
    %728 = math.tanh %727 : vector<8x128xf32>
    %729 = arith.mulf %724, %728 : vector<8x128xf32>
    %730 = vector.shape_cast %8 : vector<8x1xi1> to vector<8x1xi1>
    %731 = vector.broadcast %730 : vector<8x1xi1> to vector<8x128xi1>
    %732 = arith.select %731, %729, %698 : vector<8x128xi1>, vector<8x128xf32>
    %733 = vector.shape_cast %8 : vector<8x1xi1> to vector<8x1xi1>
    %734 = vector.broadcast %733 : vector<8x1xi1> to vector<8x128xi1>
    %735 = arith.select %734, %727, %701 : vector<8x128xi1>, vector<8x128xf32>
    %c32_181 = arith.constant 32 : index
    %c0_182 = arith.constant 0 : index
    %736 = vector.load %arg18[%c32_181, %c0_182] : memref<64x512xf32, #tpu.memory_space<vmem>>, vector<8x512xf32>
    %cst_183 = arith.constant dense<0.000000e+00> : vector<8x512xf32>
    %737 = tpu.matmul %732, %597, %cst_183 {dimension_numbers = #tpu.dot_dimension_numbers<[1], [0], [0], [1], [0, 0, 1, 1], [], []>} : vector<8x128xf32>, vector<128x512xf32>, vector<8x512xf32> -> vector<8x512xf32>
    %738 = arith.addf %736, %737 : vector<8x512xf32>
    %739 = vector.extract_strided_slice %738 {offsets = [0, 0], sizes = [8, 128], strides = [1, 1]} : vector<8x512xf32> to vector<8x128xf32>
    %740 = arith.negf %739 : vector<8x128xf32>
    %741 = math.exp %740 : vector<8x128xf32>
    %cst_184 = arith.constant 1.000000e+00 : f32
    %742 = vector.broadcast %cst_184 : f32 to vector<8x128xf32>
    %743 = arith.addf %742, %741 : vector<8x128xf32>
    %744 = arith.divf %742, %743 : vector<8x128xf32>
    %745 = vector.extract_strided_slice %738 {offsets = [0, 128], sizes = [8, 128], strides = [1, 1]} : vector<8x512xf32> to vector<8x128xf32>
    %746 = arith.negf %745 : vector<8x128xf32>
    %747 = math.exp %746 : vector<8x128xf32>
    %cst_185 = arith.constant 1.000000e+00 : f32
    %748 = vector.broadcast %cst_185 : f32 to vector<8x128xf32>
    %749 = arith.addf %748, %747 : vector<8x128xf32>
    %750 = arith.divf %748, %749 : vector<8x128xf32>
    %751 = vector.extract_strided_slice %738 {offsets = [0, 256], sizes = [8, 128], strides = [1, 1]} : vector<8x512xf32> to vector<8x128xf32>
    %752 = math.tanh %751 : vector<8x128xf32>
    %753 = vector.extract_strided_slice %738 {offsets = [0, 384], sizes = [8, 128], strides = [1, 1]} : vector<8x512xf32> to vector<8x128xf32>
    %754 = arith.negf %753 : vector<8x128xf32>
    %755 = math.exp %754 : vector<8x128xf32>
    %cst_186 = arith.constant 1.000000e+00 : f32
    %756 = vector.broadcast %cst_186 : f32 to vector<8x128xf32>
    %757 = arith.addf %756, %755 : vector<8x128xf32>
    %758 = arith.divf %756, %757 : vector<8x128xf32>
    %759 = arith.mulf %750, %735 : vector<8x128xf32>
    %760 = arith.mulf %744, %752 : vector<8x128xf32>
    %761 = arith.addf %759, %760 : vector<8x128xf32>
    %762 = math.tanh %761 : vector<8x128xf32>
    %763 = arith.mulf %758, %762 : vector<8x128xf32>
    %764 = vector.shape_cast %10 : vector<8x1xi1> to vector<8x1xi1>
    %765 = vector.broadcast %764 : vector<8x1xi1> to vector<8x128xi1>
    %766 = arith.select %765, %763, %732 : vector<8x128xi1>, vector<8x128xf32>
    %767 = vector.shape_cast %10 : vector<8x1xi1> to vector<8x1xi1>
    %768 = vector.broadcast %767 : vector<8x1xi1> to vector<8x128xi1>
    %769 = arith.select %768, %761, %735 : vector<8x128xi1>, vector<8x128xf32>
    %c40_187 = arith.constant 40 : index
    %c0_188 = arith.constant 0 : index
    %770 = vector.load %arg18[%c40_187, %c0_188] : memref<64x512xf32, #tpu.memory_space<vmem>>, vector<8x512xf32>
    %cst_189 = arith.constant dense<0.000000e+00> : vector<8x512xf32>
    %771 = tpu.matmul %766, %597, %cst_189 {dimension_numbers = #tpu.dot_dimension_numbers<[1], [0], [0], [1], [0, 0, 1, 1], [], []>} : vector<8x128xf32>, vector<128x512xf32>, vector<8x512xf32> -> vector<8x512xf32>
    %772 = arith.addf %770, %771 : vector<8x512xf32>
    %773 = vector.extract_strided_slice %772 {offsets = [0, 0], sizes = [8, 128], strides = [1, 1]} : vector<8x512xf32> to vector<8x128xf32>
    %774 = arith.negf %773 : vector<8x128xf32>
    %775 = math.exp %774 : vector<8x128xf32>
    %cst_190 = arith.constant 1.000000e+00 : f32
    %776 = vector.broadcast %cst_190 : f32 to vector<8x128xf32>
    %777 = arith.addf %776, %775 : vector<8x128xf32>
    %778 = arith.divf %776, %777 : vector<8x128xf32>
    %779 = vector.extract_strided_slice %772 {offsets = [0, 128], sizes = [8, 128], strides = [1, 1]} : vector<8x512xf32> to vector<8x128xf32>
    %780 = arith.negf %779 : vector<8x128xf32>
    %781 = math.exp %780 : vector<8x128xf32>
    %cst_191 = arith.constant 1.000000e+00 : f32
    %782 = vector.broadcast %cst_191 : f32 to vector<8x128xf32>
    %783 = arith.addf %782, %781 : vector<8x128xf32>
    %784 = arith.divf %782, %783 : vector<8x128xf32>
    %785 = vector.extract_strided_slice %772 {offsets = [0, 256], sizes = [8, 128], strides = [1, 1]} : vector<8x512xf32> to vector<8x128xf32>
    %786 = math.tanh %785 : vector<8x128xf32>
    %787 = vector.extract_strided_slice %772 {offsets = [0, 384], sizes = [8, 128], strides = [1, 1]} : vector<8x512xf32> to vector<8x128xf32>
    %788 = arith.negf %787 : vector<8x128xf32>
    %789 = math.exp %788 : vector<8x128xf32>
    %cst_192 = arith.constant 1.000000e+00 : f32
    %790 = vector.broadcast %cst_192 : f32 to vector<8x128xf32>
    %791 = arith.addf %790, %789 : vector<8x128xf32>
    %792 = arith.divf %790, %791 : vector<8x128xf32>
    %793 = arith.mulf %784, %769 : vector<8x128xf32>
    %794 = arith.mulf %778, %786 : vector<8x128xf32>
    %795 = arith.addf %793, %794 : vector<8x128xf32>
    %796 = math.tanh %795 : vector<8x128xf32>
    %797 = arith.mulf %792, %796 : vector<8x128xf32>
    %798 = vector.shape_cast %12 : vector<8x1xi1> to vector<8x1xi1>
    %799 = vector.broadcast %798 : vector<8x1xi1> to vector<8x128xi1>
    %800 = arith.select %799, %797, %766 : vector<8x128xi1>, vector<8x128xf32>
    %801 = vector.shape_cast %12 : vector<8x1xi1> to vector<8x1xi1>
    %802 = vector.broadcast %801 : vector<8x1xi1> to vector<8x128xi1>
    %803 = arith.select %802, %795, %769 : vector<8x128xi1>, vector<8x128xf32>
    %c48_193 = arith.constant 48 : index
    %c0_194 = arith.constant 0 : index
    %804 = vector.load %arg18[%c48_193, %c0_194] : memref<64x512xf32, #tpu.memory_space<vmem>>, vector<8x512xf32>
    %cst_195 = arith.constant dense<0.000000e+00> : vector<8x512xf32>
    %805 = tpu.matmul %800, %597, %cst_195 {dimension_numbers = #tpu.dot_dimension_numbers<[1], [0], [0], [1], [0, 0, 1, 1], [], []>} : vector<8x128xf32>, vector<128x512xf32>, vector<8x512xf32> -> vector<8x512xf32>
    %806 = arith.addf %804, %805 : vector<8x512xf32>
    %807 = vector.extract_strided_slice %806 {offsets = [0, 0], sizes = [8, 128], strides = [1, 1]} : vector<8x512xf32> to vector<8x128xf32>
    %808 = arith.negf %807 : vector<8x128xf32>
    %809 = math.exp %808 : vector<8x128xf32>
    %cst_196 = arith.constant 1.000000e+00 : f32
    %810 = vector.broadcast %cst_196 : f32 to vector<8x128xf32>
    %811 = arith.addf %810, %809 : vector<8x128xf32>
    %812 = arith.divf %810, %811 : vector<8x128xf32>
    %813 = vector.extract_strided_slice %806 {offsets = [0, 128], sizes = [8, 128], strides = [1, 1]} : vector<8x512xf32> to vector<8x128xf32>
    %814 = arith.negf %813 : vector<8x128xf32>
    %815 = math.exp %814 : vector<8x128xf32>
    %cst_197 = arith.constant 1.000000e+00 : f32
    %816 = vector.broadcast %cst_197 : f32 to vector<8x128xf32>
    %817 = arith.addf %816, %815 : vector<8x128xf32>
    %818 = arith.divf %816, %817 : vector<8x128xf32>
    %819 = vector.extract_strided_slice %806 {offsets = [0, 256], sizes = [8, 128], strides = [1, 1]} : vector<8x512xf32> to vector<8x128xf32>
    %820 = math.tanh %819 : vector<8x128xf32>
    %821 = vector.extract_strided_slice %806 {offsets = [0, 384], sizes = [8, 128], strides = [1, 1]} : vector<8x512xf32> to vector<8x128xf32>
    %822 = arith.negf %821 : vector<8x128xf32>
    %823 = math.exp %822 : vector<8x128xf32>
    %cst_198 = arith.constant 1.000000e+00 : f32
    %824 = vector.broadcast %cst_198 : f32 to vector<8x128xf32>
    %825 = arith.addf %824, %823 : vector<8x128xf32>
    %826 = arith.divf %824, %825 : vector<8x128xf32>
    %827 = arith.mulf %818, %803 : vector<8x128xf32>
    %828 = arith.mulf %812, %820 : vector<8x128xf32>
    %829 = arith.addf %827, %828 : vector<8x128xf32>
    %830 = math.tanh %829 : vector<8x128xf32>
    %831 = arith.mulf %826, %830 : vector<8x128xf32>
    %832 = vector.shape_cast %14 : vector<8x1xi1> to vector<8x1xi1>
    %833 = vector.broadcast %832 : vector<8x1xi1> to vector<8x128xi1>
    %834 = arith.select %833, %831, %800 : vector<8x128xi1>, vector<8x128xf32>
    %835 = vector.shape_cast %14 : vector<8x1xi1> to vector<8x1xi1>
    %836 = vector.broadcast %835 : vector<8x1xi1> to vector<8x128xi1>
    %837 = arith.select %836, %829, %803 : vector<8x128xi1>, vector<8x128xf32>
    %c56_199 = arith.constant 56 : index
    %c0_200 = arith.constant 0 : index
    %838 = vector.load %arg18[%c56_199, %c0_200] : memref<64x512xf32, #tpu.memory_space<vmem>>, vector<8x512xf32>
    %cst_201 = arith.constant dense<0.000000e+00> : vector<8x512xf32>
    %839 = tpu.matmul %834, %597, %cst_201 {dimension_numbers = #tpu.dot_dimension_numbers<[1], [0], [0], [1], [0, 0, 1, 1], [], []>} : vector<8x128xf32>, vector<128x512xf32>, vector<8x512xf32> -> vector<8x512xf32>
    %840 = arith.addf %838, %839 : vector<8x512xf32>
    %841 = vector.extract_strided_slice %840 {offsets = [0, 0], sizes = [8, 128], strides = [1, 1]} : vector<8x512xf32> to vector<8x128xf32>
    %842 = arith.negf %841 : vector<8x128xf32>
    %843 = math.exp %842 : vector<8x128xf32>
    %cst_202 = arith.constant 1.000000e+00 : f32
    %844 = vector.broadcast %cst_202 : f32 to vector<8x128xf32>
    %845 = arith.addf %844, %843 : vector<8x128xf32>
    %846 = arith.divf %844, %845 : vector<8x128xf32>
    %847 = vector.extract_strided_slice %840 {offsets = [0, 128], sizes = [8, 128], strides = [1, 1]} : vector<8x512xf32> to vector<8x128xf32>
    %848 = arith.negf %847 : vector<8x128xf32>
    %849 = math.exp %848 : vector<8x128xf32>
    %cst_203 = arith.constant 1.000000e+00 : f32
    %850 = vector.broadcast %cst_203 : f32 to vector<8x128xf32>
    %851 = arith.addf %850, %849 : vector<8x128xf32>
    %852 = arith.divf %850, %851 : vector<8x128xf32>
    %853 = vector.extract_strided_slice %840 {offsets = [0, 256], sizes = [8, 128], strides = [1, 1]} : vector<8x512xf32> to vector<8x128xf32>
    %854 = math.tanh %853 : vector<8x128xf32>
    %855 = vector.extract_strided_slice %840 {offsets = [0, 384], sizes = [8, 128], strides = [1, 1]} : vector<8x512xf32> to vector<8x128xf32>
    %856 = arith.negf %855 : vector<8x128xf32>
    %857 = math.exp %856 : vector<8x128xf32>
    %cst_204 = arith.constant 1.000000e+00 : f32
    %858 = vector.broadcast %cst_204 : f32 to vector<8x128xf32>
    %859 = arith.addf %858, %857 : vector<8x128xf32>
    %860 = arith.divf %858, %859 : vector<8x128xf32>
    %861 = arith.mulf %852, %837 : vector<8x128xf32>
    %862 = arith.mulf %846, %854 : vector<8x128xf32>
    %863 = arith.addf %861, %862 : vector<8x128xf32>
    %864 = math.tanh %863 : vector<8x128xf32>
    %865 = arith.mulf %860, %864 : vector<8x128xf32>
    %866 = vector.shape_cast %16 : vector<8x1xi1> to vector<8x1xi1>
    %867 = vector.broadcast %866 : vector<8x1xi1> to vector<8x128xi1>
    %868 = arith.select %867, %865, %834 : vector<8x128xi1>, vector<8x128xf32>
    %c0_205 = arith.constant 0 : index
    %c0_206 = arith.constant 0 : index
    %869 = vector.load %arg11[%c0_205, %c0_206] : memref<256x512xf32, #tpu.memory_space<vmem>>, vector<256x512xf32>
    %cst_207 = arith.constant dense<0.000000e+00> : vector<64x512xf32>
    %870 = tpu.matmul %590, %869, %cst_207 {dimension_numbers = #tpu.dot_dimension_numbers<[1], [0], [0], [1], [0, 0, 1, 1], [], []>} : vector<64x256xf32>, vector<256x512xf32>, vector<64x512xf32> -> vector<64x512xf32>
    %c0_208 = arith.constant 0 : index
    %c0_209 = arith.constant 0 : index
    %871 = vector.load %arg13[%c0_208, %c0_209] : memref<1x512xf32, #tpu.memory_space<vmem>>, vector<1x512xf32>
    %872 = vector.broadcast %871 : vector<1x512xf32> to vector<64x512xf32>
    %873 = arith.addf %870, %872 : vector<64x512xf32>
    %c0_210 = arith.constant 0 : index
    %c0_211 = arith.constant 0 : index
    %874 = vector.load %arg18[%c0_210, %c0_211] : memref<64x512xf32, #tpu.memory_space<vmem>>, vector<64x512xf32>
    tpu.vector_store %arg18[%c0_210, %c0_211], %873 {strides = array<i32>} : memref<64x512xf32, #tpu.memory_space<vmem>>, vector<64x512xf32>,
    %c0_212 = arith.constant 0 : index
    %c0_213 = arith.constant 0 : index
    %875 = vector.load %arg12[%c0_212, %c0_213] : memref<128x512xf32, #tpu.memory_space<vmem>>, vector<128x512xf32>
    %cst_214 = arith.constant 0.000000e+00 : f32
    %876 = vector.broadcast %cst_214 : f32 to vector<8x128xf32>
    %cst_215 = arith.constant 0.000000e+00 : f32
    %877 = vector.broadcast %cst_215 : f32 to vector<8x128xf32>
    %c56_216 = arith.constant 56 : index
    %c0_217 = arith.constant 0 : index
    %878 = vector.load %arg18[%c56_216, %c0_217] : memref<64x512xf32, #tpu.memory_space<vmem>>, vector<8x512xf32>
    %cst_218 = arith.constant dense<0.000000e+00> : vector<8x512xf32>
    %879 = tpu.matmul %876, %875, %cst_218 {dimension_numbers = #tpu.dot_dimension_numbers<[1], [0], [0], [1], [0, 0, 1, 1], [], []>} : vector<8x128xf32>, vector<128x512xf32>, vector<8x512xf32> -> vector<8x512xf32>
    %880 = arith.addf %878, %879 : vector<8x512xf32>
    %881 = vector.extract_strided_slice %880 {offsets = [0, 0], sizes = [8, 128], strides = [1, 1]} : vector<8x512xf32> to vector<8x128xf32>
    %882 = arith.negf %881 : vector<8x128xf32>
    %883 = math.exp %882 : vector<8x128xf32>
    %cst_219 = arith.constant 1.000000e+00 : f32
    %884 = vector.broadcast %cst_219 : f32 to vector<8x128xf32>
    %885 = arith.addf %884, %883 : vector<8x128xf32>
    %886 = arith.divf %884, %885 : vector<8x128xf32>
    %887 = vector.extract_strided_slice %880 {offsets = [0, 128], sizes = [8, 128], strides = [1, 1]} : vector<8x512xf32> to vector<8x128xf32>
    %888 = arith.negf %887 : vector<8x128xf32>
    %889 = math.exp %888 : vector<8x128xf32>
    %cst_220 = arith.constant 1.000000e+00 : f32
    %890 = vector.broadcast %cst_220 : f32 to vector<8x128xf32>
    %891 = arith.addf %890, %889 : vector<8x128xf32>
    %892 = arith.divf %890, %891 : vector<8x128xf32>
    %893 = vector.extract_strided_slice %880 {offsets = [0, 256], sizes = [8, 128], strides = [1, 1]} : vector<8x512xf32> to vector<8x128xf32>
    %894 = math.tanh %893 : vector<8x128xf32>
    %895 = vector.extract_strided_slice %880 {offsets = [0, 384], sizes = [8, 128], strides = [1, 1]} : vector<8x512xf32> to vector<8x128xf32>
    %896 = arith.negf %895 : vector<8x128xf32>
    %897 = math.exp %896 : vector<8x128xf32>
    %cst_221 = arith.constant 1.000000e+00 : f32
    %898 = vector.broadcast %cst_221 : f32 to vector<8x128xf32>
    %899 = arith.addf %898, %897 : vector<8x128xf32>
    %900 = arith.divf %898, %899 : vector<8x128xf32>
    %901 = arith.mulf %892, %877 : vector<8x128xf32>
    %902 = arith.mulf %886, %894 : vector<8x128xf32>
    %903 = arith.addf %901, %902 : vector<8x128xf32>
    %904 = math.tanh %903 : vector<8x128xf32>
    %905 = arith.mulf %900, %904 : vector<8x128xf32>
    %906 = vector.shape_cast %16 : vector<8x1xi1> to vector<8x1xi1>
    %907 = vector.broadcast %906 : vector<8x1xi1> to vector<8x128xi1>
    %908 = arith.select %907, %905, %876 : vector<8x128xi1>, vector<8x128xf32>
    %909 = vector.shape_cast %16 : vector<8x1xi1> to vector<8x1xi1>
    %910 = vector.broadcast %909 : vector<8x1xi1> to vector<8x128xi1>
    %911 = arith.select %910, %903, %877 : vector<8x128xi1>, vector<8x128xf32>
    %c48_222 = arith.constant 48 : index
    %c0_223 = arith.constant 0 : index
    %912 = vector.load %arg18[%c48_222, %c0_223] : memref<64x512xf32, #tpu.memory_space<vmem>>, vector<8x512xf32>
    %cst_224 = arith.constant dense<0.000000e+00> : vector<8x512xf32>
    %913 = tpu.matmul %908, %875, %cst_224 {dimension_numbers = #tpu.dot_dimension_numbers<[1], [0], [0], [1], [0, 0, 1, 1], [], []>} : vector<8x128xf32>, vector<128x512xf32>, vector<8x512xf32> -> vector<8x512xf32>
    %914 = arith.addf %912, %913 : vector<8x512xf32>
    %915 = vector.extract_strided_slice %914 {offsets = [0, 0], sizes = [8, 128], strides = [1, 1]} : vector<8x512xf32> to vector<8x128xf32>
    %916 = arith.negf %915 : vector<8x128xf32>
    %917 = math.exp %916 : vector<8x128xf32>
    %cst_225 = arith.constant 1.000000e+00 : f32
    %918 = vector.broadcast %cst_225 : f32 to vector<8x128xf32>
    %919 = arith.addf %918, %917 : vector<8x128xf32>
    %920 = arith.divf %918, %919 : vector<8x128xf32>
    %921 = vector.extract_strided_slice %914 {offsets = [0, 128], sizes = [8, 128], strides = [1, 1]} : vector<8x512xf32> to vector<8x128xf32>
    %922 = arith.negf %921 : vector<8x128xf32>
    %923 = math.exp %922 : vector<8x128xf32>
    %cst_226 = arith.constant 1.000000e+00 : f32
    %924 = vector.broadcast %cst_226 : f32 to vector<8x128xf32>
    %925 = arith.addf %924, %923 : vector<8x128xf32>
    %926 = arith.divf %924, %925 : vector<8x128xf32>
    %927 = vector.extract_strided_slice %914 {offsets = [0, 256], sizes = [8, 128], strides = [1, 1]} : vector<8x512xf32> to vector<8x128xf32>
    %928 = math.tanh %927 : vector<8x128xf32>
    %929 = vector.extract_strided_slice %914 {offsets = [0, 384], sizes = [8, 128], strides = [1, 1]} : vector<8x512xf32> to vector<8x128xf32>
    %930 = arith.negf %929 : vector<8x128xf32>
    %931 = math.exp %930 : vector<8x128xf32>
    %cst_227 = arith.constant 1.000000e+00 : f32
    %932 = vector.broadcast %cst_227 : f32 to vector<8x128xf32>
    %933 = arith.addf %932, %931 : vector<8x128xf32>
    %934 = arith.divf %932, %933 : vector<8x128xf32>
    %935 = arith.mulf %926, %911 : vector<8x128xf32>
    %936 = arith.mulf %920, %928 : vector<8x128xf32>
    %937 = arith.addf %935, %936 : vector<8x128xf32>
    %938 = math.tanh %937 : vector<8x128xf32>
    %939 = arith.mulf %934, %938 : vector<8x128xf32>
    %940 = vector.shape_cast %14 : vector<8x1xi1> to vector<8x1xi1>
    %941 = vector.broadcast %940 : vector<8x1xi1> to vector<8x128xi1>
    %942 = arith.select %941, %939, %908 : vector<8x128xi1>, vector<8x128xf32>
    %943 = vector.shape_cast %14 : vector<8x1xi1> to vector<8x1xi1>
    %944 = vector.broadcast %943 : vector<8x1xi1> to vector<8x128xi1>
    %945 = arith.select %944, %937, %911 : vector<8x128xi1>, vector<8x128xf32>
    %c40_228 = arith.constant 40 : index
    %c0_229 = arith.constant 0 : index
    %946 = vector.load %arg18[%c40_228, %c0_229] : memref<64x512xf32, #tpu.memory_space<vmem>>, vector<8x512xf32>
    %cst_230 = arith.constant dense<0.000000e+00> : vector<8x512xf32>
    %947 = tpu.matmul %942, %875, %cst_230 {dimension_numbers = #tpu.dot_dimension_numbers<[1], [0], [0], [1], [0, 0, 1, 1], [], []>} : vector<8x128xf32>, vector<128x512xf32>, vector<8x512xf32> -> vector<8x512xf32>
    %948 = arith.addf %946, %947 : vector<8x512xf32>
    %949 = vector.extract_strided_slice %948 {offsets = [0, 0], sizes = [8, 128], strides = [1, 1]} : vector<8x512xf32> to vector<8x128xf32>
    %950 = arith.negf %949 : vector<8x128xf32>
    %951 = math.exp %950 : vector<8x128xf32>
    %cst_231 = arith.constant 1.000000e+00 : f32
    %952 = vector.broadcast %cst_231 : f32 to vector<8x128xf32>
    %953 = arith.addf %952, %951 : vector<8x128xf32>
    %954 = arith.divf %952, %953 : vector<8x128xf32>
    %955 = vector.extract_strided_slice %948 {offsets = [0, 128], sizes = [8, 128], strides = [1, 1]} : vector<8x512xf32> to vector<8x128xf32>
    %956 = arith.negf %955 : vector<8x128xf32>
    %957 = math.exp %956 : vector<8x128xf32>
    %cst_232 = arith.constant 1.000000e+00 : f32
    %958 = vector.broadcast %cst_232 : f32 to vector<8x128xf32>
    %959 = arith.addf %958, %957 : vector<8x128xf32>
    %960 = arith.divf %958, %959 : vector<8x128xf32>
    %961 = vector.extract_strided_slice %948 {offsets = [0, 256], sizes = [8, 128], strides = [1, 1]} : vector<8x512xf32> to vector<8x128xf32>
    %962 = math.tanh %961 : vector<8x128xf32>
    %963 = vector.extract_strided_slice %948 {offsets = [0, 384], sizes = [8, 128], strides = [1, 1]} : vector<8x512xf32> to vector<8x128xf32>
    %964 = arith.negf %963 : vector<8x128xf32>
    %965 = math.exp %964 : vector<8x128xf32>
    %cst_233 = arith.constant 1.000000e+00 : f32
    %966 = vector.broadcast %cst_233 : f32 to vector<8x128xf32>
    %967 = arith.addf %966, %965 : vector<8x128xf32>
    %968 = arith.divf %966, %967 : vector<8x128xf32>
    %969 = arith.mulf %960, %945 : vector<8x128xf32>
    %970 = arith.mulf %954, %962 : vector<8x128xf32>
    %971 = arith.addf %969, %970 : vector<8x128xf32>
    %972 = math.tanh %971 : vector<8x128xf32>
    %973 = arith.mulf %968, %972 : vector<8x128xf32>
    %974 = vector.shape_cast %12 : vector<8x1xi1> to vector<8x1xi1>
    %975 = vector.broadcast %974 : vector<8x1xi1> to vector<8x128xi1>
    %976 = arith.select %975, %973, %942 : vector<8x128xi1>, vector<8x128xf32>
    %977 = vector.shape_cast %12 : vector<8x1xi1> to vector<8x1xi1>
    %978 = vector.broadcast %977 : vector<8x1xi1> to vector<8x128xi1>
    %979 = arith.select %978, %971, %945 : vector<8x128xi1>, vector<8x128xf32>
    %c32_234 = arith.constant 32 : index
    %c0_235 = arith.constant 0 : index
    %980 = vector.load %arg18[%c32_234, %c0_235] : memref<64x512xf32, #tpu.memory_space<vmem>>, vector<8x512xf32>
    %cst_236 = arith.constant dense<0.000000e+00> : vector<8x512xf32>
    %981 = tpu.matmul %976, %875, %cst_236 {dimension_numbers = #tpu.dot_dimension_numbers<[1], [0], [0], [1], [0, 0, 1, 1], [], []>} : vector<8x128xf32>, vector<128x512xf32>, vector<8x512xf32> -> vector<8x512xf32>
    %982 = arith.addf %980, %981 : vector<8x512xf32>
    %983 = vector.extract_strided_slice %982 {offsets = [0, 0], sizes = [8, 128], strides = [1, 1]} : vector<8x512xf32> to vector<8x128xf32>
    %984 = arith.negf %983 : vector<8x128xf32>
    %985 = math.exp %984 : vector<8x128xf32>
    %cst_237 = arith.constant 1.000000e+00 : f32
    %986 = vector.broadcast %cst_237 : f32 to vector<8x128xf32>
    %987 = arith.addf %986, %985 : vector<8x128xf32>
    %988 = arith.divf %986, %987 : vector<8x128xf32>
    %989 = vector.extract_strided_slice %982 {offsets = [0, 128], sizes = [8, 128], strides = [1, 1]} : vector<8x512xf32> to vector<8x128xf32>
    %990 = arith.negf %989 : vector<8x128xf32>
    %991 = math.exp %990 : vector<8x128xf32>
    %cst_238 = arith.constant 1.000000e+00 : f32
    %992 = vector.broadcast %cst_238 : f32 to vector<8x128xf32>
    %993 = arith.addf %992, %991 : vector<8x128xf32>
    %994 = arith.divf %992, %993 : vector<8x128xf32>
    %995 = vector.extract_strided_slice %982 {offsets = [0, 256], sizes = [8, 128], strides = [1, 1]} : vector<8x512xf32> to vector<8x128xf32>
    %996 = math.tanh %995 : vector<8x128xf32>
    %997 = vector.extract_strided_slice %982 {offsets = [0, 384], sizes = [8, 128], strides = [1, 1]} : vector<8x512xf32> to vector<8x128xf32>
    %998 = arith.negf %997 : vector<8x128xf32>
    %999 = math.exp %998 : vector<8x128xf32>
    %cst_239 = arith.constant 1.000000e+00 : f32
    %1000 = vector.broadcast %cst_239 : f32 to vector<8x128xf32>
    %1001 = arith.addf %1000, %999 : vector<8x128xf32>
    %1002 = arith.divf %1000, %1001 : vector<8x128xf32>
    %1003 = arith.mulf %994, %979 : vector<8x128xf32>
    %1004 = arith.mulf %988, %996 : vector<8x128xf32>
    %1005 = arith.addf %1003, %1004 : vector<8x128xf32>
    %1006 = math.tanh %1005 : vector<8x128xf32>
    %1007 = arith.mulf %1002, %1006 : vector<8x128xf32>
    %1008 = vector.shape_cast %10 : vector<8x1xi1> to vector<8x1xi1>
    %1009 = vector.broadcast %1008 : vector<8x1xi1> to vector<8x128xi1>
    %1010 = arith.select %1009, %1007, %976 : vector<8x128xi1>, vector<8x128xf32>
    %1011 = vector.shape_cast %10 : vector<8x1xi1> to vector<8x1xi1>
    %1012 = vector.broadcast %1011 : vector<8x1xi1> to vector<8x128xi1>
    %1013 = arith.select %1012, %1005, %979 : vector<8x128xi1>, vector<8x128xf32>
    %c24_240 = arith.constant 24 : index
    %c0_241 = arith.constant 0 : index
    %1014 = vector.load %arg18[%c24_240, %c0_241] : memref<64x512xf32, #tpu.memory_space<vmem>>, vector<8x512xf32>
    %cst_242 = arith.constant dense<0.000000e+00> : vector<8x512xf32>
    %1015 = tpu.matmul %1010, %875, %cst_242 {dimension_numbers = #tpu.dot_dimension_numbers<[1], [0], [0], [1], [0, 0, 1, 1], [], []>} : vector<8x128xf32>, vector<128x512xf32>, vector<8x512xf32> -> vector<8x512xf32>
    %1016 = arith.addf %1014, %1015 : vector<8x512xf32>
    %1017 = vector.extract_strided_slice %1016 {offsets = [0, 0], sizes = [8, 128], strides = [1, 1]} : vector<8x512xf32> to vector<8x128xf32>
    %1018 = arith.negf %1017 : vector<8x128xf32>
    %1019 = math.exp %1018 : vector<8x128xf32>
    %cst_243 = arith.constant 1.000000e+00 : f32
    %1020 = vector.broadcast %cst_243 : f32 to vector<8x128xf32>
    %1021 = arith.addf %1020, %1019 : vector<8x128xf32>
    %1022 = arith.divf %1020, %1021 : vector<8x128xf32>
    %1023 = vector.extract_strided_slice %1016 {offsets = [0, 128], sizes = [8, 128], strides = [1, 1]} : vector<8x512xf32> to vector<8x128xf32>
    %1024 = arith.negf %1023 : vector<8x128xf32>
    %1025 = math.exp %1024 : vector<8x128xf32>
    %cst_244 = arith.constant 1.000000e+00 : f32
    %1026 = vector.broadcast %cst_244 : f32 to vector<8x128xf32>
    %1027 = arith.addf %1026, %1025 : vector<8x128xf32>
    %1028 = arith.divf %1026, %1027 : vector<8x128xf32>
    %1029 = vector.extract_strided_slice %1016 {offsets = [0, 256], sizes = [8, 128], strides = [1, 1]} : vector<8x512xf32> to vector<8x128xf32>
    %1030 = math.tanh %1029 : vector<8x128xf32>
    %1031 = vector.extract_strided_slice %1016 {offsets = [0, 384], sizes = [8, 128], strides = [1, 1]} : vector<8x512xf32> to vector<8x128xf32>
    %1032 = arith.negf %1031 : vector<8x128xf32>
    %1033 = math.exp %1032 : vector<8x128xf32>
    %cst_245 = arith.constant 1.000000e+00 : f32
    %1034 = vector.broadcast %cst_245 : f32 to vector<8x128xf32>
    %1035 = arith.addf %1034, %1033 : vector<8x128xf32>
    %1036 = arith.divf %1034, %1035 : vector<8x128xf32>
    %1037 = arith.mulf %1028, %1013 : vector<8x128xf32>
    %1038 = arith.mulf %1022, %1030 : vector<8x128xf32>
    %1039 = arith.addf %1037, %1038 : vector<8x128xf32>
    %1040 = math.tanh %1039 : vector<8x128xf32>
    %1041 = arith.mulf %1036, %1040 : vector<8x128xf32>
    %1042 = vector.shape_cast %8 : vector<8x1xi1> to vector<8x1xi1>
    %1043 = vector.broadcast %1042 : vector<8x1xi1> to vector<8x128xi1>
    %1044 = arith.select %1043, %1041, %1010 : vector<8x128xi1>, vector<8x128xf32>
    %1045 = vector.shape_cast %8 : vector<8x1xi1> to vector<8x1xi1>
    %1046 = vector.broadcast %1045 : vector<8x1xi1> to vector<8x128xi1>
    %1047 = arith.select %1046, %1039, %1013 : vector<8x128xi1>, vector<8x128xf32>
    %c16_246 = arith.constant 16 : index
    %c0_247 = arith.constant 0 : index
    %1048 = vector.load %arg18[%c16_246, %c0_247] : memref<64x512xf32, #tpu.memory_space<vmem>>, vector<8x512xf32>
    %cst_248 = arith.constant dense<0.000000e+00> : vector<8x512xf32>
    %1049 = tpu.matmul %1044, %875, %cst_248 {dimension_numbers = #tpu.dot_dimension_numbers<[1], [0], [0], [1], [0, 0, 1, 1], [], []>} : vector<8x128xf32>, vector<128x512xf32>, vector<8x512xf32> -> vector<8x512xf32>
    %1050 = arith.addf %1048, %1049 : vector<8x512xf32>
    %1051 = vector.extract_strided_slice %1050 {offsets = [0, 0], sizes = [8, 128], strides = [1, 1]} : vector<8x512xf32> to vector<8x128xf32>
    %1052 = arith.negf %1051 : vector<8x128xf32>
    %1053 = math.exp %1052 : vector<8x128xf32>
    %cst_249 = arith.constant 1.000000e+00 : f32
    %1054 = vector.broadcast %cst_249 : f32 to vector<8x128xf32>
    %1055 = arith.addf %1054, %1053 : vector<8x128xf32>
    %1056 = arith.divf %1054, %1055 : vector<8x128xf32>
    %1057 = vector.extract_strided_slice %1050 {offsets = [0, 128], sizes = [8, 128], strides = [1, 1]} : vector<8x512xf32> to vector<8x128xf32>
    %1058 = arith.negf %1057 : vector<8x128xf32>
    %1059 = math.exp %1058 : vector<8x128xf32>
    %cst_250 = arith.constant 1.000000e+00 : f32
    %1060 = vector.broadcast %cst_250 : f32 to vector<8x128xf32>
    %1061 = arith.addf %1060, %1059 : vector<8x128xf32>
    %1062 = arith.divf %1060, %1061 : vector<8x128xf32>
    %1063 = vector.extract_strided_slice %1050 {offsets = [0, 256], sizes = [8, 128], strides = [1, 1]} : vector<8x512xf32> to vector<8x128xf32>
    %1064 = math.tanh %1063 : vector<8x128xf32>
    %1065 = vector.extract_strided_slice %1050 {offsets = [0, 384], sizes = [8, 128], strides = [1, 1]} : vector<8x512xf32> to vector<8x128xf32>
    %1066 = arith.negf %1065 : vector<8x128xf32>
    %1067 = math.exp %1066 : vector<8x128xf32>
    %cst_251 = arith.constant 1.000000e+00 : f32
    %1068 = vector.broadcast %cst_251 : f32 to vector<8x128xf32>
    %1069 = arith.addf %1068, %1067 : vector<8x128xf32>
    %1070 = arith.divf %1068, %1069 : vector<8x128xf32>
    %1071 = arith.mulf %1062, %1047 : vector<8x128xf32>
    %1072 = arith.mulf %1056, %1064 : vector<8x128xf32>
    %1073 = arith.addf %1071, %1072 : vector<8x128xf32>
    %1074 = math.tanh %1073 : vector<8x128xf32>
    %1075 = arith.mulf %1070, %1074 : vector<8x128xf32>
    %1076 = vector.shape_cast %6 : vector<8x1xi1> to vector<8x1xi1>
    %1077 = vector.broadcast %1076 : vector<8x1xi1> to vector<8x128xi1>
    %1078 = arith.select %1077, %1075, %1044 : vector<8x128xi1>, vector<8x128xf32>
    %1079 = vector.shape_cast %6 : vector<8x1xi1> to vector<8x1xi1>
    %1080 = vector.broadcast %1079 : vector<8x1xi1> to vector<8x128xi1>
    %1081 = arith.select %1080, %1073, %1047 : vector<8x128xi1>, vector<8x128xf32>
    %c8_252 = arith.constant 8 : index
    %c0_253 = arith.constant 0 : index
    %1082 = vector.load %arg18[%c8_252, %c0_253] : memref<64x512xf32, #tpu.memory_space<vmem>>, vector<8x512xf32>
    %cst_254 = arith.constant dense<0.000000e+00> : vector<8x512xf32>
    %1083 = tpu.matmul %1078, %875, %cst_254 {dimension_numbers = #tpu.dot_dimension_numbers<[1], [0], [0], [1], [0, 0, 1, 1], [], []>} : vector<8x128xf32>, vector<128x512xf32>, vector<8x512xf32> -> vector<8x512xf32>
    %1084 = arith.addf %1082, %1083 : vector<8x512xf32>
    %1085 = vector.extract_strided_slice %1084 {offsets = [0, 0], sizes = [8, 128], strides = [1, 1]} : vector<8x512xf32> to vector<8x128xf32>
    %1086 = arith.negf %1085 : vector<8x128xf32>
    %1087 = math.exp %1086 : vector<8x128xf32>
    %cst_255 = arith.constant 1.000000e+00 : f32
    %1088 = vector.broadcast %cst_255 : f32 to vector<8x128xf32>
    %1089 = arith.addf %1088, %1087 : vector<8x128xf32>
    %1090 = arith.divf %1088, %1089 : vector<8x128xf32>
    %1091 = vector.extract_strided_slice %1084 {offsets = [0, 128], sizes = [8, 128], strides = [1, 1]} : vector<8x512xf32> to vector<8x128xf32>
    %1092 = arith.negf %1091 : vector<8x128xf32>
    %1093 = math.exp %1092 : vector<8x128xf32>
    %cst_256 = arith.constant 1.000000e+00 : f32
    %1094 = vector.broadcast %cst_256 : f32 to vector<8x128xf32>
    %1095 = arith.addf %1094, %1093 : vector<8x128xf32>
    %1096 = arith.divf %1094, %1095 : vector<8x128xf32>
    %1097 = vector.extract_strided_slice %1084 {offsets = [0, 256], sizes = [8, 128], strides = [1, 1]} : vector<8x512xf32> to vector<8x128xf32>
    %1098 = math.tanh %1097 : vector<8x128xf32>
    %1099 = vector.extract_strided_slice %1084 {offsets = [0, 384], sizes = [8, 128], strides = [1, 1]} : vector<8x512xf32> to vector<8x128xf32>
    %1100 = arith.negf %1099 : vector<8x128xf32>
    %1101 = math.exp %1100 : vector<8x128xf32>
    %cst_257 = arith.constant 1.000000e+00 : f32
    %1102 = vector.broadcast %cst_257 : f32 to vector<8x128xf32>
    %1103 = arith.addf %1102, %1101 : vector<8x128xf32>
    %1104 = arith.divf %1102, %1103 : vector<8x128xf32>
    %1105 = arith.mulf %1096, %1081 : vector<8x128xf32>
    %1106 = arith.mulf %1090, %1098 : vector<8x128xf32>
    %1107 = arith.addf %1105, %1106 : vector<8x128xf32>
    %1108 = math.tanh %1107 : vector<8x128xf32>
    %1109 = arith.mulf %1104, %1108 : vector<8x128xf32>
    %1110 = vector.shape_cast %4 : vector<8x1xi1> to vector<8x1xi1>
    %1111 = vector.broadcast %1110 : vector<8x1xi1> to vector<8x128xi1>
    %1112 = arith.select %1111, %1109, %1078 : vector<8x128xi1>, vector<8x128xf32>
    %1113 = vector.shape_cast %4 : vector<8x1xi1> to vector<8x1xi1>
    %1114 = vector.broadcast %1113 : vector<8x1xi1> to vector<8x128xi1>
    %1115 = arith.select %1114, %1107, %1081 : vector<8x128xi1>, vector<8x128xf32>
    %c0_258 = arith.constant 0 : index
    %c0_259 = arith.constant 0 : index
    %1116 = vector.load %arg18[%c0_258, %c0_259] : memref<64x512xf32, #tpu.memory_space<vmem>>, vector<8x512xf32>
    %cst_260 = arith.constant dense<0.000000e+00> : vector<8x512xf32>
    %1117 = tpu.matmul %1112, %875, %cst_260 {dimension_numbers = #tpu.dot_dimension_numbers<[1], [0], [0], [1], [0, 0, 1, 1], [], []>} : vector<8x128xf32>, vector<128x512xf32>, vector<8x512xf32> -> vector<8x512xf32>
    %1118 = arith.addf %1116, %1117 : vector<8x512xf32>
    %1119 = vector.extract_strided_slice %1118 {offsets = [0, 0], sizes = [8, 128], strides = [1, 1]} : vector<8x512xf32> to vector<8x128xf32>
    %1120 = arith.negf %1119 : vector<8x128xf32>
    %1121 = math.exp %1120 : vector<8x128xf32>
    %cst_261 = arith.constant 1.000000e+00 : f32
    %1122 = vector.broadcast %cst_261 : f32 to vector<8x128xf32>
    %1123 = arith.addf %1122, %1121 : vector<8x128xf32>
    %1124 = arith.divf %1122, %1123 : vector<8x128xf32>
    %1125 = vector.extract_strided_slice %1118 {offsets = [0, 128], sizes = [8, 128], strides = [1, 1]} : vector<8x512xf32> to vector<8x128xf32>
    %1126 = arith.negf %1125 : vector<8x128xf32>
    %1127 = math.exp %1126 : vector<8x128xf32>
    %cst_262 = arith.constant 1.000000e+00 : f32
    %1128 = vector.broadcast %cst_262 : f32 to vector<8x128xf32>
    %1129 = arith.addf %1128, %1127 : vector<8x128xf32>
    %1130 = arith.divf %1128, %1129 : vector<8x128xf32>
    %1131 = vector.extract_strided_slice %1118 {offsets = [0, 256], sizes = [8, 128], strides = [1, 1]} : vector<8x512xf32> to vector<8x128xf32>
    %1132 = math.tanh %1131 : vector<8x128xf32>
    %1133 = vector.extract_strided_slice %1118 {offsets = [0, 384], sizes = [8, 128], strides = [1, 1]} : vector<8x512xf32> to vector<8x128xf32>
    %1134 = arith.negf %1133 : vector<8x128xf32>
    %1135 = math.exp %1134 : vector<8x128xf32>
    %cst_263 = arith.constant 1.000000e+00 : f32
    %1136 = vector.broadcast %cst_263 : f32 to vector<8x128xf32>
    %1137 = arith.addf %1136, %1135 : vector<8x128xf32>
    %1138 = arith.divf %1136, %1137 : vector<8x128xf32>
    %1139 = arith.mulf %1130, %1115 : vector<8x128xf32>
    %1140 = arith.mulf %1124, %1132 : vector<8x128xf32>
    %1141 = arith.addf %1139, %1140 : vector<8x128xf32>
    %1142 = math.tanh %1141 : vector<8x128xf32>
    %1143 = arith.mulf %1138, %1142 : vector<8x128xf32>
    %1144 = vector.shape_cast %2 : vector<8x1xi1> to vector<8x1xi1>
    %1145 = vector.broadcast %1144 : vector<8x1xi1> to vector<8x128xi1>
    %1146 = arith.select %1145, %1143, %1112 : vector<8x128xi1>, vector<8x128xf32>
    %1147 = tpu.concatenate %868, %1146 in 1 : vector<8x128xf32>, vector<8x128xf32> -> vector<8x256xf32>
    %c0_264 = arith.constant 0 : index
    %c0_265 = arith.constant 0 : index
    %1148 = vector.load %arg14[%c0_264, %c0_265] : memref<256x128xf32, #tpu.memory_space<vmem>>, vector<256x128xf32>
    %cst_266 = arith.constant dense<0.000000e+00> : vector<8x128xf32>
    %1149 = tpu.matmul %1147, %1148, %cst_266 {dimension_numbers = #tpu.dot_dimension_numbers<[1], [0], [0], [1], [0, 0, 1, 1], [], []>} : vector<8x256xf32>, vector<256x128xf32>, vector<8x128xf32> -> vector<8x128xf32>
    %c0_267 = arith.constant 0 : index
    %c0_268 = arith.constant 0 : index
    %1150 = vector.load %arg15[%c0_267, %c0_268] : memref<1x128xf32, #tpu.memory_space<vmem>>, vector<1x128xf32>
    %1151 = vector.broadcast %1150 : vector<1x128xf32> to vector<8x128xf32>
    %1152 = arith.addf %1149, %1151 : vector<8x128xf32>
    %c0_269 = arith.constant 0 : index
    %c0_270 = arith.constant 0 : index
    %1153 = vector.load %arg16[%c0_269, %c0_270] : memref<8x128xf32, #tpu.memory_space<vmem>>, vector<8x128xf32>
    tpu.vector_store %arg16[%c0_269, %c0_270], %1152 {strides = array<i32>} : memref<8x128xf32, #tpu.memory_space<vmem>>, vector<8x128xf32>,
    return
  }
}

</mosaic_0001>

<bundles_post_ra>
// kernel: lstm_model_forward.1
= control target key start
LH: loop header
LB: loop body
LE: loop exit
PB: predicated region body
PF: predicated region fallthrough
CT: control target
= control target key end

     0   :  { %s14031_s0 = inlined_call_operand.vmem [shape: s32[8,1], index: 0, kind: input, shape index: {}]   ;;  %s14032_s1 = inlined_call_operand.vmem [shape: f32[64,128], index: 1, kind: input, shape index: {}]   ;;  %s14033_s2 = inlined_call_operand.hbm [shape: f32[128,512], index: 2, kind: input, shape index: {}]   ;;  %s14034_s3 = inlined_call_operand.hbm [shape: f32[128,512], index: 3, kind: input, shape index: {}]   ;;  %s14035_s4 = inlined_call_operand.hbm [shape: f32[1,512], index: 4, kind: input, shape index: {}]   ;;  %s14036_s5 = inlined_call_operand.hbm [shape: f32[128,512], index: 5, kind: input, shape index: {}]   ;;  %s14037_s6 = inlined_call_operand.hbm [shape: f32[128,512], index: 6, kind: input, shape index: {}]   ;;  %s14038_s7 = inlined_call_operand.hbm [shape: f32[1,512], index: 7, kind: input, shape index: {}]   ;;  %s14039_s8 = inlined_call_operand.hbm [shape: f32[256,512], index: 8, kind: input, shape index: {}]   ;;  %s14040_s9 = inlined_call_operand.hbm [shape: f32[128,512], index: 9, kind: input, shape index: {}]   ;;  %s14041_s10 = inlined_call_operand.hbm [shape: f32[1,512], index: 10, kind: input, shape index: {}]   ;;  %s14042_s11 = inlined_call_operand.hbm [shape: f32[256,512], index: 11, kind: input, shape index: {}]   ;;  %s14043_s12 = inlined_call_operand.hbm [shape: f32[128,512], index: 12, kind: input, shape index: {}]   ;;  %s14044_s13 = inlined_call_operand.hbm [shape: f32[1,512], index: 13, kind: input, shape index: {}]   ;;  %s14045_s14 = inlined_call_operand.hbm [shape: f32[256,128], index: 14, kind: input, shape index: {}]   ;;  %s14046_s15 = inlined_call_operand.hbm [shape: f32[1,128], index: 15, kind: input, shape index: {}]   ;;  %s14047_s16 = inlined_call_operand.vmem [shape: f32[8,128], index: 16, kind: output, shape index: {}]  }
   0x1   :  { %14097 = sst [smem:[#allocation54_spill]] %s14031_s0 }
   0x2   :  { %21 = vsyncpa [#allocation5], 0 }
   0x3   :  { %22 = vsyncpa [#allocation7], 0 }
   0x4   :  { %23 = vsyncpa [#allocation10], 0 }
   0x5   :  { %24 = vsyncpa [#allocation13], 0 }
   0x6   :  { %25 = vsyncpa [#allocation16], 0 }
   0x7   :  { %26 = vsyncpa [#allocation19], 0 }
   0x8   :  { %27 = vsyncpa [#allocation22], 0 }
   0x9   :  { %28 = vsyncpa [#allocation25], 0  ;;  %s11566_s21 = smov [#allocation6]   ;;  %s11567_s23 = smov [#allocation9]  }
   0xa   :  { %s50_s22 = sshll.u32 %s11566_s21, 4  ;;  %s72_s24 = sshll.u32 %s11567_s23, 4  ;;  %s51_s22 = int_to_ptr.vmem [resolvable:$true] %s50_s22  ;;  %s11671_s24 = int_to_ptr.vmem [resolvable:$true] %s72_s24 }
   0xb   :  { %s11242_s27 = scalar_lea.hbm %s14034_s3, 8192 }
   0xc   :  { %p11243_p0 = scmp.ne.s32.totalorder %s14034_s3, %s11242_s27  ;;  %p11246_p1 = scmp.lt.u32.totalorder %s11242_s27, %s14034_s3 }
   0xe   :  { %p11248_p2 = pnand %p11246_p1, %p11243_p0 }
  0x10   :  { %11251 = shalt.err (!%p11248_p2)
}
  0x11   :  { %s11252_s17 = scalar_lea.vmem %s51_s22, 8192  ;;  %p11257_p4 = scmp.lt.s32.totalorder %s51_s22, %s51_s22 }
  0x12   :  { %p11253_p3 = scmp.ne.s32.totalorder %s51_s22, %s11252_s17  ;;  %p11258_p5 = scmp.lt.s32.totalorder %s11252_s17, %s11252_s17 }
  0x14   :  { %p11259_p6 = por %p11258_p5, %p11257_p4 }
  0x16   :  { %p11260_p7 = pnand %p11259_p6, %p11253_p3 }
  0x18   :  { %11263 = shalt.err (!%p11260_p7)
}
  0x19   :  { %s11568_s18 = smov 512   ;;  %s11569_s19 = smov 32  }
  0x1a   :  { %56 = dma.hbm_to_vmem [thread:$0]  %s14034_s3, 8192, %s51_s22, [#allocation7], %s11568_s18, %s11568_s18, %s11569_s19  }
  0x1b   :  { %s11264_s26 = scalar_lea.hbm %s14036_s5, 8192 }
  0x1c   :  { %p11265_p8 = scmp.ne.s32.totalorder %s14036_s5, %s11264_s26  ;;  %p11268_p9 = scmp.lt.u32.totalorder %s11264_s26, %s14036_s5 }
  0x1e   :  { %p11270_p10 = pnand %p11268_p9, %p11265_p8 }
  0x20   :  { %11273 = shalt.err (!%p11270_p10)
}
  0x21   :  { %s11274_s0 = scalar_lea.vmem %s11671_s24, 8192  ;;  %p11279_p12 = scmp.lt.s32.totalorder %s11671_s24, %s11671_s24 }
  0x22   :  { %p11275_p11 = scmp.ne.s32.totalorder %s11671_s24, %s11274_s0  ;;  %p11280_p13 = scmp.lt.s32.totalorder %s11274_s0, %s11274_s0 }
  0x24   :  { %p11281_p0 = por %p11280_p13, %p11279_p12 }
  0x26   :  { %p11282_p1 = pnand %p11281_p0, %p11275_p11 }
  0x28   :  { %11285 = shalt.err (!%p11282_p1)
}
  0x29   :  { %78 = dma.hbm_to_vmem [thread:$0]  %s14036_s5, 8192, %s11671_s24, [#allocation10], %s11568_s18, %s11568_s18, %s11569_s19  }
  0x2a   :  { %s11570_s17 = smov [#allocation12]   ;;  %s11571_s21 = smov [#allocation15]  }
  0x2b   :  { %s97_s20 = sshll.u32 %s11570_s17, 4  ;;  %s118_s23 = sshll.u32 %s11571_s21, 4  ;;  %s98_s20 = int_to_ptr.vmem [resolvable:$true] %s97_s20  ;;  %s11708_s23 = int_to_ptr.vmem [resolvable:$true] %s118_s23 }
  0x2c   :  { %s11286_s27 = scalar_lea.hbm %s14038_s7, 64 }
  0x2d   :  { %p11287_p2 = scmp.ne.s32.totalorder %s14038_s7, %s11286_s27  ;;  %p11290_p3 = scmp.lt.u32.totalorder %s11286_s27, %s14038_s7 }
  0x2f   :  { %p11292_p4 = pnand %p11290_p3, %p11287_p2 }
  0x31   :  { %11295 = shalt.err (!%p11292_p4)
}
  0x32   :  { %s11296_s5 = scalar_lea.vmem %s98_s20, 64  ;;  %p11301_p6 = scmp.lt.s32.totalorder %s98_s20, %s98_s20 }
  0x33   :  { %p11297_p5 = scmp.ne.s32.totalorder %s98_s20, %s11296_s5  ;;  %p11302_p7 = scmp.lt.s32.totalorder %s11296_s5, %s11296_s5 }
  0x35   :  { %p11303_p8 = por %p11302_p7, %p11301_p6 }
  0x37   :  { %p11304_p9 = pnand %p11303_p8, %p11297_p5 }
  0x39   :  { %11307 = shalt.err (!%p11304_p9)
}
  0x3a   :  { %100 = dma.hbm_to_vmem [thread:$0]  %s14038_s7, 64, %s98_s20, [#allocation13]  }
  0x3b   :  { %s11308_s21 = scalar_lea.hbm %s14040_s9, 8192 }
  0x3c   :  { %p11309_p10 = scmp.ne.s32.totalorder %s14040_s9, %s11308_s21  ;;  %p11312_p11 = scmp.lt.u32.totalorder %s11308_s21, %s14040_s9 }
  0x3e   :  { %p11314_p12 = pnand %p11312_p11, %p11309_p10 }
  0x40   :  { %11317 = shalt.err (!%p11314_p12)
}
  0x41   :  { %s11318_s29 = scalar_lea.vmem %s11708_s23, 8192  ;;  %p11323_p0 = scmp.lt.s32.totalorder %s11708_s23, %s11708_s23 }
  0x42   :  { %p11319_p13 = scmp.ne.s32.totalorder %s11708_s23, %s11318_s29  ;;  %p11324_p1 = scmp.lt.s32.totalorder %s11318_s29, %s11318_s29 }
  0x44   :  { %p11325_p2 = por %p11324_p1, %p11323_p0 }
  0x46   :  { %p11326_p3 = pnand %p11325_p2, %p11319_p13 }
  0x48   :  { %11329 = shalt.err (!%p11326_p3)
}
  0x49   :  { %124 = dma.hbm_to_vmem [thread:$0]  %s14040_s9, 8192, %s11708_s23, [#allocation16], %s11568_s18, %s11568_s18, %s11569_s19  }
  0x4a   :  { %s11572_s30 = smov [#allocation18]   ;;  %s11573_s5 = smov [#allocation21]  }
  0x4b   :  { %s140_s0 = sshll.u32 %s11572_s30, 4  ;;  %s165_s24 = sshll.u32 %s11573_s5, 4  ;;  %s141_s0 = int_to_ptr.vmem [resolvable:$true] %s140_s0  ;;  %s166_s24 = int_to_ptr.vmem [resolvable:$true] %s165_s24 }
  0x4c   :  { %s11330_s17 = scalar_lea.hbm %s14042_s11, 16384 }
  0x4d   :  { %p11331_p4 = scmp.ne.s32.totalorder %s14042_s11, %s11330_s17  ;;  %p11334_p5 = scmp.lt.u32.totalorder %s11330_s17, %s14042_s11 }
  0x4f   :  { %p11336_p6 = pnand %p11334_p5, %p11331_p4 }
  0x51   :  { %11339 = shalt.err (!%p11336_p6)
}
  0x52   :  { %s11340_s9 = scalar_lea.vmem %s141_s0, 16384  ;;  %p11345_p8 = scmp.lt.s32.totalorder %s141_s0, %s141_s0 }
  0x53   :  { %p11341_p7 = scmp.ne.s32.totalorder %s141_s0, %s11340_s9  ;;  %p11346_p9 = scmp.lt.s32.totalorder %s11340_s9, %s11340_s9 }
  0x55   :  { %p11347_p10 = por %p11346_p9, %p11345_p8 }
  0x57   :  { %p11348_p11 = pnand %p11347_p10, %p11341_p7 }
  0x59   :  { %11351 = shalt.err (!%p11348_p11)
}
  0x5a   :  { %146 = dma.hbm_to_vmem [thread:$0]  %s14042_s11, 16384, %s141_s0, [#allocation19], %s11568_s18, %s11568_s18, %s11569_s19  }
  0x5b   :  { %s11352_s20 = scalar_lea.hbm %s14044_s13, 64 }
  0x5c   :  { %p11353_p12 = scmp.ne.s32.totalorder %s14044_s13, %s11352_s20  ;;  %p11356_p13 = scmp.lt.u32.totalorder %s11352_s20, %s14044_s13 }
  0x5e   :  { %p11358_p0 = pnand %p11356_p13, %p11353_p12 }
  0x60   :  { %11361 = shalt.err (!%p11358_p0)
}
  0x61   :  { %s11362_s17 = scalar_lea.vmem %s166_s24, 64  ;;  %p11367_p2 = scmp.lt.s32.totalorder %s166_s24, %s166_s24 }
  0x62   :  { %p11363_p1 = scmp.ne.s32.totalorder %s166_s24, %s11362_s17  ;;  %p11368_p3 = scmp.lt.s32.totalorder %s11362_s17, %s11362_s17 }
  0x64   :  { %p11369_p4 = por %p11368_p3, %p11367_p2 }
  0x66   :  { %p11370_p5 = pnand %p11369_p4, %p11363_p1 }
  0x68   :  { %11373 = shalt.err (!%p11370_p5)
}
  0x69   :  { %168 = dma.hbm_to_vmem [thread:$0]  %s14044_s13, 64, %s166_s24, [#allocation22]  }
  0x6a   :  { %s11574_s21 = smov [#allocation4]   ;;  %s11575_s26 = smov [#allocation8]  }
  0x6b   :  { %s38_s25 = sshll.u32 %s11574_s21, 4  ;;  %s63_s27 = sshll.u32 %s11575_s26, 4  ;;  %s39_s25 = int_to_ptr.vmem [resolvable:$true] %s38_s25  ;;  %s64_s27 = int_to_ptr.vmem [resolvable:$true] %s63_s27 }
  0x6c   :  { %s11374_s28 = scalar_lea.hbm %s14033_s2, 8192 }
  0x6d   :  { %p11375_p6 = scmp.ne.s32.totalorder %s14033_s2, %s11374_s28  ;;  %p11378_p7 = scmp.lt.u32.totalorder %s11374_s28, %s14033_s2 }
  0x6f   :  { %p11380_p8 = pnand %p11378_p7, %p11375_p6 }
  0x71   :  { %11383 = shalt.err (!%p11380_p8)
}
  0x72   :  { %s11384_s13 = scalar_lea.vmem %s39_s25, 8192  ;;  %p11389_p10 = scmp.lt.s32.totalorder %s39_s25, %s39_s25 }
  0x73   :  { %p11385_p9 = scmp.ne.s32.totalorder %s39_s25, %s11384_s13  ;;  %p11390_p11 = scmp.lt.s32.totalorder %s11384_s13, %s11384_s13 }
  0x75   :  { %p11391_p12 = por %p11390_p11, %p11389_p10 }
  0x77   :  { %p11392_p13 = pnand %p11391_p12, %p11385_p9 }
  0x79   :  { %11395 = shalt.err (!%p11392_p13)
}
  0x7a   :  { %44 = dma.hbm_to_vmem [thread:$0]  %s14033_s2, 8192, %s39_s25, [#allocation5], %s11568_s18, %s11568_s18, %s11569_s19  }
  0x7b   :  { %s11396_s17 = scalar_lea.hbm %s14035_s4, 64 }
  0x7c   :  { %p11397_p0 = scmp.ne.s32.totalorder %s14035_s4, %s11396_s17  ;;  %p11400_p1 = scmp.lt.u32.totalorder %s11396_s17, %s14035_s4 }
  0x7e   :  { %p11402_p2 = pnand %p11400_p1, %p11397_p0 }
  0x80   :  { %11405 = shalt.err (!%p11402_p2)
}
  0x81   :  { %s11406_s9 = scalar_lea.vmem %s64_s27, 64  ;;  %p11411_p4 = scmp.lt.s32.totalorder %s64_s27, %s64_s27 }
  0x82   :  { %p11407_p3 = scmp.ne.s32.totalorder %s64_s27, %s11406_s9  ;;  %p11412_p5 = scmp.lt.s32.totalorder %s11406_s9, %s11406_s9 }
  0x84   :  { %p11413_p6 = por %p11412_p5, %p11411_p4 }
  0x86   :  { %p11414_p7 = pnand %p11413_p6, %p11407_p3 }
  0x88   :  { %11417 = shalt.err (!%p11414_p7)
}
  0x89   :  { %66 = dma.hbm_to_vmem [thread:$0]  %s14035_s4, 64, %s64_s27, [#allocation7]  }
  0x8a   :  { %s11576_s23 = smov [#allocation11]   ;;  %s11577_s29 = smov [#allocation14]  }
  0x8b   :  { %s84_s28 = sshll.u32 %s11576_s23, 4  ;;  %s106_s7 = sshll.u32 %s11577_s29, 4  ;;  %s85_s28 = int_to_ptr.vmem [resolvable:$true] %s84_s28  ;;  %s11796_s7 = int_to_ptr.vmem [resolvable:$true] %s106_s7 }
  0x8c   :  { %s11418_s13 = scalar_lea.hbm %s14037_s6, 8192 }
  0x8d   :  { %p11419_p8 = scmp.ne.s32.totalorder %s14037_s6, %s11418_s13  ;;  %p11422_p9 = scmp.lt.u32.totalorder %s11418_s13, %s14037_s6 }
  0x8f   :  { %p11424_p10 = pnand %p11422_p9, %p11419_p8 }
  0x91   :  { %11427 = shalt.err (!%p11424_p10)
}
  0x92   :  { %s11428_s4 = scalar_lea.vmem %s85_s28, 8192  ;;  %p11433_p12 = scmp.lt.s32.totalorder %s85_s28, %s85_s28 }
  0x93   :  { %p11429_p11 = scmp.ne.s32.totalorder %s85_s28, %s11428_s4  ;;  %p11434_p13 = scmp.lt.s32.totalorder %s11428_s4, %s11428_s4 }
  0x95   :  { %p11435_p0 = por %p11434_p13, %p11433_p12 }
  0x97   :  { %p11436_p1 = pnand %p11435_p0, %p11429_p11 }
  0x99   :  { %11439 = shalt.err (!%p11436_p1)
}
  0x9a   :  { %90 = dma.hbm_to_vmem [thread:$0]  %s14037_s6, 8192, %s85_s28, [#allocation10], %s11568_s18, %s11568_s18, %s11569_s19  }
  0x9b   :  { %s11440_s21 = scalar_lea.hbm %s14039_s8, 16384 }
  0x9c   :  { %p11441_p2 = scmp.ne.s32.totalorder %s14039_s8, %s11440_s21  ;;  %p11444_p3 = scmp.lt.u32.totalorder %s11440_s21, %s14039_s8 }
  0x9e   :  { %p11446_p4 = pnand %p11444_p3, %p11441_p2 }
  0xa0   :  { %11449 = shalt.err (!%p11446_p4)
}
  0xa1   :  { %s11450_s23 = scalar_lea.vmem %s11796_s7, 16384  ;;  %p11455_p6 = scmp.lt.s32.totalorder %s11796_s7, %s11796_s7 }
  0xa2   :  { %p11451_p5 = scmp.ne.s32.totalorder %s11796_s7, %s11450_s23  ;;  %p11456_p7 = scmp.lt.s32.totalorder %s11450_s23, %s11450_s23 }
  0xa4   :  { %p11457_p8 = por %p11456_p7, %p11455_p6 }
  0xa6   :  { %p11458_p9 = pnand %p11457_p8, %p11451_p5 }
  0xa8   :  { %11461 = shalt.err (!%p11458_p9)
}
  0xa9   :  { %112 = dma.hbm_to_vmem [thread:$0]  %s14039_s8, 16384, %s11796_s7, [#allocation13], %s11568_s18, %s11568_s18, %s11569_s19  }
  0xaa   :  { %s11578_s29 = smov [#allocation17]   ;;  %s11579_s30 = smov [#allocation20]  }
  0xab   :  { %s131_s20 = sshll.u32 %s11578_s29, 4  ;;  %s152_s13 = sshll.u32 %s11579_s30, 4  ;;  %s132_s20 = int_to_ptr.vmem [resolvable:$true] %s131_s20  ;;  %s11833_s13 = int_to_ptr.vmem [resolvable:$true] %s152_s13 }
  0xac   :  { %s11462_s3 = scalar_lea.hbm %s14041_s10, 64 }
  0xad   :  { %p11463_p10 = scmp.ne.s32.totalorder %s14041_s10, %s11462_s3  ;;  %p11466_p11 = scmp.lt.u32.totalorder %s11462_s3, %s14041_s10 }
  0xaf   :  { %p11468_p12 = pnand %p11466_p11, %p11463_p10 }
  0xb1   :  { %11471 = shalt.err (!%p11468_p12)
}
  0xb2   :  { %s11472_s8 = scalar_lea.vmem %s132_s20, 64  ;;  %p11477_p0 = scmp.lt.s32.totalorder %s132_s20, %s132_s20 }
  0xb3   :  { %p11473_p13 = scmp.ne.s32.totalorder %s132_s20, %s11472_s8  ;;  %p11478_p1 = scmp.lt.s32.totalorder %s11472_s8, %s11472_s8 }
  0xb5   :  { %p11479_p2 = por %p11478_p1, %p11477_p0 }
  0xb7   :  { %p11480_p3 = pnand %p11479_p2, %p11473_p13 }
  0xb9   :  { %11483 = shalt.err (!%p11480_p3)
}
  0xba   :  { %134 = dma.hbm_to_vmem [thread:$0]  %s14041_s10, 64, %s132_s20, [#allocation16]  }
  0xbb   :  { %s11484_s26 = scalar_lea.hbm %s14043_s12, 8192 }
  0xbc   :  { %p11485_p4 = scmp.ne.s32.totalorder %s14043_s12, %s11484_s26  ;;  %p11488_p5 = scmp.lt.u32.totalorder %s11484_s26, %s14043_s12 }
  0xbe   :  { %p11490_p6 = pnand %p11488_p5, %p11485_p4 }
  0xc0   :  { %11493 = shalt.err (!%p11490_p6)
}
  0xc1   :  { %s11494_s6 = scalar_lea.vmem %s11833_s13, 8192  ;;  %p11499_p8 = scmp.lt.s32.totalorder %s11833_s13, %s11833_s13 }
  0xc2   :  { %p11495_p7 = scmp.ne.s32.totalorder %s11833_s13, %s11494_s6  ;;  %p11500_p9 = scmp.lt.s32.totalorder %s11494_s6, %s11494_s6 }
  0xc4   :  { %p11501_p10 = por %p11500_p9, %p11499_p8 }
  0xc6   :  { %p11502_p11 = pnand %p11501_p10, %p11495_p7 }
  0xc8   :  { %11505 = shalt.err (!%p11502_p11)
}
  0xc9   :  { %158 = dma.hbm_to_vmem [thread:$0]  %s14043_s12, 8192, %s11833_s13, [#allocation19], %s11568_s18, %s11568_s18, %s11569_s19  }
  0xca   :  { %s11580_s29 = smov [#allocation23]   ;;  %s11506_s5 = scalar_lea.hbm %s14045_s14, 4096 }
  0xcb   :  { %s174_s20 = sshll.u32 %s11580_s29, 4  ;;  %p11507_p12 = scmp.ne.s32.totalorder %s14045_s14, %s11506_s5  ;;  %s175_s20 = int_to_ptr.vmem [resolvable:$true] %s174_s20 }
  0xcc   :  { %p11510_p13 = scmp.lt.u32.totalorder %s11506_s5, %s14045_s14 }
  0xce   :  { %p11512_p0 = pnand %p11510_p13, %p11507_p12 }
  0xd0   :  { %11515 = shalt.err (!%p11512_p0)
}
  0xd1   :  { %s11516_s17 = scalar_lea.vmem %s175_s20, 4096  ;;  %p11521_p2 = scmp.lt.s32.totalorder %s175_s20, %s175_s20 }
  0xd2   :  { %p11517_p1 = scmp.ne.s32.totalorder %s175_s20, %s11516_s17  ;;  %p11522_p3 = scmp.lt.s32.totalorder %s11516_s17, %s11516_s17 }
  0xd4   :  { %p11523_p4 = por %p11522_p3, %p11521_p2 }
  0xd6   :  { %p11524_p5 = pnand %p11523_p4, %p11517_p1 }
  0xd8   :  { %11527 = shalt.err (!%p11524_p5)
}
  0xd9   :  { %s11581_s12 = smov 128   ;;  %s11582_s18 = smov 8  }
  0xda   :  { %180 = dma.hbm_to_vmem [thread:$0]  %s14045_s14, 4096, %s175_s20, [#allocation22], %s11581_s12, %s11581_s12, %s11582_s18  }
  0xdb   :  { %s11583_s8 = smov [#allocation24]   ;;  %s11528_s21 = scalar_lea.hbm %s14046_s15, 16 }
  0xdc   :  { %s187_s7 = sshll.u32 %s11583_s8, 4  ;;  %p11529_p6 = scmp.ne.s32.totalorder %s14046_s15, %s11528_s21  ;;  %s188_s7 = int_to_ptr.vmem [resolvable:$true] %s187_s7 }
  0xdd   :  { %p11532_p7 = scmp.lt.u32.totalorder %s11528_s21, %s14046_s15 }
  0xdf   :  { %p11534_p8 = pnand %p11532_p7, %p11529_p6 }
  0xe1   :  { %11537 = shalt.err (!%p11534_p8)
}
  0xe2   :  { %s11538_s23 = scalar_lea.vmem %s188_s7, 16  ;;  %s11542_s14 = scalar_lea.vmem %s188_s7, 32 }
  0xe3   :  { %p11539_p9 = scmp.ne.s32.totalorder %s188_s7, %s11538_s23  ;;  %p11543_p10 = scmp.lt.s32.totalorder %s188_s7, %s188_s7 }
  0xe4   :  { %p11544_p11 = scmp.lt.s32.totalorder %s11542_s14, %s11538_s23 }
  0xe6   :  { %p11545_p12 = por %p11544_p11, %p11543_p10 }
  0xe8   :  { %p11546_p13 = pnand %p11545_p12, %p11539_p9 }
  0xea   :  { %11549 = shalt.err (!%p11546_p13)
}
  0xeb   :  { %190 = dma.hbm_to_vmem [thread:$0]  %s14046_s15, 16, %s188_s7, [#allocation25]  }
  0xec   :  { %11550 = dma.done.wait [#allocation5], 8192  }
  0xed   :  { %11551 = vsyncadd [#allocation5], 4294959104 }
  0xee   :  { %11552 = dma.done.wait [#allocation7], 8256  }
  0xef   :  { %11553 = vsyncadd [#allocation7], 4294959040 }
  0xf0   :  { %11554 = dma.done.wait [#allocation10], 16384  }
  0xf1   :  { %11555 = vsyncadd [#allocation10], 4294950912 }
  0xf2   :  { %11556 = dma.done.wait [#allocation13], 16448  }
  0xf3   :  { %11557 = vsyncadd [#allocation13], 4294950848 }
  0xf4   :  { %11558 = dma.done.wait [#allocation16], 8256  }
  0xf5   :  { %11559 = vsyncadd [#allocation16], 4294959040 }
  0xf6   :  { %11560 = dma.done.wait [#allocation19], 24576  }
  0xf7   :  { %11561 = vsyncadd [#allocation19], 4294942720 }
  0xf8   :  { %11562 = dma.done.wait [#allocation22], 4160  }
  0xf9   :  { %11563 = vsyncadd [#allocation22], 4294963136 }
  0xfa   :  { %11564 = dma.done.wait [#allocation25], 16  }
  0xfb   :  { %11565 = vsyncadd [#allocation25], 4294967280  ;;  %v14048_v0 = vmov 0.0   ;;  %v11585_v1 = vmov 0   ;;  %v251_v2 = vld [vmem:[#allocation4 + $0x8] sm:$0xff]  ;;  %v253_v4 = vld [vmem:[#allocation4 + $0x18] sm:$0xff] }
  0xfc   :  { %400 = vmatprep.mubr.f32.mxu0 %v14048_v0  ;;  %513 = vmatprep.mubr.f32.mxu1 %v14048_v0  ;;  %v255_v3 = vld [vmem:[#allocation4 + $0x28] sm:$0xff]  ;;  %v257_v6 = vld [vmem:[#allocation4 + $0x38] sm:$0xff]  ;;  %v250_v7 = vld [vmem:[#allocation4] sm:$0xff]  ;;  %s14098_s8 = sld [smem:[#allocation54_spill]] }
  0xfd   :  { %10720 = vset.pattern.permute.xlu0 %v11585_v1  ;;  %10721 = vset.pattern.permute.xlu1 %v11585_v1  ;;  %v7980_v5 = vpack.c.bf16 %v255_v3, %v251_v2  ;;  %v254_v8 = vld [vmem:[#allocation4 + $0x20] sm:$0xff]  ;;  %v8012_v9 = vpack.c.bf16 %v257_v6, %v253_v4  ;;  %v252_v11 = vld [vmem:[#allocation4 + $0x10] sm:$0xff]  ;;  %v259_v13 = vld [vmem:[#allocation4 + $0x48] sm:$0xff] }
  0xfe   :  { %v7982_v10 = vpack.c.bf16 %v254_v8, %v250_v7  ;;  %v256_v12 = vld [vmem:[#allocation4 + $0x30] sm:$0xff]  ;;  %v263_v15 = vld [vmem:[#allocation4 + $0x68] sm:$0xff]  ;;  %v261_v16 = vld [vmem:[#allocation4 + $0x58] sm:$0xff] }
  0xff   :  { %7981 = vmatprep.subr.bf16.mxu0 %v7980_v5  ;;  %v8014_v14 = vpack.c.bf16 %v256_v12, %v252_v11  ;;  %v265_v17 = vld [vmem:[#allocation4 + $0x78] sm:$0xff]  ;;  %8013 = vmatprep.subr.bf16.mxu1 %v8012_v9  ;;  %v7984_v18 = vpack.c.bf16 %v263_v15, %v259_v13  ;;  %v258_v20 = vld [vmem:[#allocation4 + $0x40] sm:$0xff]  ;;  %v260_v22 = vld [vmem:[#allocation4 + $0x50] sm:$0xff] }
 0x100   :  { %7983 = vmatpush1.bf16.msra.mxu0 %v7982_v10  ;;  %v8016_v19 = vpack.c.bf16 %v265_v17, %v261_v16  ;;  %v262_v21 = vld [vmem:[#allocation4 + $0x60] sm:$0xff]  ;;  %v264_v24 = vld [vmem:[#allocation4 + $0x70] sm:$0xff]  ;;  %v267_v25 = vld [vmem:[#allocation4 + $0x88] sm:$0xff] }
 0x101   :  { %8015 = vmatpush1.bf16.msra.mxu1 %v8014_v14  ;;  %v7986_v23 = vpack.c.bf16 %v262_v21, %v258_v20  ;;  %v271_v26 = vld [vmem:[#allocation4 + $0xa8] sm:$0xff]  ;;  %7985 = vmatprep.subr.bf16.mxu0 %v7984_v18  ;;  %v8018_v27 = vpack.c.bf16 %v264_v24, %v260_v22  ;;  %v269_v29 = vld [vmem:[#allocation4 + $0x98] sm:$0xff]  ;;  %v266_v31 = vld [vmem:[#allocation4 + $0x80] sm:$0xff] }
 0x102   :  { %8017 = vmatprep.subr.bf16.mxu1 %v8016_v19  ;;  %v7988_v28 = vpack.c.bf16 %v271_v26, %v267_v25  ;;  %v273_v30 = vld [vmem:[#allocation4 + $0xb8] sm:$0xff]  ;;  %v270_v33 = vld [vmem:[#allocation4 + $0xa0] sm:$0xff]  ;;  %v268_v34 = vld [vmem:[#allocation4 + $0x90] sm:$0xff] }
 0x103   :  { %v8020_v32 = vpack.c.bf16 %v273_v30, %v269_v29  ;;  %v272_v35 = vld [vmem:[#allocation4 + $0xb0] sm:$0xff]  ;;  %v7990_v36 = vpack.c.bf16 %v270_v33, %v266_v31  ;;  %v275_v37 = vld [vmem:[#allocation4 + $0xc8] sm:$0xff]  ;;  %v277_v39 = vld [vmem:[#allocation4 + $0xd8] sm:$0xff] }
 0x104   :  { %7987 = vmatpush1.bf16.msra.mxu0 %v7986_v23  ;;  %v279_v38 = vld [vmem:[#allocation4 + $0xe8] sm:$0xff]  ;;  %v8022_v40 = vpack.c.bf16 %v272_v35, %v268_v34  ;;  %v281_v42 = vld [vmem:[#allocation4 + $0xf8] sm:$0xff]  ;;  %v274_v43 = vld [vmem:[#allocation4 + $0xc0] sm:$0xff] }
 0x105   :  { %8019 = vmatpush1.bf16.msra.mxu1 %v8018_v27  ;;  %7989 = vmatprep.subr.bf16.mxu0 %v7988_v28  ;;  %v7992_v41 = vpack.c.bf16 %v279_v38, %v275_v37  ;;  %v278_v44 = vld [vmem:[#allocation4 + $0xe0] sm:$0xff]  ;;  %v8024_v45 = vpack.c.bf16 %v281_v42, %v277_v39  ;;  %v276_v46 = vld [vmem:[#allocation4 + $0xd0] sm:$0xff]  ;;  %v283_v48 = vld [vmem:[#allocation4 + $0x108] sm:$0xff] }
 0x106   :  { %8021 = vmatprep.subr.bf16.mxu1 %v8020_v32  ;;  %v280_v47 = vld [vmem:[#allocation4 + $0xf0] sm:$0xff]  ;;  %v287_v49 = vld [vmem:[#allocation4 + $0x128] sm:$0xff]  ;;  %v285_v50 = vld [vmem:[#allocation4 + $0x118] sm:$0xff]  ;;  %v7994_v52 = vpack.c.bf16 %v278_v44, %v274_v43 }
 0x107   :  { %v289_v51 = vld [vmem:[#allocation4 + $0x138] sm:$0xff]  ;;  %v8026_v53 = vpack.c.bf16 %v280_v47, %v276_v46  ;;  %v7996_v54 = vpack.c.bf16 %v287_v49, %v283_v48  ;;  %v282_v55 = vld [vmem:[#allocation4 + $0x100] sm:$0xff]  ;;  %v284_v57 = vld [vmem:[#allocation4 + $0x110] sm:$0xff] }
 0x108   :  { %7991 = vmatpush1.bf16.msra.mxu0 %v7990_v36  ;;  %v286_v56 = vld [vmem:[#allocation4 + $0x120] sm:$0xff]  ;;  %v8028_v58 = vpack.c.bf16 %v289_v51, %v285_v50  ;;  %v288_v59 = vld [vmem:[#allocation4 + $0x130] sm:$0xff]  ;;  %v291_v60 = vld [vmem:[#allocation4 + $0x148] sm:$0xff] }
 0x109   :  { %8023 = vmatpush1.bf16.msra.mxu1 %v8022_v40  ;;  %7993 = vmatprep.subr.bf16.mxu0 %v7992_v41  ;;  %v295_v61 = vld [vmem:[#allocation4 + $0x168] sm:$0xff]  ;;  %v293_v62 = vld [vmem:[#allocation4 + $0x158] sm:$0xff]  ;;  %v7998_v2 = vpack.c.bf16 %v286_v56, %v282_v55  ;;  %v8030_v3 = vpack.c.bf16 %v288_v59, %v284_v57  ;;  %v290_v5 = vld [vmem:[#allocation4 + $0x140] sm:$0xff] }
 0x10a   :  { %8025 = vmatprep.subr.bf16.mxu1 %v8024_v45  ;;  %v297_v63 = vld [vmem:[#allocation4 + $0x178] sm:$0xff]  ;;  %v8000_v4 = vpack.c.bf16 %v295_v61, %v291_v60  ;;  %v294_v6 = vld [vmem:[#allocation4 + $0x160] sm:$0xff]  ;;  %v292_v7 = vld [vmem:[#allocation4 + $0x150] sm:$0xff] }
 0x10b   :  { %v8032_v8 = vpack.c.bf16 %v297_v63, %v293_v62  ;;  %v296_v9 = vld [vmem:[#allocation4 + $0x170] sm:$0xff]  ;;  %v299_v10 = vld [vmem:[#allocation4 + $0x188] sm:$0xff]  ;;  %v301_v12 = vld [vmem:[#allocation4 + $0x198] sm:$0xff]  ;;  %v8002_v14 = vpack.c.bf16 %v294_v6, %v290_v5 }
 0x10c   :  { %7995 = vmatpush1.bf16.msra.mxu0 %v7994_v52  ;;  %v303_v11 = vld [vmem:[#allocation4 + $0x1a8] sm:$0xff]  ;;  %v305_v13 = vld [vmem:[#allocation4 + $0x1b8] sm:$0xff]  ;;  %v8034_v15 = vpack.c.bf16 %v296_v9, %v292_v7  ;;  %v298_v17 = vld [vmem:[#allocation4 + $0x180] sm:$0xff] }
 0x10d   :  { %8027 = vmatpush1.bf16.msra.mxu1 %v8026_v53  ;;  %7997 = vmatprep.subr.bf16.mxu0 %v7996_v54  ;;  %v8004_v16 = vpack.c.bf16 %v303_v11, %v299_v10  ;;  %v302_v18 = vld [vmem:[#allocation4 + $0x1a0] sm:$0xff]  ;;  %v300_v19 = vld [vmem:[#allocation4 + $0x190] sm:$0xff]  ;;  %v8036_v20 = vpack.c.bf16 %v305_v13, %v301_v12  ;;  %v307_v22 = vld [vmem:[#allocation4 + $0x1c8] sm:$0xff] }
 0x10e   :  { %8029 = vmatprep.subr.bf16.mxu1 %v8028_v58  ;;  %v304_v21 = vld [vmem:[#allocation4 + $0x1b0] sm:$0xff]  ;;  %v311_v23 = vld [vmem:[#allocation4 + $0x1e8] sm:$0xff]  ;;  %v309_v24 = vld [vmem:[#allocation4 + $0x1d8] sm:$0xff]  ;;  %v8006_v26 = vpack.c.bf16 %v302_v18, %v298_v17 }
 0x10f   :  { %v313_v25 = vld [vmem:[#allocation4 + $0x1f8] sm:$0xff]  ;;  %v8038_v27 = vpack.c.bf16 %v304_v21, %v300_v19  ;;  %v8008_v28 = vpack.c.bf16 %v311_v23, %v307_v22  ;;  %v306_v29 = vld [vmem:[#allocation4 + $0x1c0] sm:$0xff]  ;;  %v308_v31 = vld [vmem:[#allocation4 + $0x1d0] sm:$0xff] }
 0x110   :  { %7999 = vmatpush1.bf16.msra.mxu0 %v7998_v2  ;;  %v310_v30 = vld [vmem:[#allocation4 + $0x1e0] sm:$0xff]  ;;  %v8040_v32 = vpack.c.bf16 %v313_v25, %v309_v24  ;;  %v312_v33 = vld [vmem:[#allocation4 + $0x1f0] sm:$0xff]  ;;  %v595_v34 = vld [vmem:[#allocation6 + $0x8] sm:$0xff] }
 0x111   :  { %8031 = vmatpush1.bf16.msra.mxu1 %v8030_v3  ;;  %8001 = vmatprep.subr.bf16.mxu0 %v8000_v4  ;;  %v599_v35 = vld [vmem:[#allocation6 + $0x28] sm:$0xff]  ;;  %v597_v36 = vld [vmem:[#allocation6 + $0x18] sm:$0xff]  ;;  %v8010_v38 = vpack.c.bf16 %v310_v30, %v306_v29  ;;  %v8042_v39 = vpack.c.bf16 %v312_v33, %v308_v31  ;;  %v594_v41 = vld [vmem:[#allocation6] sm:$0xff] }
 0x112   :  { %8033 = vmatprep.subr.bf16.mxu1 %v8032_v8  ;;  %v601_v37 = vld [vmem:[#allocation6 + $0x38] sm:$0xff]  ;;  %v11895_v40 = vpack.c.bf16 %v599_v35, %v595_v34  ;;  %v598_v42 = vld [vmem:[#allocation6 + $0x20] sm:$0xff]  ;;  %v596_v44 = vld [vmem:[#allocation6 + $0x10] sm:$0xff] }
 0x113   :  { %v11897_v43 = vpack.c.bf16 %v601_v37, %v597_v36  ;;  %v600_v45 = vld [vmem:[#allocation6 + $0x30] sm:$0xff]  ;;  %v603_v46 = vld [vmem:[#allocation6 + $0x48] sm:$0xff]  ;;  %v242_v48 = vld [vmem:[%s14032_s1] sm:$0xff]  ;;  %v11902_v49 = vpack.c.bf16 %v598_v42, %v594_v41 }
 0x114   :  { %8003 = vmatpush1.bf16.msra.mxu0 %v8002_v14  ;;  %v607_v47 = vld [vmem:[#allocation6 + $0x68] sm:$0xff]  ;;  %v605_v50 = vld [vmem:[#allocation6 + $0x58] sm:$0xff]  ;;  %v11905_v52 = vpack.c.bf16 %v600_v45, %v596_v44  ;;  %v602_v53 = vld [vmem:[#allocation6 + $0x40] sm:$0xff] }
 0x115   :  { %8035 = vmatpush1.bf16.msra.mxu1 %v8034_v15  ;;  %8005 = vmatprep.subr.bf16.mxu0 %v8004_v16  ;;  %v609_v51 = vld [vmem:[#allocation6 + $0x78] sm:$0xff]  ;;  %v606_v54 = vld [vmem:[#allocation6 + $0x60] sm:$0xff]  ;;  %v11908_v55 = vpack.c.bf16 %v607_v47, %v603_v46  ;;  %v604_v56 = vld [vmem:[#allocation6 + $0x50] sm:$0xff] }
 0x116   :  { %8037 = vmatprep.subr.bf16.mxu1 %v8036_v20  ;;  %v608_v57 = vld [vmem:[#allocation6 + $0x70] sm:$0xff]  ;;  %v11910_v58 = vpack.c.bf16 %v609_v51, %v605_v50  ;;  %v611_v59 = vld [vmem:[#allocation6 + $0x88] sm:$0xff]  ;;  %v11916_v62 = vpack.c.bf16 %v606_v54, %v602_v53  ;;  %v613_v63 = vld [vmem:[#allocation6 + $0x98] sm:$0xff] }
 0x117   :  { %v615_v60 = vld [vmem:[#allocation6 + $0xa8] sm:$0xff]  ;;  %v617_v2 = vld [vmem:[#allocation6 + $0xb8] sm:$0xff]  ;;  %v11920_v3 = vpack.c.bf16 %v608_v57, %v604_v56  ;;  %v610_v4 = vld [vmem:[#allocation6 + $0x80] sm:$0xff] }
 0x118   :  { %8007 = vmatpush1.bf16.msra.mxu0 %v8006_v26  ;;  %v243_v61 = vld [vmem:[%s14032_s1 + $0x8] sm:$0xff]  ;;  %v614_v5 = vld [vmem:[#allocation6 + $0xa0] sm:$0xff]  ;;  %v11924_v6 = vpack.c.bf16 %v615_v60, %v611_v59  ;;  %v612_v7 = vld [vmem:[#allocation6 + $0x90] sm:$0xff]  ;;  %v11927_v9 = vpack.c.bf16 %v617_v2, %v613_v63 }
 0x119   :  { %8039 = vmatpush1.bf16.msra.mxu1 %v8038_v27  ;;  %8009 = vmatprep.subr.bf16.mxu0 %v8008_v28  ;;  %v616_v8 = vld [vmem:[#allocation6 + $0xb0] sm:$0xff]  ;;  %v619_v10 = vld [vmem:[#allocation6 + $0xc8] sm:$0xff]  ;;  %v11933_v13 = vpack.c.bf16 %v614_v5, %v610_v4  ;;  %v621_v14 = vld [vmem:[#allocation6 + $0xd8] sm:$0xff] }
 0x11a   :  { %8041 = vmatprep.subr.bf16.mxu1 %v8040_v32  ;;  %v623_v11 = vld [vmem:[#allocation6 + $0xe8] sm:$0xff]  ;;  %v244_v12 = vld [vmem:[%s14032_s1 + $0x10] sm:$0xff]  ;;  %v625_v15 = vld [vmem:[#allocation6 + $0xf8] sm:$0xff]  ;;  %v11937_v16 = vpack.c.bf16 %v616_v8, %v612_v7 }
 0x11b   :  { %v618_v17 = vld [vmem:[#allocation6 + $0xc0] sm:$0xff]  ;;  %v11941_v19 = vpack.c.bf16 %v623_v11, %v619_v10  ;;  %v620_v20 = vld [vmem:[#allocation6 + $0xd0] sm:$0xff]  ;;  %v11944_v22 = vpack.c.bf16 %v625_v15, %v621_v14  ;;  %v627_v23 = vld [vmem:[#allocation6 + $0x108] sm:$0xff] }
 0x11c   :  { %8011 = vmatpush1.bf16.msra.mxu0 %v8010_v38  ;;  %v622_v18 = vld [vmem:[#allocation6 + $0xe0] sm:$0xff]  ;;  %v624_v21 = vld [vmem:[#allocation6 + $0xf0] sm:$0xff]  ;;  %v631_v24 = vld [vmem:[#allocation6 + $0x128] sm:$0xff] }
 0x11d   :  { %8043 = vmatpush1.bf16.msra.mxu1 %v8042_v39  ;;  %8045 = vmatprep.subr.bf16.mxu0 %v11895_v40  ;;  %v245_v25 = vld [vmem:[%s14032_s1 + $0x18] sm:$0xff]  ;;  %v11950_v26 = vpack.c.bf16 %v622_v18, %v618_v17  ;;  %v11954_v29 = vpack.c.bf16 %v624_v21, %v620_v20  ;;  %v626_v30 = vld [vmem:[#allocation6 + $0x100] sm:$0xff]  ;;  %v11958_v32 = vpack.c.bf16 %v631_v24, %v627_v23  ;;  %v628_v33 = vld [vmem:[#allocation6 + $0x110] sm:$0xff] }
 0x11e   :  { %8077 = vmatprep.subr.bf16.mxu1 %v11897_v43  ;;  %v629_v27 = vld [vmem:[#allocation6 + $0x118] sm:$0xff]  ;;  %v630_v31 = vld [vmem:[#allocation6 + $0x120] sm:$0xff]  ;;  %v632_v34 = vld [vmem:[#allocation6 + $0x130] sm:$0xff] }
 0x11f   :  { %401 = vmatmul.mubr.f32.vlgmr.msra.gmra.mrb[0].mxu0 %v242_v48  ;;  %v633_v28 = vld [vmem:[#allocation6 + $0x138] sm:$0xff]  ;;  %v635_v36 = vld [vmem:[#allocation6 + $0x148] sm:$0xff]  ;;  %v246_v38 = vld [vmem:[%s14032_s1 + $0x20] sm:$0xff]  ;;  %v11967_v39 = vpack.c.bf16 %v630_v31, %v626_v30  ;;  %v11971_v44 = vpack.c.bf16 %v632_v34, %v628_v33 }
 0x120   :  { %514 = vmatmul.mubr.f32.vlgmr.msra.gmra.mrb[0].mxu1 %v242_v48  ;;  %8047 = vmatpush1.bf16.msra.mxu0 %v11902_v49  ;;  %v11961_v35 = vpack.c.bf16 %v633_v28, %v629_v27  ;;  %v639_v37 = vld [vmem:[#allocation6 + $0x168] sm:$0xff]  ;;  %v637_v41 = vld [vmem:[#allocation6 + $0x158] sm:$0xff]  ;;  %v634_v45 = vld [vmem:[#allocation6 + $0x140] sm:$0xff] }
 0x121   :  { %8079 = vmatpush1.bf16.msra.mxu1 %v11905_v52  ;;  %406 = vmatprep.mubr.f32.mxu0 %v14048_v0  ;;  %v641_v42 = vld [vmem:[#allocation6 + $0x178] sm:$0xff]  ;;  %v638_v46 = vld [vmem:[#allocation6 + $0x160] sm:$0xff]  ;;  %v11975_v47 = vpack.c.bf16 %v639_v37, %v635_v36  ;;  %v636_v48 = vld [vmem:[#allocation6 + $0x150] sm:$0xff] }
 0x122   :  { %519 = vmatprep.mubr.f32.mxu1 %v14048_v0  ;;  %8049 = vmatprep.subr.bf16.mxu0 %v11908_v55  ;;  %v640_v50 = vld [vmem:[#allocation6 + $0x170] sm:$0xff]  ;;  %v11978_v51 = vpack.c.bf16 %v641_v42, %v637_v41  ;;  %v643_v53 = vld [vmem:[#allocation6 + $0x188] sm:$0xff]  ;;  %v11984_v57 = vpack.c.bf16 %v638_v46, %v634_v45  ;;  %v645_v59 = vld [vmem:[#allocation6 + $0x198] sm:$0xff]  ;;  %v316_v41 = vlaneseq }
 0x123   :  { %407 = vmatmul.mubr.f32.gmra.mrb[2].mxu0 %v243_v61  ;;  %8081 = vmatprep.subr.bf16.mxu1 %v11910_v58  ;;  %v647_v54 = vld [vmem:[#allocation6 + $0x1a8] sm:$0xff]  ;;  %v649_v60 = vld [vmem:[#allocation6 + $0x1b8] sm:$0xff]  ;;  %v642_v63 = vld [vmem:[#allocation6 + $0x180] sm:$0xff] }
 0x124   :  { %520 = vmatmul.mubr.f32.gmra.mrb[2].mxu1 %v243_v61  ;;  %8051 = vmatpush1.bf16.msra.mxu0 %v11916_v62  ;;  %v247_v56 = vld [vmem:[%s14032_s1 + $0x28] sm:$0xff]  ;;  %v11988_v61 = vpack.c.bf16 %v640_v50, %v636_v48  ;;  %v646_v2 = vld [vmem:[#allocation6 + $0x1a0] sm:$0xff]  ;;  %v11992_v4 = vpack.c.bf16 %v647_v54, %v643_v53  ;;  %v644_v5 = vld [vmem:[#allocation6 + $0x190] sm:$0xff]  ;;  %v11995_v8 = vpack.c.bf16 %v649_v60, %v645_v59  ;;  %v317_v42 = vshrl.u32 %v316_v41, 7 }
 0x125   :  { %8083 = vmatpush1.bf16.msra.mxu1 %v11920_v3  ;;  %412 = vmatprep.mubr.f32.mxu0 %v14048_v0  ;;  %v648_v7 = vld [vmem:[#allocation6 + $0x1b0] sm:$0xff]  ;;  %v651_v10 = vld [vmem:[#allocation6 + $0x1c8] sm:$0xff]  ;;  %v12001_v14 = vpack.c.bf16 %v646_v2, %v642_v63  ;;  %v653_v15 = vld [vmem:[#allocation6 + $0x1d8] sm:$0xff] }
 0x126   :  { %525 = vmatprep.mubr.f32.mxu1 %v14048_v0  ;;  %8053 = vmatprep.subr.bf16.mxu0 %v11924_v6  ;;  %v655_v11 = vld [vmem:[#allocation6 + $0x1e8] sm:$0xff]  ;;  %v657_v17 = vld [vmem:[#allocation6 + $0x1f8] sm:$0xff]  ;;  %v12005_v18 = vpack.c.bf16 %v648_v7, %v644_v5  ;;  %v650_v20 = vld [vmem:[#allocation6 + $0x1c0] sm:$0xff]  ;;  %v12082_v45 = vsub.s32 0, %v317_v42  ;;  %v12084_v48 = vsub.s32 1, %v317_v42 }
 0x127   :  { %413 = vmatmul.mubr.f32.gmra.mrb[4].mxu0 %v244_v12  ;;  %8085 = vmatprep.subr.bf16.mxu1 %v11927_v9  ;;  %v654_v21 = vld [vmem:[#allocation6 + $0x1e0] sm:$0xff]  ;;  %v12014_v24 = vpack.c.bf16 %v655_v11, %v651_v10  ;;  %v656_v27 = vld [vmem:[#allocation6 + $0x1f0] sm:$0xff]  ;;  %v12017_v28 = vpack.c.bf16 %v657_v17, %v653_v15  ;;  %v249_v30 = vld [vmem:[%s14032_s1 + $0x38] sm:$0xff] }
 0x128   :  { %526 = vmatmul.mubr.f32.gmra.mrb[4].mxu1 %v244_v12  ;;  %8055 = vmatpush1.bf16.msra.mxu0 %v11933_v13  ;;  %v248_v12 = vld [vmem:[%s14032_s1 + $0x30] sm:$0xff]  ;;  %v12010_v23 = vld [vmem:[%s14098_s8] sm:$0xff]  ;;  %v12023_v31 = vpack.c.bf16 %v654_v21, %v650_v20  ;;  %14099 = vst [vmem:[#allocation34_spill] sm:$0xff] %v12082_v45  ;;  %14100 = vst [vmem:[#allocation35_spill] sm:$0xff] %v12084_v48 }
 0x129   :  { %8087 = vmatpush1.bf16.msra.mxu1 %v11937_v16  ;;  %418 = vmatprep.mubr.f32.mxu0 %v14048_v0  ;;  %vm234_vm0 = vcmp.gt.s32.totalorder %v12010_v23, 0  ;;  %vm235_vm1 = vcmp.gt.s32.totalorder %v12010_v23, 1  ;;  %vm238_vm2 = vcmp.gt.s32.totalorder %v12010_v23, 4  ;;  %vm240_vm3 = vcmp.gt.s32.totalorder %v12010_v23, 6  ;;  %v314_v46 = vld [vmem:[#allocation8] sm:$0xf] }
 0x12a   :  { %531 = vmatprep.mubr.f32.mxu1 %v14048_v0  ;;  %8057 = vmatprep.subr.bf16.mxu0 %v11941_v19  ;;  %v832_v34 = vsel %vm234_vm0, 1, %v11585_v1  ;;  %v1014_v36 = vsel %vm235_vm1, 1, %v11585_v1  ;;  %v1560_v37 = vsel %vm238_vm2, 1, %v11585_v1  ;;  %v12087_v50 = vrot.slane %v314_v46, %v12082_v45 }
 0x12b   :  { %419 = vmatmul.mubr.f32.gmra.mrb[6].mxu0 %v245_v25  ;;  %8089 = vmatprep.subr.bf16.mxu1 %v11944_v22  ;;  %v12090_v53 = vrot.slane %v314_v46, %v12084_v48  ;;  %vm236_vm5 = vcmp.gt.s32.totalorder %v12010_v23, 2  ;;  %vm237_vm6 = vcmp.gt.s32.totalorder %v12010_v23, 3  ;;  %vm239_vm7 = vcmp.gt.s32.totalorder %v12010_v23, 5 }
 0x12c   :  { %532 = vmatmul.mubr.f32.gmra.mrb[6].mxu1 %v245_v25  ;;  %8059 = vmatpush1.bf16.msra.mxu0 %v11950_v26  ;;  %v652_v25 = vld [vmem:[#allocation6 + $0x1d0] sm:$0xff]  ;;  %vm241_vm8 = vcmp.gt.s32.totalorder %v12010_v23, 7 }
 0x12d   :  { %8091 = vmatpush1.bf16.msra.mxu1 %v11954_v29  ;;  %424 = vmatprep.mubr.f32.mxu0 %v14048_v0  ;;  %v12028_v33 = vpack.c.bf16 %v656_v27, %v652_v25 }
 0x12e   :  { %537 = vmatprep.mubr.f32.mxu1 %v14048_v0  ;;  %8061 = vmatprep.subr.bf16.mxu0 %v11958_v32 }
 0x12f   :  { %425 = vmatmul.mubr.f32.gmra.mrb[8].mxu0 %v246_v38  ;;  %8093 = vmatprep.subr.bf16.mxu1 %v11961_v35 }
 0x130   :  { %538 = vmatmul.mubr.f32.gmra.mrb[8].mxu1 %v246_v38  ;;  %8063 = vmatpush1.bf16.msra.mxu0 %v11967_v39  ;;  %v1924_v38 = vsel %vm240_vm3, 1, %v11585_v1 }
 0x131   :  { %8095 = vmatpush1.bf16.msra.mxu1 %v11971_v44  ;;  %430 = vmatprep.mubr.f32.mxu0 %v14048_v0 }
 0x132   :  { %543 = vmatprep.mubr.f32.mxu1 %v14048_v0  ;;  %8065 = vmatprep.subr.bf16.mxu0 %v11975_v47 }
 0x133   :  { %431 = vmatmul.mubr.f32.gmra.mrb[10].mxu0 %v247_v56  ;;  %8097 = vmatprep.subr.bf16.mxu1 %v11978_v51 }
 0x134   :  { %544 = vmatmul.mubr.f32.gmra.mrb[10].mxu1 %v247_v56  ;;  %8067 = vmatpush1.bf16.msra.mxu0 %v11984_v57  ;;  %v12092_v56 = vsub.s32 3, %v317_v42 }
 0x135   :  { %8099 = vmatpush1.bf16.msra.mxu1 %v11988_v61  ;;  %436 = vmatprep.mubr.f32.mxu0 %v14048_v0 }
 0x136   :  { %549 = vmatprep.mubr.f32.mxu1 %v14048_v0  ;;  %8069 = vmatprep.subr.bf16.mxu0 %v11992_v4  ;;  %14101 = vst [vmem:[#allocation36_spill] sm:$0xff] %v12092_v56  ;;  %v12097_v11 = vrot.slane %v314_v46, %v12092_v56 }
 0x137   :  { %437 = vmatmul.mubr.f32.gmra.mrb[12].mxu0 %v248_v12  ;;  %8101 = vmatprep.subr.bf16.mxu1 %v11995_v8 }
 0x138   :  { %550 = vmatmul.mubr.f32.gmra.mrb[12].mxu1 %v248_v12  ;;  %8071 = vmatpush1.bf16.msra.mxu0 %v12001_v14  ;;  %v12099_v12 = vsub.s32 2, %v317_v42 }
 0x139   :  { %8103 = vmatpush1.bf16.msra.mxu1 %v12005_v18  ;;  %442 = vmatprep.mubr.f32.mxu0 %v14048_v0 }
 0x13a   :  { %555 = vmatprep.mubr.f32.mxu1 %v14048_v0  ;;  %8073 = vmatprep.subr.bf16.mxu0 %v12014_v24  ;;  %14102 = vst [vmem:[#allocation37_spill] sm:$0xff] %v12099_v12  ;;  %v12103_v17 = vrot.slane %v314_v46, %v12099_v12 }
 0x13b   :  { %443 = vmatmul.mubr.f32.gmra.mrb[14].mxu0 %v249_v30  ;;  %8105 = vmatprep.subr.bf16.mxu1 %v12017_v28 }
 0x13c   :  { %556 = vmatmul.mubr.f32.gmra.mrb[14].mxu1 %v249_v30  ;;  %8075 = vmatpush1.bf16.msra.mxu0 %v12023_v31 }
 0x13d   :  { %8107 = vmatpush1.bf16.msra.mxu1 %v12028_v33  ;;  %726 = vmatprep.mubr.f32.mxu0 %v14048_v0 }
 0x13e   :  { %797 = vmatprep.mubr.f32.mxu1 %v14048_v0  ;;  %834 = vperm.xlu0 %10720, %v832_v34  }
 0x13f   :  { %727 = vmatmul.mubr.f32.vlgmr.msra.gmra.mrb[0].mxu0 %v14048_v0  ;;  %8109 = vmatprep.subr.bf16.mxu0 %v11895_v40 }
 0x140   :  { %798 = vmatmul.mubr.f32.vlgmr.msra.gmra.mrb[0].mxu1 %v14048_v0  ;;  %8141 = vmatprep.subr.bf16.mxu1 %v11897_v43 }
 0x141   :  { %8111 = vmatpush1.bf16.msra.mxu0 %v11902_v49  ;;  %8143 = vmatpush1.bf16.msra.mxu1 %v11905_v52 }
 0x142   :  { %1016 = vperm.xlu0 %10720, %v1014_v36   ;;  %8113 = vmatprep.subr.bf16.mxu0 %v11908_v55 }
 0x143   :  { %8145 = vmatprep.subr.bf16.mxu1 %v11910_v58  ;;  %908 = vmatprep.mubr.f32.mxu0 %v14048_v0 }
 0x144   :  { %979 = vmatprep.mubr.f32.mxu1 %v14048_v0 }
 0x145   :  { %8115 = vmatpush1.bf16.msra.mxu0 %v11916_v62  ;;  %8147 = vmatpush1.bf16.msra.mxu1 %v11920_v3 }
 0x146   :  { %1562 = vperm.xlu0 %10720, %v1560_v37   ;;  %8117 = vmatprep.subr.bf16.mxu0 %v11924_v6 }
 0x147   :  { %8149 = vmatprep.subr.bf16.mxu1 %v11927_v9 }
 0x149   :  { %8119 = vmatpush1.bf16.msra.mxu0 %v11933_v13  ;;  %8151 = vmatpush1.bf16.msra.mxu1 %v11937_v16 }
 0x14a   :  { %1926 = vperm.xlu0 %10720, %v1924_v38   ;;  %8121 = vmatprep.subr.bf16.mxu0 %v11941_v19 }
 0x14b   :  { %8153 = vmatprep.subr.bf16.mxu1 %v11944_v22 }
 0x14d   :  { %8123 = vmatpush1.bf16.msra.mxu0 %v11950_v26  ;;  %8155 = vmatpush1.bf16.msra.mxu1 %v11954_v29 }
 0x14e   :  { %8125 = vmatprep.subr.bf16.mxu0 %v11958_v32  ;;  %8157 = vmatprep.subr.bf16.mxu1 %v11961_v35 }
 0x151   :  { %8127 = vmatpush1.bf16.msra.mxu0 %v11967_v39  ;;  %8159 = vmatpush1.bf16.msra.mxu1 %v11971_v44 }
 0x152   :  { %8129 = vmatprep.subr.bf16.mxu0 %v11975_v47  ;;  %8161 = vmatprep.subr.bf16.mxu1 %v11978_v51 }
 0x155   :  { %8131 = vmatpush1.bf16.msra.mxu0 %v11984_v57  ;;  %8163 = vmatpush1.bf16.msra.mxu1 %v11988_v61 }
 0x156   :  { %8133 = vmatprep.subr.bf16.mxu0 %v11992_v4  ;;  %8165 = vmatprep.subr.bf16.mxu1 %v11995_v8 }
 0x159   :  { %8135 = vmatpush1.bf16.msra.mxu0 %v12001_v14  ;;  %8167 = vmatpush1.bf16.msra.mxu1 %v12005_v18 }
 0x15a   :  { %8137 = vmatprep.subr.bf16.mxu0 %v12014_v24  ;;  %8169 = vmatprep.subr.bf16.mxu1 %v12017_v28 }
 0x15d   :  { %8139 = vmatpush1.bf16.msra.mxu0 %v12023_v31  ;;  %8171 = vmatpush1.bf16.msra.mxu1 %v12028_v33 }
 0x15e   :  { %8173 = vmatprep.subr.bf16.mxu0 %v11895_v40  ;;  %8205 = vmatprep.subr.bf16.mxu1 %v11897_v43 }
 0x212   :  { %v728_v54 = vpop.f32.mrb[0].mxu0 }
 0x213   :  { %v10444_v59 = vadd.f32 %v728_v54, %v12087_v50  ;;  %v799_v60 = vpop.f32.mrb[0].mxu1  ;;  %v730_v63 = vpop.f32.mrb[1].mxu0 }
 0x214   :  { %v10445_v2 = vadd.f32 %v730_v63, %v12090_v53  ;;  %v801_v5 = vpop.f32.mrb[1].mxu1  ;;  %v10460_v21 = vadd.f32 %v799_v60, %v12103_v17  ;;  %v12109_v63 = vpop.permute.xlu0 %834 }
 0x215   :  { %v7832_v7 = vmul.f32 -1.442695, %v10444_v59  ;;  %v10461_v15 = vadd.f32 %v801_v5, %v12097_v11  ;;  %vm836_vm4 = vcmp.eq.s32.totalorder %v12109_v63, 1 }
 0x216   :  { %v7833_v10 = vmul.f32 -1.442695, %v10445_v2 }
 0x217   :  { %10722 = vpow2.f32 %v7832_v7  ;;  %v7834_v20 = vmul.f32 -1.442695, %v10461_v15  ;;  %v1196_v7 = vsel %vm236_vm5, 1, %v11585_v1  ;;  %v1742_v15 = vsel %vm239_vm7, 1, %v11585_v1 }
 0x218   :  { %10724 = vpow2.f32 %v7833_v10  ;;  %1198 = vperm.xlu1 %10721, %v1196_v7   ;;  %v1378_v10 = vsel %vm237_vm6, 1, %v11585_v1 }
 0x219   :  { %10726 = vpow2.f32 %v7834_v20  ;;  %v2106_v20 = vsel %vm241_vm8, 1, %v11585_v1 }
 0x21a   :  { %10728 = vtanh.f32 %v10460_v21 }
 0x21c   :  { %1380 = vperm.xlu1 %10721, %v1378_v10  }
 0x220   :  { %1744 = vperm.xlu1 %10721, %v1742_v15  }
 0x221   :  { %v10723_v25 = vpop.eup %10722 }
 0x222   :  { %v10725_v27 = vpop.eup %10724  ;;  %v811_v30 = vadd.f32 1.0, %v10723_v25 }
 0x223   :  { %v817_v34 = vadd.f32 1.0, %v10725_v27  ;;  %v10727_v36 = vpop.eup %10726 }
 0x224   :  { %10730 = vrcp.f32 %v811_v30  ;;  %v10729_v37 = vpop.eup %10728  ;;  %v824_v54 = vadd.f32 1.0, %v10727_v36  ;;  %2108 = vperm.xlu1 %10721, %v2106_v20  }
 0x225   :  { %10732 = vrcp.f32 %v817_v34 }
 0x226   :  { %10734 = vrcp.f32 %v824_v54 }
 0x22e   :  { %v10731_v38 = vpop.eup %10730 }
 0x22f   :  { %v10733_v41 = vpop.eup %10732  ;;  %v828_v42 = vmul.f32 %v10731_v38, %v10729_v37 }
 0x230   :  { %v827_v59 = vmul.f32 0.0, %v10733_v41  ;;  %v10735_v60 = vpop.eup %10734 }
 0x232   :  { %v12106_v46 = vadd.f32 %v828_v42, %v827_v59 }
 0x234   :  { %10736 = vtanh.f32 %v12106_v46 }
 0x23e   :  { %v10737_v2 = vpop.eup %10736 }
 0x23f   :  { %v12111_v5 = vmul.f32 %v10737_v2, %v10735_v60 }
 0x241   :  { %14103 = vst [vmem:[#allocation38_spill] sm:$0xff] %v12111_v5  ;;  %7835 = vmatmul.mubr.msk.f32.vlgmr.msra.gmra.mrb[2].mxu0 %vm836_vm4, %v12111_v5  ;;  %7836 = vmatmul.mubr.msk.f32.vlgmr.msra.gmra.mrb[2].mxu1 %vm836_vm4, %v12111_v5 }
 0x242   :  { %8175 = vmatpush1.bf16.msra.mxu0 %v11902_v49  ;;  %8207 = vmatpush1.bf16.msra.mxu1 %v11905_v52 }
 0x243   :  { %8177 = vmatprep.subr.bf16.mxu0 %v11908_v55  ;;  %8209 = vmatprep.subr.bf16.mxu1 %v11910_v58 }
 0x244   :  { %1090 = vmatprep.mubr.f32.mxu0 %v14048_v0  ;;  %1161 = vmatprep.mubr.f32.mxu1 %v14048_v0 }
 0x246   :  { %8179 = vmatpush1.bf16.msra.mxu0 %v11916_v62  ;;  %8211 = vmatpush1.bf16.msra.mxu1 %v11920_v3 }
 0x247   :  { %8181 = vmatprep.subr.bf16.mxu0 %v11924_v6  ;;  %8213 = vmatprep.subr.bf16.mxu1 %v11927_v9 }
 0x24a   :  { %8183 = vmatpush1.bf16.msra.mxu0 %v11933_v13  ;;  %8215 = vmatpush1.bf16.msra.mxu1 %v11937_v16 }
 0x24b   :  { %8185 = vmatprep.subr.bf16.mxu0 %v11941_v19  ;;  %8217 = vmatprep.subr.bf16.mxu1 %v11944_v22 }
 0x24e   :  { %8187 = vmatpush1.bf16.msra.mxu0 %v11950_v26  ;;  %8219 = vmatpush1.bf16.msra.mxu1 %v11954_v29 }
 0x24f   :  { %8189 = vmatprep.subr.bf16.mxu0 %v11958_v32  ;;  %8221 = vmatprep.subr.bf16.mxu1 %v11961_v35 }
 0x252   :  { %8191 = vmatpush1.bf16.msra.mxu0 %v11967_v39  ;;  %8223 = vmatpush1.bf16.msra.mxu1 %v11971_v44 }
 0x253   :  { %8193 = vmatprep.subr.bf16.mxu0 %v11975_v47  ;;  %8225 = vmatprep.subr.bf16.mxu1 %v11978_v51 }
 0x256   :  { %8195 = vmatpush1.bf16.msra.mxu0 %v11984_v57  ;;  %8227 = vmatpush1.bf16.msra.mxu1 %v11988_v61 }
 0x257   :  { %8197 = vmatprep.subr.bf16.mxu0 %v11992_v4  ;;  %8229 = vmatprep.subr.bf16.mxu1 %v11995_v8 }
 0x25a   :  { %8199 = vmatpush1.bf16.msra.mxu0 %v12001_v14  ;;  %8231 = vmatpush1.bf16.msra.mxu1 %v12005_v18 }
 0x25b   :  { %8201 = vmatprep.subr.bf16.mxu0 %v12014_v24  ;;  %8233 = vmatprep.subr.bf16.mxu1 %v12017_v28 }
 0x25e   :  { %8203 = vmatpush1.bf16.msra.mxu0 %v12023_v31  ;;  %8235 = vmatpush1.bf16.msra.mxu1 %v12028_v33 }
 0x25f   :  { %8237 = vmatprep.subr.bf16.mxu0 %v11895_v40  ;;  %8269 = vmatprep.subr.bf16.mxu1 %v11897_v43 }
 0x314   :  { %v910_v21 = vpop.f32.mrb[2].mxu0  ;;  %v981_v25 = vpop.f32.mrb[2].mxu1 }
 0x315   :  { %v10446_v27 = vadd.f32 %v910_v21, %v12087_v50  ;;  %v912_v30 = vpop.f32.mrb[3].mxu0  ;;  %v983_v34 = vpop.f32.mrb[3].mxu1  ;;  %v10462_v23 = vadd.f32 %v981_v25, %v12103_v17  ;;  %v838_v21 = vsel %vm836_vm4, %v12106_v46, 0.0  ;;  %v837_v46 = vsel %vm836_vm4, %v12111_v5, 0.0 }
 0x316   :  { %v10447_v36 = vadd.f32 %v912_v30, %v12090_v53  ;;  %v10463_v41 = vadd.f32 %v983_v34, %v12097_v11  ;;  %v12169_v25 = vpop.permute.xlu0 %1016 }
 0x317   :  { %v7837_v37 = vmul.f32 -1.442695, %v10446_v27  ;;  %vm1018_vm9 = vcmp.eq.s32.totalorder %v12169_v25, 1 }
 0x318   :  { %v7838_v38 = vmul.f32 -1.442695, %v10447_v36  ;;  %v7839_v42 = vmul.f32 -1.442695, %v10463_v41 }
 0x319   :  { %10738 = vpow2.f32 %v7837_v37 }
 0x31a   :  { %10740 = vpow2.f32 %v7838_v38 }
 0x31b   :  { %10742 = vpow2.f32 %v7839_v42 }
 0x31c   :  { %10744 = vtanh.f32 %v10462_v23 }
 0x323   :  { %v10739_v54 = vpop.eup %10738 }
 0x324   :  { %v10741_v1 = vpop.eup %10740  ;;  %v993_v59 = vadd.f32 1.0, %v10739_v54 }
 0x325   :  { %v999_v60 = vadd.f32 1.0, %v10741_v1  ;;  %v10743_v2 = vpop.eup %10742 }
 0x326   :  { %10746 = vrcp.f32 %v993_v59  ;;  %v10745_v7 = vpop.eup %10744  ;;  %v1006_v27 = vadd.f32 1.0, %v10743_v2 }
 0x327   :  { %10748 = vrcp.f32 %v999_v60 }
 0x328   :  { %10750 = vrcp.f32 %v1006_v27 }
 0x330   :  { %v10747_v10 = vpop.eup %10746 }
 0x331   :  { %v10749_v15 = vpop.eup %10748  ;;  %v1010_v20 = vmul.f32 %v10747_v10, %v10745_v7 }
 0x332   :  { %v1009_v30 = vmul.f32 %v10749_v15, %v838_v21  ;;  %v10751_v37 = vpop.eup %10750 }
 0x334   :  { %v1011_v34 = vadd.f32 %v1010_v20, %v1009_v30 }
 0x336   :  { %10752 = vtanh.f32 %v1011_v34  ;;  %v12174_v36 = vsel %vm1018_vm9, %v1011_v34, %v838_v21 }
 0x340   :  { %v10753_v38 = vpop.eup %10752 }
 0x341   :  { %v1013_v41 = vmul.f32 %v10753_v38, %v10751_v37 }
 0x343   :  { %v12181_v42 = vsel %vm1018_vm9, %v1013_v41, %v837_v46 }
 0x344   :  { %14104 = vst [vmem:[#allocation39_spill] sm:$0xff] %v12181_v42  ;;  %1091 = vmatmul.mubr.f32.vlgmr.msra.gmra.mrb[4].mxu0 %v12181_v42  ;;  %1162 = vmatmul.mubr.f32.vlgmr.msra.gmra.mrb[4].mxu1 %v12181_v42 }
 0x345   :  { %8239 = vmatpush1.bf16.msra.mxu0 %v11902_v49  ;;  %8271 = vmatpush1.bf16.msra.mxu1 %v11905_v52 }
 0x346   :  { %8241 = vmatprep.subr.bf16.mxu0 %v11908_v55  ;;  %8273 = vmatprep.subr.bf16.mxu1 %v11910_v58 }
 0x347   :  { %1272 = vmatprep.mubr.f32.mxu0 %v14048_v0  ;;  %1343 = vmatprep.mubr.f32.mxu1 %v14048_v0 }
 0x349   :  { %8243 = vmatpush1.bf16.msra.mxu0 %v11916_v62  ;;  %8275 = vmatpush1.bf16.msra.mxu1 %v11920_v3 }
 0x34a   :  { %8245 = vmatprep.subr.bf16.mxu0 %v11924_v6  ;;  %8277 = vmatprep.subr.bf16.mxu1 %v11927_v9 }
 0x34d   :  { %8247 = vmatpush1.bf16.msra.mxu0 %v11933_v13  ;;  %8279 = vmatpush1.bf16.msra.mxu1 %v11937_v16 }
 0x34e   :  { %8249 = vmatprep.subr.bf16.mxu0 %v11941_v19  ;;  %8281 = vmatprep.subr.bf16.mxu1 %v11944_v22 }
 0x351   :  { %8251 = vmatpush1.bf16.msra.mxu0 %v11950_v26  ;;  %8283 = vmatpush1.bf16.msra.mxu1 %v11954_v29 }
 0x352   :  { %8253 = vmatprep.subr.bf16.mxu0 %v11958_v32  ;;  %8285 = vmatprep.subr.bf16.mxu1 %v11961_v35 }
 0x355   :  { %8255 = vmatpush1.bf16.msra.mxu0 %v11967_v39  ;;  %8287 = vmatpush1.bf16.msra.mxu1 %v11971_v44 }
 0x356   :  { %8257 = vmatprep.subr.bf16.mxu0 %v11975_v47  ;;  %8289 = vmatprep.subr.bf16.mxu1 %v11978_v51 }
 0x359   :  { %8259 = vmatpush1.bf16.msra.mxu0 %v11984_v57  ;;  %8291 = vmatpush1.bf16.msra.mxu1 %v11988_v61 }
 0x35a   :  { %8261 = vmatprep.subr.bf16.mxu0 %v11992_v4  ;;  %8293 = vmatprep.subr.bf16.mxu1 %v11995_v8 }
 0x35d   :  { %8263 = vmatpush1.bf16.msra.mxu0 %v12001_v14  ;;  %8295 = vmatpush1.bf16.msra.mxu1 %v12005_v18 }
 0x35e   :  { %8265 = vmatprep.subr.bf16.mxu0 %v12014_v24  ;;  %8297 = vmatprep.subr.bf16.mxu1 %v12017_v28 }
 0x361   :  { %8267 = vmatpush1.bf16.msra.mxu0 %v12023_v31  ;;  %8299 = vmatpush1.bf16.msra.mxu1 %v12028_v33 }
 0x362   :  { %8301 = vmatprep.subr.bf16.mxu0 %v11895_v40  ;;  %8333 = vmatprep.subr.bf16.mxu1 %v11897_v43 }
 0x417   :  { %v1092_v23 = vpop.f32.mrb[4].mxu0  ;;  %v1163_v54 = vpop.f32.mrb[4].mxu1 }
 0x418   :  { %v10448_v1 = vadd.f32 %v1092_v23, %v12087_v50  ;;  %v1094_v59 = vpop.f32.mrb[5].mxu0  ;;  %v1165_v60 = vpop.f32.mrb[5].mxu1  ;;  %v10464_v21 = vadd.f32 %v1163_v54, %v12103_v17 }
 0x419   :  { %v10449_v2 = vadd.f32 %v1094_v59, %v12090_v53  ;;  %v10465_v15 = vadd.f32 %v1165_v60, %v12097_v11  ;;  %v12223_v23 = vpop.permute.xlu1 %1198 }
 0x41a   :  { %v7840_v7 = vmul.f32 -1.442695, %v10448_v1  ;;  %vm1200_vm10 = vcmp.eq.s32.totalorder %v12223_v23, 1 }
 0x41b   :  { %v7841_v10 = vmul.f32 -1.442695, %v10449_v2  ;;  %v7842_v20 = vmul.f32 -1.442695, %v10465_v15 }
 0x41c   :  { %10754 = vpow2.f32 %v7840_v7 }
 0x41d   :  { %10756 = vpow2.f32 %v7841_v10 }
 0x41e   :  { %10758 = vpow2.f32 %v7842_v20 }
 0x41f   :  { %10760 = vtanh.f32 %v10464_v21 }
 0x426   :  { %v10755_v27 = vpop.eup %10754 }
 0x427   :  { %v10757_v30 = vpop.eup %10756  ;;  %v1175_v34 = vadd.f32 1.0, %v10755_v27 }
 0x428   :  { %v1181_v37 = vadd.f32 1.0, %v10757_v30  ;;  %v10759_v38 = vpop.eup %10758 }
 0x429   :  { %10762 = vrcp.f32 %v1175_v34  ;;  %v10761_v41 = vpop.eup %10760  ;;  %v1188_v2 = vadd.f32 1.0, %v10759_v38 }
 0x42a   :  { %10764 = vrcp.f32 %v1181_v37 }
 0x42b   :  { %10766 = vrcp.f32 %v1188_v2 }
 0x433   :  { %v10763_v46 = vpop.eup %10762 }
 0x434   :  { %v10765_v1 = vpop.eup %10764  ;;  %v1192_v59 = vmul.f32 %v10763_v46, %v10761_v41 }
 0x435   :  { %v1191_v60 = vmul.f32 %v10765_v1, %v12174_v36  ;;  %v10767_v10 = vpop.eup %10766 }
 0x437   :  { %v1193_v54 = vadd.f32 %v1192_v59, %v1191_v60 }
 0x439   :  { %10768 = vtanh.f32 %v1193_v54  ;;  %v12230_v7 = vsel %vm1200_vm10, %v1193_v54, %v12174_v36 }
 0x443   :  { %v10769_v15 = vpop.eup %10768 }
 0x444   :  { %v1195_v20 = vmul.f32 %v10769_v15, %v10767_v10 }
 0x446   :  { %v12235_v21 = vsel %vm1200_vm10, %v1195_v20, %v12181_v42 }
 0x447   :  { %14105 = vst [vmem:[#allocation40_spill] sm:$0xff] %v12235_v21  ;;  %1273 = vmatmul.mubr.f32.vlgmr.msra.gmra.mrb[6].mxu0 %v12235_v21  ;;  %1344 = vmatmul.mubr.f32.vlgmr.msra.gmra.mrb[6].mxu1 %v12235_v21 }
 0x448   :  { %8303 = vmatpush1.bf16.msra.mxu0 %v11902_v49  ;;  %8335 = vmatpush1.bf16.msra.mxu1 %v11905_v52 }
 0x449   :  { %8305 = vmatprep.subr.bf16.mxu0 %v11908_v55  ;;  %8337 = vmatprep.subr.bf16.mxu1 %v11910_v58 }
 0x44a   :  { %1454 = vmatprep.mubr.f32.mxu0 %v14048_v0  ;;  %1525 = vmatprep.mubr.f32.mxu1 %v14048_v0 }
 0x44c   :  { %8307 = vmatpush1.bf16.msra.mxu0 %v11916_v62  ;;  %8339 = vmatpush1.bf16.msra.mxu1 %v11920_v3 }
 0x44d   :  { %8309 = vmatprep.subr.bf16.mxu0 %v11924_v6  ;;  %8341 = vmatprep.subr.bf16.mxu1 %v11927_v9 }
 0x450   :  { %8311 = vmatpush1.bf16.msra.mxu0 %v11933_v13  ;;  %8343 = vmatpush1.bf16.msra.mxu1 %v11937_v16 }
 0x451   :  { %8313 = vmatprep.subr.bf16.mxu0 %v11941_v19  ;;  %8345 = vmatprep.subr.bf16.mxu1 %v11944_v22 }
 0x454   :  { %8315 = vmatpush1.bf16.msra.mxu0 %v11950_v26  ;;  %8347 = vmatpush1.bf16.msra.mxu1 %v11954_v29 }
 0x455   :  { %8317 = vmatprep.subr.bf16.mxu0 %v11958_v32  ;;  %8349 = vmatprep.subr.bf16.mxu1 %v11961_v35 }
 0x458   :  { %8319 = vmatpush1.bf16.msra.mxu0 %v11967_v39  ;;  %8351 = vmatpush1.bf16.msra.mxu1 %v11971_v44 }
 0x459   :  { %8321 = vmatprep.subr.bf16.mxu0 %v11975_v47  ;;  %8353 = vmatprep.subr.bf16.mxu1 %v11978_v51 }
 0x45c   :  { %8323 = vmatpush1.bf16.msra.mxu0 %v11984_v57  ;;  %8355 = vmatpush1.bf16.msra.mxu1 %v11988_v61 }
 0x45d   :  { %8325 = vmatprep.subr.bf16.mxu0 %v11992_v4  ;;  %8357 = vmatprep.subr.bf16.mxu1 %v11995_v8 }
 0x460   :  { %8327 = vmatpush1.bf16.msra.mxu0 %v12001_v14  ;;  %8359 = vmatpush1.bf16.msra.mxu1 %v12005_v18 }
 0x461   :  { %8329 = vmatprep.subr.bf16.mxu0 %v12014_v24  ;;  %8361 = vmatprep.subr.bf16.mxu1 %v12017_v28 }
 0x464   :  { %8331 = vmatpush1.bf16.msra.mxu0 %v12023_v31  ;;  %8363 = vmatpush1.bf16.msra.mxu1 %v12028_v33 }
 0x465   :  { %8365 = vmatprep.subr.bf16.mxu0 %v11895_v40  ;;  %8397 = vmatprep.subr.bf16.mxu1 %v11897_v43 }
 0x51a   :  { %v1274_v36 = vpop.f32.mrb[6].mxu0  ;;  %v1345_v27 = vpop.f32.mrb[6].mxu1 }
 0x51b   :  { %v10450_v30 = vadd.f32 %v1274_v36, %v12087_v50  ;;  %v1276_v34 = vpop.f32.mrb[7].mxu0  ;;  %v1347_v37 = vpop.f32.mrb[7].mxu1  ;;  %v10466_v2 = vadd.f32 %v1345_v27, %v12103_v17 }
 0x51c   :  { %v10451_v38 = vadd.f32 %v1276_v34, %v12090_v53  ;;  %v10467_v1 = vadd.f32 %v1347_v37, %v12097_v11  ;;  %v12278_v37 = vpop.permute.xlu1 %1380 }
 0x51d   :  { %v7843_v41 = vmul.f32 -1.442695, %v10450_v30  ;;  %vm1382_vm11 = vcmp.eq.s32.totalorder %v12278_v37, 1 }
 0x51e   :  { %v7844_v46 = vmul.f32 -1.442695, %v10451_v38  ;;  %v7845_v59 = vmul.f32 -1.442695, %v10467_v1 }
 0x51f   :  { %10770 = vpow2.f32 %v7843_v41 }
 0x520   :  { %10772 = vpow2.f32 %v7844_v46 }
 0x521   :  { %10774 = vpow2.f32 %v7845_v59 }
 0x522   :  { %10776 = vtanh.f32 %v10466_v2 }
 0x529   :  { %v10771_v60 = vpop.eup %10770 }
 0x52a   :  { %v10773_v54 = vpop.eup %10772  ;;  %v1357_v10 = vadd.f32 1.0, %v10771_v60 }
 0x52b   :  { %v1363_v15 = vadd.f32 1.0, %v10773_v54  ;;  %v10775_v20 = vpop.eup %10774 }
 0x52c   :  { %10778 = vrcp.f32 %v1357_v10  ;;  %v10777_v36 = vpop.eup %10776  ;;  %v1370_v41 = vadd.f32 1.0, %v10775_v20 }
 0x52d   :  { %10780 = vrcp.f32 %v1363_v15 }
 0x52e   :  { %10782 = vrcp.f32 %v1370_v41 }
 0x536   :  { %v10779_v34 = vpop.eup %10778 }
 0x537   :  { %v10781_v30 = vpop.eup %10780  ;;  %v1374_v38 = vmul.f32 %v10779_v34, %v10777_v36 }
 0x538   :  { %v1373_v46 = vmul.f32 %v10781_v30, %v12230_v7  ;;  %v10783_v59 = vpop.eup %10782 }
 0x53a   :  { %v1375_v1 = vadd.f32 %v1374_v38, %v1373_v46 }
 0x53c   :  { %10784 = vtanh.f32 %v1375_v1  ;;  %v12284_v27 = vsel %vm1382_vm11, %v1375_v1, %v12230_v7 }
 0x546   :  { %v10785_v2 = vpop.eup %10784 }
 0x547   :  { %v1377_v60 = vmul.f32 %v10785_v2, %v10783_v59 }
 0x549   :  { %v12289_v54 = vsel %vm1382_vm11, %v1377_v60, %v12235_v21 }
 0x54a   :  { %14106 = vst [vmem:[#allocation41_spill] sm:$0xff] %v12289_v54  ;;  %1455 = vmatmul.mubr.f32.vlgmr.msra.gmra.mrb[8].mxu0 %v12289_v54  ;;  %1526 = vmatmul.mubr.f32.vlgmr.msra.gmra.mrb[8].mxu1 %v12289_v54 }
 0x54b   :  { %8367 = vmatpush1.bf16.msra.mxu0 %v11902_v49  ;;  %8399 = vmatpush1.bf16.msra.mxu1 %v11905_v52 }
 0x54c   :  { %8369 = vmatprep.subr.bf16.mxu0 %v11908_v55  ;;  %8401 = vmatprep.subr.bf16.mxu1 %v11910_v58 }
 0x54d   :  { %1636 = vmatprep.mubr.f32.mxu0 %v14048_v0  ;;  %1707 = vmatprep.mubr.f32.mxu1 %v14048_v0 }
 0x54f   :  { %8371 = vmatpush1.bf16.msra.mxu0 %v11916_v62  ;;  %8403 = vmatpush1.bf16.msra.mxu1 %v11920_v3 }
 0x550   :  { %8373 = vmatprep.subr.bf16.mxu0 %v11924_v6  ;;  %8405 = vmatprep.subr.bf16.mxu1 %v11927_v9 }
 0x553   :  { %8375 = vmatpush1.bf16.msra.mxu0 %v11933_v13  ;;  %8407 = vmatpush1.bf16.msra.mxu1 %v11937_v16 }
 0x554   :  { %8377 = vmatprep.subr.bf16.mxu0 %v11941_v19  ;;  %8409 = vmatprep.subr.bf16.mxu1 %v11944_v22 }
 0x557   :  { %8379 = vmatpush1.bf16.msra.mxu0 %v11950_v26  ;;  %8411 = vmatpush1.bf16.msra.mxu1 %v11954_v29 }
 0x558   :  { %8381 = vmatprep.subr.bf16.mxu0 %v11958_v32  ;;  %8413 = vmatprep.subr.bf16.mxu1 %v11961_v35 }
 0x55b   :  { %8383 = vmatpush1.bf16.msra.mxu0 %v11967_v39  ;;  %8415 = vmatpush1.bf16.msra.mxu1 %v11971_v44 }
 0x55c   :  { %8385 = vmatprep.subr.bf16.mxu0 %v11975_v47  ;;  %8417 = vmatprep.subr.bf16.mxu1 %v11978_v51 }
 0x55f   :  { %8387 = vmatpush1.bf16.msra.mxu0 %v11984_v57  ;;  %8419 = vmatpush1.bf16.msra.mxu1 %v11988_v61 }
 0x560   :  { %8389 = vmatprep.subr.bf16.mxu0 %v11992_v4  ;;  %8421 = vmatprep.subr.bf16.mxu1 %v11995_v8 }
 0x563   :  { %8391 = vmatpush1.bf16.msra.mxu0 %v12001_v14  ;;  %8423 = vmatpush1.bf16.msra.mxu1 %v12005_v18 }
 0x564   :  { %8393 = vmatprep.subr.bf16.mxu0 %v12014_v24  ;;  %8425 = vmatprep.subr.bf16.mxu1 %v12017_v28 }
 0x567   :  { %8395 = vmatpush1.bf16.msra.mxu0 %v12023_v31  ;;  %8427 = vmatpush1.bf16.msra.mxu1 %v12028_v33 }
 0x568   :  { %8429 = vmatprep.subr.bf16.mxu0 %v11895_v40  ;;  %8461 = vmatprep.subr.bf16.mxu1 %v11897_v43 }
 0x61d   :  { %v1456_v7 = vpop.f32.mrb[8].mxu0  ;;  %v1527_v10 = vpop.f32.mrb[8].mxu1 }
 0x61e   :  { %v10452_v15 = vadd.f32 %v1456_v7, %v12087_v50  ;;  %v1458_v20 = vpop.f32.mrb[9].mxu0  ;;  %v1529_v36 = vpop.f32.mrb[9].mxu1  ;;  %v10468_v1 = vadd.f32 %v1527_v10, %v12103_v17 }
 0x61f   :  { %v10453_v34 = vadd.f32 %v1458_v20, %v12090_v53  ;;  %v10469_v41 = vadd.f32 %v1529_v36, %v12097_v11  ;;  %v12332_v36 = vpop.permute.xlu0 %1562 }
 0x620   :  { %v7846_v30 = vmul.f32 -1.442695, %v10452_v15  ;;  %14107 = vst [vmem:[#allocation42_spill] sm:$0xff] %v12332_v36  ;;  %vm1564_vm12 = vcmp.eq.s32.totalorder %v12332_v36, 1 }
 0x621   :  { %v7847_v38 = vmul.f32 -1.442695, %v10453_v34  ;;  %v7848_v46 = vmul.f32 -1.442695, %v10469_v41 }
 0x622   :  { %10786 = vpow2.f32 %v7846_v30 }
 0x623   :  { %10788 = vpow2.f32 %v7847_v38 }
 0x624   :  { %10790 = vpow2.f32 %v7848_v46 }
 0x625   :  { %10792 = vtanh.f32 %v10468_v1 }
 0x62c   :  { %v10787_v59 = vpop.eup %10786 }
 0x62d   :  { %v10789_v2 = vpop.eup %10788  ;;  %v1539_v60 = vadd.f32 1.0, %v10787_v59 }
 0x62e   :  { %v1545_v0 = vadd.f32 1.0, %v10789_v2  ;;  %v10791_v7 = vpop.eup %10790 }
 0x62f   :  { %10794 = vrcp.f32 %v1539_v60  ;;  %v10793_v21 = vpop.eup %10792  ;;  %v1552_v30 = vadd.f32 1.0, %v10791_v7 }
 0x630   :  { %10796 = vrcp.f32 %v1545_v0 }
 0x631   :  { %10798 = vrcp.f32 %v1552_v30 }
 0x639   :  { %v10795_v20 = vpop.eup %10794 }
 0x63a   :  { %v10797_v15 = vpop.eup %10796  ;;  %v1556_v34 = vmul.f32 %v10795_v20, %v10793_v21 }
 0x63b   :  { %v1555_v38 = vmul.f32 %v10797_v15, %v12284_v27  ;;  %v10799_v0 = vpop.eup %10798 }
 0x63d   :  { %v1557_v41 = vadd.f32 %v1556_v34, %v1555_v38 }
 0x63f   :  { %10800 = vtanh.f32 %v1557_v41  ;;  %v12338_v10 = vsel %vm1564_vm12, %v1557_v41, %v12284_v27  ;;  %v14109_v27 = vmov 0.0  }
 0x649   :  { %v10801_v46 = vpop.eup %10800 }
 0x64a   :  { %v1559_v1 = vmul.f32 %v10801_v46, %v10799_v0 }
 0x64c   :  { %v12343_v21 = vsel %vm1564_vm12, %v1559_v1, %v12289_v54 }
 0x64d   :  { %14108 = vst [vmem:[#allocation43_spill] sm:$0xff] %v12343_v21  ;;  %1637 = vmatmul.mubr.f32.vlgmr.msra.gmra.mrb[10].mxu0 %v12343_v21  ;;  %1708 = vmatmul.mubr.f32.vlgmr.msra.gmra.mrb[10].mxu1 %v12343_v21 }
 0x64e   :  { %8431 = vmatpush1.bf16.msra.mxu0 %v11902_v49  ;;  %8463 = vmatpush1.bf16.msra.mxu1 %v11905_v52 }
 0x64f   :  { %8433 = vmatprep.subr.bf16.mxu0 %v11908_v55  ;;  %8465 = vmatprep.subr.bf16.mxu1 %v11910_v58 }
 0x650   :  { %1818 = vmatprep.mubr.f32.mxu0 %v14109_v27  ;;  %1889 = vmatprep.mubr.f32.mxu1 %v14109_v27 }
 0x652   :  { %8435 = vmatpush1.bf16.msra.mxu0 %v11916_v62  ;;  %8467 = vmatpush1.bf16.msra.mxu1 %v11920_v3 }
 0x653   :  { %8437 = vmatprep.subr.bf16.mxu0 %v11924_v6  ;;  %8469 = vmatprep.subr.bf16.mxu1 %v11927_v9 }
 0x656   :  { %8439 = vmatpush1.bf16.msra.mxu0 %v11933_v13  ;;  %8471 = vmatpush1.bf16.msra.mxu1 %v11937_v16 }
 0x657   :  { %8441 = vmatprep.subr.bf16.mxu0 %v11941_v19  ;;  %8473 = vmatprep.subr.bf16.mxu1 %v11944_v22 }
 0x65a   :  { %8443 = vmatpush1.bf16.msra.mxu0 %v11950_v26  ;;  %8475 = vmatpush1.bf16.msra.mxu1 %v11954_v29 }
 0x65b   :  { %8445 = vmatprep.subr.bf16.mxu0 %v11958_v32  ;;  %8477 = vmatprep.subr.bf16.mxu1 %v11961_v35 }
 0x65e   :  { %8447 = vmatpush1.bf16.msra.mxu0 %v11967_v39  ;;  %8479 = vmatpush1.bf16.msra.mxu1 %v11971_v44 }
 0x65f   :  { %8449 = vmatprep.subr.bf16.mxu0 %v11975_v47  ;;  %8481 = vmatprep.subr.bf16.mxu1 %v11978_v51 }
 0x662   :  { %8451 = vmatpush1.bf16.msra.mxu0 %v11984_v57  ;;  %8483 = vmatpush1.bf16.msra.mxu1 %v11988_v61 }
 0x663   :  { %8453 = vmatprep.subr.bf16.mxu0 %v11992_v4  ;;  %8485 = vmatprep.subr.bf16.mxu1 %v11995_v8 }
 0x666   :  { %8455 = vmatpush1.bf16.msra.mxu0 %v12001_v14  ;;  %8487 = vmatpush1.bf16.msra.mxu1 %v12005_v18 }
 0x667   :  { %8457 = vmatprep.subr.bf16.mxu0 %v12014_v24  ;;  %8489 = vmatprep.subr.bf16.mxu1 %v12017_v28 }
 0x66a   :  { %8459 = vmatpush1.bf16.msra.mxu0 %v12023_v31  ;;  %8491 = vmatpush1.bf16.msra.mxu1 %v12028_v33 }
 0x66b   :  { %8493 = vmatprep.subr.bf16.mxu0 %v11895_v40  ;;  %8525 = vmatprep.subr.bf16.mxu1 %v11897_v43 }
 0x720   :  { %v1638_v59 = vpop.f32.mrb[10].mxu0  ;;  %v1709_v2 = vpop.f32.mrb[10].mxu1 }
 0x721   :  { %v10454_v60 = vadd.f32 %v1638_v59, %v12087_v50  ;;  %v1640_v7 = vpop.f32.mrb[11].mxu0  ;;  %v1711_v20 = vpop.f32.mrb[11].mxu1  ;;  %v10470_v0 = vadd.f32 %v1709_v2, %v12103_v17 }
 0x722   :  { %v10455_v15 = vadd.f32 %v1640_v7, %v12090_v53  ;;  %v10471_v38 = vadd.f32 %v1711_v20, %v12097_v11  ;;  %v12386_v20 = vpop.permute.xlu1 %1744 }
 0x723   :  { %v7849_v34 = vmul.f32 -1.442695, %v10454_v60  ;;  %14110 = vst [vmem:[#allocation44_spill] sm:$0xff] %v12386_v20  ;;  %vm1746_vm13 = vcmp.eq.s32.totalorder %v12386_v20, 1 }
 0x724   :  { %v7850_v30 = vmul.f32 -1.442695, %v10455_v15  ;;  %v7851_v41 = vmul.f32 -1.442695, %v10471_v38 }
 0x725   :  { %10802 = vpow2.f32 %v7849_v34 }
 0x726   :  { %10804 = vpow2.f32 %v7850_v30 }
 0x727   :  { %10806 = vpow2.f32 %v7851_v41 }
 0x728   :  { %10808 = vtanh.f32 %v10470_v0 }
 0x72f   :  { %v10803_v40 = vpop.eup %10802 }
 0x730   :  { %v10805_v46 = vpop.eup %10804  ;;  %v1721_v43 = vadd.f32 1.0, %v10803_v40 }
 0x731   :  { %v1727_v1 = vadd.f32 1.0, %v10805_v46  ;;  %v10807_v59 = vpop.eup %10806  ;;  %v2113_v46 = vld [vmem:[#allocation9] sm:$0xff] }
 0x732   :  { %10810 = vrcp.f32 %v1721_v43  ;;  %v10809_v54 = vpop.eup %10808  ;;  %v1734_v34 = vadd.f32 1.0, %v10807_v59  ;;  %v2117_v43 = vld [vmem:[#allocation9 + $0x20] sm:$0xff]  ;;  %v2115_v59 = vld [vmem:[#allocation9 + $0x10] sm:$0xff] }
 0x733   :  { %10812 = vrcp.f32 %v1727_v1  ;;  %v2122_v1 = vld [vmem:[#allocation9 + $0x48] sm:$0xff] }
 0x734   :  { %10814 = vrcp.f32 %v1734_v34  ;;  %v2124_v34 = vld [vmem:[#allocation9 + $0x58] sm:$0xff] }
 0x73c   :  { %v10811_v7 = vpop.eup %10810 }
 0x73d   :  { %v10813_v60 = vpop.eup %10812  ;;  %v1738_v15 = vmul.f32 %v10811_v7, %v10809_v54  ;;  %v2119_v7 = vld [vmem:[#allocation9 + $0x30] sm:$0xff] }
 0x73e   :  { %v1737_v30 = vmul.f32 %v10813_v60, %v12338_v10  ;;  %v10815_v41 = vpop.eup %10814 }
 0x740   :  { %v1739_v38 = vadd.f32 %v1738_v15, %v1737_v30  ;;  %v2126_v15 = vld [vmem:[#allocation9 + $0x68] sm:$0xff]  ;;  %v2128_v30 = vld [vmem:[#allocation9 + $0x78] sm:$0xff] }
 0x742   :  { %10816 = vtanh.f32 %v1739_v38  ;;  %v12392_v2 = vsel %vm1746_vm13, %v1739_v38, %v12338_v10 }
 0x74c   :  { %v10817_v0 = vpop.eup %10816 }
 0x74d   :  { %v1741_v40 = vmul.f32 %v10817_v0, %v10815_v41  ;;  %v8558_v0 = vpack.c.bf16 %v2117_v43, %v2113_v46  ;;  %v2139_v46 = vld [vmem:[#allocation9 + $0xd0] sm:$0xff] }
 0x74e   :  { %v2143_v43 = vld [vmem:[#allocation9 + $0xf0] sm:$0xff] }
 0x74f   :  { %v12397_v54 = vsel %vm1746_vm13, %v1741_v40, %v12343_v21  ;;  %v2121_v40 = vld [vmem:[#allocation9 + $0x40] sm:$0xff] }
 0x750   :  { %14111 = vst [vmem:[#allocation45_spill] sm:$0xff] %v12397_v54  ;;  %1819 = vmatmul.mubr.f32.vlgmr.msra.gmra.mrb[12].mxu0 %v12397_v54  ;;  %1890 = vmatmul.mubr.f32.vlgmr.msra.gmra.mrb[12].mxu1 %v12397_v54 }
 0x751   :  { %8495 = vmatpush1.bf16.msra.mxu0 %v11902_v49  ;;  %8527 = vmatpush1.bf16.msra.mxu1 %v11905_v52  ;;  %v2114_v49 = vld [vmem:[#allocation9 + $0x8] sm:$0xff] }
 0x752   :  { %8497 = vmatprep.subr.bf16.mxu0 %v11908_v55  ;;  %8529 = vmatprep.subr.bf16.mxu1 %v11910_v58  ;;  %v2118_v52 = vld [vmem:[#allocation9 + $0x28] sm:$0xff]  ;;  %v2116_v58 = vld [vmem:[#allocation9 + $0x18] sm:$0xff] }
 0x753   :  { %2000 = vmatprep.mubr.f32.mxu0 %v14109_v27  ;;  %2071 = vmatprep.mubr.f32.mxu1 %v14109_v27  ;;  %v8556_v55 = vpack.c.bf16 %v2118_v52, %v2114_v49  ;;  %v2125_v49 = vld [vmem:[#allocation9 + $0x60] sm:$0xff]  ;;  %v8590_v52 = vpack.c.bf16 %v2119_v7, %v2115_v59  ;;  %v2148_v59 = vld [vmem:[#allocation9 + $0x118] sm:$0xff] }
 0x754   :  { %v2152_v7 = vld [vmem:[#allocation9 + $0x138] sm:$0xff] }
 0x755   :  { %8499 = vmatpush1.bf16.msra.mxu0 %v11916_v62  ;;  %8531 = vmatpush1.bf16.msra.mxu1 %v11920_v3  ;;  %v2120_v62 = vld [vmem:[#allocation9 + $0x38] sm:$0xff] }
 0x756   :  { %8501 = vmatprep.subr.bf16.mxu0 %v11924_v6  ;;  %8533 = vmatprep.subr.bf16.mxu1 %v11927_v9  ;;  %v8588_v3 = vpack.c.bf16 %v2120_v62, %v2116_v58  ;;  %v2130_v58 = vld [vmem:[#allocation9 + $0x88] sm:$0xff]  ;;  %v8592_v62 = vpack.c.bf16 %v2128_v30, %v2124_v34  ;;  %v2149_v34 = vld [vmem:[#allocation9 + $0x120] sm:$0xff]  ;;  %v8602_v30 = vpack.c.bf16 %v2143_v43, %v2139_v46 }
 0x757   :  { %v2169_v46 = vld [vmem:[#allocation9 + $0x1c0] sm:$0xff] }
 0x758   :  { %v2173_v43 = vld [vmem:[#allocation9 + $0x1e0] sm:$0xff] }
 0x759   :  { %8503 = vmatpush1.bf16.msra.mxu0 %v11933_v13  ;;  %8535 = vmatpush1.bf16.msra.mxu1 %v11937_v16 }
 0x75a   :  { %8505 = vmatprep.subr.bf16.mxu0 %v11941_v19  ;;  %8537 = vmatprep.subr.bf16.mxu1 %v11944_v22 }
 0x75d   :  { %8507 = vmatpush1.bf16.msra.mxu0 %v11950_v26  ;;  %8539 = vmatpush1.bf16.msra.mxu1 %v11954_v29 }
 0x75e   :  { %8509 = vmatprep.subr.bf16.mxu0 %v11958_v32  ;;  %8541 = vmatprep.subr.bf16.mxu1 %v11961_v35 }
 0x761   :  { %8511 = vmatpush1.bf16.msra.mxu0 %v11967_v39  ;;  %8543 = vmatpush1.bf16.msra.mxu1 %v11971_v44 }
 0x762   :  { %8513 = vmatprep.subr.bf16.mxu0 %v11975_v47  ;;  %8545 = vmatprep.subr.bf16.mxu1 %v11978_v51 }
 0x765   :  { %8515 = vmatpush1.bf16.msra.mxu0 %v11984_v57  ;;  %8547 = vmatpush1.bf16.msra.mxu1 %v11988_v61 }
 0x766   :  { %8517 = vmatprep.subr.bf16.mxu0 %v11992_v4  ;;  %8549 = vmatprep.subr.bf16.mxu1 %v11995_v8 }
 0x769   :  { %8519 = vmatpush1.bf16.msra.mxu0 %v12001_v14  ;;  %8551 = vmatpush1.bf16.msra.mxu1 %v12005_v18 }
 0x76a   :  { %8521 = vmatprep.subr.bf16.mxu0 %v12014_v24  ;;  %8553 = vmatprep.subr.bf16.mxu1 %v12017_v28  ;;  %v12437_v28 = vpop.permute.xlu0 %1926 }
 0x76b   :  { %14112 = vst [vmem:[#allocation46_spill] sm:$0xff] %v12437_v28  ;;  %vm1928_vm14 = vcmp.eq.s32.totalorder %v12437_v28, 1 }
 0x76d   :  { %8523 = vmatpush1.bf16.msra.mxu0 %v12023_v31  ;;  %8555 = vmatpush1.bf16.msra.mxu1 %v12028_v33 }
 0x76e   :  { %8557 = vmatprep.subr.bf16.mxu0 %v8556_v55  ;;  %8589 = vmatprep.subr.bf16.mxu1 %v8588_v3  ;;  %v8560_v55 = vpack.c.bf16 %v2126_v15, %v2122_v1  ;;  %v2127_v3 = vld [vmem:[#allocation9 + $0x70] sm:$0xff]  ;;  %v2150_v1 = vld [vmem:[#allocation9 + $0x128] sm:$0xff]  ;;  %v2145_v15 = vld [vmem:[#allocation9 + $0x100] sm:$0xff] }
 0x823   :  { %v1820_v6 = vpop.f32.mrb[12].mxu0  ;;  %v1891_v9 = vpop.f32.mrb[12].mxu1 }
 0x824   :  { %v10456_v13 = vadd.f32 %v1820_v6, %v12087_v50  ;;  %v1822_v16 = vpop.f32.mrb[13].mxu0  ;;  %v1893_v19 = vpop.f32.mrb[13].mxu1  ;;  %v10472_v39 = vadd.f32 %v1891_v9, %v12103_v17  ;;  %v2134_v9 = vld [vmem:[#allocation9 + $0xa8] sm:$0xff] }
 0x825   :  { %v10457_v22 = vadd.f32 %v1822_v16, %v12090_v53  ;;  %v10473_v32 = vadd.f32 %v1893_v19, %v12097_v11  ;;  %v2136_v16 = vld [vmem:[#allocation9 + $0xb8] sm:$0xff]  ;;  %v8562_v19 = vpack.c.bf16 %v2125_v49, %v2121_v40  ;;  %v2147_v40 = vld [vmem:[#allocation9 + $0x110] sm:$0xff] }
 0x826   :  { %v7852_v26 = vmul.f32 -1.442695, %v10456_v13  ;;  %v2132_v13 = vld [vmem:[#allocation9 + $0x98] sm:$0xff]  ;;  %v2151_v49 = vld [vmem:[#allocation9 + $0x130] sm:$0xff] }
 0x827   :  { %v7853_v29 = vmul.f32 -1.442695, %v10457_v22  ;;  %v7854_v35 = vmul.f32 -1.442695, %v10473_v32  ;;  %v2129_v22 = vld [vmem:[#allocation9 + $0x80] sm:$0xff]  ;;  %v8564_v32 = vpack.c.bf16 %v2134_v9, %v2130_v58  ;;  %v2160_v58 = vld [vmem:[#allocation9 + $0x178] sm:$0xff]  ;;  %v8606_v9 = vpack.c.bf16 %v2151_v49, %v2147_v40 }
 0x828   :  { %10818 = vpow2.f32 %v7852_v26  ;;  %v2133_v26 = vld [vmem:[#allocation9 + $0xa0] sm:$0xff] }
 0x829   :  { %10820 = vpow2.f32 %v7853_v29 }
 0x82a   :  { %10822 = vpow2.f32 %v7854_v35  ;;  %v2138_v35 = vld [vmem:[#allocation9 + $0xc8] sm:$0xff] }
 0x82b   :  { %10824 = vtanh.f32 %v10472_v39  ;;  %v8596_v39 = vpack.c.bf16 %v2136_v16, %v2132_v13  ;;  %v2162_v16 = vld [vmem:[#allocation9 + $0x188] sm:$0xff] }
 0x832   :  { %v10819_v44 = vpop.eup %10818 }
 0x833   :  { %v10821_v47 = vpop.eup %10820  ;;  %v1903_v51 = vadd.f32 1.0, %v10819_v44  ;;  %v2131_v44 = vld [vmem:[#allocation9 + $0x90] sm:$0xff] }
 0x834   :  { %v1909_v57 = vadd.f32 1.0, %v10821_v47  ;;  %v10823_v61 = vpop.eup %10822  ;;  %v2135_v47 = vld [vmem:[#allocation9 + $0xb0] sm:$0xff] }
 0x835   :  { %10826 = vrcp.f32 %v1903_v51  ;;  %v10825_v4 = vpop.eup %10824  ;;  %v1916_v24 = vadd.f32 1.0, %v10823_v61  ;;  %v2142_v51 = vld [vmem:[#allocation9 + $0xe8] sm:$0xff]  ;;  %v2144_v61 = vld [vmem:[#allocation9 + $0xf8] sm:$0xff] }
 0x836   :  { %10828 = vrcp.f32 %v1909_v57  ;;  %v2140_v57 = vld [vmem:[#allocation9 + $0xd8] sm:$0xff] }
 0x837   :  { %10830 = vrcp.f32 %v1916_v24  ;;  %v8568_v24 = vpack.c.bf16 %v2142_v51, %v2138_v35  ;;  %v2168_v35 = vld [vmem:[#allocation9 + $0x1b8] sm:$0xff] }
 0x83f   :  { %v10827_v8 = vpop.eup %10826 }
 0x840   :  { %v10829_v14 = vpop.eup %10828  ;;  %v1920_v18 = vmul.f32 %v10827_v8, %v10825_v4  ;;  %v8566_v4 = vpack.c.bf16 %v2133_v26, %v2129_v22  ;;  %v2137_v8 = vld [vmem:[#allocation9 + $0xc0] sm:$0xff]  ;;  %v2155_v22 = vld [vmem:[#allocation9 + $0x150] sm:$0xff] }
 0x841   :  { %v1919_v31 = vmul.f32 %v10829_v14, %v12392_v2  ;;  %v10831_v60 = vpop.eup %10830  ;;  %v2141_v14 = vld [vmem:[#allocation9 + $0xe0] sm:$0xff]  ;;  %v2159_v26 = vld [vmem:[#allocation9 + $0x170] sm:$0xff] }
 0x842   :  { %v8610_v51 = vpack.c.bf16 %v2159_v26, %v2155_v22  ;;  %v2469_v22 = vld [vmem:[#allocation11 + $0x60] sm:$0xff]  ;;  %v2474_v26 = vld [vmem:[#allocation11 + $0x88] sm:$0xff] }
 0x843   :  { %v1921_v33 = vadd.f32 %v1920_v18, %v1919_v31  ;;  %v8598_v18 = vpack.c.bf16 %v2135_v47, %v2131_v44  ;;  %v2146_v31 = vld [vmem:[#allocation9 + $0x108] sm:$0xff]  ;;  %v2161_v44 = vld [vmem:[#allocation9 + $0x180] sm:$0xff] }
 0x844   :  { %v2165_v47 = vld [vmem:[#allocation9 + $0x1a0] sm:$0xff] }
 0x845   :  { %10832 = vtanh.f32 %v1921_v33  ;;  %v12444_v10 = vsel %vm1928_vm14, %v1921_v33, %v12392_v2  ;;  %v2123_v2 = vld [vmem:[#allocation9 + $0x50] sm:$0xff]  ;;  %v8600_v33 = vpack.c.bf16 %v2144_v61, %v2140_v57  ;;  %v2170_v61 = vld [vmem:[#allocation9 + $0x1c8] sm:$0xff] }
 0x846   :  { %v8594_v29 = vpack.c.bf16 %v2127_v3, %v2123_v2  ;;  %v2153_v2 = vld [vmem:[#allocation9 + $0x140] sm:$0xff] }
 0x847   :  { %v2157_v3 = vld [vmem:[#allocation9 + $0x160] sm:$0xff] }
 0x84f   :  { %v10833_v38 = vpop.eup %10832 }
 0x850   :  { %v1923_v41 = vmul.f32 %v10833_v38, %v10831_v60  ;;  %v8570_v60 = vpack.c.bf16 %v2141_v14, %v2137_v8  ;;  %v8572_v38 = vpack.c.bf16 %v2150_v1, %v2146_v31  ;;  %v2163_v8 = vld [vmem:[#allocation9 + $0x190] sm:$0xff]  ;;  %v2176_v31 = vld [vmem:[#allocation9 + $0x1f8] sm:$0xff] }
 0x851   :  { %v2167_v14 = vld [vmem:[#allocation9 + $0x1b0] sm:$0xff] }
 0x852   :  { %v12449_v6 = vsel %vm1928_vm14, %v1923_v41, %v12397_v54  ;;  %v2154_v41 = vld [vmem:[#allocation9 + $0x148] sm:$0xff]  ;;  %v8614_v1 = vpack.c.bf16 %v2167_v14, %v2163_v8 }
 0x853   :  { %14113 = vst [vmem:[#allocation47_spill] sm:$0xff] %v12449_v6  ;;  %2001 = vmatmul.mubr.f32.vlgmr.msra.gmra.mrb[14].mxu0 %v12449_v6  ;;  %2072 = vmatmul.mubr.f32.vlgmr.msra.gmra.mrb[14].mxu1 %v12449_v6  ;;  %v2486_v8 = vld [vmem:[#allocation11 + $0xe8] sm:$0xff] }
 0x854   :  { %8559 = vmatpush1.bf16.msra.mxu0 %v8558_v0  ;;  %8591 = vmatpush1.bf16.msra.mxu1 %v8590_v52  ;;  %v8604_v0 = vpack.c.bf16 %v2152_v7, %v2148_v59  ;;  %v2158_v52 = vld [vmem:[#allocation9 + $0x168] sm:$0xff] }
 0x855   :  { %8561 = vmatprep.subr.bf16.mxu0 %v8560_v55  ;;  %8593 = vmatprep.subr.bf16.mxu1 %v8592_v62  ;;  %v2156_v55 = vld [vmem:[#allocation9 + $0x158] sm:$0xff]  ;;  %v8574_v62 = vpack.c.bf16 %v2149_v34, %v2145_v15  ;;  %v8576_v13 = vpack.c.bf16 %v2158_v52, %v2154_v41  ;;  %v2458_v7 = vld [vmem:[#allocation11 + $0x8] sm:$0xff]  ;;  %v2171_v15 = vld [vmem:[#allocation9 + $0x1d0] sm:$0xff] }
 0x856   :  { %2263 = vmatprep.mubr.f32.mxu0 %v14109_v27  ;;  %2376 = vmatprep.mubr.f32.mxu1 %v14109_v27  ;;  %v2175_v34 = vld [vmem:[#allocation9 + $0x1f0] sm:$0xff]  ;;  %v2464_v41 = vld [vmem:[#allocation11 + $0x38] sm:$0xff]  ;;  %v2457_v52 = vld [vmem:[#allocation11] sm:$0xff] }
 0x857   :  { %v8618_v40 = vpack.c.bf16 %v2175_v34, %v2171_v15  ;;  %v2490_v15 = vld [vmem:[#allocation11 + $0x108] sm:$0xff] }
 0x858   :  { %8563 = vmatpush1.bf16.msra.mxu0 %v8562_v19  ;;  %8595 = vmatpush1.bf16.msra.mxu1 %v8594_v29  ;;  %v8608_v19 = vpack.c.bf16 %v2160_v58, %v2156_v55  ;;  %v2166_v29 = vld [vmem:[#allocation9 + $0x1a8] sm:$0xff]  ;;  %v2461_v55 = vld [vmem:[#allocation11 + $0x20] sm:$0xff] }
 0x859   :  { %8565 = vmatprep.subr.bf16.mxu0 %v8564_v32  ;;  %8597 = vmatprep.subr.bf16.mxu1 %v8596_v39  ;;  %v2164_v32 = vld [vmem:[#allocation9 + $0x198] sm:$0xff]  ;;  %v8578_v39 = vpack.c.bf16 %v2157_v3, %v2153_v2  ;;  %v8580_v57 = vpack.c.bf16 %v2166_v29, %v2162_v16  ;;  %v2470_v2 = vld [vmem:[#allocation11 + $0x68] sm:$0xff]  ;;  %v2459_v3 = vld [vmem:[#allocation11 + $0x10] sm:$0xff] }
 0x85a   :  { %v2478_v29 = vld [vmem:[#allocation11 + $0xa8] sm:$0xff] }
 0x85b   :  { %v2494_v34 = vld [vmem:[#allocation11 + $0x128] sm:$0xff] }
 0x85c   :  { %8567 = vmatpush1.bf16.msra.mxu0 %v8566_v4  ;;  %8599 = vmatpush1.bf16.msra.mxu1 %v8598_v18  ;;  %v8612_v4 = vpack.c.bf16 %v2168_v35, %v2164_v32  ;;  %v2174_v18 = vld [vmem:[#allocation9 + $0x1e8] sm:$0xff]  ;;  %v11234_v35 = vld [vmem:[%s14032_s1] sm:$0xff] }
 0x85d   :  { %8569 = vmatprep.subr.bf16.mxu0 %v8568_v24  ;;  %8601 = vmatprep.subr.bf16.mxu1 %v8600_v33  ;;  %v2172_v24 = vld [vmem:[#allocation9 + $0x1d8] sm:$0xff]  ;;  %v8582_v33 = vpack.c.bf16 %v2165_v47, %v2161_v44  ;;  %v8584_v59 = vpack.c.bf16 %v2174_v18, %v2170_v61  ;;  %v2477_v61 = vld [vmem:[#allocation11 + $0xa0] sm:$0xff]  ;;  %v2467_v18 = vld [vmem:[#allocation11 + $0x50] sm:$0xff] }
 0x85e   :  { %v2472_v44 = vld [vmem:[#allocation11 + $0x78] sm:$0xff] }
 0x860   :  { %8571 = vmatpush1.bf16.msra.mxu0 %v8570_v60  ;;  %8603 = vmatpush1.bf16.msra.mxu1 %v8602_v30  ;;  %v8616_v60 = vpack.c.bf16 %v2176_v31, %v2172_v24  ;;  %v2462_v30 = vld [vmem:[#allocation11 + $0x28] sm:$0xff]  ;;  %v2471_v24 = vld [vmem:[#allocation11 + $0x70] sm:$0xff] }
 0x861   :  { %8573 = vmatprep.subr.bf16.mxu0 %v8572_v38  ;;  %8605 = vmatprep.subr.bf16.mxu1 %v8604_v0  ;;  %v2460_v38 = vld [vmem:[#allocation11 + $0x18] sm:$0xff]  ;;  %v8586_v0 = vpack.c.bf16 %v2173_v43, %v2169_v46  ;;  %v12455_v49 = vpack.c.bf16 %v2462_v30, %v2458_v7  ;;  %v11235_v31 = vld [vmem:[%s14032_s1 + $0x8] sm:$0xff] }
 0x862   :  { %v12457_v58 = vpack.c.bf16 %v2464_v41, %v2460_v38  ;;  %v2480_v46 = vld [vmem:[#allocation11 + $0xb8] sm:$0xff]  ;;  %v2485_v7 = vld [vmem:[#allocation11 + $0xe0] sm:$0xff]  ;;  %v2475_v38 = vld [vmem:[#allocation11 + $0x90] sm:$0xff] }
 0x863   :  { %v2479_v41 = vld [vmem:[#allocation11 + $0xb0] sm:$0xff] }
 0x864   :  { %8575 = vmatpush1.bf16.msra.mxu0 %v8574_v62  ;;  %8607 = vmatpush1.bf16.msra.mxu1 %v8606_v9  ;;  %v2466_v62 = vld [vmem:[#allocation11 + $0x48] sm:$0xff]  ;;  %v2463_v9 = vld [vmem:[#allocation11 + $0x30] sm:$0xff] }
 0x865   :  { %8577 = vmatprep.subr.bf16.mxu0 %v8576_v13  ;;  %8609 = vmatprep.subr.bf16.mxu1 %v8608_v19  ;;  %v12459_v13 = vpack.c.bf16 %v2461_v55, %v2457_v52  ;;  %v12462_v16 = vpack.c.bf16 %v2470_v2, %v2466_v62  ;;  %v2465_v19 = vld [vmem:[#allocation11 + $0x40] sm:$0xff]  ;;  %v12465_v32 = vpack.c.bf16 %v2463_v9, %v2459_v3  ;;  %v2488_v52 = vld [vmem:[#allocation11 + $0xf8] sm:$0xff] }
 0x866   :  { %v12472_v47 = vpack.c.bf16 %v2469_v22, %v2465_v19  ;;  %v12506_v62 = vpack.c.bf16 %v2494_v34, %v2490_v15  ;;  %v2489_v2 = vld [vmem:[#allocation11 + $0x100] sm:$0xff]  ;;  %v12508_v9 = vpack.c.bf16 %v2479_v41, %v2475_v38  ;;  %v2483_v19 = vld [vmem:[#allocation11 + $0xd0] sm:$0xff]  ;;  %v2500_v34 = vld [vmem:[#allocation11 + $0x158] sm:$0xff] }
 0x867   :  { %v2493_v3 = vld [vmem:[#allocation11 + $0x120] sm:$0xff]  ;;  %v2504_v38 = vld [vmem:[#allocation11 + $0x178] sm:$0xff] }
 0x868   :  { %8579 = vmatpush1.bf16.msra.mxu0 %v8578_v39  ;;  %8611 = vmatpush1.bf16.msra.mxu1 %v8610_v51  ;;  %v2468_v39 = vld [vmem:[#allocation11 + $0x58] sm:$0xff]  ;;  %v12476_v51 = vpack.c.bf16 %v2478_v29, %v2474_v26  ;;  %v2498_v26 = vld [vmem:[#allocation11 + $0x148] sm:$0xff] }
 0x869   :  { %8581 = vmatprep.subr.bf16.mxu0 %v8580_v57  ;;  %8613 = vmatprep.subr.bf16.mxu1 %v8612_v4  ;;  %v2473_v57 = vld [vmem:[#allocation11 + $0x80] sm:$0xff]  ;;  %v2482_v4 = vld [vmem:[#allocation11 + $0xc8] sm:$0xff]  ;;  %v12479_v14 = vpack.c.bf16 %v2472_v44, %v2468_v39  ;;  %v11237_v39 = vld [vmem:[%s14032_s1 + $0x18] sm:$0xff] }
 0x86a   :  { %v12486_v43 = vpack.c.bf16 %v2477_v61, %v2473_v57  ;;  %v2502_v29 = vld [vmem:[#allocation11 + $0x168] sm:$0xff]  ;;  %v2492_v44 = vld [vmem:[#allocation11 + $0x118] sm:$0xff]  ;;  %v12519_v61 = vpack.c.bf16 %v2493_v3, %v2489_v2  ;;  %v2509_v2 = vld [vmem:[#allocation11 + $0x1a0] sm:$0xff] }
 0x86b   :  { %v2496_v57 = vld [vmem:[#allocation11 + $0x138] sm:$0xff]  ;;  %v2499_v3 = vld [vmem:[#allocation11 + $0x150] sm:$0xff] }
 0x86c   :  { %8583 = vmatpush1.bf16.msra.mxu0 %v8582_v33  ;;  %8615 = vmatpush1.bf16.msra.mxu1 %v8614_v1  ;;  %v2476_v33 = vld [vmem:[#allocation11 + $0x98] sm:$0xff]  ;;  %v12490_v1 = vpack.c.bf16 %v2486_v8, %v2482_v4  ;;  %v12523_v4 = vpack.c.bf16 %v2502_v29, %v2498_v26  ;;  %v2503_v26 = vld [vmem:[#allocation11 + $0x170] sm:$0xff]  ;;  %v2514_v29 = vld [vmem:[#allocation11 + $0x1c8] sm:$0xff] }
 0x86d   :  { %8585 = vmatprep.subr.bf16.mxu0 %v8584_v59  ;;  %8617 = vmatprep.subr.bf16.mxu1 %v8616_v60  ;;  %v2481_v59 = vld [vmem:[#allocation11 + $0xc0] sm:$0xff]  ;;  %v12492_v60 = vpack.c.bf16 %v2471_v24, %v2467_v18  ;;  %v12495_v30 = vpack.c.bf16 %v2480_v46, %v2476_v33  ;;  %v12529_v33 = vpack.c.bf16 %v2496_v57, %v2492_v44  ;;  %v2506_v46 = vld [vmem:[#allocation11 + $0x188] sm:$0xff]  ;;  %v2508_v44 = vld [vmem:[#allocation11 + $0x198] sm:$0xff] }
 0x86e   :  { %v12502_v55 = vpack.c.bf16 %v2485_v7, %v2481_v59  ;;  %v2497_v18 = vld [vmem:[#allocation11 + $0x140] sm:$0xff]  ;;  %v2510_v59 = vld [vmem:[#allocation11 + $0x1a8] sm:$0xff]  ;;  %v2495_v7 = vld [vmem:[#allocation11 + $0x130] sm:$0xff] }
 0x86f   :  { %v2501_v24 = vld [vmem:[#allocation11 + $0x160] sm:$0xff]  ;;  %v2512_v57 = vld [vmem:[#allocation11 + $0x1b8] sm:$0xff] }
 0x870   :  { %8587 = vmatpush1.bf16.msra.mxu0 %v8586_v0  ;;  %8619 = vmatpush1.bf16.msra.mxu1 %v8618_v40  ;;  %v11236_v0 = vld [vmem:[%s14032_s1 + $0x10] sm:$0xff]  ;;  %v2484_v40 = vld [vmem:[#allocation11 + $0xd8] sm:$0xff]  ;;  %v12536_v41 = vpack.c.bf16 %v2501_v24, %v2497_v18  ;;  %v12557_v24 = vpack.c.bf16 %v2503_v26, %v2499_v3 }
 0x871   :  { %8621 = vmatprep.subr.bf16.mxu0 %v12455_v49  ;;  %8653 = vmatprep.subr.bf16.mxu1 %v12457_v58  ;;  %v12512_v22 = vpack.c.bf16 %v2488_v52, %v2484_v40  ;;  %v11238_v15 = vld [vmem:[%s14032_s1 + $0x20] sm:$0xff] }
 0x872   :  { %v2505_v52 = vld [vmem:[#allocation11 + $0x180] sm:$0xff] }
 0x873   :  { %2264 = vmatmul.mubr.f32.vlgmr.msra.gmra.mrb[16].mxu0 %v11234_v35  ;;  %2377 = vmatmul.mubr.f32.vlgmr.msra.gmra.mrb[16].mxu1 %v11234_v35  ;;  %v2487_v35 = vld [vmem:[#allocation11 + $0xf0] sm:$0xff]  ;;  %v12553_v18 = vpack.c.bf16 %v2509_v2, %v2505_v52  ;;  %v2516_v52 = vld [vmem:[#allocation11 + $0x1d8] sm:$0xff] }
 0x874   :  { %8623 = vmatpush1.bf16.msra.mxu0 %v12459_v13  ;;  %2269 = vmatprep.mubr.f32.mxu0 %v14109_v27  ;;  %v12525_v8 = vpack.c.bf16 %v2487_v35, %v2483_v19  ;;  %v12546_v19 = vpack.c.bf16 %v2504_v38, %v2500_v34  ;;  %v2518_v35 = vld [vmem:[#allocation11 + $0x1e8] sm:$0xff]  ;;  %v2511_v34 = vld [vmem:[#allocation11 + $0x1b0] sm:$0xff]  ;;  %v2520_v2 = vld [vmem:[#allocation11 + $0x1f8] sm:$0xff] }
 0x875   :  { %8625 = vmatprep.subr.bf16.mxu0 %v12462_v16  ;;  %2382 = vmatprep.mubr.f32.mxu1 %v14109_v27  ;;  %v11240_v38 = vld [vmem:[%s14032_s1 + $0x30] sm:$0xff] }
 0x876   :  { %8655 = vmatpush1.bf16.msra.mxu1 %v12465_v32 }
 0x877   :  { %2270 = vmatmul.mubr.f32.gmra.mrb[18].mxu0 %v11235_v31  ;;  %2383 = vmatmul.mubr.f32.gmra.mrb[18].mxu1 %v11235_v31  ;;  %v2491_v31 = vld [vmem:[#allocation11 + $0x110] sm:$0xff] }
 0x878   :  { %8627 = vmatpush1.bf16.msra.mxu0 %v12472_v47  ;;  %2275 = vmatprep.mubr.f32.mxu0 %v14109_v27  ;;  %v12542_v40 = vpack.c.bf16 %v2495_v7, %v2491_v31  ;;  %v12559_v31 = vpack.c.bf16 %v2518_v35, %v2514_v29  ;;  %v12563_v7 = vpack.c.bf16 %v2512_v57, %v2508_v44  ;;  %v2515_v35 = vld [vmem:[#allocation11 + $0x1d0] sm:$0xff] }
 0x879   :  { %8629 = vmatprep.subr.bf16.mxu0 %v12476_v51  ;;  %2388 = vmatprep.mubr.f32.mxu1 %v14109_v27  ;;  %v12578_v29 = vpack.c.bf16 %v2520_v2, %v2516_v52  ;;  %v11241_v44 = vld [vmem:[%s14032_s1 + $0x38] sm:$0xff] }
 0x87a   :  { %8657 = vmatprep.subr.bf16.mxu1 %v12479_v14 }
 0x87b   :  { %2276 = vmatmul.mubr.f32.gmra.mrb[20].mxu0 %v11236_v0  ;;  %2389 = vmatmul.mubr.f32.gmra.mrb[20].mxu1 %v11236_v0  ;;  %v12540_v0 = vpack.c.bf16 %v2510_v59, %v2506_v46  ;;  %v2513_v46 = vld [vmem:[#allocation11 + $0x1c0] sm:$0xff] }
 0x87c   :  { %8631 = vmatpush1.bf16.msra.mxu0 %v12486_v43  ;;  %2281 = vmatprep.mubr.f32.mxu0 %v14109_v27  ;;  %v2517_v59 = vld [vmem:[#allocation11 + $0x1e0] sm:$0xff] }
 0x87d   :  { %8633 = vmatprep.subr.bf16.mxu0 %v12490_v1  ;;  %8659 = vmatpush1.bf16.msra.mxu1 %v12492_v60  ;;  %v12570_v3 = vpack.c.bf16 %v2517_v59, %v2513_v46 }
 0x87e   :  { %2394 = vmatprep.mubr.f32.mxu1 %v14109_v27  ;;  %8661 = vmatprep.subr.bf16.mxu1 %v12495_v30 }
 0x87f   :  { %2282 = vmatmul.mubr.f32.gmra.mrb[22].mxu0 %v11237_v39  ;;  %2395 = vmatmul.mubr.f32.gmra.mrb[22].mxu1 %v11237_v39  ;;  %v11239_v39 = vld [vmem:[%s14032_s1 + $0x28] sm:$0xff] }
 0x880   :  { %2287 = vmatprep.mubr.f32.mxu0 %v14109_v27  ;;  %8635 = vmatpush1.bf16.msra.mxu0 %v12502_v55 }
 0x881   :  { %8637 = vmatprep.subr.bf16.mxu0 %v12506_v62  ;;  %8663 = vmatpush1.bf16.msra.mxu1 %v12508_v9 }
 0x882   :  { %2400 = vmatprep.mubr.f32.mxu1 %v14109_v27  ;;  %8665 = vmatprep.subr.bf16.mxu1 %v12512_v22 }
 0x883   :  { %2288 = vmatmul.mubr.f32.gmra.mrb[24].mxu0 %v11238_v15  ;;  %2401 = vmatmul.mubr.f32.gmra.mrb[24].mxu1 %v11238_v15  ;;  %v2507_v15 = vld [vmem:[#allocation11 + $0x190] sm:$0xff] }
 0x884   :  { %2293 = vmatprep.mubr.f32.mxu0 %v14109_v27  ;;  %8639 = vmatpush1.bf16.msra.mxu0 %v12519_v61  ;;  %v12574_v26 = vpack.c.bf16 %v2511_v34, %v2507_v15 }
 0x885   :  { %8641 = vmatprep.subr.bf16.mxu0 %v12523_v4  ;;  %8667 = vmatpush1.bf16.msra.mxu1 %v12525_v8 }
 0x886   :  { %2406 = vmatprep.mubr.f32.mxu1 %v14109_v27  ;;  %8669 = vmatprep.subr.bf16.mxu1 %v12529_v33 }
 0x887   :  { %2294 = vmatmul.mubr.f32.gmra.mrb[26].mxu0 %v11239_v39  ;;  %2407 = vmatmul.mubr.f32.gmra.mrb[26].mxu1 %v11239_v39  ;;  %v2519_v39 = vld [vmem:[#allocation11 + $0x1f0] sm:$0xff] }
 0x888   :  { %2299 = vmatprep.mubr.f32.mxu0 %v14109_v27  ;;  %8643 = vmatpush1.bf16.msra.mxu0 %v12536_v41  ;;  %v12586_v57 = vpack.c.bf16 %v2519_v39, %v2515_v35 }
 0x889   :  { %8645 = vmatprep.subr.bf16.mxu0 %v12540_v0  ;;  %8671 = vmatpush1.bf16.msra.mxu1 %v12542_v40 }
 0x88a   :  { %2412 = vmatprep.mubr.f32.mxu1 %v14109_v27  ;;  %8673 = vmatprep.subr.bf16.mxu1 %v12546_v19 }
 0x88b   :  { %2300 = vmatmul.mubr.f32.gmra.mrb[28].mxu0 %v11240_v38  ;;  %2413 = vmatmul.mubr.f32.gmra.mrb[28].mxu1 %v11240_v38 }
 0x88c   :  { %2305 = vmatprep.mubr.f32.mxu0 %v14109_v27  ;;  %8647 = vmatpush1.bf16.msra.mxu0 %v12553_v18 }
 0x88d   :  { %8675 = vmatpush1.bf16.msra.mxu1 %v12557_v24  ;;  %8649 = vmatprep.subr.bf16.mxu0 %v12559_v31 }
 0x88e   :  { %2418 = vmatprep.mubr.f32.mxu1 %v14109_v27  ;;  %8677 = vmatprep.subr.bf16.mxu1 %v12563_v7 }
 0x88f   :  { %2306 = vmatmul.mubr.f32.gmra.mrb[30].mxu0 %v11241_v44  ;;  %2419 = vmatmul.mubr.f32.gmra.mrb[30].mxu1 %v11241_v44 }
 0x890   :  { %8651 = vmatpush1.bf16.msra.mxu0 %v12570_v3  ;;  %2589 = vmatprep.mubr.f32.mxu0 %v14109_v27 }
 0x891   :  { %8679 = vmatpush1.bf16.msra.mxu1 %v12574_v26  ;;  %2660 = vmatprep.mubr.f32.mxu1 %v14109_v27 }
 0x892   :  { %8681 = vmatprep.subr.bf16.mxu1 %v12578_v29  ;;  %8685 = vmatprep.subr.bf16.mxu0 %v12455_v49 }
 0x895   :  { %8683 = vmatpush1.bf16.msra.mxu1 %v12586_v57 }
 0x896   :  { %8717 = vmatprep.subr.bf16.mxu1 %v12457_v58 }
 0x897   :  { %2590 = vmatmul.mubr.f32.vlgmr.msra.gmra.mrb[30].mxu0 %v14109_v27 }
 0x898   :  { %2661 = vmatmul.mubr.f32.vlgmr.msra.gmra.mrb[30].mxu1 %v14109_v27  ;;  %8687 = vmatpush1.bf16.msra.mxu0 %v12459_v13 }
 0x899   :  { %8719 = vmatpush1.bf16.msra.mxu1 %v12465_v32  ;;  %8689 = vmatprep.subr.bf16.mxu0 %v12462_v16 }
 0x89a   :  { %8721 = vmatprep.subr.bf16.mxu1 %v12479_v14  ;;  %2766 = vmatprep.mubr.f32.mxu0 %v14109_v27 }
 0x89b   :  { %2837 = vmatprep.mubr.f32.mxu1 %v14109_v27 }
 0x89c   :  { %8691 = vmatpush1.bf16.msra.mxu0 %v12472_v47 }
 0x89d   :  { %8723 = vmatpush1.bf16.msra.mxu1 %v12492_v60  ;;  %8693 = vmatprep.subr.bf16.mxu0 %v12476_v51 }
 0x89e   :  { %8725 = vmatprep.subr.bf16.mxu1 %v12495_v30 }
 0x8a0   :  { %8695 = vmatpush1.bf16.msra.mxu0 %v12486_v43 }
 0x8a1   :  { %8727 = vmatpush1.bf16.msra.mxu1 %v12508_v9  ;;  %8697 = vmatprep.subr.bf16.mxu0 %v12490_v1 }
 0x8a2   :  { %8729 = vmatprep.subr.bf16.mxu1 %v12512_v22 }
 0x8a4   :  { %8699 = vmatpush1.bf16.msra.mxu0 %v12502_v55 }
 0x8a5   :  { %8731 = vmatpush1.bf16.msra.mxu1 %v12525_v8  ;;  %8701 = vmatprep.subr.bf16.mxu0 %v12506_v62 }
 0x8a6   :  { %8733 = vmatprep.subr.bf16.mxu1 %v12529_v33 }
 0x8a8   :  { %8703 = vmatpush1.bf16.msra.mxu0 %v12519_v61 }
 0x8a9   :  { %8735 = vmatpush1.bf16.msra.mxu1 %v12542_v40  ;;  %8705 = vmatprep.subr.bf16.mxu0 %v12523_v4 }
 0x8aa   :  { %8737 = vmatprep.subr.bf16.mxu1 %v12546_v19 }
 0x8ac   :  { %8707 = vmatpush1.bf16.msra.mxu0 %v12536_v41 }
 0x8ad   :  { %8739 = vmatpush1.bf16.msra.mxu1 %v12557_v24  ;;  %8709 = vmatprep.subr.bf16.mxu0 %v12540_v0 }
 0x8ae   :  { %8741 = vmatprep.subr.bf16.mxu1 %v12563_v7 }
 0x8b0   :  { %8711 = vmatpush1.bf16.msra.mxu0 %v12553_v18 }
 0x8b1   :  { %8743 = vmatpush1.bf16.msra.mxu1 %v12574_v26  ;;  %8713 = vmatprep.subr.bf16.mxu0 %v12559_v31 }
 0x8b2   :  { %8745 = vmatprep.subr.bf16.mxu1 %v12578_v29 }
 0x8b4   :  { %8715 = vmatpush1.bf16.msra.mxu0 %v12570_v3 }
 0x8b5   :  { %8747 = vmatpush1.bf16.msra.mxu1 %v12586_v57  ;;  %8749 = vmatprep.subr.bf16.mxu0 %v12455_v49 }
 0x8b6   :  { %8781 = vmatprep.subr.bf16.mxu1 %v12457_v58 }
 0x926   :  { %v2002_v46 = vpop.f32.mrb[14].mxu0  ;;  %v2073_v59 = vpop.f32.mrb[14].mxu1 }
 0x927   :  { %v10458_v15 = vadd.f32 %v2002_v46, %v12087_v50  ;;  %v2004_v34 = vpop.f32.mrb[15].mxu0  ;;  %v2075_v38 = vpop.f32.mrb[15].mxu1  ;;  %v10474_v6 = vadd.f32 %v2073_v59, %v12103_v17 }
 0x928   :  { %v10459_v52 = vadd.f32 %v2004_v34, %v12090_v53  ;;  %v10475_v39 = vadd.f32 %v2075_v38, %v12097_v11 }
 0x929   :  { %v7855_v2 = vmul.f32 -1.442695, %v10458_v15 }
 0x92a   :  { %v7856_v35 = vmul.f32 -1.442695, %v10459_v52  ;;  %v7857_v44 = vmul.f32 -1.442695, %v10475_v39 }
 0x92b   :  { %10834 = vpow2.f32 %v7855_v2 }
 0x92c   :  { %10836 = vpow2.f32 %v7856_v35 }
 0x92d   :  { %10838 = vpow2.f32 %v7857_v44 }
 0x92e   :  { %10840 = vtanh.f32 %v10474_v6 }
 0x935   :  { %v10835_v54 = vpop.eup %10834 }
 0x936   :  { %v10837_v21 = vpop.eup %10836  ;;  %v2085_v42 = vadd.f32 1.0, %v10835_v54  ;;  %v2177_v54 = vld [vmem:[#allocation12] sm:$0xf] }
 0x937   :  { %v2091_v5 = vadd.f32 1.0, %v10837_v21  ;;  %v10839_v50 = vpop.eup %10838  ;;  %v12637_v21 = vrot.slane %v2177_v54, %v12082_v45 }
 0x938   :  { %10842 = vrcp.f32 %v2085_v42  ;;  %v10841_v46 = vpop.eup %10840  ;;  %v2098_v52 = vadd.f32 1.0, %v10839_v50 }
 0x939   :  { %10844 = vrcp.f32 %v2091_v5  ;;  %v12640_v5 = vrot.slane %v2177_v54, %v12084_v48 }
 0x93a   :  { %10846 = vrcp.f32 %v2098_v52 }
 0x942   :  { %v10843_v53 = vpop.eup %10842 }
 0x943   :  { %v10845_v15 = vpop.eup %10844  ;;  %v2102_v34 = vmul.f32 %v10843_v53, %v10841_v46  ;;  %v12645_v53 = vrot.slane %v2177_v54, %v12092_v56 }
 0x944   :  { %v2101_v2 = vmul.f32 %v10845_v15, %v12444_v10  ;;  %v10847_v17 = vpop.eup %10846 }
 0x946   :  { %v2103_v11 = vadd.f32 %v2102_v34, %v2101_v2  ;;  %v12649_v34 = vrot.slane %v2177_v54, %v12099_v12 }
 0x948   :  { %10848 = vtanh.f32 %v2103_v11 }
 0x952   :  { %v10849_v59 = vpop.eup %10848 }
 0x953   :  { %v12634_v38 = vmul.f32 %v10849_v59, %v10847_v17 }
 0x96a   :  { %v2591_v42 = vpop.f32.mrb[30].mxu0 }
 0x96b   :  { %v10490_v6 = vadd.f32 %v2591_v42, %v12637_v21  ;;  %v2593_v35 = vpop.f32.mrb[31].mxu0  ;;  %v2662_v39 = vpop.f32.mrb[30].mxu1 }
 0x96c   :  { %v10491_v10 = vadd.f32 %v2593_v35, %v12640_v5  ;;  %v2664_v44 = vpop.f32.mrb[31].mxu1  ;;  %v10506_v2 = vadd.f32 %v2662_v39, %v12649_v34 }
 0x96d   :  { %v7858_v50 = vmul.f32 -1.442695, %v10490_v6  ;;  %v10507_v15 = vadd.f32 %v2664_v44, %v12645_v53 }
 0x96e   :  { %v7859_v46 = vmul.f32 -1.442695, %v10491_v10 }
 0x96f   :  { %10850 = vpow2.f32 %v7858_v50  ;;  %v7860_v52 = vmul.f32 -1.442695, %v10507_v15  ;;  %v12655_v15 = vpop.permute.xlu1 %2108 }
 0x970   :  { %10852 = vpow2.f32 %v7859_v46  ;;  %14114 = vst [vmem:[#allocation48_spill] sm:$0xff] %v12655_v15  ;;  %vm2110_vm15 = vcmp.eq.s32.totalorder %v12655_v15, 1 }
 0x971   :  { %10854 = vpow2.f32 %v7860_v52 }
 0x972   :  { %10856 = vtanh.f32 %v10506_v2 }
 0x979   :  { %v10851_v11 = vpop.eup %10850 }
 0x97a   :  { %v10853_v17 = vpop.eup %10852  ;;  %v2674_v59 = vadd.f32 1.0, %v10851_v11 }
 0x97b   :  { %v2680_v42 = vadd.f32 1.0, %v10853_v17  ;;  %v10855_v6 = vpop.eup %10854 }
 0x97c   :  { %10858 = vrcp.f32 %v2674_v59  ;;  %v10857_v35 = vpop.eup %10856  ;;  %v2687_v44 = vadd.f32 1.0, %v10855_v6 }
 0x97d   :  { %10860 = vrcp.f32 %v2680_v42 }
 0x97e   :  { %10862 = vrcp.f32 %v2687_v44 }
 0x986   :  { %v10859_v10 = vpop.eup %10858 }
 0x987   :  { %v10861_v50 = vpop.eup %10860  ;;  %v2691_v46 = vmul.f32 %v10859_v10, %v10857_v35 }
 0x988   :  { %v2690_v56 = vmul.f32 0.0, %v10861_v50  ;;  %v10863_v39 = vpop.eup %10862 }
 0x98a   :  { %v12652_v54 = vadd.f32 %v2691_v46, %v2690_v56 }
 0x98c   :  { %10864 = vtanh.f32 %v12652_v54 }
 0x996   :  { %v10865_v52 = vpop.eup %10864 }
 0x997   :  { %v12657_v11 = vmul.f32 %v10865_v52, %v10863_v39 }
 0x999   :  { %14115 = vst [vmem:[#allocation49_spill] sm:$0xff] %v12657_v11  ;;  %7861 = vmatmul.mubr.msk.f32.vlgmr.msra.gmra.mrb[28].mxu0 %vm2110_vm15, %v12657_v11  ;;  %7862 = vmatmul.mubr.msk.f32.vlgmr.msra.gmra.mrb[28].mxu1 %vm2110_vm15, %v12657_v11 }
 0x99a   :  { %8751 = vmatpush1.bf16.msra.mxu0 %v12459_v13  ;;  %8783 = vmatpush1.bf16.msra.mxu1 %v12465_v32 }
 0x99b   :  { %8753 = vmatprep.subr.bf16.mxu0 %v12462_v16  ;;  %8785 = vmatprep.subr.bf16.mxu1 %v12479_v14 }
 0x99c   :  { %2943 = vmatprep.mubr.f32.mxu0 %v14109_v27  ;;  %3014 = vmatprep.mubr.f32.mxu1 %v14109_v27 }
 0x99e   :  { %8755 = vmatpush1.bf16.msra.mxu0 %v12472_v47  ;;  %8787 = vmatpush1.bf16.msra.mxu1 %v12492_v60 }
 0x99f   :  { %8757 = vmatprep.subr.bf16.mxu0 %v12476_v51  ;;  %8789 = vmatprep.subr.bf16.mxu1 %v12495_v30 }
 0x9a2   :  { %8759 = vmatpush1.bf16.msra.mxu0 %v12486_v43  ;;  %8791 = vmatpush1.bf16.msra.mxu1 %v12508_v9 }
 0x9a3   :  { %8761 = vmatprep.subr.bf16.mxu0 %v12490_v1  ;;  %8793 = vmatprep.subr.bf16.mxu1 %v12512_v22 }
 0x9a6   :  { %8763 = vmatpush1.bf16.msra.mxu0 %v12502_v55  ;;  %8795 = vmatpush1.bf16.msra.mxu1 %v12525_v8 }
 0x9a7   :  { %8765 = vmatprep.subr.bf16.mxu0 %v12506_v62  ;;  %8797 = vmatprep.subr.bf16.mxu1 %v12529_v33 }
 0x9aa   :  { %8767 = vmatpush1.bf16.msra.mxu0 %v12519_v61  ;;  %8799 = vmatpush1.bf16.msra.mxu1 %v12542_v40 }
 0x9ab   :  { %8769 = vmatprep.subr.bf16.mxu0 %v12523_v4  ;;  %8801 = vmatprep.subr.bf16.mxu1 %v12546_v19 }
 0x9ae   :  { %8771 = vmatpush1.bf16.msra.mxu0 %v12536_v41  ;;  %8803 = vmatpush1.bf16.msra.mxu1 %v12557_v24 }
 0x9af   :  { %8773 = vmatprep.subr.bf16.mxu0 %v12540_v0  ;;  %8805 = vmatprep.subr.bf16.mxu1 %v12563_v7 }
 0x9b2   :  { %8775 = vmatpush1.bf16.msra.mxu0 %v12553_v18  ;;  %8807 = vmatpush1.bf16.msra.mxu1 %v12574_v26 }
 0x9b3   :  { %8777 = vmatprep.subr.bf16.mxu0 %v12559_v31  ;;  %8809 = vmatprep.subr.bf16.mxu1 %v12578_v29 }
 0x9b6   :  { %8779 = vmatpush1.bf16.msra.mxu0 %v12570_v3  ;;  %8811 = vmatpush1.bf16.msra.mxu1 %v12586_v57 }
 0x9b7   :  { %8813 = vmatprep.subr.bf16.mxu0 %v12455_v49  ;;  %8845 = vmatprep.subr.bf16.mxu1 %v12457_v58 }
 0xa6c   :  { %v2768_v56 = vpop.f32.mrb[28].mxu0  ;;  %v2839_v2 = vpop.f32.mrb[28].mxu1 }
 0xa6d   :  { %v10488_v17 = vadd.f32 %v2768_v56, %v12637_v21  ;;  %v2770_v59 = vpop.f32.mrb[29].mxu0  ;;  %v2841_v42 = vpop.f32.mrb[29].mxu1  ;;  %v10504_v44 = vadd.f32 %v2839_v2, %v12649_v34 }
 0xa6e   :  { %v10489_v6 = vadd.f32 %v2770_v59, %v12640_v5  ;;  %v10505_v50 = vadd.f32 %v2841_v42, %v12645_v53 }
 0xa6f   :  { %v7863_v35 = vmul.f32 -1.442695, %v10488_v17 }
 0xa70   :  { %v7864_v10 = vmul.f32 -1.442695, %v10489_v6  ;;  %v7865_v46 = vmul.f32 -1.442695, %v10505_v50  ;;  %v2696_v6 = vsel %vm2110_vm15, %v12652_v54, 0.0 }
 0xa71   :  { %10866 = vpow2.f32 %v7863_v35 }
 0xa72   :  { %10868 = vpow2.f32 %v7864_v10 }
 0xa73   :  { %10870 = vpow2.f32 %v7865_v46 }
 0xa74   :  { %10872 = vtanh.f32 %v10504_v44  ;;  %v2695_v44 = vsel %vm2110_vm15, %v12657_v11, 0.0 }
 0xa7b   :  { %v10867_v39 = vpop.eup %10866 }
 0xa7c   :  { %v10869_v52 = vpop.eup %10868  ;;  %v2851_v12 = vadd.f32 1.0, %v10867_v39 }
 0xa7d   :  { %v2857_v48 = vadd.f32 1.0, %v10869_v52  ;;  %v10871_v56 = vpop.eup %10870 }
 0xa7e   :  { %10874 = vrcp.f32 %v2851_v12  ;;  %v10873_v45 = vpop.eup %10872  ;;  %v2864_v35 = vadd.f32 1.0, %v10871_v56 }
 0xa7f   :  { %10876 = vrcp.f32 %v2857_v48 }
 0xa80   :  { %10878 = vrcp.f32 %v2864_v35 }
 0xa88   :  { %v10875_v59 = vpop.eup %10874 }
 0xa89   :  { %v10877_v17 = vpop.eup %10876  ;;  %v2868_v42 = vmul.f32 %v10875_v59, %v10873_v45 }
 0xa8a   :  { %v2867_v10 = vmul.f32 %v10877_v17, %v2696_v6  ;;  %v10879_v12 = vpop.eup %10878 }
 0xa8c   :  { %v2869_v2 = vadd.f32 %v2868_v42, %v2867_v10 }
 0xa8e   :  { %10880 = vtanh.f32 %v2869_v2  ;;  %v12709_v50 = vsel %vm1928_vm14, %v2869_v2, %v2696_v6 }
 0xa98   :  { %v10881_v48 = vpop.eup %10880 }
 0xa99   :  { %v2871_v46 = vmul.f32 %v10881_v48, %v10879_v12 }
 0xa9b   :  { %v12716_v54 = vsel %vm1928_vm14, %v2871_v46, %v2695_v44 }
 0xa9c   :  { %14116 = vst [vmem:[#allocation50_spill] sm:$0xff] %v12716_v54  ;;  %2944 = vmatmul.mubr.f32.vlgmr.msra.gmra.mrb[26].mxu0 %v12716_v54  ;;  %3015 = vmatmul.mubr.f32.vlgmr.msra.gmra.mrb[26].mxu1 %v12716_v54 }
 0xa9d   :  { %8815 = vmatpush1.bf16.msra.mxu0 %v12459_v13  ;;  %8847 = vmatpush1.bf16.msra.mxu1 %v12465_v32 }
 0xa9e   :  { %8817 = vmatprep.subr.bf16.mxu0 %v12462_v16  ;;  %8849 = vmatprep.subr.bf16.mxu1 %v12479_v14 }
 0xa9f   :  { %3120 = vmatprep.mubr.f32.mxu0 %v14109_v27  ;;  %3191 = vmatprep.mubr.f32.mxu1 %v14109_v27 }
 0xaa1   :  { %8819 = vmatpush1.bf16.msra.mxu0 %v12472_v47  ;;  %8851 = vmatpush1.bf16.msra.mxu1 %v12492_v60 }
 0xaa2   :  { %8821 = vmatprep.subr.bf16.mxu0 %v12476_v51  ;;  %8853 = vmatprep.subr.bf16.mxu1 %v12495_v30 }
 0xaa5   :  { %8823 = vmatpush1.bf16.msra.mxu0 %v12486_v43  ;;  %8855 = vmatpush1.bf16.msra.mxu1 %v12508_v9 }
 0xaa6   :  { %8825 = vmatprep.subr.bf16.mxu0 %v12490_v1  ;;  %8857 = vmatprep.subr.bf16.mxu1 %v12512_v22 }
 0xaa9   :  { %8827 = vmatpush1.bf16.msra.mxu0 %v12502_v55  ;;  %8859 = vmatpush1.bf16.msra.mxu1 %v12525_v8 }
 0xaaa   :  { %8829 = vmatprep.subr.bf16.mxu0 %v12506_v62  ;;  %8861 = vmatprep.subr.bf16.mxu1 %v12529_v33 }
 0xaad   :  { %8831 = vmatpush1.bf16.msra.mxu0 %v12519_v61  ;;  %8863 = vmatpush1.bf16.msra.mxu1 %v12542_v40 }
 0xaae   :  { %8833 = vmatprep.subr.bf16.mxu0 %v12523_v4  ;;  %8865 = vmatprep.subr.bf16.mxu1 %v12546_v19 }
 0xab1   :  { %8835 = vmatpush1.bf16.msra.mxu0 %v12536_v41  ;;  %8867 = vmatpush1.bf16.msra.mxu1 %v12557_v24 }
 0xab2   :  { %8837 = vmatprep.subr.bf16.mxu0 %v12540_v0  ;;  %8869 = vmatprep.subr.bf16.mxu1 %v12563_v7 }
 0xab5   :  { %8839 = vmatpush1.bf16.msra.mxu0 %v12553_v18  ;;  %8871 = vmatpush1.bf16.msra.mxu1 %v12574_v26 }
 0xab6   :  { %8841 = vmatprep.subr.bf16.mxu0 %v12559_v31  ;;  %8873 = vmatprep.subr.bf16.mxu1 %v12578_v29 }
 0xab9   :  { %8843 = vmatpush1.bf16.msra.mxu0 %v12570_v3  ;;  %8875 = vmatpush1.bf16.msra.mxu1 %v12586_v57 }
 0xaba   :  { %8877 = vmatprep.subr.bf16.mxu0 %v12455_v49  ;;  %8909 = vmatprep.subr.bf16.mxu1 %v12457_v58 }
 0xb6f   :  { %v2945_v45 = vpop.f32.mrb[26].mxu0  ;;  %v3016_v39 = vpop.f32.mrb[26].mxu1 }
 0xb70   :  { %v10486_v52 = vadd.f32 %v2945_v45, %v12637_v21  ;;  %v2947_v56 = vpop.f32.mrb[27].mxu0  ;;  %v3018_v59 = vpop.f32.mrb[27].mxu1  ;;  %v10502_v2 = vadd.f32 %v3016_v39, %v12649_v34 }
 0xb71   :  { %v10487_v17 = vadd.f32 %v2947_v56, %v12640_v5  ;;  %v10503_v35 = vadd.f32 %v3018_v59, %v12645_v53 }
 0xb72   :  { %v7866_v6 = vmul.f32 -1.442695, %v10486_v52 }
 0xb73   :  { %v7867_v42 = vmul.f32 -1.442695, %v10487_v17  ;;  %v7868_v10 = vmul.f32 -1.442695, %v10503_v35 }
 0xb74   :  { %10882 = vpow2.f32 %v7866_v6 }
 0xb75   :  { %10884 = vpow2.f32 %v7867_v42 }
 0xb76   :  { %10886 = vpow2.f32 %v7868_v10 }
 0xb77   :  { %10888 = vtanh.f32 %v10502_v2 }
 0xb7e   :  { %v10883_v12 = vpop.eup %10882 }
 0xb7f   :  { %v10885_v48 = vpop.eup %10884  ;;  %v3028_v46 = vadd.f32 1.0, %v10883_v12 }
 0xb80   :  { %v3034_v44 = vadd.f32 1.0, %v10885_v48  ;;  %v10887_v45 = vpop.eup %10886 }
 0xb81   :  { %10890 = vrcp.f32 %v3028_v46  ;;  %v10889_v28 = vpop.eup %10888  ;;  %v3041_v6 = vadd.f32 1.0, %v10887_v45 }
 0xb82   :  { %10892 = vrcp.f32 %v3034_v44 }
 0xb83   :  { %10894 = vrcp.f32 %v3041_v6 }
 0xb8b   :  { %v10891_v56 = vpop.eup %10890 }
 0xb8c   :  { %v10893_v52 = vpop.eup %10892  ;;  %v3045_v17 = vmul.f32 %v10891_v56, %v10889_v28 }
 0xb8d   :  { %v3044_v42 = vmul.f32 %v10893_v52, %v12709_v50  ;;  %v10895_v35 = vpop.eup %10894 }
 0xb8f   :  { %v3046_v59 = vadd.f32 %v3045_v17, %v3044_v42 }
 0xb91   :  { %10896 = vtanh.f32 %v3046_v59  ;;  %v12762_v39 = vsel %vm1746_vm13, %v3046_v59, %v12709_v50 }
 0xb9b   :  { %v10897_v10 = vpop.eup %10896 }
 0xb9c   :  { %v3048_v2 = vmul.f32 %v10897_v10, %v10895_v35 }
 0xb9e   :  { %v12767_v12 = vsel %vm1746_vm13, %v3048_v2, %v12716_v54 }
 0xb9f   :  { %14117 = vst [vmem:[#allocation51_spill] sm:$0xff] %v12767_v12  ;;  %3121 = vmatmul.mubr.f32.vlgmr.msra.gmra.mrb[24].mxu0 %v12767_v12  ;;  %3192 = vmatmul.mubr.f32.vlgmr.msra.gmra.mrb[24].mxu1 %v12767_v12 }
 0xba0   :  { %8879 = vmatpush1.bf16.msra.mxu0 %v12459_v13  ;;  %8911 = vmatpush1.bf16.msra.mxu1 %v12465_v32 }
 0xba1   :  { %8881 = vmatprep.subr.bf16.mxu0 %v12462_v16  ;;  %8913 = vmatprep.subr.bf16.mxu1 %v12479_v14 }
 0xba2   :  { %3297 = vmatprep.mubr.f32.mxu0 %v14109_v27  ;;  %3368 = vmatprep.mubr.f32.mxu1 %v14109_v27 }
 0xba4   :  { %8883 = vmatpush1.bf16.msra.mxu0 %v12472_v47  ;;  %8915 = vmatpush1.bf16.msra.mxu1 %v12492_v60 }
 0xba5   :  { %8885 = vmatprep.subr.bf16.mxu0 %v12476_v51  ;;  %8917 = vmatprep.subr.bf16.mxu1 %v12495_v30 }
 0xba8   :  { %8887 = vmatpush1.bf16.msra.mxu0 %v12486_v43  ;;  %8919 = vmatpush1.bf16.msra.mxu1 %v12508_v9 }
 0xba9   :  { %8889 = vmatprep.subr.bf16.mxu0 %v12490_v1  ;;  %8921 = vmatprep.subr.bf16.mxu1 %v12512_v22 }
 0xbac   :  { %8891 = vmatpush1.bf16.msra.mxu0 %v12502_v55  ;;  %8923 = vmatpush1.bf16.msra.mxu1 %v12525_v8 }
 0xbad   :  { %8893 = vmatprep.subr.bf16.mxu0 %v12506_v62  ;;  %8925 = vmatprep.subr.bf16.mxu1 %v12529_v33 }
 0xbb0   :  { %8895 = vmatpush1.bf16.msra.mxu0 %v12519_v61  ;;  %8927 = vmatpush1.bf16.msra.mxu1 %v12542_v40 }
 0xbb1   :  { %8897 = vmatprep.subr.bf16.mxu0 %v12523_v4  ;;  %8929 = vmatprep.subr.bf16.mxu1 %v12546_v19 }
 0xbb4   :  { %8899 = vmatpush1.bf16.msra.mxu0 %v12536_v41  ;;  %8931 = vmatpush1.bf16.msra.mxu1 %v12557_v24 }
 0xbb5   :  { %8901 = vmatprep.subr.bf16.mxu0 %v12540_v0  ;;  %8933 = vmatprep.subr.bf16.mxu1 %v12563_v7 }
 0xbb8   :  { %8903 = vmatpush1.bf16.msra.mxu0 %v12553_v18  ;;  %8935 = vmatpush1.bf16.msra.mxu1 %v12574_v26 }
 0xbb9   :  { %8905 = vmatprep.subr.bf16.mxu0 %v12559_v31  ;;  %8937 = vmatprep.subr.bf16.mxu1 %v12578_v29 }
 0xbbc   :  { %8907 = vmatpush1.bf16.msra.mxu0 %v12570_v3  ;;  %8939 = vmatpush1.bf16.msra.mxu1 %v12586_v57 }
 0xbbd   :  { %8941 = vmatprep.subr.bf16.mxu0 %v12455_v49  ;;  %8973 = vmatprep.subr.bf16.mxu1 %v12457_v58 }
 0xc72   :  { %v3122_v28 = vpop.f32.mrb[24].mxu0  ;;  %v3193_v50 = vpop.f32.mrb[24].mxu1 }
 0xc73   :  { %v10484_v48 = vadd.f32 %v3122_v28, %v12637_v21  ;;  %v3124_v46 = vpop.f32.mrb[25].mxu0  ;;  %v3195_v44 = vpop.f32.mrb[25].mxu1  ;;  %v10500_v42 = vadd.f32 %v3193_v50, %v12649_v34 }
 0xc74   :  { %v10485_v45 = vadd.f32 %v3124_v46, %v12640_v5  ;;  %v10501_v17 = vadd.f32 %v3195_v44, %v12645_v53 }
 0xc75   :  { %v7869_v56 = vmul.f32 -1.442695, %v10484_v48 }
 0xc76   :  { %v7870_v52 = vmul.f32 -1.442695, %v10485_v45  ;;  %v7871_v6 = vmul.f32 -1.442695, %v10501_v17 }
 0xc77   :  { %10898 = vpow2.f32 %v7869_v56 }
 0xc78   :  { %10900 = vpow2.f32 %v7870_v52 }
 0xc79   :  { %10902 = vpow2.f32 %v7871_v6 }
 0xc7a   :  { %10904 = vtanh.f32 %v10500_v42 }
 0xc81   :  { %v10899_v59 = vpop.eup %10898 }
 0xc82   :  { %v10901_v35 = vpop.eup %10900  ;;  %v3205_v10 = vadd.f32 1.0, %v10899_v59 }
 0xc83   :  { %v3211_v2 = vadd.f32 1.0, %v10901_v35  ;;  %v10903_v28 = vpop.eup %10902 }
 0xc84   :  { %10906 = vrcp.f32 %v3205_v10  ;;  %v10905_v20 = vpop.eup %10904  ;;  %v3218_v56 = vadd.f32 1.0, %v10903_v28 }
 0xc85   :  { %10908 = vrcp.f32 %v3211_v2 }
 0xc86   :  { %10910 = vrcp.f32 %v3218_v56 }
 0xc8e   :  { %v10907_v46 = vpop.eup %10906 }
 0xc8f   :  { %v10909_v48 = vpop.eup %10908  ;;  %v3222_v45 = vmul.f32 %v10907_v46, %v10905_v20 }
 0xc90   :  { %v3221_v52 = vmul.f32 %v10909_v48, %v12762_v39  ;;  %v10911_v17 = vpop.eup %10910 }
 0xc92   :  { %v3223_v44 = vadd.f32 %v3222_v45, %v3221_v52 }
 0xc94   :  { %10912 = vtanh.f32 %v3223_v44  ;;  %v12813_v50 = vsel %vm1564_vm12, %v3223_v44, %v12762_v39 }
 0xc9e   :  { %v10913_v6 = vpop.eup %10912 }
 0xc9f   :  { %v3225_v42 = vmul.f32 %v10913_v6, %v10911_v17 }
 0xca1   :  { %v12818_v59 = vsel %vm1564_vm12, %v3225_v42, %v12767_v12 }
 0xca2   :  { %14118 = vst [vmem:[#allocation52_spill] sm:$0xff] %v12818_v59  ;;  %3298 = vmatmul.mubr.f32.vlgmr.msra.gmra.mrb[22].mxu0 %v12818_v59  ;;  %3369 = vmatmul.mubr.f32.vlgmr.msra.gmra.mrb[22].mxu1 %v12818_v59 }
 0xca3   :  { %8943 = vmatpush1.bf16.msra.mxu0 %v12459_v13  ;;  %8975 = vmatpush1.bf16.msra.mxu1 %v12465_v32 }
 0xca4   :  { %8945 = vmatprep.subr.bf16.mxu0 %v12462_v16  ;;  %8977 = vmatprep.subr.bf16.mxu1 %v12479_v14 }
 0xca5   :  { %3474 = vmatprep.mubr.f32.mxu0 %v14109_v27  ;;  %3545 = vmatprep.mubr.f32.mxu1 %v14109_v27 }
 0xca7   :  { %8947 = vmatpush1.bf16.msra.mxu0 %v12472_v47  ;;  %8979 = vmatpush1.bf16.msra.mxu1 %v12492_v60 }
 0xca8   :  { %8949 = vmatprep.subr.bf16.mxu0 %v12476_v51  ;;  %8981 = vmatprep.subr.bf16.mxu1 %v12495_v30 }
 0xcab   :  { %8951 = vmatpush1.bf16.msra.mxu0 %v12486_v43  ;;  %8983 = vmatpush1.bf16.msra.mxu1 %v12508_v9 }
 0xcac   :  { %8953 = vmatprep.subr.bf16.mxu0 %v12490_v1  ;;  %8985 = vmatprep.subr.bf16.mxu1 %v12512_v22 }
 0xcaf   :  { %8955 = vmatpush1.bf16.msra.mxu0 %v12502_v55  ;;  %8987 = vmatpush1.bf16.msra.mxu1 %v12525_v8 }
 0xcb0   :  { %8957 = vmatprep.subr.bf16.mxu0 %v12506_v62  ;;  %8989 = vmatprep.subr.bf16.mxu1 %v12529_v33 }
 0xcb3   :  { %8959 = vmatpush1.bf16.msra.mxu0 %v12519_v61  ;;  %8991 = vmatpush1.bf16.msra.mxu1 %v12542_v40 }
 0xcb4   :  { %8961 = vmatprep.subr.bf16.mxu0 %v12523_v4  ;;  %8993 = vmatprep.subr.bf16.mxu1 %v12546_v19 }
 0xcb7   :  { %8963 = vmatpush1.bf16.msra.mxu0 %v12536_v41  ;;  %8995 = vmatpush1.bf16.msra.mxu1 %v12557_v24 }
 0xcb8   :  { %8965 = vmatprep.subr.bf16.mxu0 %v12540_v0  ;;  %8997 = vmatprep.subr.bf16.mxu1 %v12563_v7 }
 0xcbb   :  { %8967 = vmatpush1.bf16.msra.mxu0 %v12553_v18  ;;  %8999 = vmatpush1.bf16.msra.mxu1 %v12574_v26 }
 0xcbc   :  { %8969 = vmatprep.subr.bf16.mxu0 %v12559_v31  ;;  %9001 = vmatprep.subr.bf16.mxu1 %v12578_v29 }
 0xcbf   :  { %8971 = vmatpush1.bf16.msra.mxu0 %v12570_v3  ;;  %9003 = vmatpush1.bf16.msra.mxu1 %v12586_v57 }
 0xcc0   :  { %9005 = vmatprep.subr.bf16.mxu0 %v12455_v49  ;;  %9037 = vmatprep.subr.bf16.mxu1 %v12457_v58 }
 0xd75   :  { %v3299_v20 = vpop.f32.mrb[22].mxu0  ;;  %v3370_v39 = vpop.f32.mrb[22].mxu1 }
 0xd76   :  { %v10482_v35 = vadd.f32 %v3299_v20, %v12637_v21  ;;  %v3301_v10 = vpop.f32.mrb[23].mxu0  ;;  %v3372_v2 = vpop.f32.mrb[23].mxu1  ;;  %v10498_v52 = vadd.f32 %v3370_v39, %v12649_v34 }
 0xd77   :  { %v10483_v28 = vadd.f32 %v3301_v10, %v12640_v5  ;;  %v10499_v45 = vadd.f32 %v3372_v2, %v12645_v53 }
 0xd78   :  { %v7872_v46 = vmul.f32 -1.442695, %v10482_v35 }
 0xd79   :  { %v7873_v48 = vmul.f32 -1.442695, %v10483_v28  ;;  %v7874_v56 = vmul.f32 -1.442695, %v10499_v45 }
 0xd7a   :  { %10914 = vpow2.f32 %v7872_v46 }
 0xd7b   :  { %10916 = vpow2.f32 %v7873_v48 }
 0xd7c   :  { %10918 = vpow2.f32 %v7874_v56 }
 0xd7d   :  { %10920 = vtanh.f32 %v10498_v52 }
 0xd84   :  { %v10915_v44 = vpop.eup %10914 }
 0xd85   :  { %v10917_v17 = vpop.eup %10916  ;;  %v3382_v6 = vadd.f32 1.0, %v10915_v44 }
 0xd86   :  { %v3388_v42 = vadd.f32 1.0, %v10917_v17  ;;  %v10919_v20 = vpop.eup %10918 }
 0xd87   :  { %10922 = vrcp.f32 %v3382_v6  ;;  %v10921_v36 = vpop.eup %10920  ;;  %v3395_v46 = vadd.f32 1.0, %v10919_v20 }
 0xd88   :  { %10924 = vrcp.f32 %v3388_v42 }
 0xd89   :  { %10926 = vrcp.f32 %v3395_v46 }
 0xd91   :  { %v10923_v10 = vpop.eup %10922 }
 0xd92   :  { %v10925_v35 = vpop.eup %10924  ;;  %v3399_v28 = vmul.f32 %v10923_v10, %v10921_v36 }
 0xd93   :  { %v3398_v48 = vmul.f32 %v10925_v35, %v12813_v50  ;;  %v10927_v45 = vpop.eup %10926 }
 0xd95   :  { %v3400_v2 = vadd.f32 %v3399_v28, %v3398_v48 }
 0xd97   :  { %10928 = vtanh.f32 %v3400_v2  ;;  %v12864_v39 = vsel %vm1382_vm11, %v3400_v2, %v12813_v50 }
 0xda1   :  { %v10929_v56 = vpop.eup %10928 }
 0xda2   :  { %v3402_v52 = vmul.f32 %v10929_v56, %v10927_v45 }
 0xda4   :  { %v12869_v44 = vsel %vm1382_vm11, %v3402_v52, %v12818_v59 }
 0xda5   :  { %14119 = vst [vmem:[#allocation53_spill] sm:$0xff] %v12869_v44  ;;  %3475 = vmatmul.mubr.f32.vlgmr.msra.gmra.mrb[20].mxu0 %v12869_v44  ;;  %3546 = vmatmul.mubr.f32.vlgmr.msra.gmra.mrb[20].mxu1 %v12869_v44 }
 0xda6   :  { %9007 = vmatpush1.bf16.msra.mxu0 %v12459_v13  ;;  %9039 = vmatpush1.bf16.msra.mxu1 %v12465_v32 }
 0xda7   :  { %9009 = vmatprep.subr.bf16.mxu0 %v12462_v16  ;;  %9041 = vmatprep.subr.bf16.mxu1 %v12479_v14 }
 0xda8   :  { %3651 = vmatprep.mubr.f32.mxu0 %v14109_v27  ;;  %3722 = vmatprep.mubr.f32.mxu1 %v14109_v27 }
 0xdaa   :  { %9011 = vmatpush1.bf16.msra.mxu0 %v12472_v47  ;;  %9043 = vmatpush1.bf16.msra.mxu1 %v12492_v60 }
 0xdab   :  { %9013 = vmatprep.subr.bf16.mxu0 %v12476_v51  ;;  %9045 = vmatprep.subr.bf16.mxu1 %v12495_v30 }
 0xdae   :  { %9015 = vmatpush1.bf16.msra.mxu0 %v12486_v43  ;;  %9047 = vmatpush1.bf16.msra.mxu1 %v12508_v9 }
 0xdaf   :  { %9017 = vmatprep.subr.bf16.mxu0 %v12490_v1  ;;  %9049 = vmatprep.subr.bf16.mxu1 %v12512_v22 }
 0xdb2   :  { %9019 = vmatpush1.bf16.msra.mxu0 %v12502_v55  ;;  %9051 = vmatpush1.bf16.msra.mxu1 %v12525_v8 }
 0xdb3   :  { %9021 = vmatprep.subr.bf16.mxu0 %v12506_v62  ;;  %9053 = vmatprep.subr.bf16.mxu1 %v12529_v33 }
 0xdb6   :  { %9023 = vmatpush1.bf16.msra.mxu0 %v12519_v61  ;;  %9055 = vmatpush1.bf16.msra.mxu1 %v12542_v40 }
 0xdb7   :  { %9025 = vmatprep.subr.bf16.mxu0 %v12523_v4  ;;  %9057 = vmatprep.subr.bf16.mxu1 %v12546_v19 }
 0xdba   :  { %9027 = vmatpush1.bf16.msra.mxu0 %v12536_v41  ;;  %9059 = vmatpush1.bf16.msra.mxu1 %v12557_v24 }
 0xdbb   :  { %9029 = vmatprep.subr.bf16.mxu0 %v12540_v0  ;;  %9061 = vmatprep.subr.bf16.mxu1 %v12563_v7 }
 0xdbe   :  { %9031 = vmatpush1.bf16.msra.mxu0 %v12553_v18  ;;  %9063 = vmatpush1.bf16.msra.mxu1 %v12574_v26 }
 0xdbf   :  { %9033 = vmatprep.subr.bf16.mxu0 %v12559_v31  ;;  %9065 = vmatprep.subr.bf16.mxu1 %v12578_v29 }
 0xdc2   :  { %9035 = vmatpush1.bf16.msra.mxu0 %v12570_v3  ;;  %9067 = vmatpush1.bf16.msra.mxu1 %v12586_v57 }
 0xdc3   :  { %9069 = vmatprep.subr.bf16.mxu0 %v12455_v49  ;;  %9101 = vmatprep.subr.bf16.mxu1 %v12457_v58 }
 0xe78   :  { %v3476_v36 = vpop.f32.mrb[20].mxu0  ;;  %v3547_v50 = vpop.f32.mrb[20].mxu1 }
 0xe79   :  { %v10480_v17 = vadd.f32 %v3476_v36, %v12637_v21  ;;  %v3478_v6 = vpop.f32.mrb[21].mxu0  ;;  %v3549_v42 = vpop.f32.mrb[21].mxu1  ;;  %v10496_v48 = vadd.f32 %v3547_v50, %v12649_v34 }
 0xe7a   :  { %v10481_v20 = vadd.f32 %v3478_v6, %v12640_v5  ;;  %v10497_v28 = vadd.f32 %v3549_v42, %v12645_v53 }
 0xe7b   :  { %v7875_v10 = vmul.f32 -1.442695, %v10480_v17 }
 0xe7c   :  { %v7876_v35 = vmul.f32 -1.442695, %v10481_v20  ;;  %v7877_v46 = vmul.f32 -1.442695, %v10497_v28 }
 0xe7d   :  { %10930 = vpow2.f32 %v7875_v10 }
 0xe7e   :  { %10932 = vpow2.f32 %v7876_v35 }
 0xe7f   :  { %10934 = vpow2.f32 %v7877_v46 }
 0xe80   :  { %10936 = vtanh.f32 %v10496_v48 }
 0xe87   :  { %v10931_v49 = vpop.eup %10930 }
 0xe88   :  { %v10933_v2 = vpop.eup %10932  ;;  %v3559_v58 = vadd.f32 1.0, %v10931_v49  ;;  %v3956_v49 = vld [vmem:[#allocation14 + $0x20] sm:$0xff] }
 0xe89   :  { %v3565_v45 = vadd.f32 1.0, %v10933_v2  ;;  %v10935_v56 = vpop.eup %10934  ;;  %v3954_v2 = vld [vmem:[#allocation14 + $0x10] sm:$0xff] }
 0xe8a   :  { %10938 = vrcp.f32 %v3559_v58  ;;  %v10937_v52 = vpop.eup %10936  ;;  %v3572_v20 = vadd.f32 1.0, %v10935_v56  ;;  %v3958_v58 = vld [vmem:[#allocation14 + $0x30] sm:$0xff] }
 0xe8b   :  { %10940 = vrcp.f32 %v3565_v45  ;;  %v3961_v45 = vld [vmem:[#allocation14 + $0x48] sm:$0xff] }
 0xe8c   :  { %10942 = vrcp.f32 %v3572_v20 }
 0xe94   :  { %v10939_v36 = vpop.eup %10938 }
 0xe95   :  { %v10941_v17 = vpop.eup %10940  ;;  %v3576_v6 = vmul.f32 %v10939_v36, %v10937_v52  ;;  %v3965_v52 = vld [vmem:[#allocation14 + $0x68] sm:$0xff]  ;;  %v3963_v36 = vld [vmem:[#allocation14 + $0x58] sm:$0xff] }
 0xe96   :  { %v3575_v10 = vmul.f32 %v10941_v17, %v12864_v39  ;;  %v10943_v35 = vpop.eup %10942  ;;  %v3967_v17 = vld [vmem:[#allocation14 + $0x78] sm:$0xff] }
 0xe98   :  { %v3577_v42 = vadd.f32 %v3576_v6, %v3575_v10 }
 0xe9a   :  { %10944 = vtanh.f32 %v3577_v42  ;;  %v12915_v50 = vsel %vm1200_vm10, %v3577_v42, %v12864_v39  ;;  %v3952_v39 = vld [vmem:[#allocation14] sm:$0xff]  ;;  %v9198_v42 = vpack.c.bf16 %v3958_v58, %v3954_v2  ;;  %v3987_v2 = vld [vmem:[#allocation14 + $0x118] sm:$0xff] }
 0xe9b   :  { %v9134_v10 = vpack.c.bf16 %v3956_v49, %v3952_v39  ;;  %v3985_v39 = vld [vmem:[#allocation14 + $0x108] sm:$0xff] }
 0xe9c   :  { %v3989_v49 = vld [vmem:[#allocation14 + $0x128] sm:$0xff] }
 0xe9d   :  { %v9148_v58 = vpack.c.bf16 %v3989_v49, %v3985_v39  ;;  %v4010_v39 = vld [vmem:[#allocation14 + $0x1d0] sm:$0xff] }
 0xe9e   :  { %v4014_v49 = vld [vmem:[#allocation14 + $0x1f0] sm:$0xff] }
 0xea4   :  { %v10945_v28 = vpop.eup %10944 }
 0xea5   :  { %v3579_v46 = vmul.f32 %v10945_v28, %v10943_v35  ;;  %v3960_v35 = vld [vmem:[#allocation14 + $0x40] sm:$0xff] }
 0xea6   :  { %v3964_v28 = vld [vmem:[#allocation14 + $0x60] sm:$0xff] }
 0xea7   :  { %v12920_v48 = vsel %vm1200_vm10, %v3579_v46, %v12869_v44  ;;  %v9136_v46 = vpack.c.bf16 %v3965_v52, %v3961_v45  ;;  %v3991_v45 = vld [vmem:[#allocation14 + $0x138] sm:$0xff]  ;;  %v3988_v52 = vld [vmem:[#allocation14 + $0x120] sm:$0xff] }
 0xea8   :  { %3652 = vmatmul.mubr.f32.vlgmr.msra.gmra.mrb[18].mxu0 %v12920_v48  ;;  %3723 = vmatmul.mubr.f32.vlgmr.msra.gmra.mrb[18].mxu1 %v12920_v48 }
 0xea9   :  { %9071 = vmatpush1.bf16.msra.mxu0 %v12459_v13  ;;  %9103 = vmatpush1.bf16.msra.mxu1 %v12465_v32  ;;  %v3953_v13 = vld [vmem:[#allocation14 + $0x8] sm:$0xff]  ;;  %v3955_v32 = vld [vmem:[#allocation14 + $0x18] sm:$0xff] }
 0xeaa   :  { %9073 = vmatprep.subr.bf16.mxu0 %v12462_v16  ;;  %9105 = vmatprep.subr.bf16.mxu1 %v12479_v14  ;;  %v3957_v16 = vld [vmem:[#allocation14 + $0x28] sm:$0xff] }
 0xeab   :  { %3828 = vmatprep.mubr.f32.mxu0 %v14109_v27  ;;  %3899 = vmatprep.mubr.f32.mxu1 %v14109_v27 }
 0xead   :  { %9075 = vmatpush1.bf16.msra.mxu0 %v12472_v47  ;;  %9107 = vmatpush1.bf16.msra.mxu1 %v12492_v60  ;;  %v9132_v47 = vpack.c.bf16 %v3957_v16, %v3953_v13  ;;  %v9200_v13 = vpack.c.bf16 %v3967_v17, %v3963_v36  ;;  %v3962_v16 = vld [vmem:[#allocation14 + $0x50] sm:$0xff]  ;;  %v9212_v36 = vpack.c.bf16 %v3991_v45, %v3987_v2  ;;  %v4021_v45 = vld [vmem:[#allocation14 + $0x228] sm:$0xff] }
 0xeae   :  { %9077 = vmatprep.subr.bf16.mxu0 %v12476_v51  ;;  %9109 = vmatprep.subr.bf16.mxu1 %v12495_v30  ;;  %v3959_v51 = vld [vmem:[#allocation14 + $0x38] sm:$0xff]  ;;  %v9226_v2 = vpack.c.bf16 %v4014_v49, %v4010_v39  ;;  %v4044_v39 = vld [vmem:[#allocation14 + $0x2e0] sm:$0xff] }
 0xeaf   :  { %v9196_v14 = vpack.c.bf16 %v3959_v51, %v3955_v32  ;;  %v3969_v32 = vld [vmem:[#allocation14 + $0x88] sm:$0xff] }
 0xeb0   :  { %v3973_v51 = vld [vmem:[#allocation14 + $0xa8] sm:$0xff] }
 0xeb1   :  { %9079 = vmatpush1.bf16.msra.mxu0 %v12486_v43  ;;  %9111 = vmatpush1.bf16.msra.mxu1 %v12508_v9 }
 0xeb2   :  { %9081 = vmatprep.subr.bf16.mxu0 %v12490_v1  ;;  %9113 = vmatprep.subr.bf16.mxu1 %v12512_v22 }
 0xeb5   :  { %9083 = vmatpush1.bf16.msra.mxu0 %v12502_v55  ;;  %9115 = vmatpush1.bf16.msra.mxu1 %v12525_v8 }
 0xeb6   :  { %9085 = vmatprep.subr.bf16.mxu0 %v12506_v62  ;;  %9117 = vmatprep.subr.bf16.mxu1 %v12529_v33 }
 0xeb9   :  { %9087 = vmatpush1.bf16.msra.mxu0 %v12519_v61  ;;  %9119 = vmatpush1.bf16.msra.mxu1 %v12542_v40 }
 0xeba   :  { %9089 = vmatprep.subr.bf16.mxu0 %v12523_v4  ;;  %9121 = vmatprep.subr.bf16.mxu1 %v12546_v19 }
 0xebd   :  { %9091 = vmatpush1.bf16.msra.mxu0 %v12536_v41  ;;  %9123 = vmatpush1.bf16.msra.mxu1 %v12557_v24 }
 0xebe   :  { %9093 = vmatprep.subr.bf16.mxu0 %v12540_v0  ;;  %9125 = vmatprep.subr.bf16.mxu1 %v12563_v7 }
 0xec1   :  { %9095 = vmatpush1.bf16.msra.mxu0 %v12553_v18  ;;  %9127 = vmatpush1.bf16.msra.mxu1 %v12574_v26 }
 0xec2   :  { %9097 = vmatprep.subr.bf16.mxu0 %v12559_v31  ;;  %9129 = vmatprep.subr.bf16.mxu1 %v12578_v29 }
 0xec5   :  { %9099 = vmatpush1.bf16.msra.mxu0 %v12570_v3  ;;  %9131 = vmatpush1.bf16.msra.mxu1 %v12586_v57 }
 0xec6   :  { %9133 = vmatprep.subr.bf16.mxu0 %v9132_v47  ;;  %9197 = vmatprep.subr.bf16.mxu1 %v9196_v14  ;;  %v3971_v14 = vld [vmem:[#allocation14 + $0x98] sm:$0xff] }
 0xf7b   :  { %v3653_v43 = vpop.f32.mrb[18].mxu0  ;;  %v3724_v1 = vpop.f32.mrb[18].mxu1 }
 0xf7c   :  { %v10478_v60 = vadd.f32 %v3653_v43, %v12637_v21  ;;  %v3655_v30 = vpop.f32.mrb[19].mxu0  ;;  %v3726_v55 = vpop.f32.mrb[19].mxu1  ;;  %v10494_v8 = vadd.f32 %v3724_v1, %v12649_v34  ;;  %v3975_v43 = vld [vmem:[#allocation14 + $0xb8] sm:$0xff]  ;;  %v9138_v1 = vpack.c.bf16 %v3964_v28, %v3960_v35  ;;  %v3997_v35 = vld [vmem:[#allocation14 + $0x168] sm:$0xff] }
 0xf7d   :  { %v10479_v62 = vadd.f32 %v3655_v30, %v12640_v5  ;;  %v10495_v61 = vadd.f32 %v3726_v55, %v12645_v53  ;;  %v3968_v30 = vld [vmem:[#allocation14 + $0x80] sm:$0xff]  ;;  %v3995_v28 = vld [vmem:[#allocation14 + $0x158] sm:$0xff] }
 0xf7e   :  { %v7878_v9 = vmul.f32 -1.442695, %v10478_v60  ;;  %v3972_v55 = vld [vmem:[#allocation14 + $0xa0] sm:$0xff] }
 0xf7f   :  { %v7879_v22 = vmul.f32 -1.442695, %v10479_v62  ;;  %v7880_v4 = vmul.f32 -1.442695, %v10495_v61  ;;  %v9140_v62 = vpack.c.bf16 %v3973_v51, %v3969_v32  ;;  %v3974_v61 = vld [vmem:[#allocation14 + $0xb0] sm:$0xff] }
 0xf80   :  { %10946 = vpow2.f32 %v7878_v9  ;;  %v9204_v9 = vpack.c.bf16 %v3975_v43, %v3971_v14  ;;  %v3994_v14 = vld [vmem:[#allocation14 + $0x150] sm:$0xff] }
 0xf81   :  { %10948 = vpow2.f32 %v7879_v22  ;;  %v3970_v22 = vld [vmem:[#allocation14 + $0x90] sm:$0xff] }
 0xf82   :  { %10950 = vpow2.f32 %v7880_v4  ;;  %v3977_v4 = vld [vmem:[#allocation14 + $0xc8] sm:$0xff]  ;;  %v3998_v43 = vld [vmem:[#allocation14 + $0x170] sm:$0xff] }
 0xf83   :  { %10952 = vtanh.f32 %v10494_v8  ;;  %v3981_v8 = vld [vmem:[#allocation14 + $0xe8] sm:$0xff] }
 0xf8a   :  { %v10947_v33 = vpop.eup %10946 }
 0xf8b   :  { %v10949_v41 = vpop.eup %10948  ;;  %v3736_v0 = vadd.f32 1.0, %v10947_v33  ;;  %v3979_v33 = vld [vmem:[#allocation14 + $0xd8] sm:$0xff] }
 0xf8c   :  { %v3742_v40 = vadd.f32 1.0, %v10949_v41  ;;  %v10951_v19 = vpop.eup %10950  ;;  %v3983_v41 = vld [vmem:[#allocation14 + $0xf8] sm:$0xff] }
 0xf8d   :  { %10954 = vrcp.f32 %v3736_v0  ;;  %v10953_v18 = vpop.eup %10952  ;;  %v3749_v3 = vadd.f32 1.0, %v10951_v19  ;;  %v9142_v0 = vpack.c.bf16 %v3972_v55, %v3968_v30  ;;  %v3976_v19 = vld [vmem:[#allocation14 + $0xc0] sm:$0xff]  ;;  %v4005_v30 = vld [vmem:[#allocation14 + $0x1a8] sm:$0xff]  ;;  %v4003_v55 = vld [vmem:[#allocation14 + $0x198] sm:$0xff] }
 0xf8e   :  { %10956 = vrcp.f32 %v3742_v40  ;;  %v9206_v40 = vpack.c.bf16 %v3974_v61, %v3970_v22  ;;  %v4000_v22 = vld [vmem:[#allocation14 + $0x180] sm:$0xff] }
 0xf8f   :  { %10958 = vrcp.f32 %v3749_v3  ;;  %v3982_v3 = vld [vmem:[#allocation14 + $0xf0] sm:$0xff]  ;;  %v4004_v61 = vld [vmem:[#allocation14 + $0x1a0] sm:$0xff] }
 0xf97   :  { %v10955_v24 = vpop.eup %10954 }
 0xf98   :  { %v10957_v31 = vpop.eup %10956  ;;  %v3753_v7 = vmul.f32 %v10955_v24, %v10953_v18  ;;  %v9144_v18 = vpack.c.bf16 %v3981_v8, %v3977_v4  ;;  %v9208_v24 = vpack.c.bf16 %v3983_v41, %v3979_v33  ;;  %v9158_v8 = vpack.c.bf16 %v4004_v61, %v4000_v22  ;;  %v4002_v33 = vld [vmem:[#allocation14 + $0x190] sm:$0xff]  ;;  %v4035_v22 = vld [vmem:[#allocation14 + $0x298] sm:$0xff] }
 0xf99   :  { %v3752_v26 = vmul.f32 %v10957_v31, %v12915_v50  ;;  %v10959_v56 = vpop.eup %10958  ;;  %v3980_v31 = vld [vmem:[#allocation14 + $0xe0] sm:$0xff]  ;;  %v4006_v41 = vld [vmem:[#allocation14 + $0x1b0] sm:$0xff] }
 0xf9b   :  { %v3754_v29 = vadd.f32 %v3753_v7, %v3752_v26  ;;  %v3978_v7 = vld [vmem:[#allocation14 + $0xd0] sm:$0xff]  ;;  %v9146_v26 = vpack.c.bf16 %v3980_v31, %v3976_v19  ;;  %v4013_v19 = vld [vmem:[#allocation14 + $0x1e8] sm:$0xff]  ;;  %v4015_v31 = vld [vmem:[#allocation14 + $0x1f8] sm:$0xff] }
 0xf9d   :  { %10960 = vtanh.f32 %v3754_v29  ;;  %v12964_v57 = vsel %vm1018_vm9, %v3754_v29, %v12915_v50  ;;  %v3966_v50 = vld [vmem:[#allocation14 + $0x70] sm:$0xff]  ;;  %v9210_v29 = vpack.c.bf16 %v3982_v3, %v3978_v7  ;;  %v4008_v7 = vld [vmem:[#allocation14 + $0x1c0] sm:$0xff] }
 0xf9e   :  { %v9202_v60 = vpack.c.bf16 %v3966_v50, %v3962_v16  ;;  %v3992_v16 = vld [vmem:[#allocation14 + $0x140] sm:$0xff] }
 0xf9f   :  { %v3996_v50 = vld [vmem:[#allocation14 + $0x160] sm:$0xff] }
 0xfa0   :  { %v9154_v51 = vpack.c.bf16 %v3996_v50, %v3992_v16  ;;  %v4012_v3 = vld [vmem:[#allocation14 + $0x1e0] sm:$0xff]  ;;  %v4027_v16 = vld [vmem:[#allocation14 + $0x258] sm:$0xff] }
 0xfa7   :  { %v10961_v6 = vpop.eup %10960 }
 0xfa8   :  { %v3756_v20 = vmul.f32 %v10961_v6, %v10959_v56  ;;  %v3984_v56 = vld [vmem:[#allocation14 + $0x100] sm:$0xff]  ;;  %v3986_v6 = vld [vmem:[#allocation14 + $0x110] sm:$0xff] }
 0xfa9   :  { %v9150_v17 = vpack.c.bf16 %v3988_v52, %v3984_v56  ;;  %v4019_v56 = vld [vmem:[#allocation14 + $0x218] sm:$0xff] }
 0xfaa   :  { %v12969_v47 = vsel %vm1018_vm9, %v3756_v20, %v12920_v48  ;;  %v3990_v20 = vld [vmem:[#allocation14 + $0x130] sm:$0xff] }
 0xfab   :  { %3829 = vmatmul.mubr.f32.vlgmr.msra.gmra.mrb[16].mxu0 %v12969_v47  ;;  %3900 = vmatmul.mubr.f32.vlgmr.msra.gmra.mrb[16].mxu1 %v12969_v47 }
 0xfac   :  { %9135 = vmatpush1.bf16.msra.mxu0 %v9134_v10  ;;  %9199 = vmatpush1.bf16.msra.mxu1 %v9198_v42  ;;  %v9214_v10 = vpack.c.bf16 %v3990_v20, %v3986_v6  ;;  %v3993_v42 = vld [vmem:[#allocation14 + $0x148] sm:$0xff]  ;;  %v4020_v6 = vld [vmem:[#allocation14 + $0x220] sm:$0xff] }
 0xfad   :  { %9137 = vmatprep.subr.bf16.mxu0 %v9136_v46  ;;  %9201 = vmatprep.subr.bf16.mxu1 %v9200_v13  ;;  %v9152_v46 = vpack.c.bf16 %v3997_v35, %v3993_v42  ;;  %v3999_v13 = vld [vmem:[#allocation14 + $0x178] sm:$0xff]  ;;  %v4018_v42 = vld [vmem:[#allocation14 + $0x210] sm:$0xff] }
 0xfae   :  { %v9216_v32 = vpack.c.bf16 %v3999_v13, %v3995_v28  ;;  %v4022_v35 = vld [vmem:[#allocation14 + $0x230] sm:$0xff]  ;;  %v4029_v13 = vld [vmem:[#allocation14 + $0x268] sm:$0xff] }
 0xfaf   :  { %v9230_v28 = vpack.c.bf16 %v4022_v35, %v4018_v42  ;;  %v4052_v42 = vld [vmem:[#allocation14 + $0x320] sm:$0xff] }
 0xfb0   :  { %9139 = vmatpush1.bf16.msra.mxu0 %v9138_v1  ;;  %9203 = vmatpush1.bf16.msra.mxu1 %v9202_v60  ;;  %v9218_v1 = vpack.c.bf16 %v3998_v43, %v3994_v14  ;;  %v4001_v60 = vld [vmem:[#allocation14 + $0x188] sm:$0xff]  ;;  %v4028_v14 = vld [vmem:[#allocation14 + $0x260] sm:$0xff] }
 0xfb1   :  { %9141 = vmatprep.subr.bf16.mxu0 %v9140_v62  ;;  %9205 = vmatprep.subr.bf16.mxu1 %v9204_v9  ;;  %v9156_v62 = vpack.c.bf16 %v4005_v30, %v4001_v60  ;;  %v4007_v9 = vld [vmem:[#allocation14 + $0x1b8] sm:$0xff]  ;;  %v4026_v60 = vld [vmem:[#allocation14 + $0x250] sm:$0xff] }
 0xfb2   :  { %v9220_v4 = vpack.c.bf16 %v4007_v9, %v4003_v55  ;;  %v4030_v30 = vld [vmem:[#allocation14 + $0x270] sm:$0xff]  ;;  %v4037_v9 = vld [vmem:[#allocation14 + $0x2a8] sm:$0xff] }
 0xfb3   :  { %v9234_v55 = vpack.c.bf16 %v4030_v30, %v4026_v60  ;;  %v4060_v60 = vld [vmem:[#allocation14 + $0x360] sm:$0xff] }
 0xfb4   :  { %9143 = vmatpush1.bf16.msra.mxu0 %v9142_v0  ;;  %9207 = vmatpush1.bf16.msra.mxu1 %v9206_v40  ;;  %v9222_v0 = vpack.c.bf16 %v4006_v41, %v4002_v33  ;;  %v4009_v40 = vld [vmem:[#allocation14 + $0x1c8] sm:$0xff]  ;;  %v4036_v33 = vld [vmem:[#allocation14 + $0x2a0] sm:$0xff] }
 0xfb5   :  { %9145 = vmatprep.subr.bf16.mxu0 %v9144_v18  ;;  %9209 = vmatprep.subr.bf16.mxu1 %v9208_v24  ;;  %v4011_v18 = vld [vmem:[#allocation14 + $0x1d8] sm:$0xff]  ;;  %v9160_v24 = vpack.c.bf16 %v4013_v19, %v4009_v40  ;;  %v4034_v40 = vld [vmem:[#allocation14 + $0x290] sm:$0xff] }
 0xfb6   :  { %v4038_v19 = vld [vmem:[#allocation14 + $0x2b0] sm:$0xff] }
 0xfb8   :  { %9147 = vmatpush1.bf16.msra.mxu0 %v9146_v26  ;;  %9211 = vmatpush1.bf16.msra.mxu1 %v9210_v29  ;;  %v9224_v26 = vpack.c.bf16 %v4015_v31, %v4011_v18  ;;  %v9162_v29 = vpack.c.bf16 %v4012_v3, %v4008_v7  ;;  %v9238_v18 = vpack.c.bf16 %v4038_v19, %v4034_v40  ;;  %v4045_v31 = vld [vmem:[#allocation14 + $0x2e8] sm:$0xff]  ;;  %v4043_v7 = vld [vmem:[#allocation14 + $0x2d8] sm:$0xff]  ;;  %v4064_v40 = vld [vmem:[#allocation14 + $0x380] sm:$0xff] }
 0xfb9   :  { %9149 = vmatprep.subr.bf16.mxu0 %v9148_v58  ;;  %9213 = vmatprep.subr.bf16.mxu1 %v9212_v36  ;;  %v4017_v58 = vld [vmem:[#allocation14 + $0x208] sm:$0xff]  ;;  %v4023_v36 = vld [vmem:[#allocation14 + $0x238] sm:$0xff]  ;;  %v4068_v19 = vld [vmem:[#allocation14 + $0x3a0] sm:$0xff] }
 0xfba   :  { %v9164_v52 = vpack.c.bf16 %v4021_v45, %v4017_v58  ;;  %v9228_v20 = vpack.c.bf16 %v4023_v36, %v4019_v56  ;;  %v4042_v58 = vld [vmem:[#allocation14 + $0x2d0] sm:$0xff]  ;;  %v4053_v36 = vld [vmem:[#allocation14 + $0x328] sm:$0xff] }
 0xfbb   :  { %v4046_v45 = vld [vmem:[#allocation14 + $0x2f0] sm:$0xff] }
 0xfbc   :  { %9151 = vmatpush1.bf16.msra.mxu0 %v9150_v17  ;;  %9215 = vmatpush1.bf16.msra.mxu1 %v9214_v10  ;;  %v4016_v17 = vld [vmem:[#allocation14 + $0x200] sm:$0xff]  ;;  %v9242_v56 = vpack.c.bf16 %v4046_v45, %v4042_v58 }
 0xfbd   :  { %9153 = vmatprep.subr.bf16.mxu0 %v9152_v46  ;;  %9217 = vmatprep.subr.bf16.mxu1 %v9216_v32  ;;  %v9166_v10 = vpack.c.bf16 %v4020_v6, %v4016_v17  ;;  %v4025_v46 = vld [vmem:[#allocation14 + $0x248] sm:$0xff]  ;;  %v4031_v32 = vld [vmem:[#allocation14 + $0x278] sm:$0xff]  ;;  %v4076_v45 = vld [vmem:[#allocation14 + $0x3e0] sm:$0xff] }
 0xfbe   :  { %v9168_v50 = vpack.c.bf16 %v4029_v13, %v4025_v46  ;;  %v9232_v43 = vpack.c.bf16 %v4031_v32, %v4027_v16  ;;  %v4051_v17 = vld [vmem:[#allocation14 + $0x318] sm:$0xff]  ;;  %v4050_v46 = vld [vmem:[#allocation14 + $0x310] sm:$0xff]  ;;  %v4061_v32 = vld [vmem:[#allocation14 + $0x368] sm:$0xff] }
 0xfbf   :  { %v4054_v13 = vld [vmem:[#allocation14 + $0x330] sm:$0xff] }
 0xfc0   :  { %9155 = vmatpush1.bf16.msra.mxu0 %v9154_v51  ;;  %9219 = vmatpush1.bf16.msra.mxu1 %v9218_v1  ;;  %v4024_v51 = vld [vmem:[#allocation14 + $0x240] sm:$0xff]  ;;  %v9246_v16 = vpack.c.bf16 %v4054_v13, %v4050_v46 }
 0xfc1   :  { %9157 = vmatprep.subr.bf16.mxu0 %v9156_v62  ;;  %9221 = vmatprep.subr.bf16.mxu1 %v9220_v4  ;;  %v9170_v1 = vpack.c.bf16 %v4028_v14, %v4024_v51  ;;  %v4033_v62 = vld [vmem:[#allocation14 + $0x288] sm:$0xff]  ;;  %v4039_v4 = vld [vmem:[#allocation14 + $0x2b8] sm:$0xff] }
 0xfc2   :  { %v9172_v61 = vpack.c.bf16 %v4037_v9, %v4033_v62  ;;  %v9236_v41 = vpack.c.bf16 %v4039_v4, %v4035_v22  ;;  %v4059_v51 = vld [vmem:[#allocation14 + $0x358] sm:$0xff]  ;;  %v4058_v62 = vld [vmem:[#allocation14 + $0x350] sm:$0xff]  ;;  %v4065_v22 = vld [vmem:[#allocation14 + $0x388] sm:$0xff] }
 0xfc3   :  { %v4062_v9 = vld [vmem:[#allocation14 + $0x370] sm:$0xff]  ;;  %v4069_v4 = vld [vmem:[#allocation14 + $0x3a8] sm:$0xff] }
 0xfc4   :  { %9159 = vmatpush1.bf16.msra.mxu0 %v9158_v8  ;;  %9223 = vmatpush1.bf16.msra.mxu1 %v9222_v0  ;;  %v4032_v8 = vld [vmem:[#allocation14 + $0x280] sm:$0xff] }
 0xfc5   :  { %9161 = vmatprep.subr.bf16.mxu0 %v9160_v24  ;;  %9225 = vmatprep.subr.bf16.mxu1 %v9224_v26  ;;  %v9174_v0 = vpack.c.bf16 %v4036_v33, %v4032_v8  ;;  %v4041_v24 = vld [vmem:[#allocation14 + $0x2c8] sm:$0xff]  ;;  %v4047_v26 = vld [vmem:[#allocation14 + $0x2f8] sm:$0xff] }
 0xfc6   :  { %v9176_v3 = vpack.c.bf16 %v4045_v31, %v4041_v24  ;;  %v9240_v49 = vpack.c.bf16 %v4047_v26, %v4043_v7  ;;  %v4067_v8 = vld [vmem:[#allocation14 + $0x398] sm:$0xff]  ;;  %v9190_v24 = vpack.c.bf16 %v4068_v19, %v4064_v40  ;;  %v4070_v31 = vld [vmem:[#allocation14 + $0x3b0] sm:$0xff]  ;;  %v4073_v7 = vld [vmem:[#allocation14 + $0x3c8] sm:$0xff] }
 0xfc7   :  { %v4071_v33 = vld [vmem:[#allocation14 + $0x3b8] sm:$0xff]  ;;  %v4364_v40 = vld [vmem:[#allocation15 + $0x20] sm:$0xff] }
 0xfc8   :  { %9163 = vmatpush1.bf16.msra.mxu0 %v9162_v29  ;;  %9227 = vmatpush1.bf16.msra.mxu1 %v9226_v2  ;;  %v4040_v29 = vld [vmem:[#allocation14 + $0x2c0] sm:$0xff] }
 0xfc9   :  { %9165 = vmatprep.subr.bf16.mxu0 %v9164_v52  ;;  %9229 = vmatprep.subr.bf16.mxu1 %v9228_v20  ;;  %v9178_v2 = vpack.c.bf16 %v4044_v39, %v4040_v29  ;;  %v4049_v52 = vld [vmem:[#allocation14 + $0x308] sm:$0xff]  ;;  %v4055_v20 = vld [vmem:[#allocation14 + $0x338] sm:$0xff] }
 0xfca   :  { %v9180_v6 = vpack.c.bf16 %v4053_v36, %v4049_v52  ;;  %v9244_v35 = vpack.c.bf16 %v4055_v20, %v4051_v17  ;;  %v4075_v39 = vld [vmem:[#allocation14 + $0x3d8] sm:$0xff]  ;;  %v4078_v52 = vld [vmem:[#allocation14 + $0x3f0] sm:$0xff]  ;;  %v4365_v20 = vld [vmem:[#allocation15 + $0x28] sm:$0xff] }
 0xfcc   :  { %9167 = vmatpush1.bf16.msra.mxu0 %v9166_v10  ;;  %9231 = vmatpush1.bf16.msra.mxu1 %v9230_v28  ;;  %v4048_v10 = vld [vmem:[#allocation14 + $0x300] sm:$0xff] }
 0xfcd   :  { %9169 = vmatprep.subr.bf16.mxu0 %v9168_v50  ;;  %9233 = vmatprep.subr.bf16.mxu1 %v9232_v43  ;;  %v9182_v28 = vpack.c.bf16 %v4052_v42, %v4048_v10  ;;  %v4057_v50 = vld [vmem:[#allocation14 + $0x348] sm:$0xff]  ;;  %v4063_v43 = vld [vmem:[#allocation14 + $0x378] sm:$0xff] }
 0xfce   :  { %v9184_v14 = vpack.c.bf16 %v4061_v32, %v4057_v50  ;;  %v9248_v30 = vpack.c.bf16 %v4063_v43, %v4059_v51  ;;  %v4363_v10 = vld [vmem:[#allocation15 + $0x18] sm:$0xff] }
 0xfd0   :  { %9171 = vmatpush1.bf16.msra.mxu0 %v9170_v1  ;;  %9235 = vmatpush1.bf16.msra.mxu1 %v9234_v55  ;;  %v4056_v1 = vld [vmem:[#allocation14 + $0x340] sm:$0xff] }
 0xfd1   :  { %9173 = vmatprep.subr.bf16.mxu0 %v9172_v61  ;;  %9237 = vmatprep.subr.bf16.mxu1 %v9236_v41  ;;  %v9186_v55 = vpack.c.bf16 %v4060_v60, %v4056_v1  ;;  %v9250_v61 = vpack.c.bf16 %v4062_v9, %v4058_v62  ;;  %v9188_v41 = vpack.c.bf16 %v4069_v4, %v4065_v22 }
 0xfd4   :  { %9175 = vmatpush1.bf16.msra.mxu0 %v9174_v0  ;;  %9239 = vmatpush1.bf16.msra.mxu1 %v9238_v18  ;;  %v9252_v0 = vpack.c.bf16 %v4071_v33, %v4067_v8  ;;  %v4066_v18 = vld [vmem:[#allocation14 + $0x390] sm:$0xff] }
 0xfd5   :  { %9177 = vmatprep.subr.bf16.mxu0 %v9176_v3  ;;  %9241 = vmatprep.subr.bf16.mxu1 %v9240_v49  ;;  %v4077_v3 = vld [vmem:[#allocation14 + $0x3e8] sm:$0xff]  ;;  %v9254_v26 = vpack.c.bf16 %v4070_v31, %v4066_v18  ;;  %v4079_v49 = vld [vmem:[#allocation14 + $0x3f8] sm:$0xff]  ;;  %v4362_v18 = vld [vmem:[#allocation15 + $0x10] sm:$0xff] }
 0xfd6   :  { %v9192_v29 = vpack.c.bf16 %v4077_v3, %v4073_v7  ;;  %v9256_v58 = vpack.c.bf16 %v4079_v49, %v4075_v39  ;;  %v4369_v31 = vld [vmem:[#allocation15 + $0x48] sm:$0xff] }
 0xfd7   :  { %v4373_v3 = vld [vmem:[#allocation15 + $0x68] sm:$0xff] }
 0xfd8   :  { %9179 = vmatpush1.bf16.msra.mxu0 %v9178_v2  ;;  %9243 = vmatpush1.bf16.msra.mxu1 %v9242_v56  ;;  %v4072_v2 = vld [vmem:[#allocation14 + $0x3c0] sm:$0xff]  ;;  %v4074_v56 = vld [vmem:[#allocation14 + $0x3d0] sm:$0xff] }
 0xfd9   :  { %9181 = vmatprep.subr.bf16.mxu0 %v9180_v6  ;;  %9245 = vmatprep.subr.bf16.mxu1 %v9244_v35  ;;  %v9194_v36 = vpack.c.bf16 %v4076_v45, %v4072_v2  ;;  %v9258_v17 = vpack.c.bf16 %v4078_v52, %v4074_v56  ;;  %v4361_v6 = vld [vmem:[#allocation15 + $0x8] sm:$0xff]  ;;  %v4367_v35 = vld [vmem:[#allocation15 + $0x38] sm:$0xff]  ;;  %v4368_v2 = vld [vmem:[#allocation15 + $0x40] sm:$0xff]  ;;  %v12995_v45 = vpack.c.bf16 %v4373_v3, %v4369_v31 }
 0xfda   :  { %v12973_v42 = vpack.c.bf16 %v4365_v20, %v4361_v6  ;;  %v4370_v52 = vld [vmem:[#allocation15 + $0x50] sm:$0xff]  ;;  %v4381_v20 = vld [vmem:[#allocation15 + $0xa8] sm:$0xff]  ;;  %v4396_v31 = vld [vmem:[#allocation15 + $0x120] sm:$0xff] }
 0xfdb   :  { %v14120_v6 = vld [vmem:[#allocation38_spill] sm:$0xff] }
 0xfdc   :  { %9183 = vmatpush1.bf16.msra.mxu0 %v9182_v28  ;;  %9247 = vmatpush1.bf16.msra.mxu1 %v9246_v16  ;;  %v12975_v28 = vpack.c.bf16 %v4367_v35, %v4363_v10  ;;  %v4379_v10 = vld [vmem:[#allocation15 + $0x98] sm:$0xff] }
 0xfdd   :  { %9185 = vmatprep.subr.bf16.mxu0 %v9184_v14  ;;  %9249 = vmatprep.subr.bf16.mxu1 %v9248_v30  ;;  %v4383_v35 = vld [vmem:[#allocation15 + $0xb8] sm:$0xff] }
 0xfe0   :  { %9187 = vmatpush1.bf16.msra.mxu0 %v9186_v55  ;;  %9251 = vmatpush1.bf16.msra.mxu1 %v9250_v61 }
 0xfe1   :  { %9189 = vmatprep.subr.bf16.mxu0 %v9188_v41  ;;  %9253 = vmatprep.subr.bf16.mxu1 %v9252_v0  ;;  %v4360_v0 = vld [vmem:[#allocation15] sm:$0xff] }
 0xfe4   :  { %9191 = vmatpush1.bf16.msra.mxu0 %v9190_v24  ;;  %9255 = vmatpush1.bf16.msra.mxu1 %v9254_v26  ;;  %v4366_v24 = vld [vmem:[#allocation15 + $0x30] sm:$0xff]  ;;  %v4371_v26 = vld [vmem:[#allocation15 + $0x58] sm:$0xff] }
 0xfe5   :  { %9193 = vmatprep.subr.bf16.mxu0 %v9192_v29  ;;  %9257 = vmatprep.subr.bf16.mxu1 %v9256_v58  ;;  %v4375_v29 = vld [vmem:[#allocation15 + $0x78] sm:$0xff]  ;;  %v12991_v49 = vpack.c.bf16 %v4366_v24, %v4362_v18  ;;  %v4372_v58 = vld [vmem:[#allocation15 + $0x60] sm:$0xff] }
 0xfe6   :  { %v12997_v56 = vpack.c.bf16 %v4375_v29, %v4371_v26  ;;  %v4392_v24 = vld [vmem:[#allocation15 + $0x100] sm:$0xff]  ;;  %v4394_v26 = vld [vmem:[#allocation15 + $0x110] sm:$0xff] }
 0xfe7   :  { %v4398_v29 = vld [vmem:[#allocation15 + $0x130] sm:$0xff] }
 0xfe8   :  { %9195 = vmatpush1.bf16.msra.mxu0 %v9194_v36  ;;  %9259 = vmatpush1.bf16.msra.mxu1 %v9258_v17  ;;  %v4374_v36 = vld [vmem:[#allocation15 + $0x70] sm:$0xff]  ;;  %v4377_v17 = vld [vmem:[#allocation15 + $0x88] sm:$0xff] }
 0xfe9   :  { %9261 = vmatprep.subr.bf16.mxu0 %v12973_v42  ;;  %9293 = vmatprep.subr.bf16.mxu1 %v12975_v28 }
0x107e   :  { %v3830_v46 = vpop.f32.mrb[16].mxu0  ;;  %v3901_v13 = vpop.f32.mrb[16].mxu1 }
0x107f   :  { %v10476_v16 = vadd.f32 %v3830_v46, %v12637_v21  ;;  %v3832_v50 = vpop.f32.mrb[17].mxu0  ;;  %v3903_v32 = vpop.f32.mrb[17].mxu1  ;;  %v10492_v30 = vadd.f32 %v3901_v13, %v12649_v34  ;;  %v13009_v46 = vpack.c.bf16 %v4372_v58, %v4368_v2  ;;  %v13011_v13 = vpack.c.bf16 %v4374_v36, %v4370_v52  ;;  %v4401_v2 = vld [vmem:[#allocation15 + $0x148] sm:$0xff]  ;;  %v4403_v36 = vld [vmem:[#allocation15 + $0x158] sm:$0xff] }
0x1080   :  { %v10477_v51 = vadd.f32 %v3832_v50, %v12640_v5  ;;  %v10493_v1 = vadd.f32 %v3903_v32, %v12645_v53  ;;  %v4380_v50 = vld [vmem:[#allocation15 + $0xa0] sm:$0xff]  ;;  %v13015_v32 = vpack.c.bf16 %v4381_v20, %v4377_v17  ;;  %v4405_v52 = vld [vmem:[#allocation15 + $0x168] sm:$0xff]  ;;  %v4407_v17 = vld [vmem:[#allocation15 + $0x178] sm:$0xff]  ;;  %v13057_v20 = vpack.c.bf16 %v4396_v31, %v4392_v24 }
0x1081   :  { %v7881_v14 = vmul.f32 -1.442695, %v10476_v16  ;;  %v4376_v16 = vld [vmem:[#allocation15 + $0x80] sm:$0xff]  ;;  %v4410_v24 = vld [vmem:[#allocation15 + $0x190] sm:$0xff] }
0x1082   :  { %v7882_v43 = vmul.f32 -1.442695, %v10477_v51  ;;  %v7883_v60 = vmul.f32 -1.442695, %v10493_v1  ;;  %v13017_v51 = vpack.c.bf16 %v4383_v35, %v4379_v10  ;;  %v4385_v1 = vld [vmem:[#allocation15 + $0xc8] sm:$0xff]  ;;  %v13059_v10 = vpack.c.bf16 %v4398_v29, %v4394_v26  ;;  %v4400_v35 = vld [vmem:[#allocation15 + $0x140] sm:$0xff] }
0x1083   :  { %10962 = vpow2.f32 %v7881_v14  ;;  %v4378_v14 = vld [vmem:[#allocation15 + $0x90] sm:$0xff]  ;;  %v14123_v58 = vld [vmem:[#allocation41_spill] sm:$0xff] }
0x1084   :  { %10964 = vpow2.f32 %v7882_v43  ;;  %v4382_v43 = vld [vmem:[#allocation15 + $0xb0] sm:$0xff]  ;;  %v4417_v26 = vld [vmem:[#allocation15 + $0x1c8] sm:$0xff] }
0x1085   :  { %10966 = vpow2.f32 %v7883_v60  ;;  %v14121_v60 = vld [vmem:[#allocation39_spill] sm:$0xff]  ;;  %v14125_v29 = vld [vmem:[#allocation45_spill] sm:$0xff] }
0x1086   :  { %10968 = vtanh.f32 %v10492_v30  ;;  %v4389_v30 = vld [vmem:[#allocation15 + $0xe8] sm:$0xff]  ;;  %v4414_v31 = vld [vmem:[#allocation15 + $0x1b0] sm:$0xff] }
0x108d   :  { %v10963_v55 = vpop.eup %10962 }
0x108e   :  { %v10965_v62 = vpop.eup %10964  ;;  %v3913_v9 = vadd.f32 1.0, %v10963_v55  ;;  %v4387_v55 = vld [vmem:[#allocation15 + $0xd8] sm:$0xff] }
0x108f   :  { %v3919_v22 = vadd.f32 1.0, %v10965_v62  ;;  %v10967_v21 = vpop.eup %10966  ;;  %v4391_v62 = vld [vmem:[#allocation15 + $0xf8] sm:$0xff] }
0x1090   :  { %10970 = vrcp.f32 %v3913_v9  ;;  %v10969_v61 = vpop.eup %10968  ;;  %v3926_v33 = vadd.f32 1.0, %v10967_v21  ;;  %v13025_v9 = vpack.c.bf16 %v4380_v50, %v4376_v16  ;;  %v4384_v21 = vld [vmem:[#allocation15 + $0xc0] sm:$0xff]  ;;  %v13063_v50 = vpack.c.bf16 %v4405_v52, %v4401_v2  ;;  %v4421_v2 = vld [vmem:[#allocation15 + $0x1e8] sm:$0xff]  ;;  %v4419_v52 = vld [vmem:[#allocation15 + $0x1d8] sm:$0xff] }
0x1091   :  { %10972 = vrcp.f32 %v3919_v22  ;;  %v13027_v22 = vpack.c.bf16 %v4382_v43, %v4378_v14  ;;  %v4404_v16 = vld [vmem:[#allocation15 + $0x160] sm:$0xff]  ;;  %v13065_v14 = vpack.c.bf16 %v4407_v17, %v4403_v36  ;;  %v4402_v43 = vld [vmem:[#allocation15 + $0x150] sm:$0xff]  ;;  %v4423_v36 = vld [vmem:[#allocation15 + $0x1f8] sm:$0xff] }
0x1092   :  { %10974 = vrcp.f32 %v3926_v33  ;;  %v4390_v33 = vld [vmem:[#allocation15 + $0xf0] sm:$0xff] }
0x109a   :  { %v10971_v5 = vpop.eup %10970 }
0x109b   :  { %v10973_v4 = vpop.eup %10972  ;;  %v3930_v8 = vmul.f32 %v10971_v5, %v10969_v61  ;;  %v4388_v61 = vld [vmem:[#allocation15 + $0xe0] sm:$0xff]  ;;  %v13031_v5 = vpack.c.bf16 %v4389_v30, %v4385_v1  ;;  %v4406_v1 = vld [vmem:[#allocation15 + $0x170] sm:$0xff]  ;;  %v4409_v30 = vld [vmem:[#allocation15 + $0x188] sm:$0xff] }
0x109c   :  { %v3929_v41 = vmul.f32 %v10973_v4, %v12964_v57  ;;  %v10975_v34 = vpop.eup %10974  ;;  %v12989_v57 = vpack.c.bf16 %v4364_v40, %v4360_v0  ;;  %v13033_v4 = vpack.c.bf16 %v4391_v62, %v4387_v55  ;;  %v4395_v0 = vld [vmem:[#allocation15 + $0x118] sm:$0xff]  ;;  %v4413_v62 = vld [vmem:[#allocation15 + $0x1a8] sm:$0xff] }
0x109d   :  { %v4399_v40 = vld [vmem:[#allocation15 + $0x138] sm:$0xff] }
0x109e   :  { %v3931_v53 = vadd.f32 %v3930_v8, %v3929_v41  ;;  %v4386_v8 = vld [vmem:[#allocation15 + $0xd0] sm:$0xff]  ;;  %v4393_v41 = vld [vmem:[#allocation15 + $0x108] sm:$0xff]  ;;  %v13049_v3 = vpack.c.bf16 %v4399_v40, %v4395_v0  ;;  %v13079_v0 = vpack.c.bf16 %v4413_v62, %v4409_v30  ;;  %v4420_v30 = vld [vmem:[#allocation15 + $0x1e0] sm:$0xff] }
0x109f   :  { %v13043_v18 = vpack.c.bf16 %v4390_v33, %v4386_v8  ;;  %v14124_v55 = vld [vmem:[#allocation43_spill] sm:$0xff]  ;;  %v13073_v8 = vpack.c.bf16 %v4404_v16, %v4400_v35  ;;  %v13075_v33 = vpack.c.bf16 %v4406_v1, %v4402_v43  ;;  %v13091_v35 = vpack.c.bf16 %v4414_v31, %v4410_v24  ;;  %v4416_v16 = vld [vmem:[#allocation15 + $0x1c0] sm:$0xff]  ;;  %v14128_v31 = vld [vmem:[#allocation34_spill] sm:$0xff] }
0x10a0   :  { %10976 = vtanh.f32 %v3931_v53  ;;  %v14122_v53 = vld [vmem:[#allocation40_spill] sm:$0xff]  ;;  %v13095_v43 = vpack.c.bf16 %v4421_v2, %v4417_v26  ;;  %v13097_v1 = vpack.c.bf16 %v4423_v36, %v4419_v52  ;;  %v4418_v62 = vld [vmem:[#allocation15 + $0x1d0] sm:$0xff] }
0x10a1   :  { %v14129_v2 = vld [vmem:[#allocation35_spill] sm:$0xff] }
0x10aa   :  { %v10977_v19 = vpop.eup %10976 }
0x10ab   :  { %v3933_v7 = vmul.f32 %v10977_v19, %v10975_v34  ;;  %v4397_v34 = vld [vmem:[#allocation15 + $0x128] sm:$0xff]  ;;  %v13041_v19 = vpack.c.bf16 %v4388_v61, %v4384_v21  ;;  %v4411_v21 = vld [vmem:[#allocation15 + $0x198] sm:$0xff] }
0x10ac   :  { %v4415_v61 = vld [vmem:[#allocation15 + $0x1b8] sm:$0xff] }
0x10ad   :  { %v12987_v39 = vsel %vm836_vm4, %v3933_v7, %v12969_v47  ;;  %v13047_v7 = vpack.c.bf16 %v4397_v34, %v4393_v41  ;;  %v4408_v41 = vld [vmem:[#allocation15 + $0x180] sm:$0xff]  ;;  %v13081_v40 = vpack.c.bf16 %v4415_v61, %v4411_v21  ;;  %v4422_v21 = vld [vmem:[#allocation15 + $0x1f0] sm:$0xff] }
0x10ae   :  { %4166 = vmatprep.mubr.f32.mxu0 %v12987_v39  ;;  %4279 = vmatprep.mubr.f32.mxu1 %v12987_v39  ;;  %v4412_v34 = vld [vmem:[#allocation15 + $0x1a0] sm:$0xff]  ;;  %v14126_v61 = vld [vmem:[#allocation47_spill] sm:$0xff] }
0x10af   :  { %7937 = vmatmul.mubr.msk.f32.vlgmr.msra.gmra.mrb[32].mxu0 %vm836_vm4, %v14120_v6  ;;  %7939 = vmatmul.mubr.msk.f32.vlgmr.msra.gmra.mrb[32].mxu1 %vm836_vm4, %v14120_v6  ;;  %v13089_v17 = vpack.c.bf16 %v4412_v34, %v4408_v41  ;;  %v13109_v41 = vpack.c.bf16 %v4420_v30, %v4416_v16  ;;  %v13111_v34 = vpack.c.bf16 %v4422_v21, %v4418_v62 }
0x10b0   :  { %4172 = vmatprep.mubr.f32.mxu0 %v12969_v47  ;;  %4285 = vmatprep.mubr.f32.mxu1 %v12969_v47  ;;  %v13117_v24 = vsel %vm2110_vm15, %v12634_v38, %v14126_v61  ;;  %v4080_v38 = vld [vmem:[#allocation17] sm:$0xf] }
0x10b1   :  { %9263 = vmatpush1.bf16.msra.mxu0 %v12989_v57  ;;  %9295 = vmatpush1.bf16.msra.mxu1 %v12991_v49  ;;  %14127 = vst [vmem:[#allocation38_spill] sm:$0xff] %v13117_v24  ;;  %v13166_v26 = vrot.slane %v4080_v38, %v14128_v31  ;;  %v13169_v52 = vrot.slane %v4080_v38, %v14129_v2 }
0x10b2   :  { %9265 = vmatprep.subr.bf16.mxu0 %v12995_v45  ;;  %9297 = vmatprep.subr.bf16.mxu1 %v12997_v56 }
0x10b3   :  { %4173 = vmatmul.mubr.f32.gmra.mrb[34].mxu0 %v14121_v60  ;;  %4286 = vmatmul.mubr.f32.gmra.mrb[34].mxu1 %v14121_v60 }
0x10b4   :  { %4178 = vmatprep.mubr.f32.mxu0 %v12920_v48  ;;  %4291 = vmatprep.mubr.f32.mxu1 %v12920_v48 }
0x10b5   :  { %9267 = vmatpush1.bf16.msra.mxu0 %v13009_v46  ;;  %9299 = vmatpush1.bf16.msra.mxu1 %v13011_v13 }
0x10b6   :  { %9269 = vmatprep.subr.bf16.mxu0 %v13015_v32  ;;  %9301 = vmatprep.subr.bf16.mxu1 %v13017_v51 }
0x10b7   :  { %4179 = vmatmul.mubr.f32.gmra.mrb[36].mxu0 %v14122_v53  ;;  %4292 = vmatmul.mubr.f32.gmra.mrb[36].mxu1 %v14122_v53 }
0x10b8   :  { %4184 = vmatprep.mubr.f32.mxu0 %v12869_v44  ;;  %4297 = vmatprep.mubr.f32.mxu1 %v12869_v44 }
0x10b9   :  { %9271 = vmatpush1.bf16.msra.mxu0 %v13025_v9  ;;  %9303 = vmatpush1.bf16.msra.mxu1 %v13027_v22 }
0x10ba   :  { %9273 = vmatprep.subr.bf16.mxu0 %v13031_v5  ;;  %9305 = vmatprep.subr.bf16.mxu1 %v13033_v4 }
0x10bb   :  { %4185 = vmatmul.mubr.f32.gmra.mrb[38].mxu0 %v14123_v58  ;;  %4298 = vmatmul.mubr.f32.gmra.mrb[38].mxu1 %v14123_v58 }
0x10bc   :  { %4190 = vmatprep.mubr.f32.mxu0 %v12818_v59  ;;  %4303 = vmatprep.mubr.f32.mxu1 %v12818_v59 }
0x10bd   :  { %9275 = vmatpush1.bf16.msra.mxu0 %v13041_v19  ;;  %9307 = vmatpush1.bf16.msra.mxu1 %v13043_v18 }
0x10be   :  { %9277 = vmatprep.subr.bf16.mxu0 %v13047_v7  ;;  %9309 = vmatprep.subr.bf16.mxu1 %v13049_v3 }
0x10bf   :  { %4191 = vmatmul.mubr.f32.gmra.mrb[40].mxu0 %v14124_v55  ;;  %4304 = vmatmul.mubr.f32.gmra.mrb[40].mxu1 %v14124_v55 }
0x10c0   :  { %4196 = vmatprep.mubr.f32.mxu0 %v12767_v12  ;;  %4309 = vmatprep.mubr.f32.mxu1 %v12767_v12 }
0x10c1   :  { %9279 = vmatpush1.bf16.msra.mxu0 %v13057_v20  ;;  %9311 = vmatpush1.bf16.msra.mxu1 %v13059_v10 }
0x10c2   :  { %9281 = vmatprep.subr.bf16.mxu0 %v13063_v50  ;;  %9313 = vmatprep.subr.bf16.mxu1 %v13065_v14 }
0x10c3   :  { %4197 = vmatmul.mubr.f32.gmra.mrb[42].mxu0 %v14125_v29  ;;  %4310 = vmatmul.mubr.f32.gmra.mrb[42].mxu1 %v14125_v29  ;;  %v14131_v29 = vld [vmem:[#allocation37_spill] sm:$0xff] }
0x10c4   :  { %4202 = vmatprep.mubr.f32.mxu0 %v12716_v54  ;;  %4315 = vmatprep.mubr.f32.mxu1 %v12716_v54  ;;  %v13178_v2 = vrot.slane %v4080_v38, %v14131_v29 }
0x10c5   :  { %9283 = vmatpush1.bf16.msra.mxu0 %v13073_v8  ;;  %9315 = vmatpush1.bf16.msra.mxu1 %v13075_v33 }
0x10c6   :  { %9285 = vmatprep.subr.bf16.mxu0 %v13079_v0  ;;  %9317 = vmatprep.subr.bf16.mxu1 %v13081_v40 }
0x10c7   :  { %4203 = vmatmul.mubr.f32.gmra.mrb[44].mxu0 %v14126_v61  ;;  %4316 = vmatmul.mubr.f32.gmra.mrb[44].mxu1 %v14126_v61  ;;  %v14130_v61 = vld [vmem:[#allocation36_spill] sm:$0xff] }
0x10c8   :  { %7938 = vmatprep.mubr.msk.f32.mxu0 %vm2110_vm15, %v12657_v11  ;;  %7940 = vmatprep.mubr.msk.f32.mxu1 %vm2110_vm15, %v12657_v11  ;;  %v13174_v54 = vrot.slane %v4080_v38, %v14130_v61 }
0x10c9   :  { %9287 = vmatpush1.bf16.msra.mxu0 %v13089_v17  ;;  %9319 = vmatpush1.bf16.msra.mxu1 %v13091_v35 }
0x10ca   :  { %9289 = vmatprep.subr.bf16.mxu0 %v13095_v43  ;;  %9321 = vmatprep.subr.bf16.mxu1 %v13097_v1 }
0x10cb   :  { %4209 = vmatmul.mubr.f32.gmra.mrb[46].mxu0 %v13117_v24  ;;  %4322 = vmatmul.mubr.f32.gmra.mrb[46].mxu1 %v13117_v24 }
0x10cc   :  { %4492 = vmatprep.mubr.f32.mxu0 %v14109_v27  ;;  %4563 = vmatprep.mubr.f32.mxu1 %v14109_v27 }
0x10cd   :  { %9291 = vmatpush1.bf16.msra.mxu0 %v13109_v41  ;;  %9323 = vmatpush1.bf16.msra.mxu1 %v13111_v34 }
0x10ce   :  { %9325 = vmatprep.subr.bf16.mxu0 %v12973_v42  ;;  %9357 = vmatprep.subr.bf16.mxu1 %v12975_v28 }
0x10d0   :  { %4493 = vmatmul.mubr.f32.vlgmr.msra.gmra.mrb[32].mxu0 %v14109_v27  ;;  %4564 = vmatmul.mubr.f32.vlgmr.msra.gmra.mrb[32].mxu1 %v14109_v27 }
0x10d1   :  { %9327 = vmatpush1.bf16.msra.mxu0 %v12989_v57  ;;  %9359 = vmatpush1.bf16.msra.mxu1 %v12991_v49 }
0x10d2   :  { %9329 = vmatprep.subr.bf16.mxu0 %v12995_v45  ;;  %9361 = vmatprep.subr.bf16.mxu1 %v12997_v56 }
0x10d3   :  { %4668 = vmatprep.mubr.f32.mxu0 %v14109_v27  ;;  %4739 = vmatprep.mubr.f32.mxu1 %v14109_v27 }
0x10d5   :  { %9331 = vmatpush1.bf16.msra.mxu0 %v13009_v46  ;;  %9363 = vmatpush1.bf16.msra.mxu1 %v13011_v13 }
0x10d6   :  { %9333 = vmatprep.subr.bf16.mxu0 %v13015_v32  ;;  %9365 = vmatprep.subr.bf16.mxu1 %v13017_v51 }
0x10d9   :  { %9335 = vmatpush1.bf16.msra.mxu0 %v13025_v9  ;;  %9367 = vmatpush1.bf16.msra.mxu1 %v13027_v22 }
0x10da   :  { %9337 = vmatprep.subr.bf16.mxu0 %v13031_v5  ;;  %9369 = vmatprep.subr.bf16.mxu1 %v13033_v4 }
0x10dd   :  { %9339 = vmatpush1.bf16.msra.mxu0 %v13041_v19  ;;  %9371 = vmatpush1.bf16.msra.mxu1 %v13043_v18 }
0x10de   :  { %9341 = vmatprep.subr.bf16.mxu0 %v13047_v7  ;;  %9373 = vmatprep.subr.bf16.mxu1 %v13049_v3 }
0x10e1   :  { %9343 = vmatpush1.bf16.msra.mxu0 %v13057_v20  ;;  %9375 = vmatpush1.bf16.msra.mxu1 %v13059_v10 }
0x10e2   :  { %9345 = vmatprep.subr.bf16.mxu0 %v13063_v50  ;;  %9377 = vmatprep.subr.bf16.mxu1 %v13065_v14 }
0x10e5   :  { %9347 = vmatpush1.bf16.msra.mxu0 %v13073_v8  ;;  %9379 = vmatpush1.bf16.msra.mxu1 %v13075_v33 }
0x10e6   :  { %9349 = vmatprep.subr.bf16.mxu0 %v13079_v0  ;;  %9381 = vmatprep.subr.bf16.mxu1 %v13081_v40 }
0x10e9   :  { %9351 = vmatpush1.bf16.msra.mxu0 %v13089_v17  ;;  %9383 = vmatpush1.bf16.msra.mxu1 %v13091_v35 }
0x10ea   :  { %9353 = vmatprep.subr.bf16.mxu0 %v13095_v43  ;;  %9385 = vmatprep.subr.bf16.mxu1 %v13097_v1 }
0x10ed   :  { %9355 = vmatpush1.bf16.msra.mxu0 %v13109_v41  ;;  %9387 = vmatpush1.bf16.msra.mxu1 %v13111_v34 }
0x10ee   :  { %9389 = vmatprep.subr.bf16.mxu0 %v12973_v42  ;;  %9421 = vmatprep.subr.bf16.mxu1 %v12975_v28 }
0x11a3   :  { %v4494_v36 = vpop.f32.mrb[32].mxu0  ;;  %v4565_v16 = vpop.f32.mrb[32].mxu1 }
0x11a4   :  { %v10508_v30 = vadd.f32 %v4494_v36, %v13166_v26  ;;  %v4496_v62 = vpop.f32.mrb[33].mxu0  ;;  %v4567_v21 = vpop.f32.mrb[33].mxu1  ;;  %v10524_v55 = vadd.f32 %v4565_v16, %v13178_v2 }
0x11a5   :  { %v10509_v24 = vadd.f32 %v4496_v62, %v13169_v52  ;;  %v10525_v31 = vadd.f32 %v4567_v21, %v13174_v54 }
0x11a6   :  { %v7884_v15 = vmul.f32 -1.442695, %v10508_v30 }
0x11a7   :  { %v7885_v11 = vmul.f32 -1.442695, %v10509_v24  ;;  %v7886_v12 = vmul.f32 -1.442695, %v10525_v31 }
0x11a8   :  { %10978 = vpow2.f32 %v7884_v15 }
0x11a9   :  { %10980 = vpow2.f32 %v7885_v11 }
0x11aa   :  { %10982 = vpow2.f32 %v7886_v12 }
0x11ab   :  { %10984 = vtanh.f32 %v10524_v55 }
0x11b2   :  { %v10979_v36 = vpop.eup %10978 }
0x11b3   :  { %v10981_v59 = vpop.eup %10980  ;;  %v4577_v58 = vadd.f32 1.0, %v10979_v36 }
0x11b4   :  { %v4583_v30 = vadd.f32 1.0, %v10981_v59  ;;  %v10983_v24 = vpop.eup %10982 }
0x11b5   :  { %10986 = vrcp.f32 %v4577_v58  ;;  %v10985_v62 = vpop.eup %10984  ;;  %v4590_v21 = vadd.f32 1.0, %v10983_v24 }
0x11b6   :  { %10988 = vrcp.f32 %v4583_v30 }
0x11b7   :  { %10990 = vrcp.f32 %v4590_v21 }
0x11bf   :  { %v10987_v15 = vpop.eup %10986 }
0x11c0   :  { %v10989_v11 = vpop.eup %10988  ;;  %v4594_v61 = vmul.f32 %v10987_v15, %v10985_v62 }
0x11c1   :  { %v4593_v44 = vmul.f32 0.0, %v10989_v11  ;;  %v10991_v31 = vpop.eup %10990 }
0x11c3   :  { %v13181_v38 = vadd.f32 %v4594_v61, %v4593_v44 }
0x11c5   :  { %10992 = vtanh.f32 %v13181_v38 }
0x11cf   :  { %v10993_v16 = vpop.eup %10992 }
0x11d0   :  { %v13184_v36 = vmul.f32 %v10993_v16, %v10991_v31 }
0x11d2   :  { %7887 = vmatmul.mubr.msk.f32.vlgmr.msra.gmra.mrb[34].mxu0 %vm836_vm4, %v13184_v36  ;;  %7888 = vmatmul.mubr.msk.f32.vlgmr.msra.gmra.mrb[34].mxu1 %vm836_vm4, %v13184_v36 }
0x11d3   :  { %9391 = vmatpush1.bf16.msra.mxu0 %v12989_v57  ;;  %9423 = vmatpush1.bf16.msra.mxu1 %v12991_v49 }
0x11d4   :  { %9393 = vmatprep.subr.bf16.mxu0 %v12995_v45  ;;  %9425 = vmatprep.subr.bf16.mxu1 %v12997_v56 }
0x11d5   :  { %4844 = vmatprep.mubr.f32.mxu0 %v14109_v27  ;;  %4915 = vmatprep.mubr.f32.mxu1 %v14109_v27 }
0x11d7   :  { %9395 = vmatpush1.bf16.msra.mxu0 %v13009_v46  ;;  %9427 = vmatpush1.bf16.msra.mxu1 %v13011_v13 }
0x11d8   :  { %9397 = vmatprep.subr.bf16.mxu0 %v13015_v32  ;;  %9429 = vmatprep.subr.bf16.mxu1 %v13017_v51 }
0x11db   :  { %9399 = vmatpush1.bf16.msra.mxu0 %v13025_v9  ;;  %9431 = vmatpush1.bf16.msra.mxu1 %v13027_v22 }
0x11dc   :  { %9401 = vmatprep.subr.bf16.mxu0 %v13031_v5  ;;  %9433 = vmatprep.subr.bf16.mxu1 %v13033_v4 }
0x11df   :  { %9403 = vmatpush1.bf16.msra.mxu0 %v13041_v19  ;;  %9435 = vmatpush1.bf16.msra.mxu1 %v13043_v18 }
0x11e0   :  { %9405 = vmatprep.subr.bf16.mxu0 %v13047_v7  ;;  %9437 = vmatprep.subr.bf16.mxu1 %v13049_v3 }
0x11e3   :  { %9407 = vmatpush1.bf16.msra.mxu0 %v13057_v20  ;;  %9439 = vmatpush1.bf16.msra.mxu1 %v13059_v10 }
0x11e4   :  { %9409 = vmatprep.subr.bf16.mxu0 %v13063_v50  ;;  %9441 = vmatprep.subr.bf16.mxu1 %v13065_v14 }
0x11e7   :  { %9411 = vmatpush1.bf16.msra.mxu0 %v13073_v8  ;;  %9443 = vmatpush1.bf16.msra.mxu1 %v13075_v33 }
0x11e8   :  { %9413 = vmatprep.subr.bf16.mxu0 %v13079_v0  ;;  %9445 = vmatprep.subr.bf16.mxu1 %v13081_v40 }
0x11eb   :  { %9415 = vmatpush1.bf16.msra.mxu0 %v13089_v17  ;;  %9447 = vmatpush1.bf16.msra.mxu1 %v13091_v35 }
0x11ec   :  { %9417 = vmatprep.subr.bf16.mxu0 %v13095_v43  ;;  %9449 = vmatprep.subr.bf16.mxu1 %v13097_v1 }
0x11ef   :  { %9419 = vmatpush1.bf16.msra.mxu0 %v13109_v41  ;;  %9451 = vmatpush1.bf16.msra.mxu1 %v13111_v34 }
0x11f0   :  { %9453 = vmatprep.subr.bf16.mxu0 %v12973_v42  ;;  %9485 = vmatprep.subr.bf16.mxu1 %v12975_v28 }
0x12a5   :  { %v4670_v12 = vpop.f32.mrb[34].mxu0  ;;  %v4741_v59 = vpop.f32.mrb[34].mxu1 }
0x12a6   :  { %v10510_v44 = vadd.f32 %v4670_v12, %v13166_v26  ;;  %v4672_v58 = vpop.f32.mrb[35].mxu0  ;;  %v4743_v55 = vpop.f32.mrb[35].mxu1  ;;  %v10526_v11 = vadd.f32 %v4741_v59, %v13178_v2 }
0x12a7   :  { %v10511_v61 = vadd.f32 %v4672_v58, %v13169_v52  ;;  %v10527_v62 = vadd.f32 %v4743_v55, %v13174_v54 }
0x12a8   :  { %v7889_v30 = vmul.f32 -1.442695, %v10510_v44 }
0x12a9   :  { %v7890_v24 = vmul.f32 -1.442695, %v10511_v61  ;;  %v7891_v15 = vmul.f32 -1.442695, %v10527_v62  ;;  %v4599_v61 = vsel %vm836_vm4, %v13181_v38, 0.0 }
0x12aa   :  { %10994 = vpow2.f32 %v7889_v30 }
0x12ab   :  { %10996 = vpow2.f32 %v7890_v24 }
0x12ac   :  { %10998 = vpow2.f32 %v7891_v15 }
0x12ad   :  { %11000 = vtanh.f32 %v10526_v11 }
0x12b4   :  { %v10995_v21 = vpop.eup %10994 }
0x12b5   :  { %v10997_v31 = vpop.eup %10996  ;;  %v4753_v16 = vadd.f32 1.0, %v10995_v21  ;;  %v4598_v21 = vsel %vm836_vm4, %v13184_v36, 0.0 }
0x12b6   :  { %v4759_v29 = vadd.f32 1.0, %v10997_v31  ;;  %v10999_v12 = vpop.eup %10998 }
0x12b7   :  { %11002 = vrcp.f32 %v4753_v16  ;;  %v11001_v53 = vpop.eup %11000  ;;  %v4766_v30 = vadd.f32 1.0, %v10999_v12 }
0x12b8   :  { %11004 = vrcp.f32 %v4759_v29 }
0x12b9   :  { %11006 = vrcp.f32 %v4766_v30 }
0x12c1   :  { %v11003_v58 = vpop.eup %11002 }
0x12c2   :  { %v11005_v44 = vpop.eup %11004  ;;  %v4770_v55 = vmul.f32 %v11003_v58, %v11001_v53 }
0x12c3   :  { %v4769_v24 = vmul.f32 %v11005_v44, %v4599_v61  ;;  %v11007_v15 = vpop.eup %11006 }
0x12c5   :  { %v4771_v59 = vadd.f32 %v4770_v55, %v4769_v24 }
0x12c7   :  { %11008 = vtanh.f32 %v4771_v59  ;;  %v13235_v62 = vsel %vm1018_vm9, %v4771_v59, %v4599_v61 }
0x12d1   :  { %v11009_v29 = vpop.eup %11008 }
0x12d2   :  { %v4773_v11 = vmul.f32 %v11009_v29, %v11007_v15 }
0x12d4   :  { %v13242_v38 = vsel %vm1018_vm9, %v4773_v11, %v4598_v21 }
0x12d5   :  { %4845 = vmatmul.mubr.f32.vlgmr.msra.gmra.mrb[36].mxu0 %v13242_v38  ;;  %4916 = vmatmul.mubr.f32.vlgmr.msra.gmra.mrb[36].mxu1 %v13242_v38 }
0x12d6   :  { %9455 = vmatpush1.bf16.msra.mxu0 %v12989_v57  ;;  %9487 = vmatpush1.bf16.msra.mxu1 %v12991_v49 }
0x12d7   :  { %9457 = vmatprep.subr.bf16.mxu0 %v12995_v45  ;;  %9489 = vmatprep.subr.bf16.mxu1 %v12997_v56 }
0x12d8   :  { %5020 = vmatprep.mubr.f32.mxu0 %v14109_v27  ;;  %5091 = vmatprep.mubr.f32.mxu1 %v14109_v27 }
0x12da   :  { %9459 = vmatpush1.bf16.msra.mxu0 %v13009_v46  ;;  %9491 = vmatpush1.bf16.msra.mxu1 %v13011_v13 }
0x12db   :  { %9461 = vmatprep.subr.bf16.mxu0 %v13015_v32  ;;  %9493 = vmatprep.subr.bf16.mxu1 %v13017_v51 }
0x12de   :  { %9463 = vmatpush1.bf16.msra.mxu0 %v13025_v9  ;;  %9495 = vmatpush1.bf16.msra.mxu1 %v13027_v22 }
0x12df   :  { %9465 = vmatprep.subr.bf16.mxu0 %v13031_v5  ;;  %9497 = vmatprep.subr.bf16.mxu1 %v13033_v4 }
0x12e2   :  { %9467 = vmatpush1.bf16.msra.mxu0 %v13041_v19  ;;  %9499 = vmatpush1.bf16.msra.mxu1 %v13043_v18 }
0x12e3   :  { %9469 = vmatprep.subr.bf16.mxu0 %v13047_v7  ;;  %9501 = vmatprep.subr.bf16.mxu1 %v13049_v3 }
0x12e6   :  { %9471 = vmatpush1.bf16.msra.mxu0 %v13057_v20  ;;  %9503 = vmatpush1.bf16.msra.mxu1 %v13059_v10 }
0x12e7   :  { %9473 = vmatprep.subr.bf16.mxu0 %v13063_v50  ;;  %9505 = vmatprep.subr.bf16.mxu1 %v13065_v14 }
0x12ea   :  { %9475 = vmatpush1.bf16.msra.mxu0 %v13073_v8  ;;  %9507 = vmatpush1.bf16.msra.mxu1 %v13075_v33 }
0x12eb   :  { %9477 = vmatprep.subr.bf16.mxu0 %v13079_v0  ;;  %9509 = vmatprep.subr.bf16.mxu1 %v13081_v40 }
0x12ee   :  { %9479 = vmatpush1.bf16.msra.mxu0 %v13089_v17  ;;  %9511 = vmatpush1.bf16.msra.mxu1 %v13091_v35 }
0x12ef   :  { %9481 = vmatprep.subr.bf16.mxu0 %v13095_v43  ;;  %9513 = vmatprep.subr.bf16.mxu1 %v13097_v1 }
0x12f2   :  { %9483 = vmatpush1.bf16.msra.mxu0 %v13109_v41  ;;  %9515 = vmatpush1.bf16.msra.mxu1 %v13111_v34 }
0x12f3   :  { %9517 = vmatprep.subr.bf16.mxu0 %v12973_v42  ;;  %9549 = vmatprep.subr.bf16.mxu1 %v12975_v28 }
0x13a8   :  { %v4846_v53 = vpop.f32.mrb[36].mxu0  ;;  %v4917_v36 = vpop.f32.mrb[36].mxu1 }
0x13a9   :  { %v10512_v31 = vadd.f32 %v4846_v53, %v13166_v26  ;;  %v4848_v16 = vpop.f32.mrb[37].mxu0  ;;  %v4919_v12 = vpop.f32.mrb[37].mxu1  ;;  %v10528_v24 = vadd.f32 %v4917_v36, %v13178_v2 }
0x13aa   :  { %v10513_v58 = vadd.f32 %v4848_v16, %v13169_v52  ;;  %v10529_v55 = vadd.f32 %v4919_v12, %v13174_v54 }
0x13ab   :  { %v7892_v44 = vmul.f32 -1.442695, %v10512_v31 }
0x13ac   :  { %v7893_v61 = vmul.f32 -1.442695, %v10513_v58  ;;  %v7894_v30 = vmul.f32 -1.442695, %v10529_v55 }
0x13ad   :  { %11010 = vpow2.f32 %v7892_v44 }
0x13ae   :  { %11012 = vpow2.f32 %v7893_v61 }
0x13af   :  { %11014 = vpow2.f32 %v7894_v30 }
0x13b0   :  { %11016 = vtanh.f32 %v10528_v24 }
0x13b7   :  { %v11011_v59 = vpop.eup %11010 }
0x13b8   :  { %v11013_v15 = vpop.eup %11012  ;;  %v4929_v29 = vadd.f32 1.0, %v11011_v59 }
0x13b9   :  { %v4935_v11 = vadd.f32 1.0, %v11013_v15  ;;  %v11015_v21 = vpop.eup %11014 }
0x13ba   :  { %11018 = vrcp.f32 %v4929_v29  ;;  %v11017_v53 = vpop.eup %11016  ;;  %v4942_v44 = vadd.f32 1.0, %v11015_v21 }
0x13bb   :  { %11020 = vrcp.f32 %v4935_v11 }
0x13bc   :  { %11022 = vrcp.f32 %v4942_v44 }
0x13c4   :  { %v11019_v16 = vpop.eup %11018 }
0x13c5   :  { %v11021_v31 = vpop.eup %11020  ;;  %v4946_v58 = vmul.f32 %v11019_v16, %v11017_v53 }
0x13c6   :  { %v4945_v61 = vmul.f32 %v11021_v31, %v13235_v62  ;;  %v11023_v55 = vpop.eup %11022 }
0x13c8   :  { %v4947_v12 = vadd.f32 %v4946_v58, %v4945_v61 }
0x13ca   :  { %11024 = vtanh.f32 %v4947_v12  ;;  %v13288_v36 = vsel %vm1200_vm10, %v4947_v12, %v13235_v62 }
0x13d4   :  { %v11025_v30 = vpop.eup %11024 }
0x13d5   :  { %v4949_v24 = vmul.f32 %v11025_v30, %v11023_v55 }
0x13d7   :  { %v13293_v59 = vsel %vm1200_vm10, %v4949_v24, %v13242_v38 }
0x13d8   :  { %5021 = vmatmul.mubr.f32.vlgmr.msra.gmra.mrb[38].mxu0 %v13293_v59  ;;  %5092 = vmatmul.mubr.f32.vlgmr.msra.gmra.mrb[38].mxu1 %v13293_v59 }
0x13d9   :  { %9519 = vmatpush1.bf16.msra.mxu0 %v12989_v57  ;;  %9551 = vmatpush1.bf16.msra.mxu1 %v12991_v49 }
0x13da   :  { %9521 = vmatprep.subr.bf16.mxu0 %v12995_v45  ;;  %9553 = vmatprep.subr.bf16.mxu1 %v12997_v56 }
0x13db   :  { %5196 = vmatprep.mubr.f32.mxu0 %v14109_v27  ;;  %5267 = vmatprep.mubr.f32.mxu1 %v14109_v27 }
0x13dd   :  { %9523 = vmatpush1.bf16.msra.mxu0 %v13009_v46  ;;  %9555 = vmatpush1.bf16.msra.mxu1 %v13011_v13 }
0x13de   :  { %9525 = vmatprep.subr.bf16.mxu0 %v13015_v32  ;;  %9557 = vmatprep.subr.bf16.mxu1 %v13017_v51 }
0x13e1   :  { %9527 = vmatpush1.bf16.msra.mxu0 %v13025_v9  ;;  %9559 = vmatpush1.bf16.msra.mxu1 %v13027_v22 }
0x13e2   :  { %9529 = vmatprep.subr.bf16.mxu0 %v13031_v5  ;;  %9561 = vmatprep.subr.bf16.mxu1 %v13033_v4 }
0x13e5   :  { %9531 = vmatpush1.bf16.msra.mxu0 %v13041_v19  ;;  %9563 = vmatpush1.bf16.msra.mxu1 %v13043_v18 }
0x13e6   :  { %9533 = vmatprep.subr.bf16.mxu0 %v13047_v7  ;;  %9565 = vmatprep.subr.bf16.mxu1 %v13049_v3 }
0x13e9   :  { %9535 = vmatpush1.bf16.msra.mxu0 %v13057_v20  ;;  %9567 = vmatpush1.bf16.msra.mxu1 %v13059_v10 }
0x13ea   :  { %9537 = vmatprep.subr.bf16.mxu0 %v13063_v50  ;;  %9569 = vmatprep.subr.bf16.mxu1 %v13065_v14 }
0x13ed   :  { %9539 = vmatpush1.bf16.msra.mxu0 %v13073_v8  ;;  %9571 = vmatpush1.bf16.msra.mxu1 %v13075_v33 }
0x13ee   :  { %9541 = vmatprep.subr.bf16.mxu0 %v13079_v0  ;;  %9573 = vmatprep.subr.bf16.mxu1 %v13081_v40 }
0x13f1   :  { %9543 = vmatpush1.bf16.msra.mxu0 %v13089_v17  ;;  %9575 = vmatpush1.bf16.msra.mxu1 %v13091_v35 }
0x13f2   :  { %9545 = vmatprep.subr.bf16.mxu0 %v13095_v43  ;;  %9577 = vmatprep.subr.bf16.mxu1 %v13097_v1 }
0x13f5   :  { %9547 = vmatpush1.bf16.msra.mxu0 %v13109_v41  ;;  %9579 = vmatpush1.bf16.msra.mxu1 %v13111_v34 }
0x13f6   :  { %9581 = vmatprep.subr.bf16.mxu0 %v12973_v42  ;;  %9613 = vmatprep.subr.bf16.mxu1 %v12975_v28 }
0x14ab   :  { %v5022_v62 = vpop.f32.mrb[38].mxu0  ;;  %v5093_v38 = vpop.f32.mrb[38].mxu1 }
0x14ac   :  { %v10514_v15 = vadd.f32 %v5022_v62, %v13166_v26  ;;  %v5024_v29 = vpop.f32.mrb[39].mxu0  ;;  %v5095_v11 = vpop.f32.mrb[39].mxu1  ;;  %v10530_v44 = vadd.f32 %v5093_v38, %v13178_v2 }
0x14ad   :  { %v10515_v21 = vadd.f32 %v5024_v29, %v13169_v52  ;;  %v10531_v31 = vadd.f32 %v5095_v11, %v13174_v54 }
0x14ae   :  { %v7895_v53 = vmul.f32 -1.442695, %v10514_v15 }
0x14af   :  { %v7896_v16 = vmul.f32 -1.442695, %v10515_v21  ;;  %v7897_v58 = vmul.f32 -1.442695, %v10531_v31 }
0x14b0   :  { %11026 = vpow2.f32 %v7895_v53 }
0x14b1   :  { %11028 = vpow2.f32 %v7896_v16 }
0x14b2   :  { %11030 = vpow2.f32 %v7897_v58 }
0x14b3   :  { %11032 = vtanh.f32 %v10530_v44 }
0x14ba   :  { %v11027_v61 = vpop.eup %11026 }
0x14bb   :  { %v11029_v12 = vpop.eup %11028  ;;  %v5105_v55 = vadd.f32 1.0, %v11027_v61 }
0x14bc   :  { %v5111_v30 = vadd.f32 1.0, %v11029_v12  ;;  %v11031_v24 = vpop.eup %11030 }
0x14bd   :  { %11034 = vrcp.f32 %v5105_v55  ;;  %v11033_v62 = vpop.eup %11032  ;;  %v5118_v53 = vadd.f32 1.0, %v11031_v24 }
0x14be   :  { %11036 = vrcp.f32 %v5111_v30 }
0x14bf   :  { %11038 = vrcp.f32 %v5118_v53 }
0x14c7   :  { %v11035_v29 = vpop.eup %11034 }
0x14c8   :  { %v11037_v15 = vpop.eup %11036  ;;  %v5122_v21 = vmul.f32 %v11035_v29, %v11033_v62 }
0x14c9   :  { %v5121_v16 = vmul.f32 %v11037_v15, %v13288_v36  ;;  %v11039_v31 = vpop.eup %11038 }
0x14cb   :  { %v5123_v11 = vadd.f32 %v5122_v21, %v5121_v16 }
0x14cd   :  { %11040 = vtanh.f32 %v5123_v11  ;;  %v13339_v38 = vsel %vm1382_vm11, %v5123_v11, %v13288_v36 }
0x14d7   :  { %v11041_v58 = vpop.eup %11040 }
0x14d8   :  { %v5125_v44 = vmul.f32 %v11041_v58, %v11039_v31 }
0x14da   :  { %v13344_v61 = vsel %vm1382_vm11, %v5125_v44, %v13293_v59 }
0x14db   :  { %5197 = vmatmul.mubr.f32.vlgmr.msra.gmra.mrb[40].mxu0 %v13344_v61  ;;  %5268 = vmatmul.mubr.f32.vlgmr.msra.gmra.mrb[40].mxu1 %v13344_v61 }
0x14dc   :  { %9583 = vmatpush1.bf16.msra.mxu0 %v12989_v57  ;;  %9615 = vmatpush1.bf16.msra.mxu1 %v12991_v49 }
0x14dd   :  { %9585 = vmatprep.subr.bf16.mxu0 %v12995_v45  ;;  %9617 = vmatprep.subr.bf16.mxu1 %v12997_v56 }
0x14de   :  { %5372 = vmatprep.mubr.f32.mxu0 %v14109_v27  ;;  %5443 = vmatprep.mubr.f32.mxu1 %v14109_v27 }
0x14e0   :  { %9587 = vmatpush1.bf16.msra.mxu0 %v13009_v46  ;;  %9619 = vmatpush1.bf16.msra.mxu1 %v13011_v13 }
0x14e1   :  { %9589 = vmatprep.subr.bf16.mxu0 %v13015_v32  ;;  %9621 = vmatprep.subr.bf16.mxu1 %v13017_v51 }
0x14e4   :  { %9591 = vmatpush1.bf16.msra.mxu0 %v13025_v9  ;;  %9623 = vmatpush1.bf16.msra.mxu1 %v13027_v22 }
0x14e5   :  { %9593 = vmatprep.subr.bf16.mxu0 %v13031_v5  ;;  %9625 = vmatprep.subr.bf16.mxu1 %v13033_v4 }
0x14e8   :  { %9595 = vmatpush1.bf16.msra.mxu0 %v13041_v19  ;;  %9627 = vmatpush1.bf16.msra.mxu1 %v13043_v18 }
0x14e9   :  { %9597 = vmatprep.subr.bf16.mxu0 %v13047_v7  ;;  %9629 = vmatprep.subr.bf16.mxu1 %v13049_v3 }
0x14ec   :  { %9599 = vmatpush1.bf16.msra.mxu0 %v13057_v20  ;;  %9631 = vmatpush1.bf16.msra.mxu1 %v13059_v10 }
0x14ed   :  { %9601 = vmatprep.subr.bf16.mxu0 %v13063_v50  ;;  %9633 = vmatprep.subr.bf16.mxu1 %v13065_v14 }
0x14f0   :  { %9603 = vmatpush1.bf16.msra.mxu0 %v13073_v8  ;;  %9635 = vmatpush1.bf16.msra.mxu1 %v13075_v33 }
0x14f1   :  { %9605 = vmatprep.subr.bf16.mxu0 %v13079_v0  ;;  %9637 = vmatprep.subr.bf16.mxu1 %v13081_v40 }
0x14f4   :  { %9607 = vmatpush1.bf16.msra.mxu0 %v13089_v17  ;;  %9639 = vmatpush1.bf16.msra.mxu1 %v13091_v35 }
0x14f5   :  { %9609 = vmatprep.subr.bf16.mxu0 %v13095_v43  ;;  %9641 = vmatprep.subr.bf16.mxu1 %v13097_v1 }
0x14f8   :  { %9611 = vmatpush1.bf16.msra.mxu0 %v13109_v41  ;;  %9643 = vmatpush1.bf16.msra.mxu1 %v13111_v34 }
0x14f9   :  { %9645 = vmatprep.subr.bf16.mxu0 %v12973_v42  ;;  %9677 = vmatprep.subr.bf16.mxu1 %v12975_v28 }
0x15ae   :  { %v5198_v36 = vpop.f32.mrb[40].mxu0  ;;  %v5269_v59 = vpop.f32.mrb[40].mxu1 }
0x15af   :  { %v10516_v12 = vadd.f32 %v5198_v36, %v13166_v26  ;;  %v5200_v55 = vpop.f32.mrb[41].mxu0  ;;  %v5271_v30 = vpop.f32.mrb[41].mxu1  ;;  %v10532_v53 = vadd.f32 %v5269_v59, %v13178_v2 }
0x15b0   :  { %v10517_v24 = vadd.f32 %v5200_v55, %v13169_v52  ;;  %v10533_v15 = vadd.f32 %v5271_v30, %v13174_v54 }
0x15b1   :  { %v7898_v62 = vmul.f32 -1.442695, %v10516_v12 }
0x15b2   :  { %v7899_v29 = vmul.f32 -1.442695, %v10517_v24  ;;  %v7900_v21 = vmul.f32 -1.442695, %v10533_v15 }
0x15b3   :  { %11042 = vpow2.f32 %v7898_v62 }
0x15b4   :  { %11044 = vpow2.f32 %v7899_v29 }
0x15b5   :  { %11046 = vpow2.f32 %v7900_v21 }
0x15b6   :  { %11048 = vtanh.f32 %v10532_v53 }
0x15bd   :  { %v11043_v16 = vpop.eup %11042 }
0x15be   :  { %v11045_v11 = vpop.eup %11044  ;;  %v5281_v31 = vadd.f32 1.0, %v11043_v16 }
0x15bf   :  { %v5287_v58 = vadd.f32 1.0, %v11045_v11  ;;  %v11047_v44 = vpop.eup %11046 }
0x15c0   :  { %11050 = vrcp.f32 %v5281_v31  ;;  %v11049_v36 = vpop.eup %11048  ;;  %v5294_v62 = vadd.f32 1.0, %v11047_v44 }
0x15c1   :  { %11052 = vrcp.f32 %v5287_v58 }
0x15c2   :  { %11054 = vrcp.f32 %v5294_v62 }
0x15ca   :  { %v11051_v55 = vpop.eup %11050 }
0x15cb   :  { %v11053_v12 = vpop.eup %11052  ;;  %v5298_v24 = vmul.f32 %v11051_v55, %v11049_v36 }
0x15cc   :  { %v5297_v29 = vmul.f32 %v11053_v12, %v13339_v38  ;;  %v11055_v21 = vpop.eup %11054 }
0x15ce   :  { %v5299_v30 = vadd.f32 %v5298_v24, %v5297_v29 }
0x15d0   :  { %11056 = vtanh.f32 %v5299_v30  ;;  %v13390_v15 = vsel %vm1564_vm12, %v5299_v30, %v13339_v38 }
0x15da   :  { %v11057_v53 = vpop.eup %11056 }
0x15db   :  { %v5301_v16 = vmul.f32 %v11057_v53, %v11055_v21 }
0x15dd   :  { %v13395_v11 = vsel %vm1564_vm12, %v5301_v16, %v13344_v61 }
0x15de   :  { %5373 = vmatmul.mubr.f32.vlgmr.msra.gmra.mrb[42].mxu0 %v13395_v11  ;;  %5444 = vmatmul.mubr.f32.vlgmr.msra.gmra.mrb[42].mxu1 %v13395_v11 }
0x15df   :  { %9647 = vmatpush1.bf16.msra.mxu0 %v12989_v57  ;;  %9679 = vmatpush1.bf16.msra.mxu1 %v12991_v49 }
0x15e0   :  { %9649 = vmatprep.subr.bf16.mxu0 %v12995_v45  ;;  %9681 = vmatprep.subr.bf16.mxu1 %v12997_v56 }
0x15e1   :  { %5548 = vmatprep.mubr.f32.mxu0 %v14109_v27  ;;  %5619 = vmatprep.mubr.f32.mxu1 %v14109_v27 }
0x15e3   :  { %9651 = vmatpush1.bf16.msra.mxu0 %v13009_v46  ;;  %9683 = vmatpush1.bf16.msra.mxu1 %v13011_v13 }
0x15e4   :  { %9653 = vmatprep.subr.bf16.mxu0 %v13015_v32  ;;  %9685 = vmatprep.subr.bf16.mxu1 %v13017_v51 }
0x15e7   :  { %9655 = vmatpush1.bf16.msra.mxu0 %v13025_v9  ;;  %9687 = vmatpush1.bf16.msra.mxu1 %v13027_v22 }
0x15e8   :  { %9657 = vmatprep.subr.bf16.mxu0 %v13031_v5  ;;  %9689 = vmatprep.subr.bf16.mxu1 %v13033_v4 }
0x15eb   :  { %9659 = vmatpush1.bf16.msra.mxu0 %v13041_v19  ;;  %9691 = vmatpush1.bf16.msra.mxu1 %v13043_v18 }
0x15ec   :  { %9661 = vmatprep.subr.bf16.mxu0 %v13047_v7  ;;  %9693 = vmatprep.subr.bf16.mxu1 %v13049_v3 }
0x15ef   :  { %9663 = vmatpush1.bf16.msra.mxu0 %v13057_v20  ;;  %9695 = vmatpush1.bf16.msra.mxu1 %v13059_v10 }
0x15f0   :  { %9665 = vmatprep.subr.bf16.mxu0 %v13063_v50  ;;  %9697 = vmatprep.subr.bf16.mxu1 %v13065_v14 }
0x15f3   :  { %9667 = vmatpush1.bf16.msra.mxu0 %v13073_v8  ;;  %9699 = vmatpush1.bf16.msra.mxu1 %v13075_v33 }
0x15f4   :  { %9669 = vmatprep.subr.bf16.mxu0 %v13079_v0  ;;  %9701 = vmatprep.subr.bf16.mxu1 %v13081_v40 }
0x15f7   :  { %9671 = vmatpush1.bf16.msra.mxu0 %v13089_v17  ;;  %9703 = vmatpush1.bf16.msra.mxu1 %v13091_v35 }
0x15f8   :  { %9673 = vmatprep.subr.bf16.mxu0 %v13095_v43  ;;  %9705 = vmatprep.subr.bf16.mxu1 %v13097_v1 }
0x15fb   :  { %9675 = vmatpush1.bf16.msra.mxu0 %v13109_v41  ;;  %9707 = vmatpush1.bf16.msra.mxu1 %v13111_v34 }
0x15fc   :  { %9709 = vmatprep.subr.bf16.mxu0 %v12973_v42  ;;  %9741 = vmatprep.subr.bf16.mxu1 %v12975_v28 }
0x16b1   :  { %v5374_v38 = vpop.f32.mrb[42].mxu0  ;;  %v5445_v61 = vpop.f32.mrb[42].mxu1 }
0x16b2   :  { %v10518_v31 = vadd.f32 %v5374_v38, %v13166_v26  ;;  %v5376_v58 = vpop.f32.mrb[43].mxu0  ;;  %v5447_v44 = vpop.f32.mrb[43].mxu1  ;;  %v10534_v29 = vadd.f32 %v5445_v61, %v13178_v2 }
0x16b3   :  { %v10519_v36 = vadd.f32 %v5376_v58, %v13169_v52  ;;  %v10535_v24 = vadd.f32 %v5447_v44, %v13174_v54 }
0x16b4   :  { %v7901_v55 = vmul.f32 -1.442695, %v10518_v31 }
0x16b5   :  { %v7902_v12 = vmul.f32 -1.442695, %v10519_v36  ;;  %v7903_v62 = vmul.f32 -1.442695, %v10535_v24 }
0x16b6   :  { %11058 = vpow2.f32 %v7901_v55 }
0x16b7   :  { %11060 = vpow2.f32 %v7902_v12 }
0x16b8   :  { %11062 = vpow2.f32 %v7903_v62 }
0x16b9   :  { %11064 = vtanh.f32 %v10534_v29 }
0x16c0   :  { %v11059_v42 = vpop.eup %11058 }
0x16c1   :  { %v11061_v30 = vpop.eup %11060  ;;  %v5457_v28 = vadd.f32 1.0, %v11059_v42 }
0x16c2   :  { %v5463_v21 = vadd.f32 1.0, %v11061_v30  ;;  %v11063_v53 = vpop.eup %11062  ;;  %v5835_v30 = vld [vmem:[#allocation18 + $0x20] sm:$0xff] }
0x16c3   :  { %11066 = vrcp.f32 %v5457_v28  ;;  %v11065_v16 = vpop.eup %11064  ;;  %v5470_v36 = vadd.f32 1.0, %v11063_v53  ;;  %v5833_v28 = vld [vmem:[#allocation18 + $0x10] sm:$0xff] }
0x16c4   :  { %11068 = vrcp.f32 %v5463_v21  ;;  %v5837_v21 = vld [vmem:[#allocation18 + $0x30] sm:$0xff] }
0x16c5   :  { %11070 = vrcp.f32 %v5470_v36  ;;  %v5846_v36 = vld [vmem:[#allocation18 + $0x78] sm:$0xff] }
0x16cd   :  { %v11067_v38 = vpop.eup %11066 }
0x16ce   :  { %v11069_v31 = vpop.eup %11068  ;;  %v5474_v58 = vmul.f32 %v11067_v38, %v11065_v16  ;;  %v5840_v16 = vld [vmem:[#allocation18 + $0x48] sm:$0xff] }
0x16cf   :  { %v5473_v55 = vmul.f32 %v11069_v31, %v13390_v15  ;;  %v11071_v24 = vpop.eup %11070  ;;  %v5844_v31 = vld [vmem:[#allocation18 + $0x68] sm:$0xff] }
0x16d1   :  { %v5475_v44 = vadd.f32 %v5474_v58, %v5473_v55  ;;  %v5842_v58 = vld [vmem:[#allocation18 + $0x58] sm:$0xff] }
0x16d3   :  { %11072 = vtanh.f32 %v5475_v44  ;;  %v13441_v12 = vsel %vm1746_vm13, %v5475_v44, %v13390_v15 }
0x16dd   :  { %v11073_v62 = vpop.eup %11072 }
0x16de   :  { %v5477_v29 = vmul.f32 %v11073_v62, %v11071_v24  ;;  %v9838_v24 = vpack.c.bf16 %v5837_v21, %v5833_v28  ;;  %v5839_v62 = vld [vmem:[#allocation18 + $0x40] sm:$0xff] }
0x16df   :  { %v5863_v21 = vld [vmem:[#allocation18 + $0x100] sm:$0xff] }
0x16e0   :  { %v13446_v42 = vsel %vm1746_vm13, %v5477_v29, %v13395_v11  ;;  %v5831_v11 = vld [vmem:[#allocation18] sm:$0xff] }
0x16e1   :  { %5549 = vmatmul.mubr.f32.vlgmr.msra.gmra.mrb[44].mxu0 %v13446_v42  ;;  %5620 = vmatmul.mubr.f32.vlgmr.msra.gmra.mrb[44].mxu1 %v13446_v42  ;;  %v9774_v44 = vpack.c.bf16 %v5835_v30, %v5831_v11  ;;  %v5843_v29 = vld [vmem:[#allocation18 + $0x60] sm:$0xff]  ;;  %v5870_v11 = vld [vmem:[#allocation18 + $0x138] sm:$0xff] }
0x16e2   :  { %9711 = vmatpush1.bf16.msra.mxu0 %v12989_v57  ;;  %9743 = vmatpush1.bf16.msra.mxu1 %v12991_v49  ;;  %v5832_v57 = vld [vmem:[#allocation18 + $0x8] sm:$0xff] }
0x16e3   :  { %9713 = vmatprep.subr.bf16.mxu0 %v12995_v45  ;;  %9745 = vmatprep.subr.bf16.mxu1 %v12997_v56  ;;  %v5836_v49 = vld [vmem:[#allocation18 + $0x28] sm:$0xff]  ;;  %v5834_v45 = vld [vmem:[#allocation18 + $0x18] sm:$0xff] }
0x16e4   :  { %5724 = vmatprep.mubr.f32.mxu0 %v14109_v27  ;;  %5795 = vmatprep.mubr.f32.mxu1 %v14109_v27  ;;  %v9772_v56 = vpack.c.bf16 %v5836_v49, %v5832_v57  ;;  %v5841_v57 = vld [vmem:[#allocation18 + $0x50] sm:$0xff] }
0x16e5   :  { %v5845_v49 = vld [vmem:[#allocation18 + $0x70] sm:$0xff] }
0x16e6   :  { %9715 = vmatpush1.bf16.msra.mxu0 %v13009_v46  ;;  %9747 = vmatpush1.bf16.msra.mxu1 %v13011_v13  ;;  %v5838_v46 = vld [vmem:[#allocation18 + $0x38] sm:$0xff] }
0x16e7   :  { %9717 = vmatprep.subr.bf16.mxu0 %v13015_v32  ;;  %9749 = vmatprep.subr.bf16.mxu1 %v13017_v51  ;;  %v9836_v13 = vpack.c.bf16 %v5838_v46, %v5834_v45  ;;  %v5848_v45 = vld [vmem:[#allocation18 + $0x88] sm:$0xff]  ;;  %v9840_v46 = vpack.c.bf16 %v5846_v36, %v5842_v58  ;;  %v5869_v58 = vld [vmem:[#allocation18 + $0x130] sm:$0xff] }
0x16e8   :  { %v5872_v36 = vld [vmem:[#allocation18 + $0x148] sm:$0xff] }
0x16ea   :  { %9719 = vmatpush1.bf16.msra.mxu0 %v13025_v9  ;;  %9751 = vmatpush1.bf16.msra.mxu1 %v13027_v22 }
0x16eb   :  { %9721 = vmatprep.subr.bf16.mxu0 %v13031_v5  ;;  %9753 = vmatprep.subr.bf16.mxu1 %v13033_v4 }
0x16ee   :  { %9723 = vmatpush1.bf16.msra.mxu0 %v13041_v19  ;;  %9755 = vmatpush1.bf16.msra.mxu1 %v13043_v18 }
0x16ef   :  { %9725 = vmatprep.subr.bf16.mxu0 %v13047_v7  ;;  %9757 = vmatprep.subr.bf16.mxu1 %v13049_v3 }
0x16f2   :  { %9727 = vmatpush1.bf16.msra.mxu0 %v13057_v20  ;;  %9759 = vmatpush1.bf16.msra.mxu1 %v13059_v10 }
0x16f3   :  { %9729 = vmatprep.subr.bf16.mxu0 %v13063_v50  ;;  %9761 = vmatprep.subr.bf16.mxu1 %v13065_v14 }
0x16f6   :  { %9731 = vmatpush1.bf16.msra.mxu0 %v13073_v8  ;;  %9763 = vmatpush1.bf16.msra.mxu1 %v13075_v33 }
0x16f7   :  { %9733 = vmatprep.subr.bf16.mxu0 %v13079_v0  ;;  %9765 = vmatprep.subr.bf16.mxu1 %v13081_v40 }
0x16fa   :  { %9735 = vmatpush1.bf16.msra.mxu0 %v13089_v17  ;;  %9767 = vmatpush1.bf16.msra.mxu1 %v13091_v35 }
0x16fb   :  { %9737 = vmatprep.subr.bf16.mxu0 %v13095_v43  ;;  %9769 = vmatprep.subr.bf16.mxu1 %v13097_v1 }
0x16fe   :  { %9739 = vmatpush1.bf16.msra.mxu0 %v13109_v41  ;;  %9771 = vmatpush1.bf16.msra.mxu1 %v13111_v34 }
0x16ff   :  { %9773 = vmatprep.subr.bf16.mxu0 %v9772_v56  ;;  %9837 = vmatprep.subr.bf16.mxu1 %v9836_v13  ;;  %v9776_v56 = vpack.c.bf16 %v5844_v31, %v5840_v16  ;;  %v5852_v13 = vld [vmem:[#allocation18 + $0xa8] sm:$0xff]  ;;  %v5865_v31 = vld [vmem:[#allocation18 + $0x110] sm:$0xff] }
0x17b4   :  { %v5550_v32 = vpop.f32.mrb[44].mxu0  ;;  %v5621_v51 = vpop.f32.mrb[44].mxu1 }
0x17b5   :  { %v10520_v9 = vadd.f32 %v5550_v32, %v13166_v26  ;;  %v5552_v22 = vpop.f32.mrb[45].mxu0  ;;  %v5623_v5 = vpop.f32.mrb[45].mxu1  ;;  %v10536_v20 = vadd.f32 %v5621_v51, %v13178_v2  ;;  %v5850_v32 = vld [vmem:[#allocation18 + $0x98] sm:$0xff] }
0x17b6   :  { %v10521_v4 = vadd.f32 %v5552_v22, %v13169_v52  ;;  %v10537_v7 = vadd.f32 %v5623_v5, %v13174_v54  ;;  %v5854_v51 = vld [vmem:[#allocation18 + $0xb8] sm:$0xff]  ;;  %v9842_v22 = vpack.c.bf16 %v5845_v49, %v5841_v57  ;;  %v5847_v5 = vld [vmem:[#allocation18 + $0x80] sm:$0xff] }
0x17b7   :  { %v7904_v19 = vmul.f32 -1.442695, %v10520_v9  ;;  %v9778_v9 = vpack.c.bf16 %v5843_v29, %v5839_v62  ;;  %v9854_v29 = vpack.c.bf16 %v5869_v58, %v5865_v31  ;;  %v5871_v57 = vld [vmem:[#allocation18 + $0x140] sm:$0xff] }
0x17b8   :  { %v7905_v18 = vmul.f32 -1.442695, %v10521_v4  ;;  %v7906_v3 = vmul.f32 -1.442695, %v10537_v7  ;;  %v5851_v4 = vld [vmem:[#allocation18 + $0xa0] sm:$0xff]  ;;  %v5853_v7 = vld [vmem:[#allocation18 + $0xb0] sm:$0xff] }
0x17b9   :  { %11074 = vpow2.f32 %v7904_v19  ;;  %v9844_v19 = vpack.c.bf16 %v5854_v51, %v5850_v32  ;;  %v5875_v49 = vld [vmem:[#allocation18 + $0x160] sm:$0xff]  ;;  %v5880_v32 = vld [vmem:[#allocation18 + $0x188] sm:$0xff] }
0x17ba   :  { %11076 = vpow2.f32 %v7905_v18  ;;  %v5849_v18 = vld [vmem:[#allocation18 + $0x90] sm:$0xff]  ;;  %v5884_v51 = vld [vmem:[#allocation18 + $0x1a8] sm:$0xff] }
0x17bb   :  { %11078 = vpow2.f32 %v7906_v3  ;;  %v5856_v3 = vld [vmem:[#allocation18 + $0xc8] sm:$0xff] }
0x17bc   :  { %11080 = vtanh.f32 %v10536_v20  ;;  %v5860_v20 = vld [vmem:[#allocation18 + $0xe8] sm:$0xff] }
0x17c3   :  { %v11075_v10 = vpop.eup %11074 }
0x17c4   :  { %v11077_v50 = vpop.eup %11076  ;;  %v5633_v14 = vadd.f32 1.0, %v11075_v10  ;;  %v5858_v10 = vld [vmem:[#allocation18 + $0xd8] sm:$0xff] }
0x17c5   :  { %v5639_v8 = vadd.f32 1.0, %v11077_v50  ;;  %v11079_v33 = vpop.eup %11078  ;;  %v5862_v50 = vld [vmem:[#allocation18 + $0xf8] sm:$0xff] }
0x17c6   :  { %11082 = vrcp.f32 %v5633_v14  ;;  %v11081_v0 = vpop.eup %11080  ;;  %v5646_v43 = vadd.f32 1.0, %v11079_v33  ;;  %v9782_v14 = vpack.c.bf16 %v5851_v4, %v5847_v5  ;;  %v5855_v33 = vld [vmem:[#allocation18 + $0xc0] sm:$0xff]  ;;  %v9794_v5 = vpack.c.bf16 %v5875_v49, %v5871_v57 }
0x17c7   :  { %11084 = vrcp.f32 %v5639_v8  ;;  %v9846_v8 = vpack.c.bf16 %v5853_v7, %v5849_v18  ;;  %v9796_v18 = vpack.c.bf16 %v5884_v51, %v5880_v32  ;;  %v5905_v32 = vld [vmem:[#allocation18 + $0x250] sm:$0xff] }
0x17c8   :  { %11086 = vrcp.f32 %v5646_v43  ;;  %v5864_v43 = vld [vmem:[#allocation18 + $0x108] sm:$0xff]  ;;  %v5909_v51 = vld [vmem:[#allocation18 + $0x270] sm:$0xff] }
0x17d0   :  { %v11083_v40 = vpop.eup %11082 }
0x17d1   :  { %v11085_v17 = vpop.eup %11084  ;;  %v5650_v35 = vmul.f32 %v11083_v40, %v11081_v0  ;;  %v5859_v0 = vld [vmem:[#allocation18 + $0xe0] sm:$0xff]  ;;  %v9784_v40 = vpack.c.bf16 %v5860_v20, %v5856_v3  ;;  %v5881_v3 = vld [vmem:[#allocation18 + $0x190] sm:$0xff] }
0x17d2   :  { %v5649_v1 = vmul.f32 %v11085_v17, %v13441_v12  ;;  %v11087_v53 = vpop.eup %11086  ;;  %v5857_v17 = vld [vmem:[#allocation18 + $0xd0] sm:$0xff]  ;;  %v9786_v30 = vpack.c.bf16 %v5859_v0, %v5855_v33 }
0x17d3   :  { %v5885_v20 = vld [vmem:[#allocation18 + $0x1b0] sm:$0xff] }
0x17d4   :  { %v5651_v41 = vadd.f32 %v5650_v35, %v5649_v1  ;;  %v5861_v35 = vld [vmem:[#allocation18 + $0xf0] sm:$0xff]  ;;  %v5868_v1 = vld [vmem:[#allocation18 + $0x128] sm:$0xff]  ;;  %v9862_v0 = vpack.c.bf16 %v5885_v20, %v5881_v3 }
0x17d5   :  { %v9850_v28 = vpack.c.bf16 %v5861_v35, %v5857_v17  ;;  %v9788_v16 = vpack.c.bf16 %v5868_v1, %v5864_v43  ;;  %v5889_v43 = vld [vmem:[#allocation18 + $0x1d0] sm:$0xff] }
0x17d6   :  { %11088 = vtanh.f32 %v5651_v41  ;;  %v13490_v15 = vsel %vm1928_vm14, %v5651_v41, %v13441_v12  ;;  %v5866_v41 = vld [vmem:[#allocation18 + $0x118] sm:$0xff]  ;;  %v5893_v1 = vld [vmem:[#allocation18 + $0x1f0] sm:$0xff] }
0x17e0   :  { %v11089_v38 = vpop.eup %11088 }
0x17e1   :  { %v5653_v55 = vmul.f32 %v11089_v38, %v11087_v53  ;;  %v5867_v53 = vld [vmem:[#allocation18 + $0x120] sm:$0xff]  ;;  %v9852_v38 = vpack.c.bf16 %v5870_v11, %v5866_v41  ;;  %v5896_v41 = vld [vmem:[#allocation18 + $0x208] sm:$0xff] }
0x17e2   :  { %v9790_v62 = vpack.c.bf16 %v5867_v53, %v5863_v21  ;;  %v5900_v11 = vld [vmem:[#allocation18 + $0x228] sm:$0xff]  ;;  %v9866_v53 = vpack.c.bf16 %v5893_v1, %v5889_v43 }
0x17e3   :  { %v13495_v12 = vsel %vm1928_vm14, %v5653_v55, %v13446_v42  ;;  %v9780_v42 = vpack.c.bf16 %v5852_v13, %v5848_v45  ;;  %v5876_v55 = vld [vmem:[#allocation18 + $0x168] sm:$0xff]  ;;  %v5877_v13 = vld [vmem:[#allocation18 + $0x170] sm:$0xff]  ;;  %v9804_v31 = vpack.c.bf16 %v5900_v11, %v5896_v41 }
0x17e4   :  { %5725 = vmatmul.mubr.f32.vlgmr.msra.gmra.mrb[46].mxu0 %v13495_v12  ;;  %5796 = vmatmul.mubr.f32.vlgmr.msra.gmra.mrb[46].mxu1 %v13495_v12  ;;  %v9792_v45 = vpack.c.bf16 %v5876_v55, %v5872_v36  ;;  %v5897_v36 = vld [vmem:[#allocation18 + $0x210] sm:$0xff] }
0x17e5   :  { %9775 = vmatpush1.bf16.msra.mxu0 %v9774_v44  ;;  %9839 = vmatpush1.bf16.msra.mxu1 %v9838_v24  ;;  %v5874_v44 = vld [vmem:[#allocation18 + $0x158] sm:$0xff]  ;;  %v5901_v55 = vld [vmem:[#allocation18 + $0x230] sm:$0xff] }
0x17e6   :  { %6045 = vmatprep.mubr.f32.mxu0 %v12987_v39  ;;  %6158 = vmatprep.mubr.f32.mxu1 %v12987_v39  ;;  %v9848_v39 = vpack.c.bf16 %v5862_v50, %v5858_v10  ;;  %v5878_v24 = vld [vmem:[#allocation18 + $0x178] sm:$0xff]  ;;  %v5888_v10 = vld [vmem:[#allocation18 + $0x1c8] sm:$0xff]  ;;  %v9870_v49 = vpack.c.bf16 %v5901_v55, %v5897_v36  ;;  %v5921_v41 = vld [vmem:[#allocation18 + $0x2d0] sm:$0xff] }
0x17e7   :  { %9777 = vmatprep.subr.bf16.mxu0 %v9776_v56  ;;  %9841 = vmatprep.subr.bf16.mxu1 %v9840_v46  ;;  %v9856_v56 = vpack.c.bf16 %v5878_v24, %v5874_v44  ;;  %v5873_v46 = vld [vmem:[#allocation18 + $0x150] sm:$0xff]  ;;  %v5892_v50 = vld [vmem:[#allocation18 + $0x1e8] sm:$0xff] }
0x17e8   :  { %v9858_v4 = vpack.c.bf16 %v5877_v13, %v5873_v46  ;;  %v9800_v17 = vpack.c.bf16 %v5892_v50, %v5888_v10  ;;  %v5904_v44 = vld [vmem:[#allocation18 + $0x248] sm:$0xff]  ;;  %v5913_v10 = vld [vmem:[#allocation18 + $0x290] sm:$0xff] }
0x17e9   :  { %9779 = vmatpush1.bf16.msra.mxu0 %v9778_v9  ;;  %9843 = vmatpush1.bf16.msra.mxu1 %v9842_v22  ;;  %v5882_v9 = vld [vmem:[#allocation18 + $0x198] sm:$0xff]  ;;  %v5908_v24 = vld [vmem:[#allocation18 + $0x268] sm:$0xff]  ;;  %v5917_v50 = vld [vmem:[#allocation18 + $0x2b0] sm:$0xff] }
0x17ea   :  { %9781 = vmatprep.subr.bf16.mxu0 %v9780_v42  ;;  %9845 = vmatprep.subr.bf16.mxu1 %v9844_v19  ;;  %v5886_v22 = vld [vmem:[#allocation18 + $0x1b8] sm:$0xff]  ;;  %v5879_v42 = vld [vmem:[#allocation18 + $0x180] sm:$0xff]  ;;  %v9808_v46 = vpack.c.bf16 %v5908_v24, %v5904_v44  ;;  %v5925_v11 = vld [vmem:[#allocation18 + $0x2f0] sm:$0xff] }
0x17eb   :  { %v5883_v19 = vld [vmem:[#allocation18 + $0x1a0] sm:$0xff]  ;;  %v9860_v7 = vpack.c.bf16 %v5886_v22, %v5882_v9  ;;  %v5912_v9 = vld [vmem:[#allocation18 + $0x288] sm:$0xff]  ;;  %v5929_v44 = vld [vmem:[#allocation18 + $0x310] sm:$0xff] }
0x17ec   :  { %v9798_v33 = vpack.c.bf16 %v5883_v19, %v5879_v42  ;;  %v5916_v22 = vld [vmem:[#allocation18 + $0x2a8] sm:$0xff]  ;;  %v9874_v19 = vpack.c.bf16 %v5909_v51, %v5905_v32  ;;  %v5933_v24 = vld [vmem:[#allocation18 + $0x330] sm:$0xff] }
0x17ed   :  { %9783 = vmatpush1.bf16.msra.mxu0 %v9782_v14  ;;  %9847 = vmatpush1.bf16.msra.mxu1 %v9846_v8  ;;  %v5890_v14 = vld [vmem:[#allocation18 + $0x1d8] sm:$0xff]  ;;  %v9812_v3 = vpack.c.bf16 %v5916_v22, %v5912_v9  ;;  %v5937_v9 = vld [vmem:[#allocation18 + $0x350] sm:$0xff] }
0x17ee   :  { %9785 = vmatprep.subr.bf16.mxu0 %v9784_v40  ;;  %9849 = vmatprep.subr.bf16.mxu1 %v9848_v39  ;;  %v5894_v8 = vld [vmem:[#allocation18 + $0x1f8] sm:$0xff]  ;;  %v5887_v40 = vld [vmem:[#allocation18 + $0x1c0] sm:$0xff]  ;;  %v5941_v22 = vld [vmem:[#allocation18 + $0x370] sm:$0xff] }
0x17ef   :  { %v5891_v39 = vld [vmem:[#allocation18 + $0x1e0] sm:$0xff]  ;;  %v9864_v35 = vpack.c.bf16 %v5894_v8, %v5890_v14  ;;  %v5920_v14 = vld [vmem:[#allocation18 + $0x2c8] sm:$0xff] }
0x17f0   :  { %v9802_v21 = vpack.c.bf16 %v5891_v39, %v5887_v40  ;;  %v5924_v8 = vld [vmem:[#allocation18 + $0x2e8] sm:$0xff]  ;;  %v9878_v39 = vpack.c.bf16 %v5917_v50, %v5913_v10 }
0x17f1   :  { %9787 = vmatpush1.bf16.msra.mxu0 %v9786_v30  ;;  %9851 = vmatpush1.bf16.msra.mxu1 %v9850_v28  ;;  %v5898_v30 = vld [vmem:[#allocation18 + $0x218] sm:$0xff]  ;;  %v9816_v43 = vpack.c.bf16 %v5924_v8, %v5920_v14  ;;  %v5945_v14 = vld [vmem:[#allocation18 + $0x390] sm:$0xff] }
0x17f2   :  { %9789 = vmatprep.subr.bf16.mxu0 %v9788_v16  ;;  %9853 = vmatprep.subr.bf16.mxu1 %v9852_v38  ;;  %v5902_v28 = vld [vmem:[#allocation18 + $0x238] sm:$0xff]  ;;  %v5895_v16 = vld [vmem:[#allocation18 + $0x200] sm:$0xff]  ;;  %v5949_v8 = vld [vmem:[#allocation18 + $0x3b0] sm:$0xff] }
0x17f3   :  { %v5899_v38 = vld [vmem:[#allocation18 + $0x220] sm:$0xff]  ;;  %v9868_v58 = vpack.c.bf16 %v5902_v28, %v5898_v30  ;;  %v5928_v30 = vld [vmem:[#allocation18 + $0x308] sm:$0xff] }
0x17f4   :  { %v9806_v57 = vpack.c.bf16 %v5899_v38, %v5895_v16  ;;  %v5932_v28 = vld [vmem:[#allocation18 + $0x328] sm:$0xff]  ;;  %v9882_v38 = vpack.c.bf16 %v5925_v11, %v5921_v41 }
0x17f5   :  { %9791 = vmatpush1.bf16.msra.mxu0 %v9790_v62  ;;  %9855 = vmatpush1.bf16.msra.mxu1 %v9854_v29  ;;  %v5906_v62 = vld [vmem:[#allocation18 + $0x258] sm:$0xff]  ;;  %v9820_v36 = vpack.c.bf16 %v5932_v28, %v5928_v30  ;;  %v5953_v30 = vld [vmem:[#allocation18 + $0x3d0] sm:$0xff] }
0x17f6   :  { %9793 = vmatprep.subr.bf16.mxu0 %v9792_v45  ;;  %9857 = vmatprep.subr.bf16.mxu1 %v9856_v56  ;;  %v5910_v29 = vld [vmem:[#allocation18 + $0x278] sm:$0xff]  ;;  %v5903_v45 = vld [vmem:[#allocation18 + $0x240] sm:$0xff]  ;;  %v5957_v28 = vld [vmem:[#allocation18 + $0x3f0] sm:$0xff] }
0x17f7   :  { %v5907_v56 = vld [vmem:[#allocation18 + $0x260] sm:$0xff]  ;;  %v9872_v13 = vpack.c.bf16 %v5910_v29, %v5906_v62  ;;  %v5936_v62 = vld [vmem:[#allocation18 + $0x348] sm:$0xff] }
0x17f8   :  { %v9810_v42 = vpack.c.bf16 %v5907_v56, %v5903_v45  ;;  %v5940_v29 = vld [vmem:[#allocation18 + $0x368] sm:$0xff]  ;;  %v9886_v56 = vpack.c.bf16 %v5933_v24, %v5929_v44  ;;  %v6243_v44 = vld [vmem:[#allocation20 + $0x20] sm:$0xff] }
0x17f9   :  { %9795 = vmatpush1.bf16.msra.mxu0 %v9794_v5  ;;  %9859 = vmatpush1.bf16.msra.mxu1 %v9858_v4  ;;  %v5914_v5 = vld [vmem:[#allocation18 + $0x298] sm:$0xff]  ;;  %v9824_v32 = vpack.c.bf16 %v5940_v29, %v5936_v62  ;;  %v6248_v62 = vld [vmem:[#allocation20 + $0x48] sm:$0xff]  ;;  %v6241_v29 = vld [vmem:[#allocation20 + $0x10] sm:$0xff] }
0x17fa   :  { %9797 = vmatprep.subr.bf16.mxu0 %v9796_v18  ;;  %9861 = vmatprep.subr.bf16.mxu1 %v9860_v7  ;;  %v5918_v4 = vld [vmem:[#allocation18 + $0x2b8] sm:$0xff]  ;;  %v5911_v18 = vld [vmem:[#allocation18 + $0x280] sm:$0xff] }
0x17fb   :  { %v5915_v7 = vld [vmem:[#allocation18 + $0x2a0] sm:$0xff]  ;;  %v9876_v20 = vpack.c.bf16 %v5918_v4, %v5914_v5  ;;  %v5944_v5 = vld [vmem:[#allocation18 + $0x388] sm:$0xff] }
0x17fc   :  { %v9814_v40 = vpack.c.bf16 %v5915_v7, %v5911_v18  ;;  %v5948_v4 = vld [vmem:[#allocation18 + $0x3a8] sm:$0xff]  ;;  %v9890_v7 = vpack.c.bf16 %v5941_v22, %v5937_v9 }
0x17fd   :  { %9799 = vmatpush1.bf16.msra.mxu0 %v9798_v33  ;;  %9863 = vmatpush1.bf16.msra.mxu1 %v9862_v0  ;;  %v5922_v33 = vld [vmem:[#allocation18 + $0x2d8] sm:$0xff]  ;;  %v9828_v10 = vpack.c.bf16 %v5948_v4, %v5944_v5  ;;  %v6256_v5 = vld [vmem:[#allocation20 + $0x88] sm:$0xff]  ;;  %v6249_v4 = vld [vmem:[#allocation20 + $0x50] sm:$0xff] }
0x17fe   :  { %9801 = vmatprep.subr.bf16.mxu0 %v9800_v17  ;;  %9865 = vmatprep.subr.bf16.mxu1 %v9864_v35  ;;  %v5926_v0 = vld [vmem:[#allocation18 + $0x2f8] sm:$0xff]  ;;  %v5919_v17 = vld [vmem:[#allocation18 + $0x2c0] sm:$0xff] }
0x17ff   :  { %v5923_v35 = vld [vmem:[#allocation18 + $0x2e0] sm:$0xff]  ;;  %v9880_v1 = vpack.c.bf16 %v5926_v0, %v5922_v33  ;;  %v5952_v33 = vld [vmem:[#allocation18 + $0x3c8] sm:$0xff] }
0x1800   :  { %v9818_v16 = vpack.c.bf16 %v5923_v35, %v5919_v17  ;;  %v5956_v0 = vld [vmem:[#allocation18 + $0x3e8] sm:$0xff]  ;;  %v9894_v35 = vpack.c.bf16 %v5949_v8, %v5945_v14  ;;  %v6257_v8 = vld [vmem:[#allocation20 + $0x90] sm:$0xff] }
0x1801   :  { %9803 = vmatpush1.bf16.msra.mxu0 %v9802_v21  ;;  %9867 = vmatpush1.bf16.msra.mxu1 %v9866_v53  ;;  %v5930_v21 = vld [vmem:[#allocation18 + $0x318] sm:$0xff]  ;;  %v9832_v41 = vpack.c.bf16 %v5956_v0, %v5952_v33  ;;  %v6264_v33 = vld [vmem:[#allocation20 + $0xc8] sm:$0xff] }
0x1802   :  { %9805 = vmatprep.subr.bf16.mxu0 %v9804_v31  ;;  %9869 = vmatprep.subr.bf16.mxu1 %v9868_v58  ;;  %v5934_v53 = vld [vmem:[#allocation18 + $0x338] sm:$0xff]  ;;  %v5927_v31 = vld [vmem:[#allocation18 + $0x300] sm:$0xff]  ;;  %v6268_v0 = vld [vmem:[#allocation20 + $0xe8] sm:$0xff] }
0x1803   :  { %v5931_v58 = vld [vmem:[#allocation18 + $0x320] sm:$0xff]  ;;  %v9884_v55 = vpack.c.bf16 %v5934_v53, %v5930_v21  ;;  %v6240_v21 = vld [vmem:[#allocation20 + $0x8] sm:$0xff] }
0x1804   :  { %v9822_v45 = vpack.c.bf16 %v5931_v58, %v5927_v31  ;;  %v6244_v53 = vld [vmem:[#allocation20 + $0x28] sm:$0xff]  ;;  %v9898_v58 = vpack.c.bf16 %v5957_v28, %v5953_v30  ;;  %v14135_v28 = vld [vmem:[#allocation40_spill] sm:$0xff] }
0x1805   :  { %9807 = vmatpush1.bf16.msra.mxu0 %v9806_v57  ;;  %9871 = vmatpush1.bf16.msra.mxu1 %v9870_v49  ;;  %v5938_v57 = vld [vmem:[#allocation18 + $0x358] sm:$0xff]  ;;  %v6272_v30 = vld [vmem:[#allocation20 + $0x108] sm:$0xff] }
0x1806   :  { %9809 = vmatprep.subr.bf16.mxu0 %v9808_v46  ;;  %9873 = vmatprep.subr.bf16.mxu1 %v9872_v13  ;;  %v5942_v49 = vld [vmem:[#allocation18 + $0x378] sm:$0xff]  ;;  %v5935_v46 = vld [vmem:[#allocation18 + $0x340] sm:$0xff] }
0x1807   :  { %v5939_v13 = vld [vmem:[#allocation18 + $0x360] sm:$0xff]  ;;  %v9888_v51 = vpack.c.bf16 %v5942_v49, %v5938_v57  ;;  %v6245_v57 = vld [vmem:[#allocation20 + $0x30] sm:$0xff]  ;;  %v6252_v49 = vld [vmem:[#allocation20 + $0x68] sm:$0xff] }
0x1808   :  { %v9826_v18 = vpack.c.bf16 %v5939_v13, %v5935_v46  ;;  %v13509_v13 = vpack.c.bf16 %v6245_v57, %v6241_v29  ;;  %v13511_v9 = vpack.c.bf16 %v6252_v49, %v6248_v62  ;;  %v6273_v57 = vld [vmem:[#allocation20 + $0x110] sm:$0xff] }
0x1809   :  { %9811 = vmatpush1.bf16.msra.mxu0 %v9810_v42  ;;  %9875 = vmatpush1.bf16.msra.mxu1 %v9874_v19  ;;  %v5946_v42 = vld [vmem:[#allocation18 + $0x398] sm:$0xff]  ;;  %v6277_v49 = vld [vmem:[#allocation20 + $0x130] sm:$0xff] }
0x180a   :  { %9813 = vmatprep.subr.bf16.mxu0 %v9812_v3  ;;  %9877 = vmatprep.subr.bf16.mxu1 %v9876_v20  ;;  %v5950_v19 = vld [vmem:[#allocation18 + $0x3b8] sm:$0xff]  ;;  %v5943_v3 = vld [vmem:[#allocation18 + $0x380] sm:$0xff] }
0x180b   :  { %v5947_v20 = vld [vmem:[#allocation18 + $0x3a0] sm:$0xff]  ;;  %v9892_v50 = vpack.c.bf16 %v5950_v19, %v5946_v42  ;;  %v6253_v42 = vld [vmem:[#allocation20 + $0x70] sm:$0xff]  ;;  %v6260_v19 = vld [vmem:[#allocation20 + $0xa8] sm:$0xff] }
0x180c   :  { %v9830_v17 = vpack.c.bf16 %v5947_v20, %v5943_v3  ;;  %v13527_v20 = vpack.c.bf16 %v6253_v42, %v6249_v4  ;;  %v14138_v4 = vld [vmem:[#allocation52_spill] sm:$0xff] }
0x180d   :  { %9815 = vmatpush1.bf16.msra.mxu0 %v9814_v40  ;;  %9879 = vmatpush1.bf16.msra.mxu1 %v9878_v39  ;;  %v5954_v40 = vld [vmem:[#allocation18 + $0x3d8] sm:$0xff] }
0x180e   :  { %9817 = vmatprep.subr.bf16.mxu0 %v9816_v43  ;;  %9881 = vmatprep.subr.bf16.mxu1 %v9880_v1  ;;  %v5958_v39 = vld [vmem:[#allocation18 + $0x3f8] sm:$0xff]  ;;  %v5951_v43 = vld [vmem:[#allocation18 + $0x3c0] sm:$0xff] }
0x180f   :  { %v5955_v1 = vld [vmem:[#allocation18 + $0x3e0] sm:$0xff]  ;;  %v9896_v11 = vpack.c.bf16 %v5958_v39, %v5954_v40  ;;  %v6266_v40 = vld [vmem:[#allocation20 + $0xd8] sm:$0xff] }
0x1810   :  { %v9834_v31 = vpack.c.bf16 %v5955_v1, %v5951_v43  ;;  %v6270_v39 = vld [vmem:[#allocation20 + $0xf8] sm:$0xff]  ;;  %v6263_v43 = vld [vmem:[#allocation20 + $0xc0] sm:$0xff] }
0x1811   :  { %9819 = vmatpush1.bf16.msra.mxu0 %v9818_v16  ;;  %9883 = vmatpush1.bf16.msra.mxu1 %v9882_v38  ;;  %v6242_v16 = vld [vmem:[#allocation20 + $0x18] sm:$0xff]  ;;  %v6267_v1 = vld [vmem:[#allocation20 + $0xe0] sm:$0xff] }
0x1812   :  { %9821 = vmatprep.subr.bf16.mxu0 %v9820_v36  ;;  %9885 = vmatprep.subr.bf16.mxu1 %v9884_v55  ;;  %v6246_v38 = vld [vmem:[#allocation20 + $0x38] sm:$0xff]  ;;  %v13501_v36 = vpack.c.bf16 %v6244_v53, %v6240_v21  ;;  %v6239_v55 = vld [vmem:[#allocation20] sm:$0xff]  ;;  %v6276_v21 = vld [vmem:[#allocation20 + $0x128] sm:$0xff] }
0x1813   :  { %v13503_v24 = vpack.c.bf16 %v6246_v38, %v6242_v16  ;;  %v13506_v46 = vpack.c.bf16 %v6243_v44, %v6239_v55  ;;  %v6274_v53 = vld [vmem:[#allocation20 + $0x118] sm:$0xff]  ;;  %v6271_v55 = vld [vmem:[#allocation20 + $0x100] sm:$0xff]  ;;  %v13563_v62 = vpack.c.bf16 %v6276_v21, %v6272_v30 }
0x1814   :  { %v6278_v16 = vld [vmem:[#allocation20 + $0x138] sm:$0xff]  ;;  %v6275_v44 = vld [vmem:[#allocation20 + $0x120] sm:$0xff] }
0x1815   :  { %9823 = vmatpush1.bf16.msra.mxu0 %v9822_v45  ;;  %9887 = vmatpush1.bf16.msra.mxu1 %v9886_v56  ;;  %v6250_v45 = vld [vmem:[#allocation20 + $0x58] sm:$0xff]  ;;  %v13565_v29 = vpack.c.bf16 %v6278_v16, %v6274_v53  ;;  %v13573_v42 = vpack.c.bf16 %v6275_v44, %v6271_v55  ;;  %v6287_v30 = vld [vmem:[#allocation20 + $0x180] sm:$0xff]  ;;  %v6289_v16 = vld [vmem:[#allocation20 + $0x190] sm:$0xff] }
0x1816   :  { %9825 = vmatprep.subr.bf16.mxu0 %v9824_v32  ;;  %9889 = vmatprep.subr.bf16.mxu1 %v9888_v51  ;;  %v6254_v56 = vld [vmem:[#allocation20 + $0x78] sm:$0xff]  ;;  %v6247_v32 = vld [vmem:[#allocation20 + $0x40] sm:$0xff]  ;;  %v6296_v55 = vld [vmem:[#allocation20 + $0x1c8] sm:$0xff] }
0x1817   :  { %v6251_v51 = vld [vmem:[#allocation20 + $0x60] sm:$0xff]  ;;  %v13513_v22 = vpack.c.bf16 %v6254_v56, %v6250_v45  ;;  %v6280_v45 = vld [vmem:[#allocation20 + $0x148] sm:$0xff] }
0x1818   :  { %v13525_v3 = vpack.c.bf16 %v6251_v51, %v6247_v32  ;;  %v14136_v38 = vld [vmem:[#allocation53_spill] sm:$0xff]  ;;  %v6284_v32 = vld [vmem:[#allocation20 + $0x168] sm:$0xff] }
0x1819   :  { %9827 = vmatpush1.bf16.msra.mxu0 %v9826_v18  ;;  %9891 = vmatpush1.bf16.msra.mxu1 %v9890_v7  ;;  %v6258_v18 = vld [vmem:[#allocation20 + $0x98] sm:$0xff] }
0x181a   :  { %9829 = vmatprep.subr.bf16.mxu0 %v9828_v10  ;;  %9893 = vmatprep.subr.bf16.mxu1 %v9892_v50  ;;  %v6262_v7 = vld [vmem:[#allocation20 + $0xb8] sm:$0xff]  ;;  %v6255_v10 = vld [vmem:[#allocation20 + $0x80] sm:$0xff] }
0x181b   :  { %v6259_v50 = vld [vmem:[#allocation20 + $0xa0] sm:$0xff]  ;;  %v13533_v14 = vpack.c.bf16 %v6262_v7, %v6258_v18  ;;  %v6282_v51 = vld [vmem:[#allocation20 + $0x158] sm:$0xff] }
0x181c   :  { %v14137_v56 = vld [vmem:[#allocation41_spill] sm:$0xff] }
0x181d   :  { %9831 = vmatpush1.bf16.msra.mxu0 %v9830_v17  ;;  %9895 = vmatpush1.bf16.msra.mxu1 %v9894_v35  ;;  %v13541_v17 = vpack.c.bf16 %v6259_v50, %v6255_v10  ;;  %v6279_v18 = vld [vmem:[#allocation20 + $0x140] sm:$0xff]  ;;  %v13579_v10 = vpack.c.bf16 %v6284_v32, %v6280_v45  ;;  %v6302_v45 = vld [vmem:[#allocation20 + $0x1f8] sm:$0xff] }
0x181e   :  { %9833 = vmatprep.subr.bf16.mxu0 %v9832_v41  ;;  %9897 = vmatprep.subr.bf16.mxu1 %v9896_v11  ;;  %v13549_v41 = vpack.c.bf16 %v6270_v39, %v6266_v40  ;;  %v6265_v11 = vld [vmem:[#allocation20 + $0xd0] sm:$0xff]  ;;  %v6283_v7 = vld [vmem:[#allocation20 + $0x160] sm:$0xff]  ;;  %v6292_v40 = vld [vmem:[#allocation20 + $0x1a8] sm:$0xff] }
0x181f   :  { %v6290_v39 = vld [vmem:[#allocation20 + $0x198] sm:$0xff] }
0x1820   :  { %v14141_v44 = vld [vmem:[#allocation45_spill] sm:$0xff] }
0x1821   :  { %9835 = vmatpush1.bf16.msra.mxu0 %v9834_v31  ;;  %9899 = vmatpush1.bf16.msra.mxu1 %v9898_v58  ;;  %v13557_v31 = vpack.c.bf16 %v6267_v1, %v6263_v43  ;;  %v6294_v43 = vld [vmem:[#allocation20 + $0x1b8] sm:$0xff]  ;;  %v14140_v1 = vld [vmem:[#allocation51_spill] sm:$0xff] }
0x1822   :  { %9901 = vmatprep.subr.bf16.mxu0 %v13501_v36  ;;  %9933 = vmatprep.subr.bf16.mxu1 %v13503_v24  ;;  %v13597_v53 = vpack.c.bf16 %v6294_v43, %v6290_v39 }
0x1824   :  { %7941 = vmatmul.mubr.msk.f32.vlgmr.msra.gmra.mrb[48].mxu0 %vm836_vm4, %v14120_v6  ;;  %7943 = vmatmul.mubr.msk.f32.vlgmr.msra.gmra.mrb[48].mxu1 %vm836_vm4, %v14120_v6  ;;  %v13531_v6 = vpack.c.bf16 %v6260_v19, %v6256_v5  ;;  %v6286_v5 = vld [vmem:[#allocation20 + $0x178] sm:$0xff]  ;;  %v13575_v19 = vpack.c.bf16 %v6277_v49, %v6273_v57  ;;  %v6300_v57 = vld [vmem:[#allocation20 + $0x1e8] sm:$0xff] }
0x1825   :  { %6051 = vmatprep.mubr.f32.mxu0 %v12969_v47  ;;  %6164 = vmatprep.mubr.f32.mxu1 %v12969_v47  ;;  %v6261_v47 = vld [vmem:[#allocation20 + $0xb0] sm:$0xff]  ;;  %v13581_v50 = vpack.c.bf16 %v6286_v5, %v6282_v51  ;;  %v6298_v49 = vld [vmem:[#allocation20 + $0x1d8] sm:$0xff]  ;;  %v6295_v5 = vld [vmem:[#allocation20 + $0x1c0] sm:$0xff] }
0x1826   :  { %9903 = vmatpush1.bf16.msra.mxu0 %v13506_v46  ;;  %9935 = vmatpush1.bf16.msra.mxu1 %v13509_v13  ;;  %v13543_v35 = vpack.c.bf16 %v6261_v47, %v6257_v8  ;;  %v6281_v8 = vld [vmem:[#allocation20 + $0x150] sm:$0xff] }
0x1827   :  { %9905 = vmatprep.subr.bf16.mxu0 %v13511_v9  ;;  %9937 = vmatprep.subr.bf16.mxu1 %v13513_v22  ;;  %v6285_v47 = vld [vmem:[#allocation20 + $0x170] sm:$0xff] }
0x1828   :  { %6052 = vmatmul.mubr.f32.gmra.mrb[50].mxu0 %v14121_v60  ;;  %6165 = vmatmul.mubr.f32.gmra.mrb[50].mxu1 %v14121_v60  ;;  %v13547_v60 = vpack.c.bf16 %v6268_v0, %v6264_v33  ;;  %v6288_v33 = vld [vmem:[#allocation20 + $0x188] sm:$0xff] }
0x1829   :  { %6057 = vmatprep.mubr.f32.mxu0 %v12920_v48  ;;  %6170 = vmatprep.mubr.f32.mxu1 %v12920_v48  ;;  %v6269_v48 = vld [vmem:[#allocation20 + $0xf0] sm:$0xff]  ;;  %v13595_v21 = vpack.c.bf16 %v6292_v40, %v6288_v33 }
0x182a   :  { %9907 = vmatpush1.bf16.msra.mxu0 %v13525_v3  ;;  %9939 = vmatpush1.bf16.msra.mxu1 %v13527_v20  ;;  %v13559_v58 = vpack.c.bf16 %v6269_v48, %v6265_v11  ;;  %v14139_v0 = vld [vmem:[#allocation43_spill] sm:$0xff]  ;;  %v13589_v11 = vpack.c.bf16 %v6283_v7, %v6279_v18  ;;  %v13591_v48 = vpack.c.bf16 %v6285_v47, %v6281_v8  ;;  %v6299_v7 = vld [vmem:[#allocation20 + $0x1e0] sm:$0xff] }
0x182b   :  { %9909 = vmatprep.subr.bf16.mxu0 %v13531_v6  ;;  %9941 = vmatprep.subr.bf16.mxu1 %v13533_v14  ;;  %v13613_v18 = vpack.c.bf16 %v6302_v45, %v6298_v49  ;;  %v6297_v8 = vld [vmem:[#allocation20 + $0x1d0] sm:$0xff]  ;;  %v13625_v39 = vpack.c.bf16 %v6299_v7, %v6295_v5 }
0x182c   :  { %6058 = vmatmul.mubr.f32.gmra.mrb[52].mxu0 %v14135_v28  ;;  %6171 = vmatmul.mubr.f32.gmra.mrb[52].mxu1 %v14135_v28  ;;  %v6291_v28 = vld [vmem:[#allocation20 + $0x1a0] sm:$0xff]  ;;  %v6301_v47 = vld [vmem:[#allocation20 + $0x1f0] sm:$0xff] }
0x182d   :  { %6063 = vmatprep.mubr.f32.mxu0 %v14136_v38  ;;  %6176 = vmatprep.mubr.f32.mxu1 %v14136_v38  ;;  %v6293_v38 = vld [vmem:[#allocation20 + $0x1b0] sm:$0xff]  ;;  %v13605_v32 = vpack.c.bf16 %v6291_v28, %v6287_v30  ;;  %v13627_v43 = vpack.c.bf16 %v6301_v47, %v6297_v8 }
0x182e   :  { %9911 = vmatpush1.bf16.msra.mxu0 %v13541_v17  ;;  %9943 = vmatpush1.bf16.msra.mxu1 %v13543_v35  ;;  %v13607_v51 = vpack.c.bf16 %v6293_v38, %v6289_v16  ;;  %v14143_v33 = vld [vmem:[#allocation47_spill] sm:$0xff] }
0x182f   :  { %9913 = vmatprep.subr.bf16.mxu0 %v13547_v60  ;;  %9945 = vmatprep.subr.bf16.mxu1 %v13549_v41 }
0x1830   :  { %6064 = vmatmul.mubr.f32.gmra.mrb[54].mxu0 %v14137_v56  ;;  %6177 = vmatmul.mubr.f32.gmra.mrb[54].mxu1 %v14137_v56  ;;  %v14142_v56 = vld [vmem:[#allocation50_spill] sm:$0xff] }
0x1831   :  { %6069 = vmatprep.mubr.f32.mxu0 %v14138_v4  ;;  %6182 = vmatprep.mubr.f32.mxu1 %v14138_v4  ;;  %v13611_v4 = vpack.c.bf16 %v6300_v57, %v6296_v55 }
0x1832   :  { %9915 = vmatpush1.bf16.msra.mxu0 %v13557_v31  ;;  %9947 = vmatpush1.bf16.msra.mxu1 %v13559_v58 }
0x1833   :  { %9917 = vmatprep.subr.bf16.mxu0 %v13563_v62  ;;  %9949 = vmatprep.subr.bf16.mxu1 %v13565_v29 }
0x1834   :  { %6070 = vmatmul.mubr.f32.gmra.mrb[56].mxu0 %v14139_v0  ;;  %6183 = vmatmul.mubr.f32.gmra.mrb[56].mxu1 %v14139_v0  ;;  %v14144_v0 = vld [vmem:[#allocation49_spill] sm:$0xff] }
0x1835   :  { %6075 = vmatprep.mubr.f32.mxu0 %v14140_v1  ;;  %6188 = vmatprep.mubr.f32.mxu1 %v14140_v1  ;;  %v14146_v1 = vld [vmem:[#allocation38_spill] sm:$0xff] }
0x1836   :  { %9919 = vmatpush1.bf16.msra.mxu0 %v13573_v42  ;;  %9951 = vmatpush1.bf16.msra.mxu1 %v13575_v19 }
0x1837   :  { %9921 = vmatprep.subr.bf16.mxu0 %v13579_v10  ;;  %9953 = vmatprep.subr.bf16.mxu1 %v13581_v50 }
0x1838   :  { %6076 = vmatmul.mubr.f32.gmra.mrb[58].mxu0 %v14141_v44  ;;  %6189 = vmatmul.mubr.f32.gmra.mrb[58].mxu1 %v14141_v44 }
0x1839   :  { %6081 = vmatprep.mubr.f32.mxu0 %v14142_v56  ;;  %6194 = vmatprep.mubr.f32.mxu1 %v14142_v56 }
0x183a   :  { %9923 = vmatpush1.bf16.msra.mxu0 %v13589_v11  ;;  %9955 = vmatpush1.bf16.msra.mxu1 %v13591_v48 }
0x183b   :  { %9925 = vmatprep.subr.bf16.mxu0 %v13595_v21  ;;  %9957 = vmatprep.subr.bf16.mxu1 %v13597_v53 }
0x183c   :  { %6082 = vmatmul.mubr.f32.gmra.mrb[60].mxu0 %v14143_v33  ;;  %6195 = vmatmul.mubr.f32.gmra.mrb[60].mxu1 %v14143_v33 }
0x183d   :  { %7942 = vmatprep.mubr.msk.f32.mxu0 %vm2110_vm15, %v14144_v0  ;;  %7944 = vmatprep.mubr.msk.f32.mxu1 %vm2110_vm15, %v14144_v0 }
0x183e   :  { %9927 = vmatpush1.bf16.msra.mxu0 %v13605_v32  ;;  %9959 = vmatpush1.bf16.msra.mxu1 %v13607_v51 }
0x183f   :  { %9929 = vmatprep.subr.bf16.mxu0 %v13611_v4  ;;  %9961 = vmatprep.subr.bf16.mxu1 %v13613_v18 }
0x1840   :  { %6088 = vmatmul.mubr.f32.gmra.mrb[62].mxu0 %v14146_v1  ;;  %6201 = vmatmul.mubr.f32.gmra.mrb[62].mxu1 %v14146_v1 }
0x1841   :  { %6371 = vmatprep.mubr.f32.mxu0 %v14109_v27  ;;  %6442 = vmatprep.mubr.f32.mxu1 %v14109_v27 }
0x1842   :  { %9931 = vmatpush1.bf16.msra.mxu0 %v13625_v39  ;;  %9963 = vmatpush1.bf16.msra.mxu1 %v13627_v43 }
0x1843   :  { %9965 = vmatprep.subr.bf16.mxu0 %v13501_v36  ;;  %9997 = vmatprep.subr.bf16.mxu1 %v13503_v24 }
0x1848   :  { %6372 = vmatmul.mubr.f32.vlgmr.msra.gmra.mrb[62].mxu0 %v14109_v27  ;;  %6443 = vmatmul.mubr.f32.vlgmr.msra.gmra.mrb[62].mxu1 %v14109_v27 }
0x1849   :  { %9967 = vmatpush1.bf16.msra.mxu0 %v13506_v46  ;;  %9999 = vmatpush1.bf16.msra.mxu1 %v13509_v13 }
0x184a   :  { %9969 = vmatprep.subr.bf16.mxu0 %v13511_v9  ;;  %10001 = vmatprep.subr.bf16.mxu1 %v13513_v22 }
0x184b   :  { %6547 = vmatprep.mubr.f32.mxu0 %v14109_v27  ;;  %6618 = vmatprep.mubr.f32.mxu1 %v14109_v27 }
0x184d   :  { %9971 = vmatpush1.bf16.msra.mxu0 %v13525_v3  ;;  %10003 = vmatpush1.bf16.msra.mxu1 %v13527_v20 }
0x184e   :  { %9973 = vmatprep.subr.bf16.mxu0 %v13531_v6  ;;  %10005 = vmatprep.subr.bf16.mxu1 %v13533_v14 }
0x1851   :  { %9975 = vmatpush1.bf16.msra.mxu0 %v13541_v17  ;;  %10007 = vmatpush1.bf16.msra.mxu1 %v13543_v35 }
0x1852   :  { %9977 = vmatprep.subr.bf16.mxu0 %v13547_v60  ;;  %10009 = vmatprep.subr.bf16.mxu1 %v13549_v41 }
0x1855   :  { %9979 = vmatpush1.bf16.msra.mxu0 %v13557_v31  ;;  %10011 = vmatpush1.bf16.msra.mxu1 %v13559_v58 }
0x1856   :  { %9981 = vmatprep.subr.bf16.mxu0 %v13563_v62  ;;  %10013 = vmatprep.subr.bf16.mxu1 %v13565_v29 }
0x1859   :  { %9983 = vmatpush1.bf16.msra.mxu0 %v13573_v42  ;;  %10015 = vmatpush1.bf16.msra.mxu1 %v13575_v19 }
0x185a   :  { %9985 = vmatprep.subr.bf16.mxu0 %v13579_v10  ;;  %10017 = vmatprep.subr.bf16.mxu1 %v13581_v50 }
0x185d   :  { %9987 = vmatpush1.bf16.msra.mxu0 %v13589_v11  ;;  %10019 = vmatpush1.bf16.msra.mxu1 %v13591_v48 }
0x185e   :  { %9989 = vmatprep.subr.bf16.mxu0 %v13595_v21  ;;  %10021 = vmatprep.subr.bf16.mxu1 %v13597_v53 }
0x1861   :  { %9991 = vmatpush1.bf16.msra.mxu0 %v13605_v32  ;;  %10023 = vmatpush1.bf16.msra.mxu1 %v13607_v51 }
0x1862   :  { %9993 = vmatprep.subr.bf16.mxu0 %v13611_v4  ;;  %10025 = vmatprep.subr.bf16.mxu1 %v13613_v18 }
0x1865   :  { %9995 = vmatpush1.bf16.msra.mxu0 %v13625_v39  ;;  %10027 = vmatpush1.bf16.msra.mxu1 %v13627_v43 }
0x1866   :  { %10029 = vmatprep.subr.bf16.mxu0 %v13501_v36  ;;  %10061 = vmatprep.subr.bf16.mxu1 %v13503_v24 }
0x18b7   :  { %v5726_v30 = vpop.f32.mrb[46].mxu0  ;;  %v5797_v28 = vpop.f32.mrb[46].mxu1 }
0x18b8   :  { %v10522_v16 = vadd.f32 %v5726_v30, %v13166_v26  ;;  %v5728_v38 = vpop.f32.mrb[47].mxu0  ;;  %v5799_v55 = vpop.f32.mrb[47].mxu1  ;;  %v10538_v5 = vadd.f32 %v5797_v28, %v13178_v2 }
0x18b9   :  { %v10523_v44 = vadd.f32 %v5728_v38, %v13169_v52  ;;  %v10539_v45 = vadd.f32 %v5799_v55, %v13174_v54 }
0x18ba   :  { %v7907_v57 = vmul.f32 -1.442695, %v10522_v16 }
0x18bb   :  { %v7908_v49 = vmul.f32 -1.442695, %v10523_v44  ;;  %v7909_v56 = vmul.f32 -1.442695, %v10539_v45  ;;  %v5959_v44 = vld [vmem:[#allocation21] sm:$0xf] }
0x18bc   :  { %11090 = vpow2.f32 %v7907_v57  ;;  %v14148_v57 = vld [vmem:[#allocation34_spill] sm:$0xff]  ;;  %v14149_v45 = vld [vmem:[#allocation35_spill] sm:$0xff] }
0x18bd   :  { %11092 = vpow2.f32 %v7908_v49  ;;  %v13683_v49 = vrot.slane %v5959_v44, %v14148_v57 }
0x18be   :  { %11094 = vpow2.f32 %v7909_v56  ;;  %v13686_v56 = vrot.slane %v5959_v44, %v14149_v45 }
0x18bf   :  { %11096 = vtanh.f32 %v10538_v5 }
0x18c6   :  { %v11091_v7 = vpop.eup %11090 }
0x18c7   :  { %v11093_v8 = vpop.eup %11092  ;;  %v5809_v47 = vadd.f32 1.0, %v11091_v7 }
0x18c8   :  { %v5815_v33 = vadd.f32 1.0, %v11093_v8  ;;  %v11095_v26 = vpop.eup %11094 }
0x18c9   :  { %11098 = vrcp.f32 %v5809_v47  ;;  %v11097_v0 = vpop.eup %11096  ;;  %v5822_v16 = vadd.f32 1.0, %v11095_v26 }
0x18ca   :  { %11100 = vrcp.f32 %v5815_v33 }
0x18cb   :  { %11102 = vrcp.f32 %v5822_v16  ;;  %v14151_v16 = vld [vmem:[#allocation37_spill] sm:$0xff] }
0x18d3   :  { %v11099_v52 = vpop.eup %11098 }
0x18d4   :  { %v11101_v1 = vpop.eup %11100  ;;  %v5826_v30 = vmul.f32 %v11099_v52, %v11097_v0  ;;  %v14150_v52 = vld [vmem:[#allocation36_spill] sm:$0xff] }
0x18d5   :  { %v5825_v38 = vmul.f32 %v11101_v1, %v13490_v15  ;;  %v11103_v2 = vpop.eup %11102  ;;  %v13691_v1 = vrot.slane %v5959_v44, %v14150_v52 }
0x18d7   :  { %v5827_v54 = vadd.f32 %v5826_v30, %v5825_v38  ;;  %v13695_v38 = vrot.slane %v5959_v44, %v14151_v16 }
0x18d9   :  { %11104 = vtanh.f32 %v5827_v54 }
0x18e3   :  { %v11105_v28 = vpop.eup %11104 }
0x18e4   :  { %v13680_v55 = vmul.f32 %v11105_v28, %v11103_v2 }
0x18e6   :  { %14147 = vst [vmem:[#allocation39_spill] sm:$0xff] %v13680_v55 }
0x191b   :  { %v6373_v5 = vpop.f32.mrb[62].mxu0  ;;  %v6444_v7 = vpop.f32.mrb[62].mxu1 }
0x191c   :  { %v10554_v8 = vadd.f32 %v6373_v5, %v13683_v49  ;;  %v6375_v47 = vpop.f32.mrb[63].mxu0  ;;  %v6446_v15 = vpop.f32.mrb[63].mxu1  ;;  %v10570_v2 = vadd.f32 %v6444_v7, %v13695_v38 }
0x191d   :  { %v10555_v33 = vadd.f32 %v6375_v47, %v13686_v56  ;;  %v10571_v30 = vadd.f32 %v6446_v15, %v13691_v1 }
0x191e   :  { %v7910_v26 = vmul.f32 -1.442695, %v10554_v8 }
0x191f   :  { %v7911_v0 = vmul.f32 -1.442695, %v10555_v33  ;;  %v7912_v54 = vmul.f32 -1.442695, %v10571_v30 }
0x1920   :  { %11106 = vpow2.f32 %v7910_v26 }
0x1921   :  { %11108 = vpow2.f32 %v7911_v0 }
0x1922   :  { %11110 = vpow2.f32 %v7912_v54 }
0x1923   :  { %11112 = vtanh.f32 %v10570_v2 }
0x192a   :  { %v11107_v28 = vpop.eup %11106 }
0x192b   :  { %v11109_v57 = vpop.eup %11108  ;;  %v6456_v45 = vadd.f32 1.0, %v11107_v28 }
0x192c   :  { %v6462_v5 = vadd.f32 1.0, %v11109_v57  ;;  %v11111_v8 = vpop.eup %11110 }
0x192d   :  { %11114 = vrcp.f32 %v6456_v45  ;;  %v11113_v47 = vpop.eup %11112  ;;  %v6469_v15 = vadd.f32 1.0, %v11111_v8 }
0x192e   :  { %11116 = vrcp.f32 %v6462_v5 }
0x192f   :  { %11118 = vrcp.f32 %v6469_v15 }
0x1937   :  { %v11115_v33 = vpop.eup %11114 }
0x1938   :  { %v11117_v26 = vpop.eup %11116  ;;  %v6473_v0 = vmul.f32 %v11115_v33, %v11113_v47 }
0x1939   :  { %v6472_v52 = vmul.f32 0.0, %v11117_v26  ;;  %v11119_v7 = vpop.eup %11118 }
0x193b   :  { %v13698_v44 = vadd.f32 %v6473_v0, %v6472_v52 }
0x193d   :  { %11120 = vtanh.f32 %v13698_v44 }
0x1947   :  { %v11121_v30 = vpop.eup %11120 }
0x1948   :  { %v13701_v16 = vmul.f32 %v11121_v30, %v11119_v7 }
0x194a   :  { %7913 = vmatmul.mubr.msk.f32.vlgmr.msra.gmra.mrb[60].mxu0 %vm2110_vm15, %v13701_v16  ;;  %7914 = vmatmul.mubr.msk.f32.vlgmr.msra.gmra.mrb[60].mxu1 %vm2110_vm15, %v13701_v16 }
0x194b   :  { %10031 = vmatpush1.bf16.msra.mxu0 %v13506_v46  ;;  %10063 = vmatpush1.bf16.msra.mxu1 %v13509_v13 }
0x194c   :  { %10033 = vmatprep.subr.bf16.mxu0 %v13511_v9  ;;  %10065 = vmatprep.subr.bf16.mxu1 %v13513_v22 }
0x194d   :  { %6723 = vmatprep.mubr.f32.mxu0 %v14109_v27  ;;  %6794 = vmatprep.mubr.f32.mxu1 %v14109_v27 }
0x194f   :  { %10035 = vmatpush1.bf16.msra.mxu0 %v13525_v3  ;;  %10067 = vmatpush1.bf16.msra.mxu1 %v13527_v20 }
0x1950   :  { %10037 = vmatprep.subr.bf16.mxu0 %v13531_v6  ;;  %10069 = vmatprep.subr.bf16.mxu1 %v13533_v14 }
0x1953   :  { %10039 = vmatpush1.bf16.msra.mxu0 %v13541_v17  ;;  %10071 = vmatpush1.bf16.msra.mxu1 %v13543_v35 }
0x1954   :  { %10041 = vmatprep.subr.bf16.mxu0 %v13547_v60  ;;  %10073 = vmatprep.subr.bf16.mxu1 %v13549_v41 }
0x1957   :  { %10043 = vmatpush1.bf16.msra.mxu0 %v13557_v31  ;;  %10075 = vmatpush1.bf16.msra.mxu1 %v13559_v58 }
0x1958   :  { %10045 = vmatprep.subr.bf16.mxu0 %v13563_v62  ;;  %10077 = vmatprep.subr.bf16.mxu1 %v13565_v29 }
0x195b   :  { %10047 = vmatpush1.bf16.msra.mxu0 %v13573_v42  ;;  %10079 = vmatpush1.bf16.msra.mxu1 %v13575_v19 }
0x195c   :  { %10049 = vmatprep.subr.bf16.mxu0 %v13579_v10  ;;  %10081 = vmatprep.subr.bf16.mxu1 %v13581_v50 }
0x195f   :  { %10051 = vmatpush1.bf16.msra.mxu0 %v13589_v11  ;;  %10083 = vmatpush1.bf16.msra.mxu1 %v13591_v48 }
0x1960   :  { %10053 = vmatprep.subr.bf16.mxu0 %v13595_v21  ;;  %10085 = vmatprep.subr.bf16.mxu1 %v13597_v53 }
0x1963   :  { %10055 = vmatpush1.bf16.msra.mxu0 %v13605_v32  ;;  %10087 = vmatpush1.bf16.msra.mxu1 %v13607_v51 }
0x1964   :  { %10057 = vmatprep.subr.bf16.mxu0 %v13611_v4  ;;  %10089 = vmatprep.subr.bf16.mxu1 %v13613_v18 }
0x1967   :  { %10059 = vmatpush1.bf16.msra.mxu0 %v13625_v39  ;;  %10091 = vmatpush1.bf16.msra.mxu1 %v13627_v43 }
0x1968   :  { %10093 = vmatprep.subr.bf16.mxu0 %v13501_v36  ;;  %10125 = vmatprep.subr.bf16.mxu1 %v13503_v24 }
0x1a1d   :  { %v6549_v54 = vpop.f32.mrb[60].mxu0  ;;  %v6620_v2 = vpop.f32.mrb[60].mxu1 }
0x1a1e   :  { %v10552_v28 = vadd.f32 %v6549_v54, %v13683_v49  ;;  %v6551_v57 = vpop.f32.mrb[61].mxu0  ;;  %v6622_v45 = vpop.f32.mrb[61].mxu1  ;;  %v10568_v0 = vadd.f32 %v6620_v2, %v13695_v38 }
0x1a1f   :  { %v10553_v5 = vadd.f32 %v6551_v57, %v13686_v56  ;;  %v10569_v33 = vadd.f32 %v6622_v45, %v13691_v1 }
0x1a20   :  { %v7915_v8 = vmul.f32 -1.442695, %v10552_v28 }
0x1a21   :  { %v7916_v47 = vmul.f32 -1.442695, %v10553_v5  ;;  %v7917_v26 = vmul.f32 -1.442695, %v10569_v33  ;;  %v6478_v5 = vsel %vm2110_vm15, %v13698_v44, 0.0 }
0x1a22   :  { %11122 = vpow2.f32 %v7915_v8 }
0x1a23   :  { %11124 = vpow2.f32 %v7916_v47 }
0x1a24   :  { %11126 = vpow2.f32 %v7917_v26 }
0x1a25   :  { %11128 = vtanh.f32 %v10568_v0 }
0x1a2c   :  { %v11123_v15 = vpop.eup %11122 }
0x1a2d   :  { %v11125_v52 = vpop.eup %11124  ;;  %v6632_v7 = vadd.f32 1.0, %v11123_v15 }
0x1a2e   :  { %v6638_v30 = vadd.f32 1.0, %v11125_v52  ;;  %v11127_v54 = vpop.eup %11126  ;;  %v6477_v52 = vsel %vm2110_vm15, %v13701_v16, 0.0 }
0x1a2f   :  { %11130 = vrcp.f32 %v6632_v7  ;;  %v11129_v55 = vpop.eup %11128  ;;  %v6645_v8 = vadd.f32 1.0, %v11127_v54 }
0x1a30   :  { %11132 = vrcp.f32 %v6638_v30 }
0x1a31   :  { %11134 = vrcp.f32 %v6645_v8 }
0x1a39   :  { %v11131_v57 = vpop.eup %11130 }
0x1a3a   :  { %v11133_v28 = vpop.eup %11132  ;;  %v6649_v45 = vmul.f32 %v11131_v57, %v11129_v55 }
0x1a3b   :  { %v6648_v47 = vmul.f32 %v11133_v28, %v6478_v5  ;;  %v11135_v26 = vpop.eup %11134 }
0x1a3d   :  { %v6650_v2 = vadd.f32 %v6649_v45, %v6648_v47 }
0x1a3f   :  { %11136 = vtanh.f32 %v6650_v2  ;;  %v13752_v33 = vsel %vm1928_vm14, %v6650_v2, %v6478_v5 }
0x1a49   :  { %v11137_v0 = vpop.eup %11136 }
0x1a4a   :  { %v6652_v15 = vmul.f32 %v11137_v0, %v11135_v26 }
0x1a4c   :  { %v13759_v44 = vsel %vm1928_vm14, %v6652_v15, %v6477_v52 }
0x1a4d   :  { %6724 = vmatmul.mubr.f32.vlgmr.msra.gmra.mrb[58].mxu0 %v13759_v44  ;;  %6795 = vmatmul.mubr.f32.vlgmr.msra.gmra.mrb[58].mxu1 %v13759_v44 }
0x1a4e   :  { %10095 = vmatpush1.bf16.msra.mxu0 %v13506_v46  ;;  %10127 = vmatpush1.bf16.msra.mxu1 %v13509_v13 }
0x1a4f   :  { %10097 = vmatprep.subr.bf16.mxu0 %v13511_v9  ;;  %10129 = vmatprep.subr.bf16.mxu1 %v13513_v22 }
0x1a50   :  { %6899 = vmatprep.mubr.f32.mxu0 %v14109_v27  ;;  %6970 = vmatprep.mubr.f32.mxu1 %v14109_v27 }
0x1a52   :  { %10099 = vmatpush1.bf16.msra.mxu0 %v13525_v3  ;;  %10131 = vmatpush1.bf16.msra.mxu1 %v13527_v20 }
0x1a53   :  { %10101 = vmatprep.subr.bf16.mxu0 %v13531_v6  ;;  %10133 = vmatprep.subr.bf16.mxu1 %v13533_v14 }
0x1a56   :  { %10103 = vmatpush1.bf16.msra.mxu0 %v13541_v17  ;;  %10135 = vmatpush1.bf16.msra.mxu1 %v13543_v35 }
0x1a57   :  { %10105 = vmatprep.subr.bf16.mxu0 %v13547_v60  ;;  %10137 = vmatprep.subr.bf16.mxu1 %v13549_v41 }
0x1a5a   :  { %10107 = vmatpush1.bf16.msra.mxu0 %v13557_v31  ;;  %10139 = vmatpush1.bf16.msra.mxu1 %v13559_v58 }
0x1a5b   :  { %10109 = vmatprep.subr.bf16.mxu0 %v13563_v62  ;;  %10141 = vmatprep.subr.bf16.mxu1 %v13565_v29 }
0x1a5e   :  { %10111 = vmatpush1.bf16.msra.mxu0 %v13573_v42  ;;  %10143 = vmatpush1.bf16.msra.mxu1 %v13575_v19 }
0x1a5f   :  { %10113 = vmatprep.subr.bf16.mxu0 %v13579_v10  ;;  %10145 = vmatprep.subr.bf16.mxu1 %v13581_v50 }
0x1a62   :  { %10115 = vmatpush1.bf16.msra.mxu0 %v13589_v11  ;;  %10147 = vmatpush1.bf16.msra.mxu1 %v13591_v48 }
0x1a63   :  { %10117 = vmatprep.subr.bf16.mxu0 %v13595_v21  ;;  %10149 = vmatprep.subr.bf16.mxu1 %v13597_v53 }
0x1a66   :  { %10119 = vmatpush1.bf16.msra.mxu0 %v13605_v32  ;;  %10151 = vmatpush1.bf16.msra.mxu1 %v13607_v51 }
0x1a67   :  { %10121 = vmatprep.subr.bf16.mxu0 %v13611_v4  ;;  %10153 = vmatprep.subr.bf16.mxu1 %v13613_v18 }
0x1a6a   :  { %10123 = vmatpush1.bf16.msra.mxu0 %v13625_v39  ;;  %10155 = vmatpush1.bf16.msra.mxu1 %v13627_v43 }
0x1a6b   :  { %10157 = vmatprep.subr.bf16.mxu0 %v13501_v36  ;;  %10189 = vmatprep.subr.bf16.mxu1 %v13503_v24 }
0x1b20   :  { %v6725_v34 = vpop.f32.mrb[58].mxu0  ;;  %v6796_v55 = vpop.f32.mrb[58].mxu1 }
0x1b21   :  { %v10550_v16 = vadd.f32 %v6725_v34, %v13683_v49  ;;  %v6727_v7 = vpop.f32.mrb[59].mxu0  ;;  %v6798_v30 = vpop.f32.mrb[59].mxu1  ;;  %v10566_v8 = vadd.f32 %v6796_v55, %v13695_v38 }
0x1b22   :  { %v10551_v54 = vadd.f32 %v6727_v7, %v13686_v56  ;;  %v10567_v5 = vadd.f32 %v6798_v30, %v13691_v1 }
0x1b23   :  { %v7918_v57 = vmul.f32 -1.442695, %v10550_v16 }
0x1b24   :  { %v7919_v28 = vmul.f32 -1.442695, %v10551_v54  ;;  %v7920_v45 = vmul.f32 -1.442695, %v10567_v5 }
0x1b25   :  { %11138 = vpow2.f32 %v7918_v57 }
0x1b26   :  { %11140 = vpow2.f32 %v7919_v28 }
0x1b27   :  { %11142 = vpow2.f32 %v7920_v45 }
0x1b28   :  { %11144 = vtanh.f32 %v10566_v8 }
0x1b2f   :  { %v11139_v47 = vpop.eup %11138 }
0x1b30   :  { %v11141_v2 = vpop.eup %11140  ;;  %v6808_v26 = vadd.f32 1.0, %v11139_v47 }
0x1b31   :  { %v6814_v0 = vadd.f32 1.0, %v11141_v2  ;;  %v11143_v15 = vpop.eup %11142 }
0x1b32   :  { %11146 = vrcp.f32 %v6808_v26  ;;  %v11145_v52 = vpop.eup %11144  ;;  %v6821_v54 = vadd.f32 1.0, %v11143_v15 }
0x1b33   :  { %11148 = vrcp.f32 %v6814_v0 }
0x1b34   :  { %11150 = vrcp.f32 %v6821_v54 }
0x1b3c   :  { %v11147_v34 = vpop.eup %11146 }
0x1b3d   :  { %v11149_v16 = vpop.eup %11148  ;;  %v6825_v7 = vmul.f32 %v11147_v34, %v11145_v52 }
0x1b3e   :  { %v6824_v57 = vmul.f32 %v11149_v16, %v13752_v33  ;;  %v11151_v28 = vpop.eup %11150 }
0x1b40   :  { %v6826_v30 = vadd.f32 %v6825_v7, %v6824_v57 }
0x1b42   :  { %11152 = vtanh.f32 %v6826_v30  ;;  %v13805_v55 = vsel %vm1746_vm13, %v6826_v30, %v13752_v33 }
0x1b4c   :  { %v11153_v5 = vpop.eup %11152 }
0x1b4d   :  { %v6828_v45 = vmul.f32 %v11153_v5, %v11151_v28 }
0x1b4f   :  { %v13810_v8 = vsel %vm1746_vm13, %v6828_v45, %v13759_v44 }
0x1b50   :  { %6900 = vmatmul.mubr.f32.vlgmr.msra.gmra.mrb[56].mxu0 %v13810_v8  ;;  %6971 = vmatmul.mubr.f32.vlgmr.msra.gmra.mrb[56].mxu1 %v13810_v8 }
0x1b51   :  { %10159 = vmatpush1.bf16.msra.mxu0 %v13506_v46  ;;  %10191 = vmatpush1.bf16.msra.mxu1 %v13509_v13 }
0x1b52   :  { %10161 = vmatprep.subr.bf16.mxu0 %v13511_v9  ;;  %10193 = vmatprep.subr.bf16.mxu1 %v13513_v22 }
0x1b53   :  { %7075 = vmatprep.mubr.f32.mxu0 %v14109_v27  ;;  %7146 = vmatprep.mubr.f32.mxu1 %v14109_v27 }
0x1b55   :  { %10163 = vmatpush1.bf16.msra.mxu0 %v13525_v3  ;;  %10195 = vmatpush1.bf16.msra.mxu1 %v13527_v20 }
0x1b56   :  { %10165 = vmatprep.subr.bf16.mxu0 %v13531_v6  ;;  %10197 = vmatprep.subr.bf16.mxu1 %v13533_v14 }
0x1b59   :  { %10167 = vmatpush1.bf16.msra.mxu0 %v13541_v17  ;;  %10199 = vmatpush1.bf16.msra.mxu1 %v13543_v35 }
0x1b5a   :  { %10169 = vmatprep.subr.bf16.mxu0 %v13547_v60  ;;  %10201 = vmatprep.subr.bf16.mxu1 %v13549_v41 }
0x1b5d   :  { %10171 = vmatpush1.bf16.msra.mxu0 %v13557_v31  ;;  %10203 = vmatpush1.bf16.msra.mxu1 %v13559_v58 }
0x1b5e   :  { %10173 = vmatprep.subr.bf16.mxu0 %v13563_v62  ;;  %10205 = vmatprep.subr.bf16.mxu1 %v13565_v29 }
0x1b61   :  { %10175 = vmatpush1.bf16.msra.mxu0 %v13573_v42  ;;  %10207 = vmatpush1.bf16.msra.mxu1 %v13575_v19 }
0x1b62   :  { %10177 = vmatprep.subr.bf16.mxu0 %v13579_v10  ;;  %10209 = vmatprep.subr.bf16.mxu1 %v13581_v50 }
0x1b65   :  { %10179 = vmatpush1.bf16.msra.mxu0 %v13589_v11  ;;  %10211 = vmatpush1.bf16.msra.mxu1 %v13591_v48 }
0x1b66   :  { %10181 = vmatprep.subr.bf16.mxu0 %v13595_v21  ;;  %10213 = vmatprep.subr.bf16.mxu1 %v13597_v53 }
0x1b69   :  { %10183 = vmatpush1.bf16.msra.mxu0 %v13605_v32  ;;  %10215 = vmatpush1.bf16.msra.mxu1 %v13607_v51 }
0x1b6a   :  { %10185 = vmatprep.subr.bf16.mxu0 %v13611_v4  ;;  %10217 = vmatprep.subr.bf16.mxu1 %v13613_v18 }
0x1b6d   :  { %10187 = vmatpush1.bf16.msra.mxu0 %v13625_v39  ;;  %10219 = vmatpush1.bf16.msra.mxu1 %v13627_v43 }
0x1b6e   :  { %10221 = vmatprep.subr.bf16.mxu0 %v13501_v36  ;;  %10253 = vmatprep.subr.bf16.mxu1 %v13503_v24 }
0x1c23   :  { %v6901_v61 = vpop.f32.mrb[56].mxu0  ;;  %v6972_v33 = vpop.f32.mrb[56].mxu1 }
0x1c24   :  { %v10548_v44 = vadd.f32 %v6901_v61, %v13683_v49  ;;  %v6903_v47 = vpop.f32.mrb[57].mxu0  ;;  %v6974_v2 = vpop.f32.mrb[57].mxu1  ;;  %v10564_v16 = vadd.f32 %v6972_v33, %v13695_v38 }
0x1c25   :  { %v10549_v26 = vadd.f32 %v6903_v47, %v13686_v56  ;;  %v10565_v52 = vadd.f32 %v6974_v2, %v13691_v1 }
0x1c26   :  { %v7921_v0 = vmul.f32 -1.442695, %v10548_v44 }
0x1c27   :  { %v7922_v15 = vmul.f32 -1.442695, %v10549_v26  ;;  %v7923_v34 = vmul.f32 -1.442695, %v10565_v52 }
0x1c28   :  { %11154 = vpow2.f32 %v7921_v0 }
0x1c29   :  { %11156 = vpow2.f32 %v7922_v15 }
0x1c2a   :  { %11158 = vpow2.f32 %v7923_v34 }
0x1c2b   :  { %11160 = vtanh.f32 %v10564_v16 }
0x1c32   :  { %v11155_v7 = vpop.eup %11154 }
0x1c33   :  { %v11157_v54 = vpop.eup %11156  ;;  %v6984_v57 = vadd.f32 1.0, %v11155_v7 }
0x1c34   :  { %v6990_v30 = vadd.f32 1.0, %v11157_v54  ;;  %v11159_v28 = vpop.eup %11158 }
0x1c35   :  { %11162 = vrcp.f32 %v6984_v57  ;;  %v11161_v5 = vpop.eup %11160  ;;  %v6997_v47 = vadd.f32 1.0, %v11159_v28 }
0x1c36   :  { %11164 = vrcp.f32 %v6990_v30 }
0x1c37   :  { %11166 = vrcp.f32 %v6997_v47 }
0x1c3f   :  { %v11163_v45 = vpop.eup %11162 }
0x1c40   :  { %v11165_v61 = vpop.eup %11164  ;;  %v7001_v44 = vmul.f32 %v11163_v45, %v11161_v5 }
0x1c41   :  { %v7000_v26 = vmul.f32 %v11165_v61, %v13805_v55  ;;  %v11167_v0 = vpop.eup %11166 }
0x1c43   :  { %v7002_v2 = vadd.f32 %v7001_v44, %v7000_v26 }
0x1c45   :  { %11168 = vtanh.f32 %v7002_v2  ;;  %v13856_v33 = vsel %vm1564_vm12, %v7002_v2, %v13805_v55 }
0x1c4f   :  { %v11169_v15 = vpop.eup %11168 }
0x1c50   :  { %v7004_v52 = vmul.f32 %v11169_v15, %v11167_v0 }
0x1c52   :  { %v13861_v34 = vsel %vm1564_vm12, %v7004_v52, %v13810_v8 }
0x1c53   :  { %7076 = vmatmul.mubr.f32.vlgmr.msra.gmra.mrb[54].mxu0 %v13861_v34  ;;  %7147 = vmatmul.mubr.f32.vlgmr.msra.gmra.mrb[54].mxu1 %v13861_v34 }
0x1c54   :  { %10223 = vmatpush1.bf16.msra.mxu0 %v13506_v46  ;;  %10255 = vmatpush1.bf16.msra.mxu1 %v13509_v13 }
0x1c55   :  { %10225 = vmatprep.subr.bf16.mxu0 %v13511_v9  ;;  %10257 = vmatprep.subr.bf16.mxu1 %v13513_v22 }
0x1c56   :  { %7251 = vmatprep.mubr.f32.mxu0 %v14109_v27  ;;  %7322 = vmatprep.mubr.f32.mxu1 %v14109_v27 }
0x1c58   :  { %10227 = vmatpush1.bf16.msra.mxu0 %v13525_v3  ;;  %10259 = vmatpush1.bf16.msra.mxu1 %v13527_v20 }
0x1c59   :  { %10229 = vmatprep.subr.bf16.mxu0 %v13531_v6  ;;  %10261 = vmatprep.subr.bf16.mxu1 %v13533_v14 }
0x1c5c   :  { %10231 = vmatpush1.bf16.msra.mxu0 %v13541_v17  ;;  %10263 = vmatpush1.bf16.msra.mxu1 %v13543_v35 }
0x1c5d   :  { %10233 = vmatprep.subr.bf16.mxu0 %v13547_v60  ;;  %10265 = vmatprep.subr.bf16.mxu1 %v13549_v41 }
0x1c60   :  { %10235 = vmatpush1.bf16.msra.mxu0 %v13557_v31  ;;  %10267 = vmatpush1.bf16.msra.mxu1 %v13559_v58 }
0x1c61   :  { %10237 = vmatprep.subr.bf16.mxu0 %v13563_v62  ;;  %10269 = vmatprep.subr.bf16.mxu1 %v13565_v29 }
0x1c64   :  { %10239 = vmatpush1.bf16.msra.mxu0 %v13573_v42  ;;  %10271 = vmatpush1.bf16.msra.mxu1 %v13575_v19 }
0x1c65   :  { %10241 = vmatprep.subr.bf16.mxu0 %v13579_v10  ;;  %10273 = vmatprep.subr.bf16.mxu1 %v13581_v50 }
0x1c68   :  { %10243 = vmatpush1.bf16.msra.mxu0 %v13589_v11  ;;  %10275 = vmatpush1.bf16.msra.mxu1 %v13591_v48 }
0x1c69   :  { %10245 = vmatprep.subr.bf16.mxu0 %v13595_v21  ;;  %10277 = vmatprep.subr.bf16.mxu1 %v13597_v53 }
0x1c6c   :  { %10247 = vmatpush1.bf16.msra.mxu0 %v13605_v32  ;;  %10279 = vmatpush1.bf16.msra.mxu1 %v13607_v51 }
0x1c6d   :  { %10249 = vmatprep.subr.bf16.mxu0 %v13611_v4  ;;  %10281 = vmatprep.subr.bf16.mxu1 %v13613_v18 }
0x1c70   :  { %10251 = vmatpush1.bf16.msra.mxu0 %v13625_v39  ;;  %10283 = vmatpush1.bf16.msra.mxu1 %v13627_v43 }
0x1c71   :  { %10285 = vmatprep.subr.bf16.mxu0 %v13501_v36  ;;  %10317 = vmatprep.subr.bf16.mxu1 %v13503_v24 }
0x1d26   :  { %v7077_v59 = vpop.f32.mrb[54].mxu0  ;;  %v7148_v55 = vpop.f32.mrb[54].mxu1 }
0x1d27   :  { %v10546_v8 = vadd.f32 %v7077_v59, %v13683_v49  ;;  %v7079_v16 = vpop.f32.mrb[55].mxu0  ;;  %v7150_v7 = vpop.f32.mrb[55].mxu1  ;;  %v10562_v45 = vadd.f32 %v7148_v55, %v13695_v38 }
0x1d28   :  { %v10547_v54 = vadd.f32 %v7079_v16, %v13686_v56  ;;  %v10563_v28 = vadd.f32 %v7150_v7, %v13691_v1 }
0x1d29   :  { %v7924_v57 = vmul.f32 -1.442695, %v10546_v8 }
0x1d2a   :  { %v7925_v30 = vmul.f32 -1.442695, %v10547_v54  ;;  %v7926_v5 = vmul.f32 -1.442695, %v10563_v28 }
0x1d2b   :  { %11170 = vpow2.f32 %v7924_v57 }
0x1d2c   :  { %11172 = vpow2.f32 %v7925_v30 }
0x1d2d   :  { %11174 = vpow2.f32 %v7926_v5 }
0x1d2e   :  { %11176 = vtanh.f32 %v10562_v45 }
0x1d35   :  { %v11171_v61 = vpop.eup %11170 }
0x1d36   :  { %v11173_v44 = vpop.eup %11172  ;;  %v7160_v47 = vadd.f32 1.0, %v11171_v61 }
0x1d37   :  { %v7166_v26 = vadd.f32 1.0, %v11173_v44  ;;  %v11175_v2 = vpop.eup %11174 }
0x1d38   :  { %11178 = vrcp.f32 %v7160_v47  ;;  %v11177_v0 = vpop.eup %11176  ;;  %v7173_v8 = vadd.f32 1.0, %v11175_v2 }
0x1d39   :  { %11180 = vrcp.f32 %v7166_v26 }
0x1d3a   :  { %11182 = vrcp.f32 %v7173_v8 }
0x1d42   :  { %v11179_v15 = vpop.eup %11178 }
0x1d43   :  { %v11181_v52 = vpop.eup %11180  ;;  %v7177_v59 = vmul.f32 %v11179_v15, %v11177_v0 }
0x1d44   :  { %v7176_v16 = vmul.f32 %v11181_v52, %v13856_v33  ;;  %v11183_v54 = vpop.eup %11182 }
0x1d46   :  { %v7178_v7 = vadd.f32 %v7177_v59, %v7176_v16 }
0x1d48   :  { %11184 = vtanh.f32 %v7178_v7  ;;  %v13907_v55 = vsel %vm1382_vm11, %v7178_v7, %v13856_v33 }
0x1d52   :  { %v11185_v57 = vpop.eup %11184 }
0x1d53   :  { %v7180_v30 = vmul.f32 %v11185_v57, %v11183_v54 }
0x1d55   :  { %v13912_v28 = vsel %vm1382_vm11, %v7180_v30, %v13861_v34 }
0x1d56   :  { %7252 = vmatmul.mubr.f32.vlgmr.msra.gmra.mrb[52].mxu0 %v13912_v28  ;;  %7323 = vmatmul.mubr.f32.vlgmr.msra.gmra.mrb[52].mxu1 %v13912_v28 }
0x1d57   :  { %10287 = vmatpush1.bf16.msra.mxu0 %v13506_v46  ;;  %10319 = vmatpush1.bf16.msra.mxu1 %v13509_v13 }
0x1d58   :  { %10289 = vmatprep.subr.bf16.mxu0 %v13511_v9  ;;  %10321 = vmatprep.subr.bf16.mxu1 %v13513_v22 }
0x1d59   :  { %7427 = vmatprep.mubr.f32.mxu0 %v14109_v27  ;;  %7498 = vmatprep.mubr.f32.mxu1 %v14109_v27 }
0x1d5b   :  { %10291 = vmatpush1.bf16.msra.mxu0 %v13525_v3  ;;  %10323 = vmatpush1.bf16.msra.mxu1 %v13527_v20 }
0x1d5c   :  { %10293 = vmatprep.subr.bf16.mxu0 %v13531_v6  ;;  %10325 = vmatprep.subr.bf16.mxu1 %v13533_v14 }
0x1d5f   :  { %10295 = vmatpush1.bf16.msra.mxu0 %v13541_v17  ;;  %10327 = vmatpush1.bf16.msra.mxu1 %v13543_v35 }
0x1d60   :  { %10297 = vmatprep.subr.bf16.mxu0 %v13547_v60  ;;  %10329 = vmatprep.subr.bf16.mxu1 %v13549_v41 }
0x1d63   :  { %10299 = vmatpush1.bf16.msra.mxu0 %v13557_v31  ;;  %10331 = vmatpush1.bf16.msra.mxu1 %v13559_v58 }
0x1d64   :  { %10301 = vmatprep.subr.bf16.mxu0 %v13563_v62  ;;  %10333 = vmatprep.subr.bf16.mxu1 %v13565_v29 }
0x1d67   :  { %10303 = vmatpush1.bf16.msra.mxu0 %v13573_v42  ;;  %10335 = vmatpush1.bf16.msra.mxu1 %v13575_v19 }
0x1d68   :  { %10305 = vmatprep.subr.bf16.mxu0 %v13579_v10  ;;  %10337 = vmatprep.subr.bf16.mxu1 %v13581_v50 }
0x1d6b   :  { %10307 = vmatpush1.bf16.msra.mxu0 %v13589_v11  ;;  %10339 = vmatpush1.bf16.msra.mxu1 %v13591_v48 }
0x1d6c   :  { %10309 = vmatprep.subr.bf16.mxu0 %v13595_v21  ;;  %10341 = vmatprep.subr.bf16.mxu1 %v13597_v53 }
0x1d6f   :  { %10311 = vmatpush1.bf16.msra.mxu0 %v13605_v32  ;;  %10343 = vmatpush1.bf16.msra.mxu1 %v13607_v51 }
0x1d70   :  { %10313 = vmatprep.subr.bf16.mxu0 %v13611_v4  ;;  %10345 = vmatprep.subr.bf16.mxu1 %v13613_v18 }
0x1d73   :  { %10315 = vmatpush1.bf16.msra.mxu0 %v13625_v39  ;;  %10347 = vmatpush1.bf16.msra.mxu1 %v13627_v43 }
0x1d74   :  { %10349 = vmatprep.subr.bf16.mxu0 %v13501_v36  ;;  %10381 = vmatprep.subr.bf16.mxu1 %v13503_v24 }
0x1e29   :  { %v7253_v37 = vpop.f32.mrb[52].mxu0  ;;  %v7324_v33 = vpop.f32.mrb[52].mxu1 }
0x1e2a   :  { %v10544_v34 = vadd.f32 %v7253_v37, %v13683_v49  ;;  %v7255_v5 = vpop.f32.mrb[53].mxu0  ;;  %v7326_v45 = vpop.f32.mrb[53].mxu1  ;;  %v10560_v0 = vadd.f32 %v7324_v33, %v13695_v38 }
0x1e2b   :  { %v10545_v61 = vadd.f32 %v7255_v5, %v13686_v56  ;;  %v10561_v26 = vadd.f32 %v7326_v45, %v13691_v1 }
0x1e2c   :  { %v7927_v44 = vmul.f32 -1.442695, %v10544_v34 }
0x1e2d   :  { %v7928_v47 = vmul.f32 -1.442695, %v10545_v61  ;;  %v7929_v2 = vmul.f32 -1.442695, %v10561_v26 }
0x1e2e   :  { %11186 = vpow2.f32 %v7927_v44  ;;  %v7728_v44 = vld [vmem:[#allocation23 + $0x90] sm:$0xff] }
0x1e2f   :  { %11188 = vpow2.f32 %v7928_v47  ;;  %v7729_v47 = vld [vmem:[#allocation23 + $0x98] sm:$0xff] }
0x1e30   :  { %11190 = vpow2.f32 %v7929_v2  ;;  %v10416_v26 = vpack.c.bf16 %v7729_v47, %v7728_v44  ;;  %v7712_v2 = vld [vmem:[#allocation23 + $0x10] sm:$0xff] }
0x1e31   :  { %11192 = vtanh.f32 %v10560_v0  ;;  %v7713_v0 = vld [vmem:[#allocation23 + $0x18] sm:$0xff] }
0x1e32   :  { %v10418_v25 = vpack.c.bf16 %v7713_v0, %v7712_v2 }
0x1e38   :  { %v11187_v36 = vpop.eup %11186 }
0x1e39   :  { %v11189_v15 = vpop.eup %11188  ;;  %v7336_v24 = vadd.f32 1.0, %v11187_v36  ;;  %v7730_v36 = vld [vmem:[#allocation23 + $0xa0] sm:$0xff] }
0x1e3a   :  { %v7342_v52 = vadd.f32 1.0, %v11189_v15  ;;  %v11191_v59 = vpop.eup %11190  ;;  %v7731_v15 = vld [vmem:[#allocation23 + $0xa8] sm:$0xff] }
0x1e3b   :  { %11194 = vrcp.f32 %v7336_v24  ;;  %v11193_v8 = vpop.eup %11192  ;;  %v7349_v57 = vadd.f32 1.0, %v11191_v59  ;;  %v10420_v24 = vpack.c.bf16 %v7731_v15, %v7730_v36  ;;  %v7715_v59 = vld [vmem:[#allocation23 + $0x28] sm:$0xff] }
0x1e3c   :  { %11196 = vrcp.f32 %v7342_v52  ;;  %v7714_v52 = vld [vmem:[#allocation23 + $0x20] sm:$0xff] }
0x1e3d   :  { %11198 = vrcp.f32 %v7349_v57  ;;  %v7716_v57 = vld [vmem:[#allocation23 + $0x30] sm:$0xff] }
0x1e45   :  { %v11195_v16 = vpop.eup %11194 }
0x1e46   :  { %v11197_v7 = vpop.eup %11196  ;;  %v7353_v54 = vmul.f32 %v11195_v16, %v11193_v8  ;;  %v10422_v8 = vpack.c.bf16 %v7715_v59, %v7714_v52  ;;  %v7732_v16 = vld [vmem:[#allocation23 + $0xb0] sm:$0xff] }
0x1e47   :  { %v7352_v30 = vmul.f32 %v11197_v7, %v13907_v55  ;;  %v11199_v34 = vpop.eup %11198  ;;  %v7733_v7 = vld [vmem:[#allocation23 + $0xb8] sm:$0xff]  ;;  %v14152_v59 = vld [vmem:[#allocation39_spill] sm:$0xff] }
0x1e49   :  { %v7354_v37 = vadd.f32 %v7353_v54, %v7352_v30  ;;  %v10424_v54 = vpack.c.bf16 %v7733_v7, %v7732_v16  ;;  %v7717_v30 = vld [vmem:[#allocation23 + $0x38] sm:$0xff]  ;;  %v7936_v7 = vld [vmem:[#allocation24] ss:$0 sm:$0xff] }
0x1e4b   :  { %11200 = vtanh.f32 %v7354_v37  ;;  %v13958_v33 = vsel %vm1200_vm10, %v7354_v37, %v13907_v55  ;;  %v7711_v55 = vld [vmem:[#allocation23 + $0x8] sm:$0xff]  ;;  %v10426_v37 = vpack.c.bf16 %v7717_v30, %v7716_v57 }
0x1e55   :  { %v11201_v5 = vpop.eup %11200 }
0x1e56   :  { %v7356_v45 = vmul.f32 %v11201_v5, %v11199_v34  ;;  %v7735_v34 = vld [vmem:[#allocation23 + $0xc8] sm:$0xff]  ;;  %v7718_v5 = vld [vmem:[#allocation23 + $0x40] sm:$0xff] }
0x1e58   :  { %v13963_v61 = vsel %vm1200_vm10, %v7356_v45, %v13912_v28 }
0x1e59   :  { %7428 = vmatmul.mubr.f32.vlgmr.msra.gmra.mrb[50].mxu0 %v13963_v61  ;;  %7499 = vmatmul.mubr.f32.vlgmr.msra.gmra.mrb[50].mxu1 %v13963_v61 }
0x1e5a   :  { %10351 = vmatpush1.bf16.msra.mxu0 %v13506_v46  ;;  %10383 = vmatpush1.bf16.msra.mxu1 %v13509_v13 }
0x1e5b   :  { %10353 = vmatprep.subr.bf16.mxu0 %v13511_v9  ;;  %10385 = vmatprep.subr.bf16.mxu1 %v13513_v22 }
0x1e5c   :  { %7603 = vmatprep.mubr.f32.mxu0 %v14109_v27  ;;  %7674 = vmatprep.mubr.f32.mxu1 %v14109_v27 }
0x1e5e   :  { %10355 = vmatpush1.bf16.msra.mxu0 %v13525_v3  ;;  %10387 = vmatpush1.bf16.msra.mxu1 %v13527_v20 }
0x1e5f   :  { %10357 = vmatprep.subr.bf16.mxu0 %v13531_v6  ;;  %10389 = vmatprep.subr.bf16.mxu1 %v13533_v14 }
0x1e62   :  { %10359 = vmatpush1.bf16.msra.mxu0 %v13541_v17  ;;  %10391 = vmatpush1.bf16.msra.mxu1 %v13543_v35 }
0x1e63   :  { %10361 = vmatprep.subr.bf16.mxu0 %v13547_v60  ;;  %10393 = vmatprep.subr.bf16.mxu1 %v13549_v41 }
0x1e66   :  { %10363 = vmatpush1.bf16.msra.mxu0 %v13557_v31  ;;  %10395 = vmatpush1.bf16.msra.mxu1 %v13559_v58 }
0x1e67   :  { %10365 = vmatprep.subr.bf16.mxu0 %v13563_v62  ;;  %10397 = vmatprep.subr.bf16.mxu1 %v13565_v29 }
0x1e6a   :  { %10367 = vmatpush1.bf16.msra.mxu0 %v13573_v42  ;;  %10399 = vmatpush1.bf16.msra.mxu1 %v13575_v19 }
0x1e6b   :  { %10369 = vmatprep.subr.bf16.mxu0 %v13579_v10  ;;  %10401 = vmatprep.subr.bf16.mxu1 %v13581_v50 }
0x1e6e   :  { %10371 = vmatpush1.bf16.msra.mxu0 %v13589_v11  ;;  %10403 = vmatpush1.bf16.msra.mxu1 %v13591_v48 }
0x1e6f   :  { %10373 = vmatprep.subr.bf16.mxu0 %v13595_v21  ;;  %10405 = vmatprep.subr.bf16.mxu1 %v13597_v53 }
0x1e72   :  { %10375 = vmatpush1.bf16.msra.mxu0 %v13605_v32  ;;  %10407 = vmatpush1.bf16.msra.mxu1 %v13607_v51 }
0x1e73   :  { %10377 = vmatprep.subr.bf16.mxu0 %v13611_v4  ;;  %10409 = vmatprep.subr.bf16.mxu1 %v13613_v18  ;;  %v7726_v4 = vld [vmem:[#allocation23 + $0x80] sm:$0xff]  ;;  %v7727_v18 = vld [vmem:[#allocation23 + $0x88] sm:$0xff] }
0x1e76   :  { %10379 = vmatpush1.bf16.msra.mxu0 %v13625_v39  ;;  %10411 = vmatpush1.bf16.msra.mxu1 %v13627_v43  ;;  %v10412_v39 = vpack.c.bf16 %v7727_v18, %v7726_v4  ;;  %v7710_v43 = vld [vmem:[#allocation23] sm:$0xff] }
0x1e77   :  { %v10414_v28 = vpack.c.bf16 %v7711_v55, %v7710_v43 }
0x1e78   :  { %10413 = vmatprep.subr.bf16.mxu0 %v10412_v39 }
0x1f2c   :  { %v7429_v23 = vpop.f32.mrb[50].mxu0  ;;  %v7500_v27 = vpop.f32.mrb[50].mxu1 }
0x1f2d   :  { %v10542_v46 = vadd.f32 %v7429_v23, %v13683_v49  ;;  %v7431_v13 = vpop.f32.mrb[51].mxu0  ;;  %v7502_v9 = vpop.f32.mrb[51].mxu1  ;;  %v10558_v17 = vadd.f32 %v7500_v27, %v13695_v38  ;;  %v7736_v23 = vld [vmem:[#allocation23 + $0xd0] sm:$0xff]  ;;  %v7737_v27 = vld [vmem:[#allocation23 + $0xd8] sm:$0xff] }
0x1f2e   :  { %v10543_v22 = vadd.f32 %v7431_v13, %v13686_v56  ;;  %v10559_v6 = vadd.f32 %v7502_v9, %v13691_v1  ;;  %v10432_v13 = vpack.c.bf16 %v7737_v27, %v7736_v23  ;;  %v7720_v9 = vld [vmem:[#allocation23 + $0x50] sm:$0xff] }
0x1f2f   :  { %v7930_v3 = vmul.f32 -1.442695, %v10542_v46 }
0x1f30   :  { %v7931_v20 = vmul.f32 -1.442695, %v10543_v22  ;;  %v7932_v14 = vmul.f32 -1.442695, %v10559_v6  ;;  %v7721_v22 = vld [vmem:[#allocation23 + $0x58] sm:$0xff] }
0x1f31   :  { %11202 = vpow2.f32 %v7930_v3  ;;  %v7738_v3 = vld [vmem:[#allocation23 + $0xe0] sm:$0xff]  ;;  %v10434_v6 = vpack.c.bf16 %v7721_v22, %v7720_v9 }
0x1f32   :  { %11204 = vpow2.f32 %v7931_v20  ;;  %v7739_v20 = vld [vmem:[#allocation23 + $0xe8] sm:$0xff] }
0x1f33   :  { %11206 = vpow2.f32 %v7932_v14  ;;  %v10436_v14 = vpack.c.bf16 %v7739_v20, %v7738_v3 }
0x1f34   :  { %11208 = vtanh.f32 %v10558_v17  ;;  %v7722_v17 = vld [vmem:[#allocation23 + $0x60] sm:$0xff] }
0x1f3b   :  { %v11203_v35 = vpop.eup %11202 }
0x1f3c   :  { %v11205_v60 = vpop.eup %11204  ;;  %v7512_v41 = vadd.f32 1.0, %v11203_v35  ;;  %v7723_v35 = vld [vmem:[#allocation23 + $0x68] sm:$0xff] }
0x1f3d   :  { %v7518_v31 = vadd.f32 1.0, %v11205_v60  ;;  %v11207_v58 = vpop.eup %11206  ;;  %v7740_v60 = vld [vmem:[#allocation23 + $0xf0] sm:$0xff] }
0x1f3e   :  { %11210 = vrcp.f32 %v7512_v41  ;;  %v11209_v62 = vpop.eup %11208  ;;  %v7525_v10 = vadd.f32 1.0, %v11207_v58  ;;  %v7741_v41 = vld [vmem:[#allocation23 + $0xf8] sm:$0xff] }
0x1f3f   :  { %11212 = vrcp.f32 %v7518_v31  ;;  %v10438_v31 = vpack.c.bf16 %v7723_v35, %v7722_v17  ;;  %v10440_v58 = vpack.c.bf16 %v7741_v41, %v7740_v60 }
0x1f40   :  { %11214 = vrcp.f32 %v7525_v10 }
0x1f48   :  { %v11211_v29 = vpop.eup %11210 }
0x1f49   :  { %v11213_v42 = vpop.eup %11212  ;;  %v7529_v19 = vmul.f32 %v11211_v29, %v11209_v62  ;;  %v7724_v62 = vld [vmem:[#allocation23 + $0x70] sm:$0xff]  ;;  %v7725_v29 = vld [vmem:[#allocation23 + $0x78] sm:$0xff] }
0x1f4a   :  { %v7528_v50 = vmul.f32 %v11213_v42, %v13958_v33  ;;  %v11215_v21 = vpop.eup %11214  ;;  %v10442_v42 = vpack.c.bf16 %v7725_v29, %v7724_v62 }
0x1f4c   :  { %v7530_v11 = vadd.f32 %v7529_v19, %v7528_v50 }
0x1f4e   :  { %11216 = vtanh.f32 %v7530_v11  ;;  %v14007_v48 = vsel %vm1018_vm9, %v7530_v11, %v13958_v33  ;;  %v7734_v33 = vld [vmem:[#allocation23 + $0xc0] sm:$0xff] }
0x1f4f   :  { %v10428_v45 = vpack.c.bf16 %v7735_v34, %v7734_v33 }
0x1f58   :  { %v11217_v53 = vpop.eup %11216 }
0x1f59   :  { %v7532_v32 = vmul.f32 %v11217_v53, %v11215_v21 }
0x1f5b   :  { %v14012_v51 = vsel %vm1018_vm9, %v7532_v32, %v13963_v61  ;;  %v7719_v61 = vld [vmem:[#allocation23 + $0x48] sm:$0xff] }
0x1f5c   :  { %7604 = vmatmul.mubr.f32.vlgmr.msra.gmra.mrb[48].mxu0 %v14012_v51  ;;  %7675 = vmatmul.mubr.f32.vlgmr.msra.gmra.mrb[48].mxu1 %v14012_v51  ;;  %v10430_v46 = vpack.c.bf16 %v7719_v61, %v7718_v5 }
0x1f5d   :  { %10415 = vmatpush3.bf16.msra.mxu0 %v10414_v28 }
0x1f5e   :  { %10417 = vmatprep.subr.bf16.mxu0 %v10416_v26 }
0x1f61   :  { %10419 = vmatpush3.bf16.msra.mxu0 %v10418_v25 }
0x1f62   :  { %10421 = vmatprep.subr.bf16.mxu0 %v10420_v24 }
0x1f65   :  { %10423 = vmatpush3.bf16.msra.mxu0 %v10422_v8  ;;  %v5830_v8 = vsel %vm2110_vm15, %v14152_v59, %v13495_v12 }
0x1f66   :  { %10425 = vmatprep.subr.bf16.mxu0 %v10424_v54 }
0x1f69   :  { %10427 = vmatpush3.bf16.msra.mxu0 %v10426_v37 }
0x1f6a   :  { %10429 = vmatprep.subr.bf16.mxu0 %v10428_v45 }
0x1f6d   :  { %10431 = vmatpush3.bf16.msra.mxu0 %v10430_v46 }
0x1f6e   :  { %10433 = vmatprep.subr.bf16.mxu0 %v10432_v13 }
0x1f71   :  { %10435 = vmatpush3.bf16.msra.mxu0 %v10434_v6 }
0x1f72   :  { %10437 = vmatprep.subr.bf16.mxu0 %v10436_v14 }
0x1f75   :  { %10439 = vmatpush3.bf16.msra.mxu0 %v10438_v31 }
0x1f76   :  { %10441 = vmatprep.subr.bf16.mxu0 %v10440_v58 }
0x1f79   :  { %10443 = vmatpush3.bf16.msra.mxu0 %v10442_v42 }
0x202f   :  { %v7605_v19 = vpop.f32.mrb[48].mxu0  ;;  %v7676_v10 = vpop.f32.mrb[48].mxu1 }
0x2030   :  { %v10540_v50 = vadd.f32 %v7605_v19, %v13683_v49  ;;  %v7607_v11 = vpop.f32.mrb[49].mxu0  ;;  %v7678_v21 = vpop.f32.mrb[49].mxu1  ;;  %v10556_v43 = vadd.f32 %v7676_v10, %v13695_v38 }
0x2031   :  { %v10541_v53 = vadd.f32 %v7607_v11, %v13686_v56  ;;  %v10557_v18 = vadd.f32 %v7678_v21, %v13691_v1 }
0x2032   :  { %v7933_v32 = vmul.f32 -1.442695, %v10540_v50 }
0x2033   :  { %v7934_v4 = vmul.f32 -1.442695, %v10541_v53  ;;  %v7935_v39 = vmul.f32 -1.442695, %v10557_v18 }
0x2034   :  { %11218 = vpow2.f32 %v7933_v32 }
0x2035   :  { %11220 = vpow2.f32 %v7934_v4 }
0x2036   :  { %11222 = vpow2.f32 %v7935_v39 }
0x2037   :  { %11224 = vtanh.f32 %v10556_v43 }
0x203e   :  { %v11219_v55 = vpop.eup %11218 }
0x203f   :  { %v11221_v28 = vpop.eup %11220  ;;  %v7688_v44 = vadd.f32 1.0, %v11219_v55 }
0x2040   :  { %v7694_v47 = vadd.f32 1.0, %v11221_v28  ;;  %v11223_v49 = vpop.eup %11222 }
0x2041   :  { %11226 = vrcp.f32 %v7688_v44  ;;  %v11225_v26 = vpop.eup %11224  ;;  %v7701_v25 = vadd.f32 1.0, %v11223_v49 }
0x2042   :  { %11228 = vrcp.f32 %v7694_v47 }
0x2043   :  { %11230 = vrcp.f32 %v7701_v25 }
0x204b   :  { %v11227_v56 = vpop.eup %11226 }
0x204c   :  { %v11229_v2 = vpop.eup %11228  ;;  %v7705_v0 = vmul.f32 %v11227_v56, %v11225_v26 }
0x204d   :  { %v7704_v36 = vmul.f32 %v11229_v2, %v14007_v48  ;;  %v11231_v38 = vpop.eup %11230 }
0x204f   :  { %v7706_v1 = vadd.f32 %v7705_v0, %v7704_v36 }
0x2051   :  { %11232 = vtanh.f32 %v7706_v1 }
0x205b   :  { %v11233_v15 = vpop.eup %11232 }
0x205c   :  { %v7708_v24 = vmul.f32 %v11233_v15, %v11231_v38 }
0x205e   :  { %v7709_v52 = vsel %vm836_vm4, %v7708_v24, %v14012_v51 }
0x205f   :  { %7813 = vmatprep.mubr.f32.mxu0 %v7709_v52 }
0x2060   :  { %7814 = vmatmul.mubr.f32.vlgmr.msra.gmra.mrb[64].mxu0 %v5830_v8 }
0x2133   :  { %v7977_v16 = vpop.f32.mrb[64].mxu0 }
0x2134   :  { %v7978_v48 = vpop.f32.mrb[65].mxu0 }
0x2135   :  { %v7979_v54 = vadd.f32 %v7978_v48, %v7977_v16 }
0x2137   :  { %v7816_v57 = vadd.f32 %v7979_v54, %v7936_v7 }
0x2139   :  { %7819 = vst [vmem:[%s14047_s16] sm:$0xff] %v7816_v57 }
0x213a   :  { %7824 = vsyncpa [#allocation5], 1 }
0x213b   :  { %7825 = vsyncpa [#allocation7], 1 }
0x213c   :  { %7826 = vsyncpa [#allocation10], 1 }
0x213d   :  { %7827 = vsyncpa [#allocation13], 1 }
0x213e   :  { %7828 = vsyncpa [#allocation16], 1 }
0x213f   :  { %7829 = vsyncpa [#allocation19], 1 }
0x2140   :  { %7830 = vsyncpa [#allocation22], 1 }
0x2141   :  { %7831 = vsyncpa [#allocation25], 1 }

</bundles_post_ra>
